<compile_context>
chip_gen: v5e
topology: v5e:2x2
jax: 0.10.0
libtpu: 0.0.40
codegen_flags: <defaults>
</compile_context>

<pallas_src>
import jax
import jax.numpy as jnp
from jax.experimental import pallas as pl
from jax.experimental.pallas import tpu as pltpu

SIZE_IN = 80 * 80        # 6400, as in the PyTorch module
HIDDEN = 200             # nn.Linear(6400, 200)
ACTION_SPACE = 6         # gym Pong-v0 action space size
MAX_TB = 128             # max batch rows per grid step


def policy_kernel(x_ref, w1_ref, b1_ref, w2_ref, b2_ref, out_ref):
    # First affine: bf16 operands, f32 accumulation on the MXU.
    h = jnp.dot(x_ref[...], w1_ref[...], preferred_element_type=jnp.float32)
    h = jnp.maximum(h + b1_ref[...], 0.0)                       # bias + ReLU
    # Second affine in f32 (tiny: (TB,200) @ (200,6)).
    logits = jnp.dot(h, w2_ref[...],
                     preferred_element_type=jnp.float32) + b2_ref[...]
    # Numerically stable softmax over the action axis (dim=1), exact divide.
    m = jnp.max(logits, axis=1, keepdims=True)
    e = jnp.exp(logits - m)
    out_ref[...] = (e / jnp.sum(e, axis=1, keepdims=True)).astype(out_ref.dtype)


def prepare_params(w1, b1, w2, b2):
    """Cast the streamed W1 to bf16 (2.56 MiB in HBM); keep the rest f32."""
    return (w1.astype(jnp.bfloat16), b1.astype(jnp.float32),
            w2.astype(jnp.float32), b2.astype(jnp.float32))


def _round_up(n, m):
    return ((n + m - 1) // m) * m


@jax.jit
def policy_forward(x, w1p, b1p, w2p, b2p):
    B = x.shape[0]
    # Rows per grid step: multiple of 16 (bf16 sublane packing), capped at 128.
    TB = min(MAX_TB, _round_up(max(B, 1), 16))
    Bp = _round_up(B, TB)
    xp = jnp.pad(x, ((0, Bp - B), (0, 0))).astype(jnp.bfloat16)

    out = pl.pallas_call(
        policy_kernel,
        out_shape=jax.ShapeDtypeStruct((Bp, ACTION_SPACE), jnp.float32),
        grid=(Bp // TB,),
        in_specs=[
            pl.BlockSpec((TB, SIZE_IN), lambda b: (b, 0)),             # x tile
            pl.BlockSpec((SIZE_IN, HIDDEN), lambda b: (0, 0)),         # W1 (resident)
            pl.BlockSpec((1, HIDDEN), lambda b: (0, 0)),               # b1
            pl.BlockSpec((HIDDEN, ACTION_SPACE), lambda b: (0, 0)),    # W2
            pl.BlockSpec((1, ACTION_SPACE), lambda b: (0, 0)),         # b2
        ],
        out_specs=pl.BlockSpec((TB, ACTION_SPACE), lambda b: (b, 0)),
        compiler_params=pltpu.CompilerParams(
            dimension_semantics=("parallel",),   # batch tiles are independent
        ),
    )(xp, w1p, b1p, w2p, b2p)
    return out[:B]


def init_params(key):
    """Deterministic parameter init (shapes match nn.Linear(6400,200) / (200,6)).
    Stored as [in, out] = transpose of PyTorch's [out, in] weight layout."""
    k1, k2, k3, k4 = jax.random.split(key, 4)
    w1 = jax.random.normal(k1, (SIZE_IN, HIDDEN), jnp.float32) * 0.01
    b1 = jax.random.normal(k2, (1, HIDDEN), jnp.float32) * 0.01
    w2 = jax.random.normal(k3, (HIDDEN, ACTION_SPACE), jnp.float32) * 0.01
    b2 = jax.random.normal(k4, (1, ACTION_SPACE), jnp.float32) * 0.01
    return w1, b1, w2, b2


def reference_forward(x, w1, b1, w2, b2):
    h = jnp.maximum(x @ w1 + b1, 0.0)
    logits = h @ w2 + b2
    return jax.nn.softmax(logits, axis=1)


if __name__ == "__main__":
    key = jax.random.PRNGKey(0)
    kx, kp = jax.random.split(key)

    B = 2  # small batch
    x = jax.random.normal(kx, (B, SIZE_IN), jnp.float32)
    w1, b1, w2, b2 = init_params(kp)

    params = prepare_params(w1, b1, w2, b2)
    out = jax.block_until_ready(policy_forward(x, *params))

    # Reference computed with the same bf16-rounded x / W1 the kernel sees
    # (tight check) and against the pure-f32 module (loose, bf16-weight cast).
    x_bf = x.astype(jnp.bfloat16).astype(jnp.float32)
    w1_bf = w1.astype(jnp.bfloat16).astype(jnp.float32)
    ref_bf16 = reference_forward(x_bf, w1_bf, b1, w2, b2)
    ref_f32 = reference_forward(x, w1, b1, w2, b2)

    assert out.shape == (B, ACTION_SPACE)
    # Exact divide -> rows sum to 1 up to f32 rounding.
    assert jnp.allclose(jnp.sum(out, axis=1), 1.0, atol=1e-4)
    assert jnp.allclose(out, ref_bf16, atol=3e-3, rtol=3e-3)
    assert jnp.allclose(out, ref_f32, atol=2e-2, rtol=2e-2)

    print("KERNEL_OK")
</pallas_src>

<mosaic_0001>
module attributes {stable_mosaic.version = 11 : i64} {
  func.func @policy_kernel(%arg0: i32, %arg1: memref<16x6400xbf16, #tpu.memory_space<vmem>>, %arg2: memref<6400x200xbf16, #tpu.memory_space<vmem>>, %arg3: memref<1x200xf32, #tpu.memory_space<vmem>>, %arg4: memref<200x6xf32, #tpu.memory_space<vmem>>, %arg5: memref<1x6xf32, #tpu.memory_space<vmem>>, %arg6: memref<16x6xf32, #tpu.memory_space<vmem>>) attributes {dimension_semantics = [#tpu.dimension_semantics<parallel>], iteration_bounds = array<i64: 1>, scalar_prefetch = 0 : i64, scratch_operands = 0 : i64, tpu.core_type = #tpu.core_type<tc>, window_params = [{transform_indices = @transform_0, window_bounds = array<i64: 16, 6400>}, {pipeline_mode = #tpu.pipeline_mode<synchronous>, transform_indices = @transform_1, window_bounds = array<i64: 6400, 200>}, {pipeline_mode = #tpu.pipeline_mode<synchronous>, transform_indices = @transform_2, window_bounds = array<i64: 1, 200>}, {pipeline_mode = #tpu.pipeline_mode<synchronous>, transform_indices = @transform_3, window_bounds = array<i64: 200, 6>}, {pipeline_mode = #tpu.pipeline_mode<synchronous>, transform_indices = @transform_4, window_bounds = array<i64: 1, 6>}, {transform_indices = @transform_5, window_bounds = array<i64: 16, 6>}]} {
    %c0 = arith.constant 0 : index
    %c0_0 = arith.constant 0 : index
    %0 = vector.load %arg1[%c0, %c0_0] : memref<16x6400xbf16, #tpu.memory_space<vmem>>, vector<16x6400xbf16>
    %c0_1 = arith.constant 0 : index
    %c0_2 = arith.constant 0 : index
    %1 = vector.load %arg2[%c0_1, %c0_2] : memref<6400x200xbf16, #tpu.memory_space<vmem>>, vector<6400x200xbf16>
    %cst = arith.constant dense<0.000000e+00> : vector<16x200xf32>
    %2 = tpu.matmul %0, %1, %cst {dimension_numbers = #tpu.dot_dimension_numbers<[1], [0], [0], [1], [0, 0, 1, 1], [], []>} : vector<16x6400xbf16>, vector<6400x200xbf16>, vector<16x200xf32> -> vector<16x200xf32>
    %c0_3 = arith.constant 0 : index
    %c0_4 = arith.constant 0 : index
    %3 = vector.load %arg3[%c0_3, %c0_4] : memref<1x200xf32, #tpu.memory_space<vmem>>, vector<1x200xf32>
    %4 = vector.broadcast %3 : vector<1x200xf32> to vector<16x200xf32>
    %5 = arith.addf %2, %4 : vector<16x200xf32>
    %cst_5 = arith.constant 0.000000e+00 : f32
    %6 = vector.broadcast %cst_5 : f32 to vector<16x200xf32>
    %7 = arith.maximumf %5, %6 : vector<16x200xf32>
    %c0_6 = arith.constant 0 : index
    %c0_7 = arith.constant 0 : index
    %8 = vector.load %arg4[%c0_6, %c0_7] : memref<200x6xf32, #tpu.memory_space<vmem>>, vector<200x6xf32>
    %cst_8 = arith.constant dense<0.000000e+00> : vector<16x6xf32>
    %9 = tpu.matmul %7, %8, %cst_8 {dimension_numbers = #tpu.dot_dimension_numbers<[1], [0], [0], [1], [0, 0, 1, 1], [], []>} : vector<16x200xf32>, vector<200x6xf32>, vector<16x6xf32> -> vector<16x6xf32>
    %c0_9 = arith.constant 0 : index
    %c0_10 = arith.constant 0 : index
    %10 = vector.load %arg5[%c0_9, %c0_10] : memref<1x6xf32, #tpu.memory_space<vmem>>, vector<1x6xf32>
    %11 = vector.broadcast %10 : vector<1x6xf32> to vector<16x6xf32>
    %12 = arith.addf %9, %11 : vector<16x6xf32>
    %cst_11 = arith.constant dense<0xFF800000> : vector<16xf32>
    %13 = vector.multi_reduction <maximumf>, %12, %cst_11 [1] : vector<16x6xf32> to vector<16xf32>
    %14 = vector.shape_cast %13 : vector<16xf32> to vector<16x1xf32>
    %15 = vector.broadcast %14 : vector<16x1xf32> to vector<16x6xf32>
    %16 = arith.subf %12, %15 : vector<16x6xf32>
    %17 = math.exp %16 : vector<16x6xf32>
    %cst_12 = arith.constant dense<0.000000e+00> : vector<16xf32>
    %18 = vector.multi_reduction <add>, %17, %cst_12 [1] : vector<16x6xf32> to vector<16xf32>
    %19 = vector.shape_cast %18 : vector<16xf32> to vector<16x1xf32>
    %20 = vector.broadcast %19 : vector<16x1xf32> to vector<16x6xf32>
    %21 = arith.divf %17, %20 : vector<16x6xf32>
    %c0_13 = arith.constant 0 : index
    %c0_14 = arith.constant 0 : index
    %22 = vector.load %arg6[%c0_13, %c0_14] : memref<16x6xf32, #tpu.memory_space<vmem>>, vector<16x6xf32>
    tpu.vector_store %arg6[%c0_13, %c0_14], %21 {strides = array<i32>} : memref<16x6xf32, #tpu.memory_space<vmem>>, vector<16x6xf32>,
    return
  }
  func.func @transform_0(%arg0: i32) -> (i32, i32) {
    %c0_i32 = arith.constant 0 : i32
    %c0_i32_0 = arith.constant 0 : i32
    return %arg0, %c0_i32 : i32, i32
  }
  func.func @transform_1(%arg0: i32) -> (i32, i32) {
    %c0_i32 = arith.constant 0 : i32
    %c0_i32_0 = arith.constant 0 : i32
    %c0_i32_1 = arith.constant 0 : i32
    return %c0_i32, %c0_i32_0 : i32, i32
  }
  func.func @transform_2(%arg0: i32) -> (i32, i32) {
    %c0_i32 = arith.constant 0 : i32
    %c0_i32_0 = arith.constant 0 : i32
    %c0_i32_1 = arith.constant 0 : i32
    return %c0_i32, %c0_i32_0 : i32, i32
  }
  func.func @transform_3(%arg0: i32) -> (i32, i32) {
    %c0_i32 = arith.constant 0 : i32
    %c0_i32_0 = arith.constant 0 : i32
    %c0_i32_1 = arith.constant 0 : i32
    return %c0_i32, %c0_i32_0 : i32, i32
  }
  func.func @transform_4(%arg0: i32) -> (i32, i32) {
    %c0_i32 = arith.constant 0 : i32
    %c0_i32_0 = arith.constant 0 : i32
    %c0_i32_1 = arith.constant 0 : i32
    return %c0_i32, %c0_i32_0 : i32, i32
  }
  func.func @transform_5(%arg0: i32) -> (i32, i32) {
    %c0_i32 = arith.constant 0 : i32
    %c0_i32_0 = arith.constant 0 : i32
    return %arg0, %c0_i32 : i32, i32
  }
}

</mosaic_0001>

<bundles_post_ra>
// kernel: policy_forward.1
= control target key start
LH: loop header
LB: loop body
LE: loop exit
PB: predicated region body
PF: predicated region fallthrough
CT: control target
= control target key end

     0   :  { %vm6559_vm0 = vcmask 588800   ;;  %vm6612_vm1 = vcmask 48128   ;;  %s16619_s1 = inlined_call_operand.vmem [shape: bf16[6400,200], index: 1, kind: input, shape index: {}]   ;;  %s16620_s0 = inlined_call_operand.vmem [shape: bf16[16,6400], index: 0, kind: input, shape index: {}]   ;;  %s16621_s2 = inlined_call_operand.vmem [shape: f32[1,200], index: 2, kind: input, shape index: {}]   ;;  %s16622_s3 = inlined_call_operand.vmem [shape: f32[200,6], index: 3, kind: input, shape index: {}]   ;;  %s16623_s4 = inlined_call_operand.vmem [shape: f32[1,6], index: 4, kind: input, shape index: {}]   ;;  %s16624_s5 = inlined_call_operand.vmem [shape: f32[16,6], index: 5, kind: output, shape index: {}]  }
   0x1   :  { %v6925_v0 = vld [vmem:[%s16619_s1 + $0x70] sm:$0xf]  ;;  %v10134_v1 = vld [vmem:[%s16619_s1 + $0x74] sm:$0xf0]  ;;  %v6917_v11 = vld [vmem:[%s16619_s1 + $0x60] sm:$0xf] }
   0x2   :  { %v6989_v2 = vld [vmem:[%s16619_s1 + $0xf0] sm:$0xf]  ;;  %v6926_v3 = vor.u32 %v10134_v1, %v6925_v0  ;;  %v10150_v4 = vld [vmem:[%s16619_s1 + $0xf4] sm:$0xf0]  ;;  %v10132_v13 = vld [vmem:[%s16619_s1 + $0x64] sm:$0xf0] }
   0x3   :  { %v7053_v5 = vld [vmem:[%s16619_s1 + $0x170] sm:$0xf]  ;;  %v10166_v6 = vld [vmem:[%s16619_s1 + $0x174] sm:$0xf0]  ;;  %v6990_v7 = vor.u32 %v10150_v4, %v6989_v2  ;;  %v6981_v14 = vld [vmem:[%s16619_s1 + $0xe0] sm:$0xf]  ;;  %v6918_v16 = vor.u32 %v10132_v13, %v6917_v11 }
   0x4   :  { %v7054_v8 = vor.u32 %v10166_v6, %v7053_v5  ;;  %v7117_v9 = vld [vmem:[%s16619_s1 + $0x1f0] sm:$0xf]  ;;  %v10182_v10 = vld [vmem:[%s16619_s1 + $0x1f4] sm:$0xf0]  ;;  %5126 = vmatpush.bf16.msra.mxu0 %v6926_v3  ;;  %v10148_v15 = vld [vmem:[%s16619_s1 + $0xe4] sm:$0xf0] }
   0x5   :  { %v7118_v12 = vor.u32 %v10182_v10, %v7117_v9  ;;  %5140 = vmatpush.bf16.msra.mxu1 %v6990_v7  ;;  %v6982_v17 = vor.u32 %v10148_v15, %v6981_v14  ;;  %v7045_v18 = vld [vmem:[%s16619_s1 + $0x160] sm:$0xf]  ;;  %v10164_v19 = vld [vmem:[%s16619_s1 + $0x164] sm:$0xf0]  ;;  %v6909_v23 = vld [vmem:[%s16619_s1 + $0x50] sm:$0xf] }
   0x6   :  { %5154 = vmatpush.bf16.msra.mxu2 %v7054_v8  ;;  %v7109_v20 = vld [vmem:[%s16619_s1 + $0x1e0] sm:$0xf]  ;;  %v7046_v21 = vor.u32 %v10164_v19, %v7045_v18  ;;  %v10180_v22 = vld [vmem:[%s16619_s1 + $0x1e4] sm:$0xf0]  ;;  %v10130_v24 = vld [vmem:[%s16619_s1 + $0x54] sm:$0xf0] }
   0x7   :  { %5168 = vmatpush.bf16.msra.mxu3 %v7118_v12  ;;  %v7110_v25 = vor.u32 %v10180_v22, %v7109_v20  ;;  %v6973_v26 = vld [vmem:[%s16619_s1 + $0xd0] sm:$0xf]  ;;  %v10146_v27 = vld [vmem:[%s16619_s1 + $0xd4] sm:$0xf0]  ;;  %v6910_v29 = vor.u32 %v10130_v24, %v6909_v23  ;;  %v6901_v35 = vld [vmem:[%s16619_s1 + $0x40] sm:$0xf] }
   0x8   :  { %v7037_v28 = vld [vmem:[%s16619_s1 + $0x150] sm:$0xf]  ;;  %5127 = vmatpush.bf16.msra.mxu0 %v6918_v16  ;;  %v10162_v30 = vld [vmem:[%s16619_s1 + $0x154] sm:$0xf0]  ;;  %v6974_v33 = vor.u32 %v10146_v27, %v6973_v26  ;;  %v10128_v36 = vld [vmem:[%s16619_s1 + $0x44] sm:$0xf0] }
   0x9   :  { %v7101_v31 = vld [vmem:[%s16619_s1 + $0x1d0] sm:$0xf]  ;;  %v10178_v32 = vld [vmem:[%s16619_s1 + $0x1d4] sm:$0xf0]  ;;  %5141 = vmatpush.bf16.msra.mxu1 %v6982_v17  ;;  %v7038_v34 = vor.u32 %v10162_v30, %v7037_v28  ;;  %v6965_v37 = vld [vmem:[%s16619_s1 + $0xc0] sm:$0xf]  ;;  %v6902_v44 = vor.u32 %v10128_v36, %v6901_v35 }
   0xa   :  { %5155 = vmatpush.bf16.msra.mxu2 %v7046_v21  ;;  %v7102_v38 = vor.u32 %v10178_v32, %v7101_v31  ;;  %v10144_v39 = vld [vmem:[%s16619_s1 + $0xc4] sm:$0xf0]  ;;  %v7029_v40 = vld [vmem:[%s16619_s1 + $0x140] sm:$0xf]  ;;  %v6893_v47 = vld [vmem:[%s16619_s1 + $0x30] sm:$0xf] }
   0xb   :  { %5169 = vmatpush.bf16.msra.mxu3 %v7110_v25  ;;  %v10160_v41 = vld [vmem:[%s16619_s1 + $0x144] sm:$0xf0]  ;;  %v7093_v42 = vld [vmem:[%s16619_s1 + $0x1c0] sm:$0xf]  ;;  %v6966_v45 = vor.u32 %v10144_v39, %v6965_v37  ;;  %v10126_v48 = vld [vmem:[%s16619_s1 + $0x34] sm:$0xf0] }
   0xc   :  { %v10176_v43 = vld [vmem:[%s16619_s1 + $0x1c4] sm:$0xf0]  ;;  %5128 = vmatpush.bf16.msra.mxu0 %v6910_v29  ;;  %v7030_v46 = vor.u32 %v10160_v41, %v7029_v40  ;;  %v6957_v49 = vld [vmem:[%s16619_s1 + $0xb0] sm:$0xf]  ;;  %v10142_v51 = vld [vmem:[%s16619_s1 + $0xb4] sm:$0xf0]  ;;  %v6894_v56 = vor.u32 %v10126_v48, %v6893_v47 }
   0xd   :  { %5142 = vmatpush.bf16.msra.mxu1 %v6974_v33  ;;  %v7094_v50 = vor.u32 %v10176_v43, %v7093_v42  ;;  %v7021_v52 = vld [vmem:[%s16619_s1 + $0x130] sm:$0xf]  ;;  %v10158_v53 = vld [vmem:[%s16619_s1 + $0x134] sm:$0xf0]  ;;  %v6958_v57 = vor.u32 %v10142_v51, %v6957_v49  ;;  %v6885_v59 = vld [vmem:[%s16619_s1 + $0x20] sm:$0xf] }
   0xe   :  { %5156 = vmatpush.bf16.msra.mxu2 %v7038_v34  ;;  %v7085_v54 = vld [vmem:[%s16619_s1 + $0x1b0] sm:$0xf]  ;;  %v10174_v55 = vld [vmem:[%s16619_s1 + $0x1b4] sm:$0xf0]  ;;  %v7022_v58 = vor.u32 %v10158_v53, %v7021_v52  ;;  %v10124_v60 = vld [vmem:[%s16619_s1 + $0x24] sm:$0xf0] }
   0xf   :  { %5170 = vmatpush.bf16.msra.mxu3 %v7102_v38  ;;  %v6949_v61 = vld [vmem:[%s16619_s1 + $0xa0] sm:$0xf]  ;;  %v7086_v62 = vor.u32 %v10174_v55, %v7085_v54  ;;  %v10140_v63 = vld [vmem:[%s16619_s1 + $0xa4] sm:$0xf0]  ;;  %v6886_v4 = vor.u32 %v10124_v60, %v6885_v59  ;;  %v6877_v7 = vld [vmem:[%s16619_s1 + $0x10] sm:$0xf] }
  0x10   :  { %5129 = vmatpush.bf16.msra.mxu0 %v6902_v44  ;;  %v7013_v0 = vld [vmem:[%s16619_s1 + $0x120] sm:$0xf]  ;;  %v10156_v1 = vld [vmem:[%s16619_s1 + $0x124] sm:$0xf0]  ;;  %v6950_v5 = vor.u32 %v10140_v63, %v6949_v61  ;;  %v10122_v8 = vld [vmem:[%s16619_s1 + $0x14] sm:$0xf0] }
  0x11   :  { %5143 = vmatpush.bf16.msra.mxu1 %v6966_v45  ;;  %v7077_v2 = vld [vmem:[%s16619_s1 + $0x1a0] sm:$0xf]  ;;  %v10172_v3 = vld [vmem:[%s16619_s1 + $0x1a4] sm:$0xf0]  ;;  %v7014_v6 = vor.u32 %v10156_v1, %v7013_v0  ;;  %v6941_v9 = vld [vmem:[%s16619_s1 + $0x90] sm:$0xf]  ;;  %v6878_v16 = vor.u32 %v10122_v8, %v6877_v7 }
  0x12   :  { %5157 = vmatpush.bf16.msra.mxu2 %v7030_v46  ;;  %v7078_v10 = vor.u32 %v10172_v3, %v7077_v2  ;;  %v10138_v11 = vld [vmem:[%s16619_s1 + $0x94] sm:$0xf0]  ;;  %v7005_v12 = vld [vmem:[%s16619_s1 + $0x110] sm:$0xf]  ;;  %v6869_v17 = vld [vmem:[%s16619_s1] sm:$0xf] }
  0x13   :  { %5171 = vmatpush.bf16.msra.mxu3 %v7094_v50  ;;  %v10154_v13 = vld [vmem:[%s16619_s1 + $0x114] sm:$0xf0]  ;;  %v7069_v14 = vld [vmem:[%s16619_s1 + $0x190] sm:$0xf]  ;;  %v10120_v18 = vld [vmem:[%s16619_s1 + $0x4] sm:$0xf0]  ;;  %v6942_v19 = vor.u32 %v10138_v11, %v6941_v9 }
  0x14   :  { %5130 = vmatpush.bf16.msra.mxu0 %v6894_v56  ;;  %v10170_v15 = vld [vmem:[%s16619_s1 + $0x194] sm:$0xf0]  ;;  %v7006_v20 = vor.u32 %v10154_v13, %v7005_v12  ;;  %v6933_v21 = vld [vmem:[%s16619_s1 + $0x80] sm:$0xf]  ;;  %v10136_v22 = vld [vmem:[%s16619_s1 + $0x84] sm:$0xf0]  ;;  %v6870_v31 = vor.u32 %v10120_v18, %v6869_v17 }
  0x15   :  { %5144 = vmatpush.bf16.msra.mxu1 %v6958_v57  ;;  %v6997_v23 = vld [vmem:[%s16619_s1 + $0x100] sm:$0xf]  ;;  %v7070_v24 = vor.u32 %v10170_v15, %v7069_v14  ;;  %v10152_v25 = vld [vmem:[%s16619_s1 + $0x104] sm:$0xf0]  ;;  %v7181_v28 = vld [vmem:[%s16619_s1 + $0x270] sm:$0xf]  ;;  %v6934_v35 = vor.u32 %v10136_v22, %v6933_v21 }
  0x16   :  { %5158 = vmatpush.bf16.msra.mxu2 %v7022_v58  ;;  %v7061_v26 = vld [vmem:[%s16619_s1 + $0x180] sm:$0xf]  ;;  %v10168_v27 = vld [vmem:[%s16619_s1 + $0x184] sm:$0xf0]  ;;  %v10198_v29 = vld [vmem:[%s16619_s1 + $0x274] sm:$0xf0]  ;;  %v6998_v36 = vor.u32 %v10152_v25, %v6997_v23 }
  0x17   :  { %5172 = vmatpush.bf16.msra.mxu3 %v7086_v62  ;;  %v7245_v30 = vld [vmem:[%s16619_s1 + $0x2f0] sm:$0xf]  ;;  %v10214_v32 = vld [vmem:[%s16619_s1 + $0x2f4] sm:$0xf0]  ;;  %v7062_v39 = vor.u32 %v10168_v27, %v7061_v26  ;;  %v7182_v40 = vor.u32 %v10198_v29, %v7181_v28  ;;  %v7173_v41 = vld [vmem:[%s16619_s1 + $0x260] sm:$0xf] }
  0x18   :  { %5131 = vmatpush.bf16.msra.mxu0 %v6886_v4  ;;  %v7309_v33 = vld [vmem:[%s16619_s1 + $0x370] sm:$0xf]  ;;  %v10230_v34 = vld [vmem:[%s16619_s1 + $0x374] sm:$0xf0]  ;;  %v10196_v42 = vld [vmem:[%s16619_s1 + $0x264] sm:$0xf0]  ;;  %v7246_v43 = vor.u32 %v10214_v32, %v7245_v30 }
  0x19   :  { %5145 = vmatpush.bf16.msra.mxu1 %v6950_v5  ;;  %v7373_v37 = vld [vmem:[%s16619_s1 + $0x3f0] sm:$0xf]  ;;  %v10246_v38 = vld [vmem:[%s16619_s1 + $0x3f4] sm:$0xf0]  ;;  %v7310_v44 = vor.u32 %v10230_v34, %v7309_v33  ;;  %v7237_v45 = vld [vmem:[%s16619_s1 + $0x2e0] sm:$0xf]  ;;  %v7174_v55 = vor.u32 %v10196_v42, %v7173_v41 }
  0x1a   :  { %5159 = vmatpush.bf16.msra.mxu2 %v7014_v6  ;;  %v10212_v46 = vld [vmem:[%s16619_s1 + $0x2e4] sm:$0xf0]  ;;  %v7301_v47 = vld [vmem:[%s16619_s1 + $0x360] sm:$0xf]  ;;  %v7374_v48 = vor.u32 %v10246_v38, %v7373_v37  ;;  %v7165_v56 = vld [vmem:[%s16619_s1 + $0x250] sm:$0xf] }
  0x1b   :  { %5173 = vmatpush.bf16.msra.mxu3 %v7078_v10  ;;  %v10228_v49 = vld [vmem:[%s16619_s1 + $0x364] sm:$0xf0]  ;;  %v7365_v50 = vld [vmem:[%s16619_s1 + $0x3e0] sm:$0xf]  ;;  %v10194_v57 = vld [vmem:[%s16619_s1 + $0x254] sm:$0xf0]  ;;  %v7238_v60 = vor.u32 %v10212_v46, %v7237_v45 }
  0x1c   :  { %5132 = vmatpush.bf16.msra.mxu0 %v6878_v16  ;;  %v10244_v51 = vld [vmem:[%s16619_s1 + $0x3e4] sm:$0xf0]  ;;  %v6669_v52 = vld [vmem:[%s16620_s0] sm:$0xf]  ;;  %v10095_v59 = vld [vmem:[%s16620_s0 + $0xcc] sm:$0xf0]  ;;  %v7302_v61 = vor.u32 %v10228_v49, %v7301_v47  ;;  %v7166_v9 = vor.u32 %v10194_v57, %v7165_v56 }
  0x1d   :  { %5146 = vmatpush.bf16.msra.mxu1 %v6942_v19  ;;  %v10094_v53 = vld [vmem:[%s16620_s0 + $0xc4] sm:$0xf0]  ;;  %v7229_v62 = vld [vmem:[%s16619_s1 + $0x2d0] sm:$0xf]  ;;  %v10210_v63 = vld [vmem:[%s16619_s1 + $0x2d4] sm:$0xf0]  ;;  %v7366_v2 = vor.u32 %v10244_v51, %v7365_v50 }
  0x1e   :  { %5160 = vmatpush.bf16.msra.mxu2 %v7006_v20  ;;  %v6677_v54 = vld [vmem:[%s16620_s0 + $0x8] sm:$0xf]  ;;  %v11230_v58 = vor.u32 %v10094_v53, %v6669_v52  ;;  %v7293_v0 = vld [vmem:[%s16619_s1 + $0x350] sm:$0xf]  ;;  %v10226_v3 = vld [vmem:[%s16619_s1 + $0x354] sm:$0xf0]  ;;  %v7230_v12 = vor.u32 %v10210_v63, %v7229_v62 }
  0x1f   :  { %5174 = vmatpush.bf16.msra.mxu3 %v7070_v24  ;;  %v11244_v1 = vor.u32 %v10095_v59, %v6677_v54  ;;  %v7357_v4 = vld [vmem:[%s16619_s1 + $0x3d0] sm:$0xf]  ;;  %v10242_v5 = vld [vmem:[%s16619_s1 + $0x3d4] sm:$0xf0]  ;;  %v10069_v6 = vld [vmem:[%s16620_s0 + $0x4] sm:$0xf]  ;;  %v7294_v13 = vor.u32 %v10226_v3, %v7293_v0 }
  0x20   :  { %5133 = vmatpush.bf16.msra.mxu0 %v6870_v31  ;;  %v6671_v7 = vld [vmem:[%s16620_s0 + $0xc8] sm:$0xf0]  ;;  %v6679_v11 = vld [vmem:[%s16620_s0 + $0xd0] sm:$0xf0]  ;;  %v7157_v14 = vld [vmem:[%s16619_s1 + $0x240] sm:$0xf]  ;;  %v7358_v18 = vor.u32 %v10242_v5, %v7357_v4 }
  0x21   :  { %5147 = vmatpush.bf16.msra.mxu1 %v6934_v35  ;;  %v10070_v8 = vld [vmem:[%s16620_s0 + $0xc] sm:$0xf]  ;;  %v11266_v10 = vor.u32 %v10069_v6, %v6671_v7  ;;  %v10192_v15 = vld [vmem:[%s16619_s1 + $0x244] sm:$0xf0]  ;;  %v7221_v16 = vld [vmem:[%s16619_s1 + $0x2c0] sm:$0xf] }
  0x22   :  { %5161 = vmatpush.bf16.msra.mxu2 %v6998_v36  ;;  %v11280_v17 = vor.u32 %v10070_v8, %v6679_v11  ;;  %v10208_v19 = vld [vmem:[%s16619_s1 + $0x2c4] sm:$0xf0]  ;;  %v7285_v20 = vld [vmem:[%s16619_s1 + $0x340] sm:$0xf]  ;;  %v7158_v24 = vor.u32 %v10192_v15, %v7157_v14  ;;  %v7149_v27 = vld [vmem:[%s16619_s1 + $0x230] sm:$0xf] }
  0x23   :  { %5175 = vmatpush.bf16.msra.mxu3 %v7062_v39  ;;  %5134 = vmatmul.bf16.vlgmr.msra.gmra.mxu0 %v11230_v58  ;;  %v10224_v21 = vld [vmem:[%s16619_s1 + $0x344] sm:$0xf0]  ;;  %v7349_v22 = vld [vmem:[%s16619_s1 + $0x3c0] sm:$0xf]  ;;  %v7222_v25 = vor.u32 %v10208_v19, %v7221_v16  ;;  %v10190_v28 = vld [vmem:[%s16619_s1 + $0x234] sm:$0xf0] }
  0x24   :  { %5182 = vmatpush.bf16.msrb.mxu0 %v7182_v40  ;;  %5148 = vmatmul.bf16.vlgmr.msra.gmra.mxu1 %v11266_v10  ;;  %v10240_v23 = vld [vmem:[%s16619_s1 + $0x3c4] sm:$0xf0]  ;;  %v7286_v26 = vor.u32 %v10224_v21, %v7285_v20  ;;  %v7213_v29 = vld [vmem:[%s16619_s1 + $0x2b0] sm:$0xf]  ;;  %v10206_v31 = vld [vmem:[%s16619_s1 + $0x2b4] sm:$0xf0]  ;;  %v7150_v36 = vor.u32 %v10190_v28, %v7149_v27 }
  0x25   :  { %5196 = vmatpush.bf16.msrb.mxu1 %v7246_v43  ;;  %5162 = vmatmul.bf16.vlgmr.msra.gmra.mxu2 %v11244_v1  ;;  %v7350_v30 = vor.u32 %v10240_v23, %v7349_v22  ;;  %v7277_v32 = vld [vmem:[%s16619_s1 + $0x330] sm:$0xf]  ;;  %v10222_v33 = vld [vmem:[%s16619_s1 + $0x334] sm:$0xf0]  ;;  %v7214_v37 = vor.u32 %v10206_v31, %v7213_v29  ;;  %v7141_v39 = vld [vmem:[%s16619_s1 + $0x220] sm:$0xf] }
  0x26   :  { %5210 = vmatpush.bf16.msrb.mxu2 %v7310_v44  ;;  %5176 = vmatmul.bf16.vlgmr.msra.gmra.mxu3 %v11280_v17  ;;  %v7341_v34 = vld [vmem:[%s16619_s1 + $0x3b0] sm:$0xf]  ;;  %v10238_v35 = vld [vmem:[%s16619_s1 + $0x3b4] sm:$0xf0]  ;;  %v7278_v38 = vor.u32 %v10222_v33, %v7277_v32  ;;  %v10188_v40 = vld [vmem:[%s16619_s1 + $0x224] sm:$0xf0] }
  0x27   :  { %5224 = vmatpush.bf16.msrb.mxu3 %v7374_v48  ;;  %v7205_v41 = vld [vmem:[%s16619_s1 + $0x2a0] sm:$0xf]  ;;  %v7342_v42 = vor.u32 %v10238_v35, %v7341_v34  ;;  %v10204_v43 = vld [vmem:[%s16619_s1 + $0x2a4] sm:$0xf0]  ;;  %v7142_v48 = vor.u32 %v10188_v40, %v7141_v39  ;;  %v7133_v49 = vld [vmem:[%s16619_s1 + $0x210] sm:$0xf] }
  0x28   :  { %5183 = vmatpush.bf16.msrb.mxu0 %v7174_v55  ;;  %v7269_v44 = vld [vmem:[%s16619_s1 + $0x320] sm:$0xf]  ;;  %v10220_v45 = vld [vmem:[%s16619_s1 + $0x324] sm:$0xf0]  ;;  %v7206_v50 = vor.u32 %v10204_v43, %v7205_v41  ;;  %v10186_v52 = vld [vmem:[%s16619_s1 + $0x214] sm:$0xf0] }
  0x29   :  { %5197 = vmatpush.bf16.msrb.mxu1 %v7238_v60  ;;  %v7333_v46 = vld [vmem:[%s16619_s1 + $0x3a0] sm:$0xf]  ;;  %v10236_v47 = vld [vmem:[%s16619_s1 + $0x3a4] sm:$0xf0]  ;;  %v7270_v51 = vor.u32 %v10220_v45, %v7269_v44  ;;  %v7197_v53 = vld [vmem:[%s16619_s1 + $0x290] sm:$0xf]  ;;  %v7134_v63 = vor.u32 %v10186_v52, %v7133_v49 }
  0x2a   :  { %5211 = vmatpush.bf16.msrb.mxu2 %v7302_v61  ;;  %v10202_v54 = vld [vmem:[%s16619_s1 + $0x294] sm:$0xf0]  ;;  %v7334_v55 = vor.u32 %v10236_v47, %v7333_v46  ;;  %v7261_v56 = vld [vmem:[%s16619_s1 + $0x310] sm:$0xf]  ;;  %v7125_v61 = vld [vmem:[%s16619_s1 + $0x200] sm:$0xf] }
  0x2b   :  { %5225 = vmatpush.bf16.msrb.mxu3 %v7366_v2  ;;  %v10218_v57 = vld [vmem:[%s16619_s1 + $0x314] sm:$0xf0]  ;;  %v7325_v59 = vld [vmem:[%s16619_s1 + $0x390] sm:$0xf]  ;;  %v10184_v62 = vld [vmem:[%s16619_s1 + $0x204] sm:$0xf0]  ;;  %v7198_v5 = vor.u32 %v10202_v54, %v7197_v53 }
  0x2c   :  { %5184 = vmatpush.bf16.msrb.mxu0 %v7166_v9  ;;  %v10234_v60 = vld [vmem:[%s16619_s1 + $0x394] sm:$0xf0]  ;;  %v7189_v0 = vld [vmem:[%s16619_s1 + $0x280] sm:$0xf]  ;;  %v10200_v2 = vld [vmem:[%s16619_s1 + $0x284] sm:$0xf0]  ;;  %v7262_v6 = vor.u32 %v10218_v57, %v7261_v56  ;;  %v7126_v19 = vor.u32 %v10184_v62, %v7125_v61 }
  0x2d   :  { %5198 = vmatpush.bf16.msrb.mxu1 %v7230_v12  ;;  %v7253_v3 = vld [vmem:[%s16619_s1 + $0x300] sm:$0xf]  ;;  %v10216_v4 = vld [vmem:[%s16619_s1 + $0x304] sm:$0xf0]  ;;  %v7437_v9 = vld [vmem:[%s16619_s1 + $0x470] sm:$0xf]  ;;  %v7326_v11 = vor.u32 %v10234_v60, %v7325_v59  ;;  %v7190_v23 = vor.u32 %v10200_v2, %v7189_v0 }
  0x2e   :  { %5212 = vmatpush.bf16.msrb.mxu2 %v7294_v13  ;;  %v7317_v7 = vld [vmem:[%s16619_s1 + $0x380] sm:$0xf]  ;;  %v10232_v8 = vld [vmem:[%s16619_s1 + $0x384] sm:$0xf0]  ;;  %v10262_v12 = vld [vmem:[%s16619_s1 + $0x474] sm:$0xf0] }
  0x2f   :  { %5226 = vmatpush.bf16.msrb.mxu3 %v7358_v18  ;;  %v7501_v13 = vld [vmem:[%s16619_s1 + $0x4f0] sm:$0xf]  ;;  %v10278_v14 = vld [vmem:[%s16619_s1 + $0x4f4] sm:$0xf0]  ;;  %v10071_v27 = vld [vmem:[%s16620_s0 + $0x14] sm:$0xf]  ;;  %v7318_v28 = vor.u32 %v10232_v8, %v7317_v7  ;;  %v7438_v29 = vor.u32 %v10262_v12, %v7437_v9 }
  0x30   :  { %5185 = vmatpush.bf16.msrb.mxu0 %v7158_v24  ;;  %v7565_v15 = vld [vmem:[%s16619_s1 + $0x570] sm:$0xf]  ;;  %v10294_v16 = vld [vmem:[%s16619_s1 + $0x574] sm:$0xf0]  ;;  %v7254_v24 = vor.u32 %v10216_v4, %v7253_v3  ;;  %v10072_v31 = vld [vmem:[%s16620_s0 + $0x1c] sm:$0xf]  ;;  %v7502_v33 = vor.u32 %v10278_v14, %v7501_v13 }
  0x31   :  { %5199 = vmatpush.bf16.msrb.mxu1 %v7222_v25  ;;  %v7629_v18 = vld [vmem:[%s16619_s1 + $0x5f0] sm:$0xf]  ;;  %v10310_v20 = vld [vmem:[%s16619_s1 + $0x5f4] sm:$0xf0]  ;;  %v6695_v32 = vld [vmem:[%s16620_s0 + $0xe0] sm:$0xf0]  ;;  %v7566_v34 = vor.u32 %v10294_v16, %v7565_v15 }
  0x32   :  { %5213 = vmatpush.bf16.msrb.mxu2 %v7286_v26  ;;  %v6685_v21 = vld [vmem:[%s16620_s0 + $0x10] sm:$0xf]  ;;  %v10096_v22 = vld [vmem:[%s16620_s0 + $0xd4] sm:$0xf0]  ;;  %v10097_v26 = vld [vmem:[%s16620_s0 + $0xdc] sm:$0xf0]  ;;  %v11473_v47 = vor.u32 %v10072_v31, %v6695_v32 }
  0x33   :  { %5227 = vmatpush.bf16.msrb.mxu3 %v7350_v30  ;;  %v6693_v25 = vld [vmem:[%s16620_s0 + $0x18] sm:$0xf]  ;;  %v6687_v30 = vld [vmem:[%s16620_s0 + $0xd8] sm:$0xf0]  ;;  %v7429_v35 = vld [vmem:[%s16619_s1 + $0x460] sm:$0xf]  ;;  %v11452_v39 = vor.u32 %v10096_v22, %v6685_v21 }
  0x34   :  { %5186 = vmatpush.bf16.msrb.mxu0 %v7150_v36  ;;  %v10260_v36 = vld [vmem:[%s16619_s1 + $0x464] sm:$0xf0]  ;;  %v7557_v41 = vld [vmem:[%s16619_s1 + $0x560] sm:$0xf]  ;;  %v11463_v43 = vor.u32 %v10097_v26, %v6693_v25  ;;  %v11465_v44 = vor.u32 %v10071_v27, %v6687_v30  ;;  %v10258_v52 = vld [vmem:[%s16619_s1 + $0x454] sm:$0xf0] }
  0x35   :  { %5200 = vmatpush.bf16.msrb.mxu1 %v7214_v37  ;;  %v7493_v37 = vld [vmem:[%s16619_s1 + $0x4e0] sm:$0xf]  ;;  %v10276_v40 = vld [vmem:[%s16619_s1 + $0x4e4] sm:$0xf0]  ;;  %v7485_v53 = vld [vmem:[%s16619_s1 + $0x4d0] sm:$0xf] }
  0x36   :  { %5214 = vmatpush.bf16.msrb.mxu2 %v7278_v38  ;;  %v7630_v38 = vor.u32 %v10310_v20, %v7629_v18  ;;  %v7621_v45 = vld [vmem:[%s16619_s1 + $0x5e0] sm:$0xf]  ;;  %v10308_v46 = vld [vmem:[%s16619_s1 + $0x5e4] sm:$0xf0]  ;;  %v7494_v49 = vor.u32 %v10276_v40, %v7493_v37  ;;  %v7549_v56 = vld [vmem:[%s16619_s1 + $0x550] sm:$0xf] }
  0x37   :  { %5228 = vmatpush.bf16.msrb.mxu3 %v7342_v42  ;;  %v10292_v42 = vld [vmem:[%s16619_s1 + $0x564] sm:$0xf0]  ;;  %v7622_v54 = vor.u32 %v10308_v46, %v7621_v45  ;;  %v10290_v57 = vld [vmem:[%s16619_s1 + $0x554] sm:$0xf0]  ;;  %v7613_v59 = vld [vmem:[%s16619_s1 + $0x5d0] sm:$0xf] }
  0x38   :  { %5187 = vmatpush.bf16.msrb.mxu0 %v7142_v48  ;;  %v7430_v48 = vor.u32 %v10260_v36, %v7429_v35  ;;  %v10306_v60 = vld [vmem:[%s16619_s1 + $0x5d4] sm:$0xf0]  ;;  %v7413_v0 = vld [vmem:[%s16619_s1 + $0x440] sm:$0xf]  ;;  %v10256_v2 = vld [vmem:[%s16619_s1 + $0x444] sm:$0xf0] }
  0x39   :  { %5201 = vmatpush.bf16.msrb.mxu1 %v7206_v50  ;;  %v7558_v50 = vor.u32 %v10292_v42, %v7557_v41  ;;  %v7477_v3 = vld [vmem:[%s16619_s1 + $0x4c0] sm:$0xf]  ;;  %v7614_v4 = vor.u32 %v10306_v60, %v7613_v59  ;;  %v10288_v7 = vld [vmem:[%s16619_s1 + $0x544] sm:$0xf0]  ;;  %v7405_v14 = vld [vmem:[%s16619_s1 + $0x430] sm:$0xf] }
  0x3a   :  { %5215 = vmatpush.bf16.msrb.mxu2 %v7270_v51  ;;  %v7421_v51 = vld [vmem:[%s16619_s1 + $0x450] sm:$0xf]  ;;  %v7605_v8 = vld [vmem:[%s16619_s1 + $0x5c0] sm:$0xf]  ;;  %v10304_v9 = vld [vmem:[%s16619_s1 + $0x5c4] sm:$0xf0] }
  0x3b   :  { %5229 = vmatpush.bf16.msrb.mxu3 %v7334_v55  ;;  %v10274_v55 = vld [vmem:[%s16619_s1 + $0x4d4] sm:$0xf0]  ;;  %v7422_v61 = vor.u32 %v10258_v52, %v7421_v51  ;;  %v7469_v16 = vld [vmem:[%s16619_s1 + $0x4b0] sm:$0xf]  ;;  %v7606_v18 = vor.u32 %v10304_v9, %v7605_v8  ;;  %v7397_v27 = vld [vmem:[%s16619_s1 + $0x420] sm:$0xf] }
  0x3c   :  { %5188 = vmatpush.bf16.msrb.mxu0 %v7134_v63  ;;  %v7486_v62 = vor.u32 %v10274_v55, %v7485_v53  ;;  %v7550_v63 = vor.u32 %v10290_v57, %v7549_v56  ;;  %v10254_v15 = vld [vmem:[%s16619_s1 + $0x434] sm:$0xf0]  ;;  %v7533_v20 = vld [vmem:[%s16619_s1 + $0x530] sm:$0xf]  ;;  %v10268_v31 = vld [vmem:[%s16619_s1 + $0x4a4] sm:$0xf0] }
  0x3d   :  { %5202 = vmatpush.bf16.msrb.mxu1 %v7198_v5  ;;  %v10272_v5 = vld [vmem:[%s16619_s1 + $0x4c4] sm:$0xf0]  ;;  %v10286_v21 = vld [vmem:[%s16619_s1 + $0x534] sm:$0xf0]  ;;  %v7597_v22 = vld [vmem:[%s16619_s1 + $0x5b0] sm:$0xf] }
  0x3e   :  { %5216 = vmatpush.bf16.msrb.mxu2 %v7262_v6  ;;  %v7541_v6 = vld [vmem:[%s16619_s1 + $0x540] sm:$0xf]  ;;  %v7478_v12 = vor.u32 %v10272_v5, %v7477_v3  ;;  %v7534_v26 = vor.u32 %v10286_v21, %v7533_v20  ;;  %v10300_v35 = vld [vmem:[%s16619_s1 + $0x5a4] sm:$0xf0]  ;;  %v7389_v37 = vld [vmem:[%s16619_s1 + $0x410] sm:$0xf] }
  0x3f   :  { %5230 = vmatpush.bf16.msrb.mxu3 %v7326_v11  ;;  %v7414_v11 = vor.u32 %v10256_v2, %v7413_v0  ;;  %v7542_v13 = vor.u32 %v10288_v7, %v7541_v6  ;;  %v7525_v32 = vld [vmem:[%s16619_s1 + $0x520] sm:$0xf]  ;;  %v10250_v41 = vld [vmem:[%s16619_s1 + $0x414] sm:$0xf0]  ;;  %v7453_v42 = vld [vmem:[%s16619_s1 + $0x490] sm:$0xf] }
  0x40   :  { %5189 = vmatpush.bf16.msrb.mxu0 %v7126_v19  ;;  %v10270_v19 = vld [vmem:[%s16619_s1 + $0x4b4] sm:$0xf0]  ;;  %v7381_v52 = vld [vmem:[%s16619_s1 + $0x400] sm:$0xf]  ;;  %v10248_v53 = vld [vmem:[%s16619_s1 + $0x404] sm:$0xf0] }
  0x41   :  { %5203 = vmatpush.bf16.msrb.mxu1 %v7190_v23  ;;  %v10302_v23 = vld [vmem:[%s16619_s1 + $0x5b4] sm:$0xf0]  ;;  %v7470_v25 = vor.u32 %v10270_v19, %v7469_v16  ;;  %v7445_v55 = vld [vmem:[%s16619_s1 + $0x480] sm:$0xf]  ;;  %v10264_v56 = vld [vmem:[%s16619_s1 + $0x484] sm:$0xf0]  ;;  %v7382_v9 = vor.u32 %v10248_v53, %v7381_v52 }
  0x42   :  { %5217 = vmatpush.bf16.msrb.mxu2 %v7254_v24  ;;  %v7406_v24 = vor.u32 %v10254_v15, %v7405_v14  ;;  %v7598_v30 = vor.u32 %v10302_v23, %v7597_v22  ;;  %v10266_v45 = vld [vmem:[%s16619_s1 + $0x494] sm:$0xf0]  ;;  %v7509_v57 = vld [vmem:[%s16619_s1 + $0x500] sm:$0xf]  ;;  %v10280_v59 = vld [vmem:[%s16619_s1 + $0x504] sm:$0xf0]  ;;  %v7446_v14 = vor.u32 %v10264_v56, %v7445_v55 }
  0x43   :  { %5231 = vmatpush.bf16.msrb.mxu3 %v7318_v28  ;;  %5190 = vmatmul.bf16.vlgmr.msrb.gmra.mxu0 %v11452_v39  ;;  %v10252_v28 = vld [vmem:[%s16619_s1 + $0x424] sm:$0xf0]  ;;  %v10298_v51 = vld [vmem:[%s16619_s1 + $0x594] sm:$0xf0]  ;;  %v7454_v60 = vor.u32 %v10266_v45, %v7453_v42  ;;  %v7693_v0 = vld [vmem:[%s16619_s1 + $0x670] sm:$0xf]  ;;  %v7510_v15 = vor.u32 %v10280_v59, %v7509_v57 }
  0x44   :  { %5238 = vmatpush.bf16.msra.mxu0 %v7438_v29  ;;  %5204 = vmatmul.bf16.vlgmr.msrb.gmra.mxu1 %v11465_v44  ;;  %v7461_v29 = vld [vmem:[%s16619_s1 + $0x4a0] sm:$0xf]  ;;  %v7398_v36 = vor.u32 %v10252_v28, %v7397_v27  ;;  %v10326_v3 = vld [vmem:[%s16619_s1 + $0x674] sm:$0xf0]  ;;  %v7821_v6 = vld [vmem:[%s16619_s1 + $0x770] sm:$0xf] }
  0x45   :  { %5252 = vmatpush.bf16.msra.mxu1 %v7502_v33  ;;  %5218 = vmatmul.bf16.vlgmr.msrb.gmra.mxu2 %v11463_v43  ;;  %v10284_v33 = vld [vmem:[%s16619_s1 + $0x524] sm:$0xf0]  ;;  %v10342_v5 = vld [vmem:[%s16619_s1 + $0x6f4] sm:$0xf0]  ;;  %v7885_v8 = vld [vmem:[%s16619_s1 + $0x7f0] sm:$0xf]  ;;  %v7694_v21 = vor.u32 %v10326_v3, %v7693_v0 }
  0x46   :  { %5266 = vmatpush.bf16.msra.mxu2 %v7566_v34  ;;  %5232 = vmatmul.bf16.vlgmr.msrb.gmra.mxu3 %v11473_v47  ;;  %v7589_v34 = vld [vmem:[%s16619_s1 + $0x5a0] sm:$0xf]  ;;  %v7526_v40 = vor.u32 %v10284_v33, %v7525_v32  ;;  %v10358_v7 = vld [vmem:[%s16619_s1 + $0x774] sm:$0xf0]  ;;  %v6709_v16 = vld [vmem:[%s16620_s0 + $0x28] sm:$0xf] }
  0x47   :  { %5280 = vmatpush.bf16.msra.mxu3 %v7630_v38  ;;  %v7462_v38 = vor.u32 %v10268_v31, %v7461_v29  ;;  %v7590_v46 = vor.u32 %v10300_v35, %v7589_v34  ;;  %v10073_v19 = vld [vmem:[%s16620_s0 + $0x24] sm:$0xf]  ;;  %v6703_v22 = vld [vmem:[%s16620_s0 + $0xe8] sm:$0xf0]  ;;  %v7685_v27 = vld [vmem:[%s16619_s1 + $0x660] sm:$0xf] }
  0x48   :  { %5239 = vmatpush.bf16.msra.mxu0 %v7430_v48  ;;  %v7517_v48 = vld [vmem:[%s16619_s1 + $0x510] sm:$0xf]  ;;  %v10074_v23 = vld [vmem:[%s16620_s0 + $0x2c] sm:$0xf]  ;;  %v10324_v28 = vld [vmem:[%s16619_s1 + $0x664] sm:$0xf0] }
  0x49   :  { %5253 = vmatpush.bf16.msra.mxu1 %v7494_v49  ;;  %v10282_v49 = vld [vmem:[%s16619_s1 + $0x514] sm:$0xf0]  ;;  %v7749_v29 = vld [vmem:[%s16619_s1 + $0x6e0] sm:$0xf]  ;;  %v10340_v32 = vld [vmem:[%s16619_s1 + $0x6e4] sm:$0xf0] }
  0x4a   :  { %5267 = vmatpush.bf16.msra.mxu2 %v7558_v50  ;;  %v7581_v50 = vld [vmem:[%s16619_s1 + $0x590] sm:$0xf]  ;;  %v7813_v33 = vld [vmem:[%s16619_s1 + $0x760] sm:$0xf]  ;;  %v10356_v34 = vld [vmem:[%s16619_s1 + $0x764] sm:$0xf0]  ;;  %v7750_v42 = vor.u32 %v10340_v32, %v7749_v29 }
  0x4b   :  { %5281 = vmatpush.bf16.msra.mxu3 %v7622_v54  ;;  %v7390_v54 = vor.u32 %v10250_v41, %v7389_v37  ;;  %v7582_v2 = vor.u32 %v10298_v51, %v7581_v50  ;;  %v7877_v37 = vld [vmem:[%s16619_s1 + $0x7e0] sm:$0xf]  ;;  %v7686_v41 = vor.u32 %v10324_v28, %v7685_v27  ;;  %v7814_v45 = vor.u32 %v10356_v34, %v7813_v33  ;;  %v10338_v51 = vld [vmem:[%s16619_s1 + $0x6d4] sm:$0xf0]  ;;  %v7805_v52 = vld [vmem:[%s16619_s1 + $0x750] sm:$0xf] }
  0x4c   :  { %5240 = vmatpush.bf16.msra.mxu0 %v7422_v61  ;;  %v7518_v61 = vor.u32 %v10282_v49, %v7517_v48  ;;  %v10322_v48 = vld [vmem:[%s16619_s1 + $0x654] sm:$0xf0]  ;;  %v7741_v49 = vld [vmem:[%s16619_s1 + $0x6d0] sm:$0xf]  ;;  %v10336_v0 = vld [vmem:[%s16619_s1 + $0x6c4] sm:$0xf0] }
  0x4d   :  { %5254 = vmatpush.bf16.msra.mxu1 %v7486_v62  ;;  %v7573_v62 = vld [vmem:[%s16619_s1 + $0x580] sm:$0xf]  ;;  %v10354_v53 = vld [vmem:[%s16619_s1 + $0x754] sm:$0xf0]  ;;  %v7742_v57 = vor.u32 %v10338_v51, %v7741_v49  ;;  %v10352_v3 = vld [vmem:[%s16619_s1 + $0x744] sm:$0xf0] }
  0x4e   :  { %5268 = vmatpush.bf16.msra.mxu2 %v7550_v63  ;;  %v10296_v63 = vld [vmem:[%s16619_s1 + $0x584] sm:$0xf0]  ;;  %v10370_v55 = vld [vmem:[%s16619_s1 + $0x7d4] sm:$0xf0]  ;;  %v7806_v59 = vor.u32 %v10354_v53, %v7805_v52  ;;  %v7781_v28 = vld [vmem:[%s16619_s1 + $0x720] sm:$0xf] }
  0x4f   :  { %5282 = vmatpush.bf16.msra.mxu3 %v7614_v4  ;;  %v7757_v4 = vld [vmem:[%s16619_s1 + $0x6f0] sm:$0xf]  ;;  %v7574_v20 = vor.u32 %v10296_v63, %v7573_v62  ;;  %v7733_v62 = vld [vmem:[%s16619_s1 + $0x6c0] sm:$0xf]  ;;  %v10332_v27 = vld [vmem:[%s16619_s1 + $0x6a4] sm:$0xf0] }
  0x50   :  { %5241 = vmatpush.bf16.msra.mxu0 %v7414_v11  ;;  %v10374_v11 = vld [vmem:[%s16619_s1 + $0x7f4] sm:$0xf0]  ;;  %v10348_v29 = vld [vmem:[%s16619_s1 + $0x724] sm:$0xf0]  ;;  %v7645_v34 = vld [vmem:[%s16619_s1 + $0x610] sm:$0xf] }
  0x51   :  { %5255 = vmatpush.bf16.msra.mxu1 %v7478_v12  ;;  %v6701_v12 = vld [vmem:[%s16620_s0 + $0x20] sm:$0xf]  ;;  %v10364_v32 = vld [vmem:[%s16619_s1 + $0x7a4] sm:$0xf0]  ;;  %v10346_v49 = vld [vmem:[%s16619_s1 + $0x714] sm:$0xf0] }
  0x52   :  { %5269 = vmatpush.bf16.msra.mxu2 %v7542_v13  ;;  %v10098_v13 = vld [vmem:[%s16620_s0 + $0xe4] sm:$0xf0]  ;;  %v10362_v51 = vld [vmem:[%s16619_s1 + $0x794] sm:$0xf0]  ;;  %v7637_v52 = vld [vmem:[%s16619_s1 + $0x600] sm:$0xf] }
  0x53   :  { %5283 = vmatpush.bf16.msra.mxu3 %v7606_v18  ;;  %v10099_v18 = vld [vmem:[%s16620_s0 + $0xec] sm:$0xf0]  ;;  %v11680_v31 = vor.u32 %v10098_v13, %v6701_v12  ;;  %v10312_v53 = vld [vmem:[%s16619_s1 + $0x604] sm:$0xf0] }
  0x54   :  { %5242 = vmatpush.bf16.msra.mxu0 %v7406_v24  ;;  %v6711_v24 = vld [vmem:[%s16620_s0 + $0xf0] sm:$0xf0]  ;;  %v11691_v35 = vor.u32 %v10099_v18, %v6709_v16  ;;  %v7725_v12 = vld [vmem:[%s16619_s1 + $0x6b0] sm:$0xf]  ;;  %v10350_v16 = vld [vmem:[%s16619_s1 + $0x734] sm:$0xf0] }
  0x55   :  { %5256 = vmatpush.bf16.msra.mxu1 %v7470_v25  ;;  %v7758_v25 = vor.u32 %v10342_v5, %v7757_v4  ;;  %v7861_v4 = vld [vmem:[%s16619_s1 + $0x7c0] sm:$0xf]  ;;  %v10368_v5 = vld [vmem:[%s16619_s1 + $0x7c4] sm:$0xf0]  ;;  %v7853_v18 = vld [vmem:[%s16619_s1 + $0x7b0] sm:$0xf] }
  0x56   :  { %5270 = vmatpush.bf16.msra.mxu2 %v7534_v26  ;;  %v7822_v26 = vor.u32 %v10358_v7, %v7821_v6  ;;  %v7734_v7 = vor.u32 %v10336_v0, %v7733_v62  ;;  %v7862_v13 = vor.u32 %v10368_v5, %v7861_v4  ;;  %v7829_v62 = vld [vmem:[%s16619_s1 + $0x780] sm:$0xf]  ;;  %v7949_v0 = vld [vmem:[%s16619_s1 + $0x870] sm:$0xf]  ;;  %v10406_v5 = vld [vmem:[%s16619_s1 + $0x8f4] sm:$0xf0] }
  0x57   :  { %5284 = vmatpush.bf16.msra.mxu3 %v7598_v30  ;;  %v7886_v30 = vor.u32 %v10374_v11, %v7885_v8  ;;  %v10318_v11 = vld [vmem:[%s16619_s1 + $0x634] sm:$0xf0]  ;;  %v8013_v4 = vld [vmem:[%s16619_s1 + $0x8f0] sm:$0xf] }
  0x58   :  { %5243 = vmatpush.bf16.msra.mxu0 %v7398_v36  ;;  %v11693_v36 = vor.u32 %v10073_v19, %v6703_v22  ;;  %v10366_v19 = vld [vmem:[%s16619_s1 + $0x7b4] sm:$0xf0] }
  0x59   :  { %5257 = vmatpush.bf16.msra.mxu1 %v7462_v38  ;;  %v10372_v38 = vld [vmem:[%s16619_s1 + $0x7e4] sm:$0xf0] }
  0x5a   :  { %5271 = vmatpush.bf16.msra.mxu2 %v7526_v40  ;;  %v11701_v40 = vor.u32 %v10074_v23, %v6711_v24  ;;  %v7878_v50 = vor.u32 %v10372_v38, %v7877_v37  ;;  %v7653_v23 = vld [vmem:[%s16619_s1 + $0x620] sm:$0xf]  ;;  %v10316_v24 = vld [vmem:[%s16619_s1 + $0x624] sm:$0xf0]  ;;  %v7782_v38 = vor.u32 %v10348_v29, %v7781_v28 }
  0x5b   :  { %5285 = vmatpush.bf16.msra.mxu3 %v7590_v46  ;;  %v7677_v46 = vld [vmem:[%s16619_s1 + $0x650] sm:$0xf]  ;;  %v7654_v33 = vor.u32 %v10316_v24, %v7653_v23  ;;  %v10076_v23 = vld [vmem:[%s16620_s0 + $0x3c] sm:$0xf]  ;;  %v6727_v24 = vld [vmem:[%s16620_s0 + $0x100] sm:$0xf0] }
  0x5c   :  { %5244 = vmatpush.bf16.msra.mxu0 %v7390_v54  ;;  %v7869_v54 = vld [vmem:[%s16619_s1 + $0x7d0] sm:$0xf]  ;;  %v7678_v56 = vor.u32 %v10322_v48, %v7677_v46  ;;  %v10388_v28 = vld [vmem:[%s16619_s1 + $0x864] sm:$0xf0]  ;;  %v8005_v29 = vld [vmem:[%s16619_s1 + $0x8e0] sm:$0xf] }
  0x5d   :  { %5258 = vmatpush.bf16.msra.mxu1 %v7454_v60  ;;  %v7669_v60 = vld [vmem:[%s16619_s1 + $0x640] sm:$0xf]  ;;  %v7870_v63 = vor.u32 %v10370_v55, %v7869_v54  ;;  %v7773_v48 = vld [vmem:[%s16619_s1 + $0x710] sm:$0xf] }
  0x5e   :  { %5272 = vmatpush.bf16.msra.mxu2 %v7518_v61  ;;  %v10320_v61 = vld [vmem:[%s16619_s1 + $0x644] sm:$0xf0]  ;;  %v7701_v55 = vld [vmem:[%s16619_s1 + $0x680] sm:$0xf] }
  0x5f   :  { %5286 = vmatpush.bf16.msra.mxu3 %v7582_v2  ;;  %v7797_v2 = vld [vmem:[%s16619_s1 + $0x740] sm:$0xf]  ;;  %v7670_v6 = vor.u32 %v10320_v61, %v7669_v60  ;;  %v7774_v61 = vor.u32 %v10346_v49, %v7773_v48 }
  0x60   :  { %5245 = vmatpush.bf16.msra.mxu0 %v7382_v9  ;;  %v7798_v8 = vor.u32 %v10352_v3, %v7797_v2  ;;  %v7661_v9 = vld [vmem:[%s16619_s1 + $0x630] sm:$0xf]  ;;  %v10390_v3 = vld [vmem:[%s16619_s1 + $0x874] sm:$0xf0] }
  0x61   :  { %5259 = vmatpush.bf16.msra.mxu1 %v7446_v14  ;;  %v10334_v14 = vld [vmem:[%s16619_s1 + $0x6b4] sm:$0xf0] }
  0x62   :  { %5273 = vmatpush.bf16.msra.mxu2 %v7510_v15  ;;  %v7789_v15 = vld [vmem:[%s16619_s1 + $0x730] sm:$0xf] }
  0x63   :  { %5287 = vmatpush.bf16.msra.mxu3 %v7574_v20  ;;  %5246 = vmatmul.bf16.vlgmr.msra.gmra.mxu0 %v11680_v31  ;;  %v7662_v20 = vor.u32 %v10318_v11, %v7661_v9  ;;  %v7790_v22 = vor.u32 %v10350_v16, %v7789_v15  ;;  %v7638_v9 = vor.u32 %v10312_v53, %v7637_v52  ;;  %v10438_v11 = vld [vmem:[%s16619_s1 + $0x9f4] sm:$0xf0]  ;;  %v7997_v53 = vld [vmem:[%s16619_s1 + $0x8d0] sm:$0xf] }
  0x64   :  { %5294 = vmatpush.bf16.msrb.mxu0 %v7694_v21  ;;  %5260 = vmatmul.bf16.vlgmr.msra.gmra.mxu1 %v11693_v36  ;;  %v7726_v21 = vor.u32 %v10334_v14, %v7725_v12  ;;  %v6717_v12 = vld [vmem:[%s16620_s0 + $0x30] sm:$0xf]  ;;  %v6725_v16 = vld [vmem:[%s16620_s0 + $0x38] sm:$0xf] }
  0x65   :  { %5308 = vmatpush.bf16.msrb.mxu1 %v7758_v25  ;;  %5274 = vmatmul.bf16.vlgmr.msra.gmra.mxu2 %v11691_v35  ;;  %v7717_v25 = vld [vmem:[%s16619_s1 + $0x6a0] sm:$0xf]  ;;  %v10386_v52 = vld [vmem:[%s16619_s1 + $0x854] sm:$0xf0] }
  0x66   :  { %5322 = vmatpush.bf16.msrb.mxu2 %v7822_v26  ;;  %5288 = vmatmul.bf16.vlgmr.msra.gmra.mxu3 %v11701_v40  ;;  %v7854_v26 = vor.u32 %v10366_v19, %v7853_v18  ;;  %v7718_v37 = vor.u32 %v10332_v27, %v7717_v25  ;;  %v10101_v18 = vld [vmem:[%s16620_s0 + $0xfc] sm:$0xf0]  ;;  %v10075_v19 = vld [vmem:[%s16620_s0 + $0x34] sm:$0xf]  ;;  %v8014_v25 = vor.u32 %v10406_v5, %v8013_v4  ;;  %v10400_v5 = vld [vmem:[%s16619_s1 + $0x8c4] sm:$0xf0] }
  0x67   :  { %5336 = vmatpush.bf16.msrb.mxu3 %v7886_v30  ;;  %v7845_v30 = vld [vmem:[%s16619_s1 + $0x7a0] sm:$0xf] }
  0x68   :  { %5295 = vmatpush.bf16.msrb.mxu0 %v7686_v41  ;;  %v10314_v41 = vld [vmem:[%s16619_s1 + $0x614] sm:$0xf0]  ;;  %v7846_v46 = vor.u32 %v10364_v32, %v7845_v30  ;;  %v7941_v27 = vld [vmem:[%s16619_s1 + $0x860] sm:$0xf] }
  0x69   :  { %5309 = vmatpush.bf16.msrb.mxu1 %v7750_v42  ;;  %v7709_v42 = vld [vmem:[%s16619_s1 + $0x690] sm:$0xf]  ;;  %v7646_v54 = vor.u32 %v10314_v41, %v7645_v34  ;;  %v8069_v34 = vld [vmem:[%s16619_s1 + $0x960] sm:$0xf]  ;;  %v7942_v48 = vor.u32 %v10388_v28, %v7941_v27  ;;  %v10380_v28 = vld [vmem:[%s16619_s1 + $0x824] sm:$0xf0] }
  0x6a   :  { %5323 = vmatpush.bf16.msrb.mxu2 %v7814_v45  ;;  %v10330_v45 = vld [vmem:[%s16619_s1 + $0x694] sm:$0xf0]  ;;  %v7909_v27 = vld [vmem:[%s16619_s1 + $0x820] sm:$0xf] }
  0x6b   :  { %5337 = vmatpush.bf16.msrb.mxu3 %v7878_v50  ;;  %v7837_v50 = vld [vmem:[%s16619_s1 + $0x790] sm:$0xf]  ;;  %v7710_v60 = vor.u32 %v10330_v45, %v7709_v42  ;;  %v8133_v42 = vld [vmem:[%s16619_s1 + $0x9e0] sm:$0xf]  ;;  %v10436_v45 = vld [vmem:[%s16619_s1 + $0x9e4] sm:$0xf0] }
  0x6c   :  { %5296 = vmatpush.bf16.msrb.mxu0 %v7678_v56  ;;  %v10328_v56 = vld [vmem:[%s16619_s1 + $0x684] sm:$0xf0]  ;;  %v7838_v2 = vor.u32 %v10362_v51, %v7837_v50  ;;  %v7933_v51 = vld [vmem:[%s16619_s1 + $0x850] sm:$0xf] }
  0x6d   :  { %5310 = vmatpush.bf16.msrb.mxu1 %v7742_v57  ;;  %v7765_v57 = vld [vmem:[%s16619_s1 + $0x700] sm:$0xf]  ;;  %v7702_v14 = vor.u32 %v10328_v56, %v7701_v55  ;;  %v10402_v55 = vld [vmem:[%s16619_s1 + $0x8d4] sm:$0xf0]  ;;  %v8061_v56 = vld [vmem:[%s16619_s1 + $0x950] sm:$0xf] }
  0x6e   :  { %5324 = vmatpush.bf16.msrb.mxu2 %v7806_v59  ;;  %v10344_v59 = vld [vmem:[%s16619_s1 + $0x704] sm:$0xf0] }
  0x6f   :  { %5338 = vmatpush.bf16.msrb.mxu3 %v7870_v63  ;;  %v10360_v63 = vld [vmem:[%s16619_s1 + $0x784] sm:$0xf0]  ;;  %v7766_v15 = vor.u32 %v10344_v59, %v7765_v57  ;;  %v10418_v57 = vld [vmem:[%s16619_s1 + $0x954] sm:$0xf0]  ;;  %v8125_v59 = vld [vmem:[%s16619_s1 + $0x9d0] sm:$0xf] }
  0x70   :  { %5297 = vmatpush.bf16.msrb.mxu0 %v7670_v6  ;;  %v8077_v6 = vld [vmem:[%s16619_s1 + $0x970] sm:$0xf] }
  0x71   :  { %5311 = vmatpush.bf16.msrb.mxu1 %v7734_v7  ;;  %v10422_v7 = vld [vmem:[%s16619_s1 + $0x974] sm:$0xf0] }
  0x72   :  { %5325 = vmatpush.bf16.msrb.mxu2 %v7798_v8  ;;  %v8141_v8 = vld [vmem:[%s16619_s1 + $0x9f0] sm:$0xf] }
  0x73   :  { %5339 = vmatpush.bf16.msrb.mxu3 %v7862_v13  ;;  %v10100_v13 = vld [vmem:[%s16620_s0 + $0xf4] sm:$0xf0]  ;;  %v8142_v30 = vor.u32 %v10438_v11, %v8141_v8  ;;  %v8117_v8 = vld [vmem:[%s16619_s1 + $0x9c0] sm:$0xf] }
  0x74   :  { %5298 = vmatpush.bf16.msrb.mxu0 %v7662_v20  ;;  %v7830_v20 = vor.u32 %v10360_v63, %v7829_v62  ;;  %v11908_v32 = vor.u32 %v10100_v13, %v6717_v12  ;;  %v7998_v62 = vor.u32 %v10402_v55, %v7997_v53  ;;  %v8062_v63 = vor.u32 %v10418_v57, %v8061_v56  ;;  %v7965_v53 = vld [vmem:[%s16619_s1 + $0x890] sm:$0xf]  ;;  %v10410_v57 = vld [vmem:[%s16619_s1 + $0x914] sm:$0xf0] }
  0x75   :  { %5312 = vmatpush.bf16.msrb.mxu1 %v7726_v21  ;;  %v7950_v21 = vor.u32 %v10390_v3, %v7949_v0  ;;  %v7925_v0 = vld [vmem:[%s16619_s1 + $0x840] sm:$0xf]  ;;  %v8029_v56 = vld [vmem:[%s16619_s1 + $0x910] sm:$0xf] }
  0x76   :  { %5326 = vmatpush.bf16.msrb.mxu2 %v7790_v22  ;;  %v6719_v22 = vld [vmem:[%s16620_s0 + $0xf8] sm:$0xf0]  ;;  %v7989_v3 = vld [vmem:[%s16619_s1 + $0x8c0] sm:$0xf] }
  0x77   :  { %5340 = vmatpush.bf16.msrb.mxu3 %v7854_v26  ;;  %v8078_v26 = vor.u32 %v10422_v7, %v8077_v6  ;;  %v11921_v41 = vor.u32 %v10075_v19, %v6719_v22  ;;  %v8053_v6 = vld [vmem:[%s16619_s1 + $0x940] sm:$0xf]  ;;  %v10416_v7 = vld [vmem:[%s16619_s1 + $0x944] sm:$0xf0]  ;;  %v7990_v12 = vor.u32 %v10400_v5, %v7989_v3  ;;  %v10398_v19 = vld [vmem:[%s16619_s1 + $0x8b4] sm:$0xf0] }
  0x78   :  { %5299 = vmatpush.bf16.msrb.mxu0 %v7654_v33  ;;  %v10404_v33 = vld [vmem:[%s16619_s1 + $0x8e4] sm:$0xf0]  ;;  %v8054_v13 = vor.u32 %v10416_v7, %v8053_v6  ;;  %v8109_v22 = vld [vmem:[%s16619_s1 + $0x9b0] sm:$0xf]  ;;  %v8021_v3 = vld [vmem:[%s16619_s1 + $0x900] sm:$0xf]  ;;  %v8030_v6 = vor.u32 %v10410_v57, %v8029_v56 }
  0x79   :  { %5313 = vmatpush.bf16.msrb.mxu1 %v7718_v37  ;;  %v10420_v37 = vld [vmem:[%s16619_s1 + $0x964] sm:$0xf0]  ;;  %v8006_v49 = vor.u32 %v10404_v33, %v8005_v29  ;;  %v7973_v29 = vld [vmem:[%s16619_s1 + $0x8a0] sm:$0xf] }
  0x7a   :  { %5327 = vmatpush.bf16.msrb.mxu2 %v7782_v38  ;;  %v11919_v38 = vor.u32 %v10101_v18, %v6725_v16  ;;  %v8070_v50 = vor.u32 %v10420_v37, %v8069_v34  ;;  %v7981_v16 = vld [vmem:[%s16619_s1 + $0x8b0] sm:$0xf]  ;;  %v10396_v33 = vld [vmem:[%s16619_s1 + $0x8a4] sm:$0xf0]  ;;  %v8037_v34 = vld [vmem:[%s16619_s1 + $0x920] sm:$0xf] }
  0x7b   :  { %5341 = vmatpush.bf16.msrb.mxu3 %v7846_v46  ;;  %v11929_v46 = vor.u32 %v10076_v23, %v6727_v24  ;;  %v10430_v23 = vld [vmem:[%s16619_s1 + $0x9b4] sm:$0xf0]  ;;  %v10412_v37 = vld [vmem:[%s16619_s1 + $0x924] sm:$0xf0]  ;;  %v8085_v7 = vld [vmem:[%s16619_s1 + $0x980] sm:$0xf] }
  0x7c   :  { %5300 = vmatpush.bf16.msrb.mxu0 %v7646_v54  ;;  %v8134_v54 = vor.u32 %v10436_v45, %v8133_v42  ;;  %v8101_v42 = vld [vmem:[%s16619_s1 + $0x9a0] sm:$0xf]  ;;  %v10428_v45 = vld [vmem:[%s16619_s1 + $0x9a4] sm:$0xf0] }
  0x7d   :  { %5314 = vmatpush.bf16.msrb.mxu1 %v7710_v60  ;;  %v10434_v60 = vld [vmem:[%s16619_s1 + $0x9d4] sm:$0xf0]  ;;  %v8102_v55 = vor.u32 %v10428_v45, %v8101_v42  ;;  %v8197_v45 = vld [vmem:[%s16619_s1 + $0xa60] sm:$0xf] }
  0x7e   :  { %5328 = vmatpush.bf16.msrb.mxu2 %v7774_v61  ;;  %v7934_v61 = vor.u32 %v10386_v52, %v7933_v51  ;;  %v8126_v4 = vor.u32 %v10434_v60, %v8125_v59  ;;  %v8038_v51 = vor.u32 %v10412_v37, %v8037_v34  ;;  %v10378_v52 = vld [vmem:[%s16619_s1 + $0x814] sm:$0xf0]  ;;  %v8093_v59 = vld [vmem:[%s16619_s1 + $0x990] sm:$0xf]  ;;  %v6743_v34 = vld [vmem:[%s16620_s0 + $0x110] sm:$0xf0] }
  0x7f   :  { %5342 = vmatpush.bf16.msrb.mxu3 %v7838_v2  ;;  %v10384_v2 = vld [vmem:[%s16619_s1 + $0x844] sm:$0xf0]  ;;  %v10426_v60 = vld [vmem:[%s16619_s1 + $0x994] sm:$0xf0]  ;;  %v8389_v57 = vld [vmem:[%s16619_s1 + $0xbe0] sm:$0xf] }
  0x80   :  { %5301 = vmatpush.bf16.msrb.mxu0 %v7638_v9  ;;  %v10432_v9 = vld [vmem:[%s16619_s1 + $0x9c4] sm:$0xf0]  ;;  %v7926_v11 = vor.u32 %v10384_v2, %v7925_v0  ;;  %v7957_v0 = vld [vmem:[%s16619_s1 + $0x880] sm:$0xf] }
  0x81   :  { %5315 = vmatpush.bf16.msrb.mxu1 %v7702_v14  ;;  %v7917_v14 = vld [vmem:[%s16619_s1 + $0x830] sm:$0xf]  ;;  %v8118_v18 = vor.u32 %v10432_v9, %v8117_v8  ;;  %v10392_v2 = vld [vmem:[%s16619_s1 + $0x884] sm:$0xf0] }
  0x82   :  { %5329 = vmatpush.bf16.msrb.mxu2 %v7766_v15  ;;  %v10382_v15 = vld [vmem:[%s16619_s1 + $0x834] sm:$0xf0]  ;;  %v10424_v8 = vld [vmem:[%s16619_s1 + $0x984] sm:$0xf0]  ;;  %v8205_v9 = vld [vmem:[%s16619_s1 + $0xa70] sm:$0xf] }
  0x83   :  { %5343 = vmatpush.bf16.msrb.mxu3 %v7830_v20  ;;  %5302 = vmatmul.bf16.vlgmr.msrb.gmra.mxu0 %v11908_v32  ;;  %v8045_v20 = vld [vmem:[%s16619_s1 + $0x930] sm:$0xf]  ;;  %v7918_v24 = vor.u32 %v10382_v15, %v7917_v14  ;;  %v10470_v14 = vld [vmem:[%s16619_s1 + $0xaf4] sm:$0xf0] }
  0x84   :  { %5350 = vmatpush.bf16.msra.mxu0 %v7950_v21  ;;  %5316 = vmatmul.bf16.vlgmr.msrb.gmra.mxu1 %v11921_v41  ;;  %v10414_v21 = vld [vmem:[%s16619_s1 + $0x934] sm:$0xf0]  ;;  %v8333_v15 = vld [vmem:[%s16619_s1 + $0xb70] sm:$0xf] }
  0x85   :  { %5364 = vmatpush.bf16.msra.mxu1 %v8014_v25  ;;  %5330 = vmatmul.bf16.vlgmr.msrb.gmra.mxu2 %v11919_v38  ;;  %v7982_v25 = vor.u32 %v10398_v19, %v7981_v16  ;;  %v10486_v16 = vld [vmem:[%s16619_s1 + $0xb74] sm:$0xf0] }
  0x86   :  { %5378 = vmatpush.bf16.msra.mxu2 %v8078_v26  ;;  %5344 = vmatmul.bf16.vlgmr.msrb.gmra.mxu3 %v11929_v46  ;;  %v8046_v26 = vor.u32 %v10414_v21, %v8045_v20  ;;  %v10502_v20 = vld [vmem:[%s16619_s1 + $0xbf4] sm:$0xf0]  ;;  %v6733_v21 = vld [vmem:[%s16620_s0 + $0x40] sm:$0xf]  ;;  %v8334_v42 = vor.u32 %v10486_v16, %v8333_v15 }
  0x87   :  { %5392 = vmatpush.bf16.msra.mxu3 %v8142_v30  ;;  %v8110_v30 = vor.u32 %v10430_v23, %v8109_v22  ;;  %v10102_v22 = vld [vmem:[%s16620_s0 + $0x104] sm:$0xf0]  ;;  %v7958_v23 = vor.u32 %v10392_v2, %v7957_v0  ;;  %v10450_v2 = vld [vmem:[%s16619_s1 + $0xa54] sm:$0xf0]  ;;  %v8181_v16 = vld [vmem:[%s16619_s1 + $0xa40] sm:$0xf] }
  0x88   :  { %5351 = vmatpush.bf16.msra.mxu0 %v7942_v48  ;;  %v7910_v48 = vor.u32 %v10380_v28, %v7909_v27  ;;  %v10077_v27 = vld [vmem:[%s16620_s0 + $0x44] sm:$0xf]  ;;  %v8086_v28 = vor.u32 %v10424_v8, %v8085_v7  ;;  %v8317_v7 = vld [vmem:[%s16619_s1 + $0xb50] sm:$0xf]  ;;  %v10482_v8 = vld [vmem:[%s16619_s1 + $0xb54] sm:$0xf0] }
  0x89   :  { %5365 = vmatpush.bf16.msra.mxu1 %v8006_v49  ;;  %v7901_v49 = vld [vmem:[%s16619_s1 + $0x810] sm:$0xf]  ;;  %v8318_v15 = vor.u32 %v10482_v8, %v8317_v7  ;;  %v8357_v8 = vld [vmem:[%s16619_s1 + $0xba0] sm:$0xf] }
  0x8a   :  { %5379 = vmatpush.bf16.msra.mxu2 %v8070_v50  ;;  %v7974_v50 = vor.u32 %v10396_v33, %v7973_v29  ;;  %v10078_v33 = vld [vmem:[%s16620_s0 + $0x4c] sm:$0xf] }
  0x8b   :  { %5393 = vmatpush.bf16.msra.mxu3 %v8134_v54  ;;  %v10394_v54 = vld [vmem:[%s16619_s1 + $0x894] sm:$0xf0] }
  0x8c   :  { %5352 = vmatpush.bf16.msra.mxu0 %v7934_v61  ;;  %v7893_v61 = vld [vmem:[%s16619_s1 + $0x800] sm:$0xf]  ;;  %v7966_v5 = vor.u32 %v10394_v54, %v7965_v53  ;;  %v10484_v54 = vld [vmem:[%s16619_s1 + $0xb64] sm:$0xf0] }
  0x8d   :  { %5366 = vmatpush.bf16.msra.mxu1 %v7998_v62  ;;  %v10376_v62 = vld [vmem:[%s16619_s1 + $0x804] sm:$0xf0]  ;;  %v8325_v53 = vld [vmem:[%s16619_s1 + $0xb60] sm:$0xf] }
  0x8e   :  { %5380 = vmatpush.bf16.msra.mxu2 %v8062_v63  ;;  %v7902_v63 = vor.u32 %v10378_v52, %v7901_v49  ;;  %v7894_v19 = vor.u32 %v10376_v62, %v7893_v61  ;;  %v8261_v49 = vld [vmem:[%s16619_s1 + $0xae0] sm:$0xf]  ;;  %v10468_v52 = vld [vmem:[%s16619_s1 + $0xae4] sm:$0xf0]  ;;  %v8189_v62 = vld [vmem:[%s16619_s1 + $0xa50] sm:$0xf]  ;;  %v8326_v0 = vor.u32 %v10484_v54, %v8325_v53 }
  0x8f   :  { %5394 = vmatpush.bf16.msra.mxu3 %v8126_v4  ;;  %v10408_v4 = vld [vmem:[%s16619_s1 + $0x904] sm:$0xf0] }
  0x90   :  { %5353 = vmatpush.bf16.msra.mxu0 %v7926_v11  ;;  %v8094_v11 = vor.u32 %v10426_v60, %v8093_v59  ;;  %v10500_v59 = vld [vmem:[%s16619_s1 + $0xbe4] sm:$0xf0]  ;;  %v12157_v60 = vor.u32 %v10078_v33, %v6743_v34  ;;  %v8173_v33 = vld [vmem:[%s16619_s1 + $0xa30] sm:$0xf]  ;;  %v10446_v34 = vld [vmem:[%s16619_s1 + $0xa34] sm:$0xf0] }
  0x91   :  { %5367 = vmatpush.bf16.msra.mxu1 %v7990_v12  ;;  %v10454_v12 = vld [vmem:[%s16619_s1 + $0xa74] sm:$0xf0]  ;;  %v8174_v54 = vor.u32 %v10446_v34, %v8173_v33  ;;  %v8213_v33 = vld [vmem:[%s16619_s1 + $0xa80] sm:$0xf]  ;;  %v10456_v34 = vld [vmem:[%s16619_s1 + $0xa84] sm:$0xf0] }
  0x92   :  { %5381 = vmatpush.bf16.msra.mxu2 %v8054_v13  ;;  %v8269_v13 = vld [vmem:[%s16619_s1 + $0xaf0] sm:$0xf]  ;;  %v8206_v29 = vor.u32 %v10454_v12, %v8205_v9  ;;  %v8190_v12 = vor.u32 %v10450_v2, %v8189_v62  ;;  %v8165_v62 = vld [vmem:[%s16619_s1 + $0xa20] sm:$0xf] }
  0x93   :  { %5395 = vmatpush.bf16.msra.mxu3 %v8118_v18  ;;  %v8397_v18 = vld [vmem:[%s16619_s1 + $0xbf0] sm:$0xf]  ;;  %v8270_v37 = vor.u32 %v10470_v14, %v8269_v13 }
  0x94   :  { %5354 = vmatpush.bf16.msra.mxu0 %v7918_v24  ;;  %v8022_v24 = vor.u32 %v10408_v4, %v8021_v3  ;;  %v8253_v3 = vld [vmem:[%s16619_s1 + $0xad0] sm:$0xf]  ;;  %v12171_v4 = vld [vmem:[%s16621_s2] sm:$0x3] }
  0x95   :  { %5368 = vmatpush.bf16.msra.mxu1 %v7982_v25  ;;  %v6741_v25 = vld [vmem:[%s16620_s0 + $0x48] sm:$0xf]  ;;  %v8381_v9 = vld [vmem:[%s16619_s1 + $0xbd0] sm:$0xf]  ;;  %v16625_v13 = vperm.slane %v12171_v4, 0 }
  0x96   :  { %5382 = vmatpush.bf16.msra.mxu2 %v8046_v26  ;;  %v10103_v26 = vld [vmem:[%s16620_s0 + $0x10c] sm:$0xf0] }
  0x97   :  { %5396 = vmatpush.bf16.msra.mxu3 %v8110_v30  ;;  %v6735_v30 = vld [vmem:[%s16620_s0 + $0x108] sm:$0xf0] }
  0x98   :  { %5355 = vmatpush.bf16.msra.mxu0 %v7910_v48  ;;  %v10452_v48 = vld [vmem:[%s16619_s1 + $0xa64] sm:$0xf0]  ;;  %v12149_v56 = vor.u32 %v10077_v27, %v6735_v30 }
  0x99   :  { %5369 = vmatpush.bf16.msra.mxu1 %v7974_v50  ;;  %v8398_v50 = vor.u32 %v10502_v20, %v8397_v18  ;;  %v8198_v61 = vor.u32 %v10452_v48, %v8197_v45  ;;  %v10448_v18 = vld [vmem:[%s16619_s1 + $0xa44] sm:$0xf0]  ;;  %v10462_v45 = vld [vmem:[%s16619_s1 + $0xab4] sm:$0xf0]  ;;  %v8301_v48 = vld [vmem:[%s16619_s1 + $0xb30] sm:$0xf] }
  0x9a   :  { %5383 = vmatpush.bf16.msra.mxu2 %v8038_v51  ;;  %v12136_v51 = vor.u32 %v10102_v22, %v6733_v21  ;;  %v10464_v21 = vld [vmem:[%s16619_s1 + $0xac4] sm:$0xf0]  ;;  %v8309_v22 = vld [vmem:[%s16619_s1 + $0xb40] sm:$0xf]  ;;  %v8182_v27 = vor.u32 %v10448_v18, %v8181_v16  ;;  %v10442_v18 = vld [vmem:[%s16619_s1 + $0xa14] sm:$0xf0] }
  0x9b   :  { %5397 = vmatpush.bf16.msra.mxu3 %v8102_v55  ;;  %v12147_v55 = vor.u32 %v10103_v26, %v6741_v25  ;;  %v10496_v25 = vld [vmem:[%s16619_s1 + $0xbc4] sm:$0xf0] }
  0x9c   :  { %5356 = vmatpush.bf16.msra.mxu0 %v7902_v63  ;;  %v8262_v63 = vor.u32 %v10468_v52, %v8261_v49  ;;  %v10478_v49 = vld [vmem:[%s16619_s1 + $0xb34] sm:$0xf0] }
  0x9d   :  { %5370 = vmatpush.bf16.msra.mxu1 %v7966_v5  ;;  %v8390_v5 = vor.u32 %v10500_v59, %v8389_v57  ;;  %v10494_v52 = vld [vmem:[%s16619_s1 + $0xbb4] sm:$0xf0] }
  0x9e   :  { %5384 = vmatpush.bf16.msra.mxu2 %v8030_v6  ;;  %v10466_v6 = vld [vmem:[%s16619_s1 + $0xad4] sm:$0xf0] }
  0x9f   :  { %5398 = vmatpush.bf16.msra.mxu3 %v8094_v11  ;;  %v10498_v11 = vld [vmem:[%s16619_s1 + $0xbd4] sm:$0xf0]  ;;  %v8254_v14 = vor.u32 %v10466_v6, %v8253_v3  ;;  %v10460_v3 = vld [vmem:[%s16619_s1 + $0xaa4] sm:$0xf0] }
  0xa0   :  { %5357 = vmatpush.bf16.msra.mxu0 %v7894_v19  ;;  %v8245_v19 = vld [vmem:[%s16619_s1 + $0xac0] sm:$0xf]  ;;  %v8382_v20 = vor.u32 %v10498_v11, %v8381_v9  ;;  %v5135_v26 = vpop.f32.mrf.mxu0  ;;  %v10476_v6 = vld [vmem:[%s16619_s1 + $0xb24] sm:$0xf0] }
  0xa1   :  { %5371 = vmatpush.bf16.msra.mxu1 %v7958_v23  ;;  %v10480_v23 = vld [vmem:[%s16619_s1 + $0xb44] sm:$0xf0]  ;;  %v5149_v53 = vpop.f32.mrf.mxu1 }
  0xa2   :  { %5385 = vmatpush.bf16.msra.mxu2 %v8022_v24  ;;  %v8373_v24 = vld [vmem:[%s16619_s1 + $0xbc0] sm:$0xf]  ;;  %v8310_v30 = vor.u32 %v10480_v23, %v8309_v22  ;;  %v10492_v9 = vld [vmem:[%s16619_s1 + $0xba4] sm:$0xf0]  ;;  %v8285_v22 = vld [vmem:[%s16619_s1 + $0xb10] sm:$0xf] }
  0xa3   :  { %5399 = vmatpush.bf16.msra.mxu3 %v8086_v28  ;;  %5358 = vmatmul.bf16.vlgmr.msra.gmra.mxu0 %v12136_v51  ;;  %v5136_v28 = vadd.f32 %v5135_v26, %v16625_v13  ;;  %v10474_v23 = vld [vmem:[%s16619_s1 + $0xb14] sm:$0xf0] }
  0xa4   :  { %5406 = vmatpush.bf16.msrb.mxu0 %v8206_v29  ;;  %5372 = vmatmul.bf16.vlgmr.msra.gmra.mxu1 %v12149_v56  ;;  %v8246_v29 = vor.u32 %v10464_v21, %v8245_v19  ;;  %v8221_v19 = vld [vmem:[%s16619_s1 + $0xa90] sm:$0xf]  ;;  %v8358_v21 = vor.u32 %v10492_v9, %v8357_v8  ;;  %v10490_v26 = vld [vmem:[%s16619_s1 + $0xb94] sm:$0xf0]  ;;  %v10105_v9 = vld [vmem:[%s16620_s0 + $0x11c] sm:$0xf0] }
  0xa5   :  { %5420 = vmatpush.bf16.msrb.mxu1 %v8270_v37  ;;  %5386 = vmatmul.bf16.vlgmr.msra.gmra.mxu2 %v12147_v55  ;;  %v8237_v37 = vld [vmem:[%s16619_s1 + $0xab0] sm:$0xf]  ;;  %v5150_v57 = vadd.f32 %v5149_v53, %v5136_v28  ;;  %v10440_v28 = vld [vmem:[%s16619_s1 + $0xa04] sm:$0xf0]  ;;  %v6757_v8 = vld [vmem:[%s16620_s0 + $0x58] sm:$0xf] }
  0xa6   :  { %5434 = vmatpush.bf16.msrb.mxu2 %v8334_v42  ;;  %5400 = vmatmul.bf16.vlgmr.msra.gmra.mxu3 %v12157_v60  ;;  %v8374_v42 = vor.u32 %v10496_v25, %v8373_v24  ;;  %v8238_v59 = vor.u32 %v10462_v45, %v8237_v37  ;;  %v8349_v24 = vld [vmem:[%s16619_s1 + $0xb90] sm:$0xf]  ;;  %v8277_v37 = vld [vmem:[%s16619_s1 + $0xb00] sm:$0xf] }
  0xa7   :  { %5448 = vmatpush.bf16.msrb.mxu3 %v8398_v50  ;;  %v8365_v50 = vld [vmem:[%s16619_s1 + $0xbb0] sm:$0xf]  ;;  %v8350_v53 = vor.u32 %v10490_v26, %v8349_v24  ;;  %v8517_v24 = vld [vmem:[%s16619_s1 + $0xce0] sm:$0xf] }
  0xa8   :  { %5407 = vmatpush.bf16.msrb.mxu0 %v8198_v61  ;;  %v8302_v61 = vor.u32 %v10478_v49, %v8301_v48  ;;  %v8366_v2 = vor.u32 %v10494_v52, %v8365_v50  ;;  %v5163_v7 = vpop.f32.mrf.mxu2  ;;  %v8286_v48 = vor.u32 %v10474_v23, %v8285_v22  ;;  %v8341_v49 = vld [vmem:[%s16619_s1 + $0xb80] sm:$0xf]  ;;  %v10488_v50 = vld [vmem:[%s16619_s1 + $0xb84] sm:$0xf0]  ;;  %v8461_v52 = vld [vmem:[%s16619_s1 + $0xc70] sm:$0xf] }
  0xa9   :  { %5421 = vmatpush.bf16.msrb.mxu1 %v8262_v63  ;;  %v10444_v63 = vld [vmem:[%s16619_s1 + $0xa24] sm:$0xf0]  ;;  %v5164_v11 = vadd.f32 %v5163_v7, %v5150_v57  ;;  %v5177_v25 = vpop.f32.mrf.mxu3  ;;  %v8525_v57 = vld [vmem:[%s16619_s1 + $0xcf0] sm:$0xf]  ;;  %v8453_v22 = vld [vmem:[%s16619_s1 + $0xc60] sm:$0xf] }
  0xaa   :  { %5435 = vmatpush.bf16.msrb.mxu2 %v8326_v0  ;;  %v8229_v0 = vld [vmem:[%s16619_s1 + $0xaa0] sm:$0xf]  ;;  %v10516_v23 = vld [vmem:[%s16619_s1 + $0xc64] sm:$0xf0] }
  0xab   :  { %5449 = vmatpush.bf16.msrb.mxu3 %v8390_v5  ;;  %v8293_v5 = vld [vmem:[%s16619_s1 + $0xb20] sm:$0xf] }
  0xac   :  { %5408 = vmatpush.bf16.msrb.mxu0 %v8190_v12  ;;  %v8166_v12 = vor.u32 %v10444_v63, %v8165_v62  ;;  %v8294_v16 = vor.u32 %v10476_v6, %v8293_v5  ;;  %v10550_v62 = vld [vmem:[%s16619_s1 + $0xd74] sm:$0xf0]  ;;  %v8653_v63 = vld [vmem:[%s16619_s1 + $0xdf0] sm:$0xf]  ;;  %v8214_v6 = vor.u32 %v10456_v34, %v8213_v33  ;;  %v12387_v33 = vor.u32 %v10105_v9, %v6757_v8  ;;  %v8437_v8 = vld [vmem:[%s16619_s1 + $0xc40] sm:$0xf] }
  0xad   :  { %5422 = vmatpush.bf16.msrb.mxu1 %v8254_v14  ;;  %v8157_v14 = vld [vmem:[%s16619_s1 + $0xa10] sm:$0xf]  ;;  %v10104_v5 = vld [vmem:[%s16620_s0 + $0x114] sm:$0xf0]  ;;  %v10512_v9 = vld [vmem:[%s16619_s1 + $0xc44] sm:$0xf0] }
  0xae   :  { %5436 = vmatpush.bf16.msrb.mxu2 %v8318_v15  ;;  %v8230_v15 = vor.u32 %v10460_v3, %v8229_v0  ;;  %v6749_v3 = vld [vmem:[%s16620_s0 + $0x50] sm:$0xf] }
  0xaf   :  { %5450 = vmatpush.bf16.msrb.mxu3 %v8382_v20  ;;  %v10458_v20 = vld [vmem:[%s16619_s1 + $0xa94] sm:$0xf0]  ;;  %v12376_v26 = vor.u32 %v10104_v5, %v6749_v3 }
  0xb0   :  { %5409 = vmatpush.bf16.msrb.mxu0 %v8182_v27  ;;  %v8149_v27 = vld [vmem:[%s16619_s1 + $0xa00] sm:$0xf]  ;;  %v8222_v45 = vor.u32 %v10458_v20, %v8221_v19  ;;  %v12429_v5 = vpop.f32.mrf.mxu2 }
  0xb1   :  { %5423 = vmatpush.bf16.msrb.mxu1 %v8246_v29  ;;  %v12297_v29 = vadd.f32 %v5177_v25, %v5164_v11  ;;  %v8150_v0 = vor.u32 %v10440_v28, %v8149_v27  ;;  %v10079_v11 = vld [vmem:[%s16620_s0 + $0x54] sm:$0xf]  ;;  %v10532_v27 = vld [vmem:[%s16619_s1 + $0xce4] sm:$0xf0]  ;;  %v8581_v28 = vld [vmem:[%s16619_s1 + $0xd60] sm:$0xf] }
  0xb2   :  { %5437 = vmatpush.bf16.msrb.mxu2 %v8310_v30  ;;  %v8158_v30 = vor.u32 %v10442_v18, %v8157_v14  ;;  %v6759_v18 = vld [vmem:[%s16620_s0 + $0x120] sm:$0xf0] }
  0xb3   :  { %5451 = vmatpush.bf16.msrb.mxu3 %v8374_v42  ;;  %v10472_v42 = vld [vmem:[%s16619_s1 + $0xb04] sm:$0xf0] }
  0xb4   :  { %5410 = vmatpush.bf16.msrb.mxu0 %v8174_v54  ;;  %v10518_v54 = vld [vmem:[%s16619_s1 + $0xc74] sm:$0xf0]  ;;  %v8278_v7 = vor.u32 %v10472_v42, %v8277_v37  ;;  %v8645_v37 = vld [vmem:[%s16619_s1 + $0xde0] sm:$0xf]  ;;  %v10564_v42 = vld [vmem:[%s16619_s1 + $0xde4] sm:$0xf0] }
  0xb5   :  { %5424 = vmatpush.bf16.msrb.mxu1 %v8238_v59  ;;  %v10534_v59 = vld [vmem:[%s16619_s1 + $0xcf4] sm:$0xf0]  ;;  %v8462_v14 = vor.u32 %v10518_v54, %v8461_v52 }
  0xb6   :  { %5438 = vmatpush.bf16.msrb.mxu2 %v8302_v61  ;;  %v8589_v61 = vld [vmem:[%s16619_s1 + $0xd70] sm:$0xf]  ;;  %v8526_v19 = vor.u32 %v10534_v59, %v8525_v57  ;;  %v10514_v54 = vld [vmem:[%s16619_s1 + $0xc54] sm:$0xf0]  ;;  %v8646_v59 = vor.u32 %v10564_v42, %v8645_v37 }
  0xb7   :  { %5452 = vmatpush.bf16.msrb.mxu3 %v8366_v2  ;;  %v10566_v2 = vld [vmem:[%s16619_s1 + $0xdf4] sm:$0xf0]  ;;  %v8590_v20 = vor.u32 %v10550_v62, %v8589_v61  ;;  %v8509_v57 = vld [vmem:[%s16619_s1 + $0xcd0] sm:$0xf] }
  0xb8   :  { %5411 = vmatpush.bf16.msrb.mxu0 %v8166_v12  ;;  %v8342_v12 = vor.u32 %v10488_v50, %v8341_v49  ;;  %v8654_v25 = vor.u32 %v10566_v2, %v8653_v63  ;;  %v8454_v49 = vor.u32 %v10516_v23, %v8453_v22  ;;  %v8518_v50 = vor.u32 %v10532_v27, %v8517_v24  ;;  %v10530_v61 = vld [vmem:[%s16619_s1 + $0xcd4] sm:$0xf0]  ;;  %v8573_v62 = vld [vmem:[%s16619_s1 + $0xd50] sm:$0xf]  ;;  %v10560_v22 = vld [vmem:[%s16619_s1 + $0xdc4] sm:$0xf0] }
  0xb9   :  { %5425 = vmatpush.bf16.msrb.mxu1 %v8230_v15  ;;  %v6751_v15 = vld [vmem:[%s16620_s0 + $0x118] sm:$0xf0]  ;;  %v10546_v63 = vld [vmem:[%s16619_s1 + $0xd54] sm:$0xf0]  ;;  %v8438_v24 = vor.u32 %v10512_v9, %v8437_v8  ;;  %v8493_v42 = vld [vmem:[%s16619_s1 + $0xcb0] sm:$0xf] }
  0xba   :  { %5439 = vmatpush.bf16.msrb.mxu2 %v8294_v16  ;;  %v10080_v16 = vld [vmem:[%s16620_s0 + $0x5c] sm:$0xf]  ;;  %v12389_v34 = vor.u32 %v10079_v11, %v6751_v15  ;;  %v10562_v2 = vld [vmem:[%s16619_s1 + $0xdd4] sm:$0xf0]  ;;  %v8501_v11 = vld [vmem:[%s16619_s1 + $0xcc0] sm:$0xf] }
  0xbb   :  { %5453 = vmatpush.bf16.msrb.mxu3 %v8358_v21  ;;  %v12365_v21 = vpop.f32.mrf.mxu0  ;;  %v10528_v15 = vld [vmem:[%s16619_s1 + $0xcc4] sm:$0xf0]  ;;  %v10510_v37 = vld [vmem:[%s16619_s1 + $0xc34] sm:$0xf0]  ;;  %v8549_v8 = vld [vmem:[%s16619_s1 + $0xd20] sm:$0xf] }
  0xbc   :  { %5412 = vmatpush.bf16.msrb.mxu0 %v8158_v30  ;;  %v10548_v30 = vld [vmem:[%s16619_s1 + $0xd64] sm:$0xf0] }
  0xbd   :  { %5426 = vmatpush.bf16.msrb.mxu1 %v8222_v45  ;;  %v12397_v45 = vpop.f32.mrf.mxu1  ;;  %v8582_v52 = vor.u32 %v10548_v30, %v8581_v28  ;;  %v8429_v30 = vld [vmem:[%s16619_s1 + $0xc30] sm:$0xf]  ;;  %v10540_v9 = vld [vmem:[%s16619_s1 + $0xd24] sm:$0xf0] }
  0xbe   :  { %5440 = vmatpush.bf16.msrb.mxu2 %v8286_v48  ;;  %v12399_v48 = vor.u32 %v10080_v16, %v6759_v18  ;;  %v8565_v16 = vld [vmem:[%s16619_s1 + $0xd40] sm:$0xf]  ;;  %v10544_v18 = vld [vmem:[%s16619_s1 + $0xd44] sm:$0xf0] }
  0xbf   :  { %5454 = vmatpush.bf16.msrb.mxu3 %v8350_v53  ;;  %v8445_v53 = vld [vmem:[%s16619_s1 + $0xc50] sm:$0xf]  ;;  %v8566_v27 = vor.u32 %v10544_v18, %v8565_v16 }
  0xc0   :  { %5413 = vmatpush.bf16.msrb.mxu0 %v8150_v0  ;;  %v8637_v0 = vld [vmem:[%s16619_s1 + $0xdd0] sm:$0xf]  ;;  %v8446_v3 = vor.u32 %v10514_v54, %v8445_v53  ;;  %v10542_v53 = vld [vmem:[%s16619_s1 + $0xd34] sm:$0xf0] }
  0xc1   :  { %5427 = vmatpush.bf16.msrb.mxu1 %v8214_v6  ;;  %v8510_v6 = vor.u32 %v10530_v61, %v8509_v57  ;;  %v8621_v54 = vld [vmem:[%s16619_s1 + $0xdb0] sm:$0xf]  ;;  %v10558_v57 = vld [vmem:[%s16619_s1 + $0xdb4] sm:$0xf0] }
  0xc2   :  { %5441 = vmatpush.bf16.msrb.mxu2 %v8278_v7  ;;  %v8574_v7 = vor.u32 %v10546_v63, %v8573_v62  ;;  %v8421_v63 = vld [vmem:[%s16619_s1 + $0xc20] sm:$0xf] }
  0xc3   :  { %5455 = vmatpush.bf16.msrb.mxu3 %v8342_v12  ;;  %5414 = vmatmul.bf16.vlgmr.msrb.gmra.mxu0 %v12376_v26  ;;  %v8638_v12 = vor.u32 %v10562_v2, %v8637_v0  ;;  %v10508_v0 = vld [vmem:[%s16619_s1 + $0xc24] sm:$0xf0]  ;;  %v8485_v2 = vld [vmem:[%s16619_s1 + $0xca0] sm:$0xf] }
  0xc4   :  { %5462 = vmatpush.bf16.msra.mxu0 %v8462_v14  ;;  %5428 = vmatmul.bf16.vlgmr.msrb.gmra.mxu1 %v12389_v34  ;;  %v12440_v14 = vpop.f32.mrf.mxu3  ;;  %v8422_v18 = vor.u32 %v10508_v0, %v8421_v63  ;;  %v8597_v63 = vld [vmem:[%s16619_s1 + $0xd80] sm:$0xf]  ;;  %v10552_v0 = vld [vmem:[%s16619_s1 + $0xd84] sm:$0xf0] }
  0xc5   :  { %5476 = vmatpush.bf16.msra.mxu1 %v8526_v19  ;;  %5442 = vmatmul.bf16.vlgmr.msrb.gmra.mxu2 %v12387_v33  ;;  %16645 = vst [vmem:[#allocation2_spill] sm:$0xff] %v12440_v14  ;;  %v5191_v19 = vpop.f32.mrf.mxu0  ;;  %v5205_v28 = vpop.f32.mrf.mxu1 }
  0xc6   :  { %5490 = vmatpush.bf16.msra.mxu2 %v8590_v20  ;;  %5456 = vmatmul.bf16.vlgmr.msrb.gmra.mxu3 %v12399_v48  ;;  %v8629_v20 = vld [vmem:[%s16619_s1 + $0xdc0] sm:$0xf]  ;;  %v5192_v23 = vadd.f32 %v5191_v19, %v12297_v29  ;;  %v8413_v19 = vld [vmem:[%s16619_s1 + $0xc10] sm:$0xf] }
  0xc7   :  { %5504 = vmatpush.bf16.msra.mxu3 %v8654_v25  ;;  %v8502_v25 = vor.u32 %v10528_v15, %v8501_v11  ;;  %v8630_v29 = vor.u32 %v10560_v22, %v8629_v20  ;;  %v10556_v15 = vld [vmem:[%s16619_s1 + $0xda4] sm:$0xf0] }
  0xc8   :  { %5463 = vmatpush.bf16.msra.mxu0 %v8454_v49  ;;  %v5206_v49 = vadd.f32 %v5205_v28, %v5192_v23  ;;  %v8550_v23 = vor.u32 %v10540_v9, %v8549_v8  ;;  %v10598_v8 = vld [vmem:[%s16619_s1 + $0xef4] sm:$0xf0]  ;;  %v8845_v9 = vld [vmem:[%s16619_s1 + $0xf70] sm:$0xf] }
  0xc9   :  { %5477 = vmatpush.bf16.msra.mxu1 %v8518_v50  ;;  %v10526_v50 = vld [vmem:[%s16619_s1 + $0xcb4] sm:$0xf0] }
  0xca   :  { %5491 = vmatpush.bf16.msra.mxu2 %v8582_v52  ;;  %v8557_v52 = vld [vmem:[%s16619_s1 + $0xd30] sm:$0xf]  ;;  %v8494_v61 = vor.u32 %v10526_v50, %v8493_v42  ;;  %v10504_v50 = vld [vmem:[%s16619_s1 + $0xc04] sm:$0xf0] }
  0xcb   :  { %5505 = vmatpush.bf16.msra.mxu3 %v8646_v59  ;;  %v8430_v59 = vor.u32 %v10510_v37, %v8429_v30  ;;  %v8558_v62 = vor.u32 %v10542_v53, %v8557_v52  ;;  %v8541_v30 = vld [vmem:[%s16619_s1 + $0xd10] sm:$0xf]  ;;  %v10538_v37 = vld [vmem:[%s16619_s1 + $0xd14] sm:$0xf0]  ;;  %v8469_v53 = vld [vmem:[%s16619_s1 + $0xc80] sm:$0xf] }
  0xcc   :  { %5464 = vmatpush.bf16.msra.mxu0 %v8446_v3  ;;  %v8622_v3 = vor.u32 %v10558_v57, %v8621_v54  ;;  %v5233_v16 = vpop.f32.mrf.mxu3  ;;  %v8605_v42 = vld [vmem:[%s16619_s1 + $0xd90] sm:$0xf]  ;;  %v10520_v54 = vld [vmem:[%s16619_s1 + $0xc84] sm:$0xf0]  ;;  %v8533_v57 = vld [vmem:[%s16619_s1 + $0xd00] sm:$0xf] }
  0xcd   :  { %5478 = vmatpush.bf16.msra.mxu1 %v8510_v6  ;;  %v5219_v6 = vpop.f32.mrf.mxu2 }
  0xce   :  { %5492 = vmatpush.bf16.msra.mxu2 %v8574_v7  ;;  %v10524_v7 = vld [vmem:[%s16619_s1 + $0xca4] sm:$0xf0]  ;;  %v5220_v11 = vadd.f32 %v5219_v6, %v5206_v49  ;;  %v8405_v49 = vld [vmem:[%s16619_s1 + $0xc00] sm:$0xf]  ;;  %v10582_v6 = vld [vmem:[%s16619_s1 + $0xe74] sm:$0xf0] }
  0xcf   :  { %5506 = vmatpush.bf16.msra.mxu3 %v8638_v12  ;;  %v8613_v12 = vld [vmem:[%s16619_s1 + $0xda0] sm:$0xf]  ;;  %v8486_v22 = vor.u32 %v10524_v7, %v8485_v2  ;;  %v8717_v2 = vld [vmem:[%s16619_s1 + $0xe70] sm:$0xf] }
  0xd0   :  { %5465 = vmatpush.bf16.msra.mxu0 %v8438_v24  ;;  %v12509_v20 = vadd.f32 %v5233_v16, %v5220_v11  ;;  %v10506_v24 = vld [vmem:[%s16619_s1 + $0xc14] sm:$0xf0]  ;;  %v8614_v28 = vor.u32 %v10556_v15, %v8613_v12  ;;  %v8781_v7 = vld [vmem:[%s16619_s1 + $0xef0] sm:$0xf]  ;;  %v8406_v15 = vor.u32 %v10504_v50, %v8405_v49 }
  0xd1   :  { %5479 = vmatpush.bf16.msra.mxu1 %v8502_v25  ;;  %v8477_v25 = vld [vmem:[%s16619_s1 + $0xc90] sm:$0xf]  ;;  %v8414_v52 = vor.u32 %v10506_v24, %v8413_v19  ;;  %v10614_v11 = vld [vmem:[%s16619_s1 + $0xf74] sm:$0xf0]  ;;  %v10106_v19 = vld [vmem:[%s16620_s0 + $0x124] sm:$0xf0]  ;;  %v8782_v49 = vor.u32 %v10598_v8, %v8781_v7  ;;  %v12636_v8 = vpop.f32.mrf.mxu1 }
  0xd2   :  { %5493 = vmatpush.bf16.msra.mxu2 %v8566_v27  ;;  %v10522_v27 = vld [vmem:[%s16619_s1 + $0xc94] sm:$0xf0]  ;;  %v8909_v12 = vld [vmem:[%s16619_s1 + $0xff0] sm:$0xf]  ;;  %v6773_v24 = vld [vmem:[%s16620_s0 + $0x68] sm:$0xf]  ;;  %v8846_v50 = vor.u32 %v10614_v11, %v8845_v9 }
  0xd3   :  { %5507 = vmatpush.bf16.msra.mxu3 %v8630_v29  ;;  %v10554_v29 = vld [vmem:[%s16619_s1 + $0xd94] sm:$0xf0]  ;;  %v10628_v7 = vld [vmem:[%s16619_s1 + $0xfe4] sm:$0xf0]  ;;  %16647 = vst [vmem:[#allocation4_spill] sm:$0xff] %v12636_v8 }
  0xd4   :  { %5466 = vmatpush.bf16.msra.mxu0 %v8430_v59  ;;  %v10536_v59 = vld [vmem:[%s16619_s1 + $0xd04] sm:$0xf0]  ;;  %v10630_v16 = vld [vmem:[%s16619_s1 + $0xff4] sm:$0xf0] }
  0xd5   :  { %5480 = vmatpush.bf16.msra.mxu1 %v8494_v61  ;;  %v8478_v61 = vor.u32 %v10522_v27, %v8477_v25  ;;  %v10107_v25 = vld [vmem:[%s16620_s0 + $0x12c] sm:$0xf0]  ;;  %v10081_v27 = vld [vmem:[%s16620_s0 + $0x64] sm:$0xf] }
  0xd6   :  { %5494 = vmatpush.bf16.msra.mxu2 %v8558_v62  ;;  %v8542_v62 = vor.u32 %v10538_v37, %v8541_v30  ;;  %v8718_v30 = vor.u32 %v10582_v6, %v8717_v2  ;;  %v6767_v37 = vld [vmem:[%s16620_s0 + $0x128] sm:$0xf0]  ;;  %v12626_v2 = vor.u32 %v10107_v25, %v6773_v24  ;;  %v8901_v6 = vld [vmem:[%s16619_s1 + $0xfe0] sm:$0xf]  ;;  %v8829_v24 = vld [vmem:[%s16619_s1 + $0xf50] sm:$0xf] }
  0xd7   :  { %5508 = vmatpush.bf16.msra.mxu3 %v8622_v3  ;;  %v8606_v3 = vor.u32 %v10554_v29, %v8605_v42  ;;  %v10082_v42 = vld [vmem:[%s16620_s0 + $0x6c] sm:$0xf]  ;;  %v6775_v29 = vld [vmem:[%s16620_s0 + $0x130] sm:$0xf0]  ;;  %v10610_v25 = vld [vmem:[%s16619_s1 + $0xf54] sm:$0xf0] }
  0xd8   :  { %5467 = vmatpush.bf16.msra.mxu0 %v8422_v18  ;;  %v6765_v18 = vld [vmem:[%s16620_s0 + $0x60] sm:$0xf]  ;;  %v12638_v9 = vor.u32 %v10082_v42, %v6775_v29  ;;  %v8830_v42 = vor.u32 %v10610_v25, %v8829_v24  ;;  %v10590_v25 = vld [vmem:[%s16619_s1 + $0xeb4] sm:$0xf0] }
  0xd9   :  { %5481 = vmatpush.bf16.msra.mxu1 %v8486_v22  ;;  %v8470_v22 = vor.u32 %v10520_v54, %v8469_v53  ;;  %v10580_v53 = vld [vmem:[%s16619_s1 + $0xe64] sm:$0xf0]  ;;  %v8773_v54 = vld [vmem:[%s16619_s1 + $0xee0] sm:$0xf] }
  0xda   :  { %5495 = vmatpush.bf16.msra.mxu2 %v8550_v23  ;;  %v8534_v23 = vor.u32 %v10536_v59, %v8533_v57  ;;  %v8910_v57 = vor.u32 %v10630_v16, %v8909_v12  ;;  %v12613_v59 = vor.u32 %v10106_v19, %v6765_v18  ;;  %v8701_v16 = vld [vmem:[%s16619_s1 + $0xe50] sm:$0xf]  ;;  %v10578_v18 = vld [vmem:[%s16619_s1 + $0xe54] sm:$0xf0]  ;;  %v8693_v29 = vld [vmem:[%s16619_s1 + $0xe40] sm:$0xf] }
  0xdb   :  { %5509 = vmatpush.bf16.msra.mxu3 %v8614_v28  ;;  %v8598_v28 = vor.u32 %v10552_v0, %v8597_v63  ;;  %v10612_v63 = vld [vmem:[%s16619_s1 + $0xf64] sm:$0xf0]  ;;  %v12624_v0 = vpop.f32.mrf.mxu0  ;;  %v8765_v19 = vld [vmem:[%s16619_s1 + $0xed0] sm:$0xf] }
  0xdc   :  { %5468 = vmatpush.bf16.msra.mxu0 %v8414_v52  ;;  %v8709_v52 = vld [vmem:[%s16619_s1 + $0xe60] sm:$0xf]  ;;  %16646 = vst [vmem:[#allocation3_spill] sm:$0xff] %v12624_v0 }
  0xdd   :  { %5482 = vmatpush.bf16.msra.mxu1 %v8478_v61  ;;  %v10596_v61 = vld [vmem:[%s16619_s1 + $0xee4] sm:$0xf0]  ;;  %v8710_v11 = vor.u32 %v10580_v53, %v8709_v52  ;;  %v12677_v52 = vpop.f32.mrf.mxu2 }
  0xde   :  { %5496 = vmatpush.bf16.msra.mxu2 %v8542_v62  ;;  %v8837_v62 = vld [vmem:[%s16619_s1 + $0xf60] sm:$0xf]  ;;  %v8774_v12 = vor.u32 %v10596_v61, %v8773_v54  ;;  %16648 = vst [vmem:[#allocation5_spill] sm:$0xff] %v12677_v52  ;;  %v10592_v54 = vld [vmem:[%s16619_s1 + $0xec4] sm:$0xf0] }
  0xdf   :  { %5510 = vmatpush.bf16.msra.mxu3 %v8606_v3  ;;  %v12628_v3 = vor.u32 %v10081_v27, %v6767_v37  ;;  %v8893_v27 = vld [vmem:[%s16619_s1 + $0xfd0] sm:$0xf]  ;;  %v10608_v61 = vld [vmem:[%s16619_s1 + $0xf44] sm:$0xf0] }
  0xe0   :  { %5469 = vmatpush.bf16.msra.mxu0 %v8406_v15  ;;  %v8838_v15 = vor.u32 %v10612_v63, %v8837_v62  ;;  %v12688_v62 = vpop.f32.mrf.mxu3 }
  0xe1   :  { %5483 = vmatpush.bf16.msra.mxu1 %v8470_v22  ;;  %v8902_v22 = vor.u32 %v10628_v7, %v8901_v6  ;;  %16649 = vst [vmem:[#allocation6_spill] sm:$0xff] %v12688_v62  ;;  %v8885_v6 = vld [vmem:[%s16619_s1 + $0xfc0] sm:$0xf]  ;;  %v10624_v7 = vld [vmem:[%s16619_s1 + $0xfc4] sm:$0xf0] }
  0xe2   :  { %5497 = vmatpush.bf16.msra.mxu2 %v8534_v23  ;;  %v10594_v23 = vld [vmem:[%s16619_s1 + $0xed4] sm:$0xf0] }
  0xe3   :  { %5511 = vmatpush.bf16.msra.mxu3 %v8598_v28  ;;  %5470 = vmatmul.bf16.vlgmr.msra.gmra.mxu0 %v12613_v59  ;;  %v10626_v28 = vld [vmem:[%s16619_s1 + $0xfd4] sm:$0xf0]  ;;  %v8766_v37 = vor.u32 %v10594_v23, %v8765_v19  ;;  %v5247_v63 = vpop.f32.mrf.mxu0  ;;  %v8685_v19 = vld [vmem:[%s16619_s1 + $0xe30] sm:$0xf] }
  0xe4   :  { %5518 = vmatpush.bf16.msrb.mxu0 %v8718_v30  ;;  %5484 = vmatmul.bf16.vlgmr.msra.gmra.mxu1 %v12628_v3  ;;  %v8702_v30 = vor.u32 %v10578_v18, %v8701_v16  ;;  %v8894_v53 = vor.u32 %v10626_v28, %v8893_v27  ;;  %v8749_v23 = vld [vmem:[%s16619_s1 + $0xeb0] sm:$0xf]  ;;  %v10606_v28 = vld [vmem:[%s16619_s1 + $0xf34] sm:$0xf0] }
  0xe5   :  { %5532 = vmatpush.bf16.msrb.mxu1 %v8782_v49  ;;  %5498 = vmatmul.bf16.vlgmr.msra.gmra.mxu2 %v12626_v2  ;;  %v10576_v49 = vld [vmem:[%s16619_s1 + $0xe44] sm:$0xf0]  ;;  %v8813_v27 = vld [vmem:[%s16619_s1 + $0xf30] sm:$0xf] }
  0xe6   :  { %5546 = vmatpush.bf16.msrb.mxu2 %v8846_v50  ;;  %5512 = vmatmul.bf16.vlgmr.msra.gmra.mxu3 %v12638_v9  ;;  %v8757_v50 = vld [vmem:[%s16619_s1 + $0xec0] sm:$0xf] }
  0xe7   :  { %5560 = vmatpush.bf16.msrb.mxu3 %v8910_v57  ;;  %v8821_v57 = vld [vmem:[%s16619_s1 + $0xf40] sm:$0xf]  ;;  %v8758_v16 = vor.u32 %v10592_v54, %v8757_v50 }
  0xe8   :  { %5519 = vmatpush.bf16.msrb.mxu0 %v8710_v11  ;;  %v5248_v11 = vadd.f32 %v5247_v63, %v12509_v20  ;;  %v8822_v18 = vor.u32 %v10608_v61, %v8821_v57  ;;  %v8886_v20 = vor.u32 %v10624_v7, %v8885_v6  ;;  %v8677_v50 = vld [vmem:[%s16619_s1 + $0xe20] sm:$0xf]  ;;  %v5275_v61 = vpop.f32.mrf.mxu2  ;;  %v10588_v63 = vld [vmem:[%s16619_s1 + $0xea4] sm:$0xf0] }
  0xe9   :  { %5533 = vmatpush.bf16.msrb.mxu1 %v8774_v12  ;;  %v8694_v12 = vor.u32 %v10576_v49, %v8693_v29  ;;  %v8750_v29 = vor.u32 %v10590_v25, %v8749_v23  ;;  %v8814_v49 = vor.u32 %v10606_v28, %v8813_v27  ;;  %v8741_v54 = vld [vmem:[%s16619_s1 + $0xea0] sm:$0xf]  ;;  %v10604_v7 = vld [vmem:[%s16619_s1 + $0xf24] sm:$0xf0]  ;;  %v8733_v25 = vld [vmem:[%s16619_s1 + $0xe90] sm:$0xf] }
  0xea   :  { %5547 = vmatpush.bf16.msrb.mxu2 %v8838_v15  ;;  %v5261_v15 = vpop.f32.mrf.mxu1  ;;  %v8805_v6 = vld [vmem:[%s16619_s1 + $0xf20] sm:$0xf]  ;;  %v8742_v23 = vor.u32 %v10588_v63, %v8741_v54  ;;  %v10586_v27 = vld [vmem:[%s16619_s1 + $0xe94] sm:$0xf0]  ;;  %v10600_v63 = vld [vmem:[%s16619_s1 + $0xf04] sm:$0xf0] }
  0xeb   :  { %5561 = vmatpush.bf16.msrb.mxu3 %v8902_v22  ;;  %v10574_v22 = vld [vmem:[%s16619_s1 + $0xe34] sm:$0xf0]  ;;  %v5262_v24 = vadd.f32 %v5261_v15, %v5248_v11  ;;  %v8869_v15 = vld [vmem:[%s16619_s1 + $0xfa0] sm:$0xf] }
  0xec   :  { %5520 = vmatpush.bf16.msrb.mxu0 %v8702_v30  ;;  %v8877_v30 = vld [vmem:[%s16619_s1 + $0xfb0] sm:$0xf]  ;;  %v8725_v54 = vld [vmem:[%s16619_s1 + $0xe80] sm:$0xf] }
  0xed   :  { %5534 = vmatpush.bf16.msrb.mxu1 %v8766_v37  ;;  %v10622_v37 = vld [vmem:[%s16619_s1 + $0xfb4] sm:$0xf0]  ;;  %v5276_v11 = vadd.f32 %v5275_v61, %v5262_v24  ;;  %v8789_v61 = vld [vmem:[%s16619_s1 + $0xf00] sm:$0xf] }
  0xee   :  { %5548 = vmatpush.bf16.msrb.mxu2 %v8830_v42  ;;  %v8686_v42 = vor.u32 %v10574_v22, %v8685_v19  ;;  %v8878_v57 = vor.u32 %v10622_v37, %v8877_v30  ;;  %v8669_v19 = vld [vmem:[%s16619_s1 + $0xe10] sm:$0xf]  ;;  %v10570_v24 = vld [vmem:[%s16619_s1 + $0xe14] sm:$0xf0] }
  0xef   :  { %5562 = vmatpush.bf16.msrb.mxu3 %v8894_v53  ;;  %v10572_v53 = vld [vmem:[%s16619_s1 + $0xe24] sm:$0xf0]  ;;  %v8797_v30 = vld [vmem:[%s16619_s1 + $0xf10] sm:$0xf]  ;;  %v10602_v37 = vld [vmem:[%s16619_s1 + $0xf14] sm:$0xf0] }
  0xf0   :  { %5521 = vmatpush.bf16.msrb.mxu0 %v8694_v12  ;;  %v5289_v12 = vpop.f32.mrf.mxu3 }
  0xf1   :  { %5535 = vmatpush.bf16.msrb.mxu1 %v8758_v16  ;;  %v10620_v16 = vld [vmem:[%s16619_s1 + $0xfa4] sm:$0xf0]  ;;  %v12748_v22 = vadd.f32 %v5289_v12, %v5276_v11  ;;  %v8853_v11 = vld [vmem:[%s16619_s1 + $0xf80] sm:$0xf] }
  0xf2   :  { %5549 = vmatpush.bf16.msrb.mxu2 %v8822_v18  ;;  %v8678_v18 = vor.u32 %v10572_v53, %v8677_v50  ;;  %v8870_v28 = vor.u32 %v10620_v16, %v8869_v15  ;;  %v10568_v50 = vld [vmem:[%s16619_s1 + $0xe04] sm:$0xf0]  ;;  %v8670_v53 = vor.u32 %v10570_v24, %v8669_v19  ;;  %v8973_v15 = vld [vmem:[%s16619_s1 + $0x1070] sm:$0xf]  ;;  %v10678_v24 = vld [vmem:[%s16619_s1 + $0x1174] sm:$0xf0] }
  0xf3   :  { %5563 = vmatpush.bf16.msrb.mxu3 %v8886_v20  ;;  %v8806_v20 = vor.u32 %v10604_v7, %v8805_v6  ;;  %v8734_v6 = vor.u32 %v10586_v27, %v8733_v25  ;;  %v8798_v7 = vor.u32 %v10602_v37, %v8797_v30  ;;  %v10616_v12 = vld [vmem:[%s16619_s1 + $0xf84] sm:$0xf0]  ;;  %v9037_v19 = vld [vmem:[%s16619_s1 + $0x10f0] sm:$0xf]  ;;  %v10108_v37 = vld [vmem:[%s16620_s0 + $0x134] sm:$0xf0] }
  0xf4   :  { %5522 = vmatpush.bf16.msrb.mxu0 %v8686_v42  ;;  %v8861_v42 = vld [vmem:[%s16619_s1 + $0xf90] sm:$0xf]  ;;  %v8854_v13 = vor.u32 %v10616_v12, %v8853_v11  ;;  %v10644_v11 = vld [vmem:[%s16619_s1 + $0x1064] sm:$0xf0]  ;;  %v9029_v12 = vld [vmem:[%s16619_s1 + $0x10e0] sm:$0xf] }
  0xf5   :  { %5536 = vmatpush.bf16.msrb.mxu1 %v8750_v29  ;;  %v10618_v29 = vld [vmem:[%s16619_s1 + $0xf94] sm:$0xf0]  ;;  %v9165_v25 = vld [vmem:[%s16619_s1 + $0x11f0] sm:$0xf] }
  0xf6   :  { %5550 = vmatpush.bf16.msrb.mxu2 %v8814_v49  ;;  %v8661_v49 = vld [vmem:[%s16619_s1 + $0xe00] sm:$0xf]  ;;  %v8862_v16 = vor.u32 %v10618_v29, %v8861_v42  ;;  %v6781_v30 = vld [vmem:[%s16620_s0 + $0x70] sm:$0xf]  ;;  %v8790_v29 = vor.u32 %v10600_v63, %v8789_v61  ;;  %v6791_v61 = vld [vmem:[%s16620_s0 + $0x140] sm:$0xf0] }
  0xf7   :  { %5564 = vmatpush.bf16.msrb.mxu3 %v8878_v57  ;;  %v10584_v57 = vld [vmem:[%s16619_s1 + $0xe84] sm:$0xf0]  ;;  %v8662_v27 = vor.u32 %v10568_v50, %v8661_v49  ;;  %v6789_v49 = vld [vmem:[%s16620_s0 + $0x78] sm:$0xf]  ;;  %v10109_v50 = vld [vmem:[%s16620_s0 + $0x13c] sm:$0xf0] }
  0xf8   :  { %5523 = vmatpush.bf16.msrb.mxu0 %v8678_v18  ;;  %v10646_v18 = vld [vmem:[%s16619_s1 + $0x1074] sm:$0xf0]  ;;  %v8726_v42 = vor.u32 %v10584_v57, %v8725_v54  ;;  %v6783_v54 = vld [vmem:[%s16620_s0 + $0x138] sm:$0xf0] }
  0xf9   :  { %5537 = vmatpush.bf16.msrb.mxu1 %v8742_v23  ;;  %v10662_v23 = vld [vmem:[%s16619_s1 + $0x10f4] sm:$0xf0]  ;;  %v8974_v62 = vor.u32 %v10646_v18, %v8973_v15  ;;  %v10084_v57 = vld [vmem:[%s16620_s0 + $0x7c] sm:$0xf]  ;;  %v10660_v18 = vld [vmem:[%s16619_s1 + $0x10e4] sm:$0xf0] }
  0xfa   :  { %5551 = vmatpush.bf16.msrb.mxu2 %v8806_v20  ;;  %v9101_v20 = vld [vmem:[%s16619_s1 + $0x1170] sm:$0xf]  ;;  %v9038_v63 = vor.u32 %v10662_v23, %v9037_v19  ;;  %v9093_v19 = vld [vmem:[%s16619_s1 + $0x1160] sm:$0xf]  ;;  %v10676_v23 = vld [vmem:[%s16619_s1 + $0x1164] sm:$0xf0] }
  0xfb   :  { %5565 = vmatpush.bf16.msrb.mxu3 %v8870_v28  ;;  %v10694_v28 = vld [vmem:[%s16619_s1 + $0x11f4] sm:$0xf0] }
  0xfc   :  { %5524 = vmatpush.bf16.msrb.mxu0 %v8670_v53  ;;  %v10083_v53 = vld [vmem:[%s16620_s0 + $0x74] sm:$0xf]  ;;  %v9166_v15 = vor.u32 %v10694_v28, %v9165_v25  ;;  %v10692_v28 = vld [vmem:[%s16619_s1 + $0x11e4] sm:$0xf0] }
  0xfd   :  { %5538 = vmatpush.bf16.msrb.mxu1 %v8734_v6  ;;  %v9102_v6 = vor.u32 %v10678_v24, %v9101_v20  ;;  %v12863_v20 = vpop.f32.mrf.mxu0  ;;  %v12865_v24 = vor.u32 %v10109_v50, %v6789_v49  ;;  %v12867_v25 = vor.u32 %v10083_v53, %v6783_v54  ;;  %v9094_v49 = vor.u32 %v10676_v23, %v9093_v19  ;;  %v8957_v50 = vld [vmem:[%s16619_s1 + $0x1050] sm:$0xf]  ;;  %v10642_v53 = vld [vmem:[%s16619_s1 + $0x1054] sm:$0xf0]  ;;  %v9013_v19 = vld [vmem:[%s16619_s1 + $0x10c0] sm:$0xf]  ;;  %v12916_v23 = vpop.f32.mrf.mxu2 }
  0xfe   :  { %5552 = vmatpush.bf16.msrb.mxu2 %v8798_v7  ;;  %v8965_v7 = vld [vmem:[%s16619_s1 + $0x1060] sm:$0xf]  ;;  %16650 = vst [vmem:[#allocation7_spill] sm:$0xff] %v12863_v20  ;;  %v10658_v54 = vld [vmem:[%s16619_s1 + $0x10d4] sm:$0xf0] }
  0xff   :  { %5566 = vmatpush.bf16.msrb.mxu3 %v8862_v16  ;;  %v12852_v16 = vor.u32 %v10108_v37, %v6781_v30  ;;  %v12875_v30 = vpop.f32.mrf.mxu1  ;;  %v12877_v37 = vor.u32 %v10084_v57, %v6791_v61  ;;  %v9085_v57 = vld [vmem:[%s16619_s1 + $0x1150] sm:$0xf]  ;;  %v10674_v61 = vld [vmem:[%s16619_s1 + $0x1154] sm:$0xf0]  ;;  %16653 = vst [vmem:[#allocation10_spill] sm:$0xff] %v12916_v23 }
 0x100   :  { %5525 = vmatpush.bf16.msrb.mxu0 %v8662_v27  ;;  %v9157_v27 = vld [vmem:[%s16619_s1 + $0x11e0] sm:$0xf]  ;;  %16651 = vst [vmem:[#allocation8_spill] sm:$0xff] %v12875_v30  ;;  %v9229_v23 = vld [vmem:[%s16619_s1 + $0x1270] sm:$0xf] }
 0x101   :  { %5539 = vmatpush.bf16.msrb.mxu1 %v8726_v42  ;;  %16652 = vst [vmem:[#allocation9_spill] sm:$0xff] %v12877_v37  ;;  %v8966_v42 = vor.u32 %v10644_v11, %v8965_v7  ;;  %v8958_v7 = vor.u32 %v10642_v53, %v8957_v50  ;;  %v9141_v53 = vld [vmem:[%s16619_s1 + $0x11c0] sm:$0xf]  ;;  %v10110_v20 = vld [vmem:[%s16620_s0 + $0x144] sm:$0xf0] }
 0x102   :  { %5553 = vmatpush.bf16.msrb.mxu2 %v8790_v29  ;;  %v9030_v29 = vor.u32 %v10660_v18, %v9029_v12  ;;  %v9086_v12 = vor.u32 %v10674_v61, %v9085_v57  ;;  %v10640_v18 = vld [vmem:[%s16619_s1 + $0x1044] sm:$0xf0] }
 0x103   :  { %5567 = vmatpush.bf16.msrb.mxu3 %v8854_v13  ;;  %v9021_v13 = vld [vmem:[%s16619_s1 + $0x10d0] sm:$0xf]  ;;  %5526 = vmatmul.bf16.vlgmr.msrb.gmra.mxu0 %v12852_v16 }
 0x104   :  { %5574 = vmatpush.bf16.msra.mxu0 %v8974_v62  ;;  %v9158_v62 = vor.u32 %v10692_v28, %v9157_v27  ;;  %5540 = vmatmul.bf16.vlgmr.msrb.gmra.mxu1 %v12867_v25  ;;  %v9022_v11 = vor.u32 %v10658_v54, %v9021_v13  ;;  %v10656_v28 = vld [vmem:[%s16619_s1 + $0x10c4] sm:$0xf0] }
 0x105   :  { %5588 = vmatpush.bf16.msra.mxu1 %v9038_v63  ;;  %5554 = vmatmul.bf16.vlgmr.msrb.gmra.mxu2 %v12865_v24  ;;  %v9149_v63 = vld [vmem:[%s16619_s1 + $0x11d0] sm:$0xf]  ;;  %v5303_v50 = vpop.f32.mrf.mxu0  ;;  %v10688_v13 = vld [vmem:[%s16619_s1 + $0x11c4] sm:$0xf0]  ;;  %v9014_v61 = vor.u32 %v10656_v28, %v9013_v19 }
 0x106   :  { %5602 = vmatpush.bf16.msra.mxu2 %v9102_v6  ;;  %v10690_v6 = vld [vmem:[%s16619_s1 + $0x11d4] sm:$0xf0]  ;;  %5568 = vmatmul.bf16.vlgmr.msrb.gmra.mxu3 %v12877_v37  ;;  %v9133_v19 = vld [vmem:[%s16619_s1 + $0x11b0] sm:$0xf] }
 0x107   :  { %5616 = vmatpush.bf16.msra.mxu3 %v9166_v15  ;;  %v8949_v15 = vld [vmem:[%s16619_s1 + $0x1040] sm:$0xf]  ;;  %v9150_v27 = vor.u32 %v10690_v6, %v9149_v63  ;;  %v5317_v57 = vpop.f32.mrf.mxu1  ;;  %v8941_v6 = vld [vmem:[%s16619_s1 + $0x1030] sm:$0xf] }
 0x108   :  { %5575 = vmatpush.bf16.msra.mxu0 %v8966_v42  ;;  %v9077_v42 = vld [vmem:[%s16619_s1 + $0x1140] sm:$0xf]  ;;  %v8950_v54 = vor.u32 %v10640_v18, %v8949_v15  ;;  %v10670_v18 = vld [vmem:[%s16619_s1 + $0x1134] sm:$0xf0] }
 0x109   :  { %5589 = vmatpush.bf16.msra.mxu1 %v9030_v29  ;;  %v10672_v29 = vld [vmem:[%s16619_s1 + $0x1144] sm:$0xf0] }
 0x10a   :  { %5603 = vmatpush.bf16.msra.mxu2 %v9094_v49  ;;  %v12927_v49 = vpop.f32.mrf.mxu3  ;;  %v9078_v63 = vor.u32 %v10672_v29, %v9077_v42 }
 0x10b   :  { %5617 = vmatpush.bf16.msra.mxu3 %v9158_v62  ;;  %16654 = vst [vmem:[#allocation11_spill] sm:$0xff] %v12927_v49  ;;  %v5304_v62 = vadd.f32 %v5303_v50, %v12748_v22  ;;  %v10638_v49 = vld [vmem:[%s16619_s1 + $0x1034] sm:$0xf0]  ;;  %v9142_v22 = vor.u32 %v10688_v13, %v9141_v53  ;;  %v8933_v50 = vld [vmem:[%s16619_s1 + $0x1020] sm:$0xf] }
 0x10c   :  { %5576 = vmatpush.bf16.msra.mxu0 %v8958_v7  ;;  %v9005_v7 = vld [vmem:[%s16619_s1 + $0x10b0] sm:$0xf]  ;;  %v8942_v28 = vor.u32 %v10638_v49, %v8941_v6  ;;  %v10636_v53 = vld [vmem:[%s16619_s1 + $0x1024] sm:$0xf0]  ;;  %v8997_v13 = vld [vmem:[%s16619_s1 + $0x10a0] sm:$0xf] }
 0x10d   :  { %5590 = vmatpush.bf16.msra.mxu1 %v9022_v11  ;;  %v5318_v15 = vadd.f32 %v5317_v57, %v5304_v62  ;;  %v10654_v11 = vld [vmem:[%s16619_s1 + $0x10b4] sm:$0xf0]  ;;  %v10652_v49 = vld [vmem:[%s16619_s1 + $0x10a4] sm:$0xf0]  ;;  %v9061_v57 = vld [vmem:[%s16619_s1 + $0x1120] sm:$0xf] }
 0x10e   :  { %5604 = vmatpush.bf16.msra.mxu2 %v9086_v12  ;;  %v9069_v12 = vld [vmem:[%s16619_s1 + $0x1130] sm:$0xf]  ;;  %v9006_v42 = vor.u32 %v10654_v11, %v9005_v7  ;;  %v9125_v7 = vld [vmem:[%s16619_s1 + $0x11a0] sm:$0xf]  ;;  %v8934_v11 = vor.u32 %v10636_v53, %v8933_v50 }
 0x10f   :  { %5618 = vmatpush.bf16.msra.mxu3 %v9150_v27  ;;  %v10686_v27 = vld [vmem:[%s16619_s1 + $0x11b4] sm:$0xf0]  ;;  %v9070_v29 = vor.u32 %v10670_v18, %v9069_v12  ;;  %v8925_v12 = vld [vmem:[%s16619_s1 + $0x1010] sm:$0xf] }
 0x110   :  { %5577 = vmatpush.bf16.msra.mxu0 %v8950_v54  ;;  %v9134_v62 = vor.u32 %v10686_v27, %v9133_v19  ;;  %v5331_v54 = vpop.f32.mrf.mxu2  ;;  %v10634_v27 = vld [vmem:[%s16619_s1 + $0x1014] sm:$0xf0]  ;;  %v9117_v53 = vld [vmem:[%s16619_s1 + $0x1190] sm:$0xf] }
 0x111   :  { %5591 = vmatpush.bf16.msra.mxu1 %v9014_v61  ;;  %v10668_v61 = vld [vmem:[%s16619_s1 + $0x1124] sm:$0xf0] }
 0x112   :  { %5605 = vmatpush.bf16.msra.mxu2 %v9078_v63  ;;  %v5332_v63 = vadd.f32 %v5331_v54, %v5318_v15  ;;  %v5345_v6 = vpop.f32.mrf.mxu3  ;;  %v8998_v15 = vor.u32 %v10652_v49, %v8997_v13  ;;  %v9062_v19 = vor.u32 %v10668_v61, %v9061_v57  ;;  %v8989_v54 = vld [vmem:[%s16619_s1 + $0x1090] sm:$0xf]  ;;  %v10682_v13 = vld [vmem:[%s16619_s1 + $0x1194] sm:$0xf0]  ;;  %v10632_v49 = vld [vmem:[%s16619_s1 + $0x1004] sm:$0xf0]  ;;  %v8926_v57 = vor.u32 %v10634_v27, %v8925_v12 }
 0x113   :  { %5619 = vmatpush.bf16.msra.mxu3 %v9142_v22  ;;  %v10684_v22 = vld [vmem:[%s16619_s1 + $0x11a4] sm:$0xf0]  ;;  %v8981_v61 = vld [vmem:[%s16619_s1 + $0x1080] sm:$0xf]  ;;  %v9118_v30 = vor.u32 %v10682_v13, %v9117_v53  ;;  %v10758_v53 = vld [vmem:[%s16619_s1 + $0x13f4] sm:$0xf0] }
 0x114   :  { %5578 = vmatpush.bf16.msra.mxu0 %v8942_v28  ;;  %v12987_v18 = vadd.f32 %v5345_v6, %v5332_v63  ;;  %v10650_v28 = vld [vmem:[%s16619_s1 + $0x1094] sm:$0xf0]  ;;  %v9126_v50 = vor.u32 %v10684_v22, %v9125_v7  ;;  %v10648_v63 = vld [vmem:[%s16619_s1 + $0x1084] sm:$0xf0]  ;;  %v9045_v6 = vld [vmem:[%s16619_s1 + $0x1100] sm:$0xf] }
 0x115   :  { %5592 = vmatpush.bf16.msra.mxu1 %v9006_v42  ;;  %v9053_v42 = vld [vmem:[%s16619_s1 + $0x1110] sm:$0xf]  ;;  %v10664_v7 = vld [vmem:[%s16619_s1 + $0x1104] sm:$0xf0]  ;;  %v8990_v22 = vor.u32 %v10650_v28, %v8989_v54  ;;  %v9109_v12 = vld [vmem:[%s16619_s1 + $0x1180] sm:$0xf]  ;;  %v8982_v52 = vor.u32 %v10648_v63, %v8981_v61 }
 0x116   :  { %5606 = vmatpush.bf16.msra.mxu2 %v9070_v29  ;;  %v10666_v29 = vld [vmem:[%s16619_s1 + $0x1114] sm:$0xf0]  ;;  %v10680_v27 = vld [vmem:[%s16619_s1 + $0x1184] sm:$0xf0]  ;;  %v9357_v28 = vld [vmem:[%s16619_s1 + $0x1370] sm:$0xf]  ;;  %v9046_v8 = vor.u32 %v10664_v7, %v9045_v6 }
 0x117   :  { %5620 = vmatpush.bf16.msra.mxu3 %v9134_v62  ;;  %v8917_v62 = vld [vmem:[%s16619_s1 + $0x1000] sm:$0xf]  ;;  %v10726_v54 = vld [vmem:[%s16619_s1 + $0x12f4] sm:$0xf0]  ;;  %v9110_v0 = vor.u32 %v10680_v27, %v9109_v12  ;;  %v6799_v61 = vld [vmem:[%s16620_s0 + $0x148] sm:$0xf0] }
 0x118   :  { %5579 = vmatpush.bf16.msra.mxu0 %v8934_v11  ;;  %v9054_v11 = vor.u32 %v10666_v29, %v9053_v42  ;;  %v9421_v42 = vld [vmem:[%s16619_s1 + $0x13f0] sm:$0xf]  ;;  %v8918_v29 = vor.u32 %v10632_v49, %v8917_v62  ;;  %v6797_v13 = vld [vmem:[%s16620_s0 + $0x80] sm:$0xf]  ;;  %v6805_v62 = vld [vmem:[%s16620_s0 + $0x88] sm:$0xf] }
 0x119   :  { %5593 = vmatpush.bf16.msra.mxu1 %v8998_v15  ;;  %v10710_v15 = vld [vmem:[%s16619_s1 + $0x1274] sm:$0xf0]  ;;  %v10111_v49 = vld [vmem:[%s16620_s0 + $0x14c] sm:$0xf0]  ;;  %v10086_v63 = vld [vmem:[%s16620_s0 + $0x8c] sm:$0xf]  ;;  %v9422_v12 = vor.u32 %v10758_v53, %v9421_v42  ;;  %v13091_v27 = vor.u32 %v10110_v20, %v6797_v13  ;;  %v13114_v53 = vpop.f32.mrf.mxu1 }
 0x11a   :  { %5607 = vmatpush.bf16.msra.mxu2 %v9062_v19  ;;  %v9293_v19 = vld [vmem:[%s16619_s1 + $0x12f0] sm:$0xf]  ;;  %v9230_v14 = vor.u32 %v10710_v15, %v9229_v23  ;;  %v6807_v6 = vld [vmem:[%s16620_s0 + $0x150] sm:$0xf0]  ;;  %v10708_v23 = vld [vmem:[%s16619_s1 + $0x1264] sm:$0xf0] }
 0x11b   :  { %5621 = vmatpush.bf16.msra.mxu3 %v9126_v50  ;;  %v10742_v50 = vld [vmem:[%s16619_s1 + $0x1374] sm:$0xf0]  ;;  %v9294_v7 = vor.u32 %v10726_v54, %v9293_v19  ;;  %v10724_v15 = vld [vmem:[%s16619_s1 + $0x12e4] sm:$0xf0]  ;;  %v9349_v19 = vld [vmem:[%s16619_s1 + $0x1360] sm:$0xf]  ;;  %v13116_v13 = vor.u32 %v10086_v63, %v6807_v6 }
 0x11c   :  { %5580 = vmatpush.bf16.msra.mxu0 %v8926_v57  ;;  %v10085_v57 = vld [vmem:[%s16620_s0 + $0x84] sm:$0xf]  ;;  %v10740_v54 = vld [vmem:[%s16619_s1 + $0x1364] sm:$0xf0]  ;;  %v9413_v42 = vld [vmem:[%s16619_s1 + $0x13e0] sm:$0xf] }
 0x11d   :  { %5594 = vmatpush.bf16.msra.mxu1 %v8990_v22  ;;  %v9358_v22 = vor.u32 %v10742_v50, %v9357_v28  ;;  %v13102_v28 = vpop.f32.mrf.mxu0  ;;  %v13104_v50 = vor.u32 %v10111_v49, %v6805_v62  ;;  %v13106_v20 = vor.u32 %v10085_v57, %v6799_v61  ;;  %16658 = vst [vmem:[#allocation15_spill] sm:$0xff] %v13114_v53  ;;  %v9213_v49 = vld [vmem:[%s16619_s1 + $0x1250] sm:$0xf]  ;;  %v10706_v57 = vld [vmem:[%s16619_s1 + $0x1254] sm:$0xf0] }
 0x11e   :  { %5608 = vmatpush.bf16.msra.mxu2 %v9054_v11  ;;  %v9285_v11 = vld [vmem:[%s16619_s1 + $0x12e0] sm:$0xf]  ;;  %16655 = vst [vmem:[#allocation12_spill] sm:$0xff] %v13102_v28  ;;  %v9350_v62 = vor.u32 %v10740_v54, %v9349_v19  ;;  %v10722_v61 = vld [vmem:[%s16619_s1 + $0x12d4] sm:$0xf0]  ;;  %v13155_v54 = vpop.f32.mrf.mxu2 }
 0x11f   :  { %5622 = vmatpush.bf16.msra.mxu3 %v9118_v30  ;;  %v9221_v30 = vld [vmem:[%s16619_s1 + $0x1260] sm:$0xf]  ;;  %16656 = vst [vmem:[#allocation13_spill] sm:$0xff] %v13104_v50  ;;  %v9341_v63 = vld [vmem:[%s16619_s1 + $0x1350] sm:$0xf] }
 0x120   :  { %5581 = vmatpush.bf16.msra.mxu0 %v8918_v29  ;;  %16657 = vst [vmem:[#allocation14_spill] sm:$0xff] %v13106_v20  ;;  %v10756_v29 = vld [vmem:[%s16619_s1 + $0x13e4] sm:$0xf0]  ;;  %v10738_v6 = vld [vmem:[%s16619_s1 + $0x1354] sm:$0xf0] }
 0x121   :  { %5595 = vmatpush.bf16.msra.mxu1 %v8982_v52  ;;  %16659 = vst [vmem:[#allocation16_spill] sm:$0xff] %v13116_v13  ;;  %v9222_v52 = vor.u32 %v10708_v23, %v9221_v30  ;;  %v9214_v30 = vor.u32 %v10706_v57, %v9213_v49  ;;  %v9269_v19 = vld [vmem:[%s16619_s1 + $0x12c0] sm:$0xf]  ;;  %v10112_v28 = vld [vmem:[%s16620_s0 + $0x154] sm:$0xf0] }
 0x122   :  { %5609 = vmatpush.bf16.msra.mxu2 %v9046_v8  ;;  %v9286_v8 = vor.u32 %v10724_v15, %v9285_v11  ;;  %v9342_v11 = vor.u32 %v10738_v6, %v9341_v63  ;;  %v10704_v15 = vld [vmem:[%s16619_s1 + $0x1244] sm:$0xf0]  ;;  %16660 = vst [vmem:[#allocation17_spill] sm:$0xff] %v13155_v54  ;;  %v9397_v57 = vld [vmem:[%s16619_s1 + $0x13c0] sm:$0xf]  ;;  %v5373_v63 = vpop.f32.mrf.mxu1 }
 0x123   :  { %5623 = vmatpush.bf16.msra.mxu3 %v9110_v0  ;;  %v9277_v0 = vld [vmem:[%s16619_s1 + $0x12d0] sm:$0xf]  ;;  %5582 = vmatmul.bf16.vlgmr.msra.gmra.mxu0 %v13091_v27 }
 0x124   :  { %5630 = vmatpush.bf16.msrb.mxu0 %v9230_v14  ;;  %v9414_v14 = vor.u32 %v10756_v29, %v9413_v42  ;;  %5596 = vmatmul.bf16.vlgmr.msra.gmra.mxu1 %v13106_v20  ;;  %v9278_v23 = vor.u32 %v10722_v61, %v9277_v0  ;;  %v10720_v29 = vld [vmem:[%s16619_s1 + $0x12c4] sm:$0xf0]  ;;  %v9485_v54 = vld [vmem:[%s16619_s1 + $0x1470] sm:$0xf] }
 0x125   :  { %5644 = vmatpush.bf16.msrb.mxu1 %v9294_v7  ;;  %5610 = vmatmul.bf16.vlgmr.msra.gmra.mxu2 %v13104_v50  ;;  %v9405_v7 = vld [vmem:[%s16619_s1 + $0x13d0] sm:$0xf]  ;;  %v5359_v49 = vpop.f32.mrf.mxu0  ;;  %v10752_v0 = vld [vmem:[%s16619_s1 + $0x13c4] sm:$0xf0]  ;;  %v9270_v6 = vor.u32 %v10720_v29, %v9269_v19 }
 0x126   :  { %5658 = vmatpush.bf16.msrb.mxu2 %v9358_v22  ;;  %v10754_v22 = vld [vmem:[%s16619_s1 + $0x13d4] sm:$0xf0]  ;;  %5624 = vmatmul.bf16.vlgmr.msra.gmra.mxu3 %v13116_v13  ;;  %v9389_v19 = vld [vmem:[%s16619_s1 + $0x13b0] sm:$0xf] }
 0x127   :  { %5672 = vmatpush.bf16.msrb.mxu3 %v9422_v12  ;;  %v9205_v12 = vld [vmem:[%s16619_s1 + $0x1240] sm:$0xf]  ;;  %v9406_v42 = vor.u32 %v10754_v22, %v9405_v7  ;;  %v9197_v22 = vld [vmem:[%s16619_s1 + $0x1230] sm:$0xf] }
 0x128   :  { %5631 = vmatpush.bf16.msrb.mxu0 %v9222_v52  ;;  %v9333_v52 = vld [vmem:[%s16619_s1 + $0x1340] sm:$0xf]  ;;  %v9206_v61 = vor.u32 %v10704_v15, %v9205_v12  ;;  %v10734_v15 = vld [vmem:[%s16619_s1 + $0x1334] sm:$0xf0] }
 0x129   :  { %5645 = vmatpush.bf16.msrb.mxu1 %v9286_v8  ;;  %v10736_v8 = vld [vmem:[%s16619_s1 + $0x1344] sm:$0xf0] }
 0x12a   :  { %5659 = vmatpush.bf16.msrb.mxu2 %v9350_v62  ;;  %v13166_v62 = vpop.f32.mrf.mxu3  ;;  %v9334_v7 = vor.u32 %v10736_v8, %v9333_v52 }
 0x12b   :  { %5673 = vmatpush.bf16.msrb.mxu3 %v9414_v14  ;;  %16661 = vst [vmem:[#allocation18_spill] sm:$0xff] %v13166_v62  ;;  %v5360_v14 = vadd.f32 %v5359_v49, %v12987_v18  ;;  %v10702_v62 = vld [vmem:[%s16619_s1 + $0x1234] sm:$0xf0]  ;;  %v9398_v18 = vor.u32 %v10752_v0, %v9397_v57  ;;  %v9189_v49 = vld [vmem:[%s16619_s1 + $0x1220] sm:$0xf] }
 0x12c   :  { %5632 = vmatpush.bf16.msrb.mxu0 %v9214_v30  ;;  %v9261_v30 = vld [vmem:[%s16619_s1 + $0x12b0] sm:$0xf]  ;;  %v9198_v29 = vor.u32 %v10702_v62, %v9197_v22  ;;  %v10700_v57 = vld [vmem:[%s16619_s1 + $0x1224] sm:$0xf0]  ;;  %v9253_v0 = vld [vmem:[%s16619_s1 + $0x12a0] sm:$0xf] }
 0x12d   :  { %5646 = vmatpush.bf16.msrb.mxu1 %v9278_v23  ;;  %v5374_v12 = vadd.f32 %v5373_v63, %v5360_v14  ;;  %v10718_v23 = vld [vmem:[%s16619_s1 + $0x12b4] sm:$0xf0]  ;;  %v10716_v62 = vld [vmem:[%s16619_s1 + $0x12a4] sm:$0xf0]  ;;  %v9317_v63 = vld [vmem:[%s16619_s1 + $0x1320] sm:$0xf] }
 0x12e   :  { %5660 = vmatpush.bf16.msrb.mxu2 %v9342_v11  ;;  %v9325_v11 = vld [vmem:[%s16619_s1 + $0x1330] sm:$0xf]  ;;  %v9262_v52 = vor.u32 %v10718_v23, %v9261_v30  ;;  %v9381_v30 = vld [vmem:[%s16619_s1 + $0x13a0] sm:$0xf]  ;;  %v9190_v23 = vor.u32 %v10700_v57, %v9189_v49 }
 0x12f   :  { %5674 = vmatpush.bf16.msrb.mxu3 %v9406_v42  ;;  %v10750_v42 = vld [vmem:[%s16619_s1 + $0x13b4] sm:$0xf0]  ;;  %v9326_v8 = vor.u32 %v10734_v15, %v9325_v11  ;;  %v9181_v11 = vld [vmem:[%s16619_s1 + $0x1210] sm:$0xf] }
 0x130   :  { %5633 = vmatpush.bf16.msrb.mxu0 %v9206_v61  ;;  %v9390_v14 = vor.u32 %v10750_v42, %v9389_v19  ;;  %v5387_v61 = vpop.f32.mrf.mxu2  ;;  %v10698_v42 = vld [vmem:[%s16619_s1 + $0x1214] sm:$0xf0]  ;;  %v9373_v57 = vld [vmem:[%s16619_s1 + $0x1390] sm:$0xf] }
 0x131   :  { %5647 = vmatpush.bf16.msrb.mxu1 %v9270_v6  ;;  %v10732_v6 = vld [vmem:[%s16619_s1 + $0x1324] sm:$0xf0] }
 0x132   :  { %5661 = vmatpush.bf16.msrb.mxu2 %v9334_v7  ;;  %v5388_v7 = vadd.f32 %v5387_v61, %v5374_v12  ;;  %v5401_v22 = vpop.f32.mrf.mxu3  ;;  %v9254_v12 = vor.u32 %v10716_v62, %v9253_v0  ;;  %v9318_v19 = vor.u32 %v10732_v6, %v9317_v63  ;;  %v9245_v61 = vld [vmem:[%s16619_s1 + $0x1290] sm:$0xf]  ;;  %v10746_v0 = vld [vmem:[%s16619_s1 + $0x1394] sm:$0xf0]  ;;  %v10696_v62 = vld [vmem:[%s16619_s1 + $0x1204] sm:$0xf0]  ;;  %v9182_v63 = vor.u32 %v10698_v42, %v9181_v11 }
 0x133   :  { %5675 = vmatpush.bf16.msrb.mxu3 %v9398_v18  ;;  %v10748_v18 = vld [vmem:[%s16619_s1 + $0x13a4] sm:$0xf0]  ;;  %v9237_v6 = vld [vmem:[%s16619_s1 + $0x1280] sm:$0xf]  ;;  %v9374_v53 = vor.u32 %v10746_v0, %v9373_v57  ;;  %v10822_v57 = vld [vmem:[%s16619_s1 + $0x15f4] sm:$0xf0] }
 0x134   :  { %5634 = vmatpush.bf16.msrb.mxu0 %v9198_v29  ;;  %v13226_v15 = vadd.f32 %v5401_v22, %v5388_v7  ;;  %v10714_v29 = vld [vmem:[%s16619_s1 + $0x1294] sm:$0xf0]  ;;  %v9382_v49 = vor.u32 %v10748_v18, %v9381_v30  ;;  %v10712_v7 = vld [vmem:[%s16619_s1 + $0x1284] sm:$0xf0]  ;;  %v9301_v22 = vld [vmem:[%s16619_s1 + $0x1300] sm:$0xf] }
 0x135   :  { %5648 = vmatpush.bf16.msrb.mxu1 %v9262_v52  ;;  %v9309_v52 = vld [vmem:[%s16619_s1 + $0x1310] sm:$0xf]  ;;  %v10728_v30 = vld [vmem:[%s16619_s1 + $0x1304] sm:$0xf0]  ;;  %v9246_v18 = vor.u32 %v10714_v29, %v9245_v61  ;;  %v9365_v11 = vld [vmem:[%s16619_s1 + $0x1380] sm:$0xf]  ;;  %v9238_v13 = vor.u32 %v10712_v7, %v9237_v6 }
 0x136   :  { %5662 = vmatpush.bf16.msrb.mxu2 %v9326_v8  ;;  %v10730_v8 = vld [vmem:[%s16619_s1 + $0x1314] sm:$0xf0]  ;;  %v10744_v42 = vld [vmem:[%s16619_s1 + $0x1384] sm:$0xf0]  ;;  %v9613_v29 = vld [vmem:[%s16619_s1 + $0x1570] sm:$0xf]  ;;  %v9302_v50 = vor.u32 %v10728_v30, %v9301_v22 }
 0x137   :  { %5676 = vmatpush.bf16.msrb.mxu3 %v9390_v14  ;;  %v9173_v14 = vld [vmem:[%s16619_s1 + $0x1200] sm:$0xf]  ;;  %v10790_v61 = vld [vmem:[%s16619_s1 + $0x14f4] sm:$0xf0]  ;;  %v6813_v0 = vld [vmem:[%s16620_s0 + $0x90] sm:$0xf]  ;;  %v9366_v20 = vor.u32 %v10744_v42, %v9365_v11 }
 0x138   :  { %5635 = vmatpush.bf16.msrb.mxu0 %v9190_v23  ;;  %v9310_v23 = vor.u32 %v10730_v8, %v9309_v52  ;;  %v9677_v52 = vld [vmem:[%s16619_s1 + $0x15f0] sm:$0xf]  ;;  %v9174_v8 = vor.u32 %v10696_v62, %v9173_v14  ;;  %v6821_v14 = vld [vmem:[%s16620_s0 + $0x98] sm:$0xf]  ;;  %v10113_v62 = vld [vmem:[%s16620_s0 + $0x15c] sm:$0xf0]  ;;  %v13330_v42 = vor.u32 %v10112_v28, %v6813_v0 }
 0x139   :  { %5649 = vmatpush.bf16.msrb.mxu1 %v9254_v12  ;;  %v10774_v12 = vld [vmem:[%s16619_s1 + $0x1474] sm:$0xf0]  ;;  %v6815_v6 = vld [vmem:[%s16620_s0 + $0x158] sm:$0xf0]  ;;  %v6823_v22 = vld [vmem:[%s16620_s0 + $0x160] sm:$0xf0]  ;;  %v9678_v11 = vor.u32 %v10822_v57, %v9677_v52  ;;  %v13353_v57 = vpop.f32.mrf.mxu1 }
 0x13a   :  { %5663 = vmatpush.bf16.msrb.mxu2 %v9318_v19  ;;  %v9549_v19 = vld [vmem:[%s16619_s1 + $0x14f0] sm:$0xf]  ;;  %v9486_v37 = vor.u32 %v10774_v12, %v9485_v54  ;;  %v10088_v7 = vld [vmem:[%s16620_s0 + $0x9c] sm:$0xf]  ;;  %v10772_v54 = vld [vmem:[%s16619_s1 + $0x1464] sm:$0xf0] }
 0x13b   :  { %5677 = vmatpush.bf16.msrb.mxu3 %v9382_v49  ;;  %v10806_v49 = vld [vmem:[%s16619_s1 + $0x1574] sm:$0xf0]  ;;  %v9550_v30 = vor.u32 %v10790_v61, %v9549_v19  ;;  %16662 = vst [vmem:[#allocation19_spill] sm:$0xff] %v13330_v42  ;;  %v10788_v12 = vld [vmem:[%s16619_s1 + $0x14e4] sm:$0xf0]  ;;  %v13355_v0 = vor.u32 %v10088_v7, %v6823_v22 }
 0x13c   :  { %5636 = vmatpush.bf16.msrb.mxu0 %v9182_v63  ;;  %v10087_v63 = vld [vmem:[%s16620_s0 + $0x94] sm:$0xf]  ;;  %v9605_v19 = vld [vmem:[%s16619_s1 + $0x1560] sm:$0xf]  ;;  %v10804_v61 = vld [vmem:[%s16619_s1 + $0x1564] sm:$0xf0] }
 0x13d   :  { %5650 = vmatpush.bf16.msrb.mxu1 %v9246_v18  ;;  %v9614_v18 = vor.u32 %v10806_v49, %v9613_v29  ;;  %v13341_v29 = vpop.f32.mrf.mxu0  ;;  %v13343_v49 = vor.u32 %v10113_v62, %v6821_v14  ;;  %v13345_v28 = vor.u32 %v10087_v63, %v6815_v6  ;;  %v9669_v52 = vld [vmem:[%s16619_s1 + $0x15e0] sm:$0xf]  ;;  %16666 = vst [vmem:[#allocation23_spill] sm:$0xff] %v13353_v57  ;;  %v9469_v62 = vld [vmem:[%s16619_s1 + $0x1450] sm:$0xf] }
 0x13e   :  { %5664 = vmatpush.bf16.msrb.mxu2 %v9310_v23  ;;  %v9541_v23 = vld [vmem:[%s16619_s1 + $0x14e0] sm:$0xf]  ;;  %16663 = vst [vmem:[#allocation20_spill] sm:$0xff] %v13341_v29  ;;  %v9606_v14 = vor.u32 %v10804_v61, %v9605_v19  ;;  %v10770_v63 = vld [vmem:[%s16619_s1 + $0x1454] sm:$0xf0]  ;;  %v13394_v61 = vpop.f32.mrf.mxu2 }
 0x13f   :  { %5678 = vmatpush.bf16.msrb.mxu3 %v9374_v53  ;;  %v9477_v53 = vld [vmem:[%s16619_s1 + $0x1460] sm:$0xf]  ;;  %16664 = vst [vmem:[#allocation21_spill] sm:$0xff] %v13343_v49  ;;  %v10786_v6 = vld [vmem:[%s16619_s1 + $0x14d4] sm:$0xf0] }
 0x140   :  { %5637 = vmatpush.bf16.msrb.mxu0 %v9174_v8  ;;  %16665 = vst [vmem:[#allocation22_spill] sm:$0xff] %v13345_v28  ;;  %v10820_v8 = vld [vmem:[%s16619_s1 + $0x15e4] sm:$0xf0]  ;;  %v9597_v7 = vld [vmem:[%s16619_s1 + $0x1550] sm:$0xf] }
 0x141   :  { %5651 = vmatpush.bf16.msrb.mxu1 %v9238_v13  ;;  %16667 = vst [vmem:[#allocation24_spill] sm:$0xff] %v13355_v0  ;;  %v9478_v13 = vor.u32 %v10772_v54, %v9477_v53  ;;  %v10802_v22 = vld [vmem:[%s16619_s1 + $0x1554] sm:$0xf0]  ;;  %v9470_v53 = vor.u32 %v10770_v63, %v9469_v62  ;;  %v9525_v19 = vld [vmem:[%s16619_s1 + $0x14c0] sm:$0xf] }
 0x142   :  { %5665 = vmatpush.bf16.msrb.mxu2 %v9302_v50  ;;  %v9542_v50 = vor.u32 %v10788_v12, %v9541_v23  ;;  %v9598_v23 = vor.u32 %v10802_v22, %v9597_v7  ;;  %v10768_v12 = vld [vmem:[%s16619_s1 + $0x1444] sm:$0xf0]  ;;  %16668 = vst [vmem:[#allocation25_spill] sm:$0xff] %v13394_v61  ;;  %v9653_v63 = vld [vmem:[%s16619_s1 + $0x15c0] sm:$0xf]  ;;  %v5429_v7 = vpop.f32.mrf.mxu1 }
 0x143   :  { %5679 = vmatpush.bf16.msrb.mxu3 %v9366_v20  ;;  %v9533_v20 = vld [vmem:[%s16619_s1 + $0x14d0] sm:$0xf]  ;;  %5638 = vmatmul.bf16.vlgmr.msrb.gmra.mxu0 %v13330_v42  ;;  %v10114_v61 = vld [vmem:[%s16620_s0 + $0x164] sm:$0xf0] }
 0x144   :  { %5686 = vmatpush.bf16.msra.mxu0 %v9486_v37  ;;  %v9670_v37 = vor.u32 %v10820_v8, %v9669_v52  ;;  %5652 = vmatmul.bf16.vlgmr.msrb.gmra.mxu1 %v13345_v28  ;;  %v9534_v54 = vor.u32 %v10786_v6, %v9533_v20  ;;  %v10784_v8 = vld [vmem:[%s16619_s1 + $0x14c4] sm:$0xf0] }
 0x145   :  { %5700 = vmatpush.bf16.msra.mxu1 %v9550_v30  ;;  %5666 = vmatmul.bf16.vlgmr.msrb.gmra.mxu2 %v13343_v49  ;;  %v9661_v30 = vld [vmem:[%s16619_s1 + $0x15d0] sm:$0xf]  ;;  %v5415_v62 = vpop.f32.mrf.mxu0  ;;  %v10816_v20 = vld [vmem:[%s16619_s1 + $0x15c4] sm:$0xf0]  ;;  %v9526_v22 = vor.u32 %v10784_v8, %v9525_v19 }
 0x146   :  { %5714 = vmatpush.bf16.msra.mxu2 %v9614_v18  ;;  %v10818_v18 = vld [vmem:[%s16619_s1 + $0x15d4] sm:$0xf0]  ;;  %5680 = vmatmul.bf16.vlgmr.msrb.gmra.mxu3 %v13355_v0  ;;  %v9645_v19 = vld [vmem:[%s16619_s1 + $0x15b0] sm:$0xf] }
 0x147   :  { %5728 = vmatpush.bf16.msra.mxu3 %v9678_v11  ;;  %v9461_v11 = vld [vmem:[%s16619_s1 + $0x1440] sm:$0xf]  ;;  %v9662_v52 = vor.u32 %v10818_v18, %v9661_v30  ;;  %v9453_v18 = vld [vmem:[%s16619_s1 + $0x1430] sm:$0xf]  ;;  %v10766_v0 = vld [vmem:[%s16619_s1 + $0x1434] sm:$0xf0] }
 0x148   :  { %5687 = vmatpush.bf16.msra.mxu0 %v9478_v13  ;;  %v9589_v13 = vld [vmem:[%s16619_s1 + $0x1540] sm:$0xf]  ;;  %v9462_v6 = vor.u32 %v10768_v12, %v9461_v11  ;;  %v10798_v12 = vld [vmem:[%s16619_s1 + $0x1534] sm:$0xf0]  ;;  %v9454_v8 = vor.u32 %v10766_v0, %v9453_v18  ;;  %v10780_v0 = vld [vmem:[%s16619_s1 + $0x14a4] sm:$0xf0] }
 0x149   :  { %5701 = vmatpush.bf16.msra.mxu1 %v9542_v50  ;;  %v10800_v50 = vld [vmem:[%s16619_s1 + $0x1544] sm:$0xf0]  ;;  %v9741_v49 = vld [vmem:[%s16619_s1 + $0x1670] sm:$0xf] }
 0x14a   :  { %5715 = vmatpush.bf16.msra.mxu2 %v9606_v14  ;;  %v13405_v14 = vpop.f32.mrf.mxu3  ;;  %v9590_v30 = vor.u32 %v10800_v50, %v9589_v13 }
 0x14b   :  { %5729 = vmatpush.bf16.msra.mxu3 %v9670_v37  ;;  %16669 = vst [vmem:[#allocation26_spill] sm:$0xff] %v13405_v14  ;;  %v5416_v37 = vadd.f32 %v5415_v62, %v13226_v15  ;;  %v9654_v15 = vor.u32 %v10816_v20, %v9653_v63  ;;  %v9445_v62 = vld [vmem:[%s16619_s1 + $0x1420] sm:$0xf]  ;;  %v10764_v63 = vld [vmem:[%s16619_s1 + $0x1424] sm:$0xf0] }
 0x14c   :  { %5688 = vmatpush.bf16.msra.mxu0 %v9470_v53  ;;  %v9517_v53 = vld [vmem:[%s16619_s1 + $0x14b0] sm:$0xf]  ;;  %v9509_v20 = vld [vmem:[%s16619_s1 + $0x14a0] sm:$0xf] }
 0x14d   :  { %5702 = vmatpush.bf16.msra.mxu1 %v9534_v54  ;;  %v5430_v11 = vadd.f32 %v5429_v7, %v5416_v37  ;;  %v10782_v54 = vld [vmem:[%s16619_s1 + $0x14b4] sm:$0xf0]  ;;  %v9573_v7 = vld [vmem:[%s16619_s1 + $0x1520] sm:$0xf] }
 0x14e   :  { %5716 = vmatpush.bf16.msra.mxu2 %v9598_v23  ;;  %v9581_v23 = vld [vmem:[%s16619_s1 + $0x1530] sm:$0xf]  ;;  %v9518_v13 = vor.u32 %v10782_v54, %v9517_v53  ;;  %v9637_v53 = vld [vmem:[%s16619_s1 + $0x15a0] sm:$0xf]  ;;  %v9446_v54 = vor.u32 %v10764_v63, %v9445_v62 }
 0x14f   :  { %5730 = vmatpush.bf16.msra.mxu3 %v9662_v52  ;;  %v10814_v52 = vld [vmem:[%s16619_s1 + $0x15b4] sm:$0xf0]  ;;  %v9582_v50 = vor.u32 %v10798_v12, %v9581_v23  ;;  %v9437_v23 = vld [vmem:[%s16619_s1 + $0x1410] sm:$0xf] }
 0x150   :  { %5689 = vmatpush.bf16.msra.mxu0 %v9462_v6  ;;  %v9646_v37 = vor.u32 %v10814_v52, %v9645_v19  ;;  %v5443_v6 = vpop.f32.mrf.mxu2  ;;  %v10762_v52 = vld [vmem:[%s16619_s1 + $0x1414] sm:$0xf0]  ;;  %v9629_v63 = vld [vmem:[%s16619_s1 + $0x1590] sm:$0xf] }
 0x151   :  { %5703 = vmatpush.bf16.msra.mxu1 %v9526_v22  ;;  %v10796_v22 = vld [vmem:[%s16619_s1 + $0x1524] sm:$0xf0] }
 0x152   :  { %5717 = vmatpush.bf16.msra.mxu2 %v9590_v30  ;;  %v5444_v30 = vadd.f32 %v5443_v6, %v5430_v11  ;;  %v5457_v18 = vpop.f32.mrf.mxu3  ;;  %v9510_v11 = vor.u32 %v10780_v0, %v9509_v20  ;;  %v9574_v19 = vor.u32 %v10796_v22, %v9573_v7  ;;  %v9501_v6 = vld [vmem:[%s16619_s1 + $0x1490] sm:$0xf]  ;;  %v10810_v20 = vld [vmem:[%s16619_s1 + $0x1594] sm:$0xf0]  ;;  %v10760_v0 = vld [vmem:[%s16619_s1 + $0x1404] sm:$0xf0]  ;;  %v9438_v7 = vor.u32 %v10762_v52, %v9437_v23 }
 0x153   :  { %5731 = vmatpush.bf16.msra.mxu3 %v9654_v15  ;;  %v10812_v15 = vld [vmem:[%s16619_s1 + $0x15a4] sm:$0xf0]  ;;  %v9493_v22 = vld [vmem:[%s16619_s1 + $0x1480] sm:$0xf]  ;;  %v9630_v14 = vor.u32 %v10810_v20, %v9629_v63  ;;  %v10886_v63 = vld [vmem:[%s16619_s1 + $0x17f4] sm:$0xf0] }
 0x154   :  { %5690 = vmatpush.bf16.msra.mxu0 %v9454_v8  ;;  %v13465_v12 = vadd.f32 %v5457_v18, %v5444_v30  ;;  %v10778_v8 = vld [vmem:[%s16619_s1 + $0x1494] sm:$0xf0]  ;;  %v9638_v62 = vor.u32 %v10812_v15, %v9637_v53  ;;  %v10776_v30 = vld [vmem:[%s16619_s1 + $0x1484] sm:$0xf0]  ;;  %v9557_v18 = vld [vmem:[%s16619_s1 + $0x1500] sm:$0xf] }
 0x155   :  { %5704 = vmatpush.bf16.msra.mxu1 %v9518_v13  ;;  %v9565_v13 = vld [vmem:[%s16619_s1 + $0x1510] sm:$0xf]  ;;  %v10792_v53 = vld [vmem:[%s16619_s1 + $0x1504] sm:$0xf0]  ;;  %v9502_v15 = vor.u32 %v10778_v8, %v9501_v6  ;;  %v9621_v23 = vld [vmem:[%s16619_s1 + $0x1580] sm:$0xf]  ;;  %v9494_v57 = vor.u32 %v10776_v30, %v9493_v22 }
 0x156   :  { %5718 = vmatpush.bf16.msra.mxu2 %v9582_v50  ;;  %v10794_v50 = vld [vmem:[%s16619_s1 + $0x1514] sm:$0xf0]  ;;  %v10808_v52 = vld [vmem:[%s16619_s1 + $0x1584] sm:$0xf0]  ;;  %v9869_v8 = vld [vmem:[%s16619_s1 + $0x1770] sm:$0xf]  ;;  %v9558_v29 = vor.u32 %v10792_v53, %v9557_v18 }
 0x157   :  { %5732 = vmatpush.bf16.msra.mxu3 %v9646_v37  ;;  %v9429_v37 = vld [vmem:[%s16619_s1 + $0x1400] sm:$0xf]  ;;  %v10854_v6 = vld [vmem:[%s16619_s1 + $0x16f4] sm:$0xf0]  ;;  %v9622_v28 = vor.u32 %v10808_v52, %v9621_v23  ;;  %v6831_v22 = vld [vmem:[%s16620_s0 + $0x168] sm:$0xf0] }
 0x158   :  { %5691 = vmatpush.bf16.msra.mxu0 %v9446_v54  ;;  %v9566_v54 = vor.u32 %v10794_v50, %v9565_v13  ;;  %v9933_v13 = vld [vmem:[%s16619_s1 + $0x17f0] sm:$0xf]  ;;  %v9430_v50 = vor.u32 %v10760_v0, %v9429_v37  ;;  %v6829_v20 = vld [vmem:[%s16620_s0 + $0xa0] sm:$0xf]  ;;  %v6837_v37 = vld [vmem:[%s16620_s0 + $0xa8] sm:$0xf] }
 0x159   :  { %5705 = vmatpush.bf16.msra.mxu1 %v9510_v11  ;;  %v10838_v11 = vld [vmem:[%s16619_s1 + $0x1674] sm:$0xf0]  ;;  %v10115_v0 = vld [vmem:[%s16620_s0 + $0x16c] sm:$0xf0]  ;;  %v10090_v30 = vld [vmem:[%s16620_s0 + $0xac] sm:$0xf]  ;;  %v9934_v23 = vor.u32 %v10886_v63, %v9933_v13  ;;  %v13569_v52 = vor.u32 %v10114_v61, %v6829_v20  ;;  %v13592_v63 = vpop.f32.mrf.mxu1 }
 0x15a   :  { %5719 = vmatpush.bf16.msra.mxu2 %v9574_v19  ;;  %v9805_v19 = vld [vmem:[%s16619_s1 + $0x16f0] sm:$0xf]  ;;  %v9742_v42 = vor.u32 %v10838_v11, %v9741_v49  ;;  %v6839_v18 = vld [vmem:[%s16620_s0 + $0x170] sm:$0xf0]  ;;  %v10836_v49 = vld [vmem:[%s16619_s1 + $0x1664] sm:$0xf0] }
 0x15b   :  { %5733 = vmatpush.bf16.msra.mxu3 %v9638_v62  ;;  %v10870_v62 = vld [vmem:[%s16619_s1 + $0x1774] sm:$0xf0]  ;;  %v9806_v53 = vor.u32 %v10854_v6, %v9805_v19  ;;  %16670 = vst [vmem:[#allocation27_spill] sm:$0xff] %v13569_v52  ;;  %v10852_v11 = vld [vmem:[%s16619_s1 + $0x16e4] sm:$0xf0]  ;;  %v13594_v20 = vor.u32 %v10090_v30, %v6839_v18 }
 0x15c   :  { %5692 = vmatpush.bf16.msra.mxu0 %v9438_v7  ;;  %v10089_v7 = vld [vmem:[%s16620_s0 + $0xa4] sm:$0xf]  ;;  %v9861_v19 = vld [vmem:[%s16619_s1 + $0x1760] sm:$0xf]  ;;  %v10868_v6 = vld [vmem:[%s16619_s1 + $0x1764] sm:$0xf0] }
 0x15d   :  { %5706 = vmatpush.bf16.msra.mxu1 %v9502_v15  ;;  %v9870_v15 = vor.u32 %v10870_v62, %v9869_v8  ;;  %v13580_v8 = vpop.f32.mrf.mxu0  ;;  %v13582_v62 = vor.u32 %v10115_v0, %v6837_v37  ;;  %v13584_v61 = vor.u32 %v10089_v7, %v6831_v22  ;;  %v9925_v13 = vld [vmem:[%s16619_s1 + $0x17e0] sm:$0xf]  ;;  %16674 = vst [vmem:[#allocation31_spill] sm:$0xff] %v13592_v63  ;;  %v9725_v0 = vld [vmem:[%s16619_s1 + $0x1650] sm:$0xf] }
 0x15e   :  { %5720 = vmatpush.bf16.msra.mxu2 %v9566_v54  ;;  %v9797_v54 = vld [vmem:[%s16619_s1 + $0x16e0] sm:$0xf]  ;;  %16671 = vst [vmem:[#allocation28_spill] sm:$0xff] %v13580_v8  ;;  %v9862_v37 = vor.u32 %v10868_v6, %v9861_v19  ;;  %v10834_v7 = vld [vmem:[%s16619_s1 + $0x1654] sm:$0xf0]  ;;  %v13633_v6 = vpop.f32.mrf.mxu2 }
 0x15f   :  { %5734 = vmatpush.bf16.msra.mxu3 %v9630_v14  ;;  %v9733_v14 = vld [vmem:[%s16619_s1 + $0x1660] sm:$0xf]  ;;  %16672 = vst [vmem:[#allocation29_spill] sm:$0xff] %v13582_v62  ;;  %v10850_v22 = vld [vmem:[%s16619_s1 + $0x16d4] sm:$0xf0] }
 0x160   :  { %5693 = vmatpush.bf16.msra.mxu0 %v9430_v50  ;;  %16673 = vst [vmem:[#allocation30_spill] sm:$0xff] %v13584_v61  ;;  %v10884_v50 = vld [vmem:[%s16619_s1 + $0x17e4] sm:$0xf0]  ;;  %v9853_v30 = vld [vmem:[%s16619_s1 + $0x1750] sm:$0xf] }
 0x161   :  { %5707 = vmatpush.bf16.msra.mxu1 %v9494_v57  ;;  %16675 = vst [vmem:[#allocation32_spill] sm:$0xff] %v13594_v20  ;;  %v9734_v57 = vor.u32 %v10836_v49, %v9733_v14  ;;  %v10866_v18 = vld [vmem:[%s16619_s1 + $0x1754] sm:$0xf0]  ;;  %v9726_v14 = vor.u32 %v10834_v7, %v9725_v0  ;;  %v9781_v19 = vld [vmem:[%s16619_s1 + $0x16c0] sm:$0xf] }
 0x162   :  { %5721 = vmatpush.bf16.msra.mxu2 %v9558_v29  ;;  %v9798_v29 = vor.u32 %v10852_v11, %v9797_v54  ;;  %v9854_v54 = vor.u32 %v10866_v18, %v9853_v30  ;;  %v10832_v11 = vld [vmem:[%s16619_s1 + $0x1644] sm:$0xf0]  ;;  %16676 = vst [vmem:[#allocation33_spill] sm:$0xff] %v13633_v6  ;;  %v9909_v7 = vld [vmem:[%s16619_s1 + $0x17c0] sm:$0xf]  ;;  %v5485_v30 = vpop.f32.mrf.mxu1 }
 0x163   :  { %5735 = vmatpush.bf16.msra.mxu3 %v9622_v28  ;;  %v9789_v28 = vld [vmem:[%s16619_s1 + $0x16d0] sm:$0xf]  ;;  %5694 = vmatmul.bf16.vlgmr.msra.gmra.mxu0 %v13569_v52  ;;  %v10116_v6 = vld [vmem:[%s16620_s0 + $0x174] sm:$0xf0] }
 0x164   :  { %5742 = vmatpush.bf16.msrb.mxu0 %v9742_v42  ;;  %v9926_v42 = vor.u32 %v10884_v50, %v9925_v13  ;;  %5708 = vmatmul.bf16.vlgmr.msra.gmra.mxu1 %v13584_v61  ;;  %v9790_v49 = vor.u32 %v10850_v22, %v9789_v28  ;;  %v10848_v50 = vld [vmem:[%s16619_s1 + $0x16c4] sm:$0xf0] }
 0x165   :  { %5756 = vmatpush.bf16.msrb.mxu1 %v9806_v53  ;;  %5722 = vmatmul.bf16.vlgmr.msra.gmra.mxu2 %v13582_v62  ;;  %v9917_v53 = vld [vmem:[%s16619_s1 + $0x17d0] sm:$0xf]  ;;  %v5471_v0 = vpop.f32.mrf.mxu0  ;;  %v10880_v28 = vld [vmem:[%s16619_s1 + $0x17c4] sm:$0xf0]  ;;  %v9782_v18 = vor.u32 %v10848_v50, %v9781_v19 }
 0x166   :  { %5770 = vmatpush.bf16.msrb.mxu2 %v9870_v15  ;;  %v10882_v15 = vld [vmem:[%s16619_s1 + $0x17d4] sm:$0xf0]  ;;  %5736 = vmatmul.bf16.vlgmr.msra.gmra.mxu3 %v13594_v20  ;;  %v9901_v19 = vld [vmem:[%s16619_s1 + $0x17b0] sm:$0xf] }
 0x167   :  { %5784 = vmatpush.bf16.msrb.mxu3 %v9934_v23  ;;  %v9717_v23 = vld [vmem:[%s16619_s1 + $0x1640] sm:$0xf]  ;;  %v9918_v13 = vor.u32 %v10882_v15, %v9917_v53  ;;  %v9709_v15 = vld [vmem:[%s16619_s1 + $0x1630] sm:$0xf]  ;;  %v10830_v20 = vld [vmem:[%s16619_s1 + $0x1634] sm:$0xf0] }
 0x168   :  { %5743 = vmatpush.bf16.msrb.mxu0 %v9734_v57  ;;  %v9845_v57 = vld [vmem:[%s16619_s1 + $0x1740] sm:$0xf]  ;;  %v9718_v22 = vor.u32 %v10832_v11, %v9717_v23  ;;  %v10862_v11 = vld [vmem:[%s16619_s1 + $0x1734] sm:$0xf0]  ;;  %v9710_v50 = vor.u32 %v10830_v20, %v9709_v15  ;;  %v10844_v20 = vld [vmem:[%s16619_s1 + $0x16a4] sm:$0xf0] }
 0x169   :  { %5757 = vmatpush.bf16.msrb.mxu1 %v9798_v29  ;;  %v10864_v29 = vld [vmem:[%s16619_s1 + $0x1744] sm:$0xf0]  ;;  %v9997_v62 = vld [vmem:[%s16619_s1 + $0x1870] sm:$0xf] }
 0x16a   :  { %5771 = vmatpush.bf16.msrb.mxu2 %v9862_v37  ;;  %v13644_v37 = vpop.f32.mrf.mxu3  ;;  %v9846_v53 = vor.u32 %v10864_v29, %v9845_v57 }
 0x16b   :  { %5785 = vmatpush.bf16.msrb.mxu3 %v9926_v42  ;;  %16677 = vst [vmem:[#allocation34_spill] sm:$0xff] %v13644_v37  ;;  %v5472_v42 = vadd.f32 %v5471_v0, %v13465_v12  ;;  %v9910_v12 = vor.u32 %v10880_v28, %v9909_v7  ;;  %v9701_v0 = vld [vmem:[%s16619_s1 + $0x1620] sm:$0xf]  ;;  %v10828_v7 = vld [vmem:[%s16619_s1 + $0x1624] sm:$0xf0] }
 0x16c   :  { %5744 = vmatpush.bf16.msrb.mxu0 %v9726_v14  ;;  %v9773_v14 = vld [vmem:[%s16619_s1 + $0x16b0] sm:$0xf]  ;;  %v9765_v28 = vld [vmem:[%s16619_s1 + $0x16a0] sm:$0xf] }
 0x16d   :  { %5758 = vmatpush.bf16.msrb.mxu1 %v9790_v49  ;;  %v5486_v23 = vadd.f32 %v5485_v30, %v5472_v42  ;;  %v10846_v49 = vld [vmem:[%s16619_s1 + $0x16b4] sm:$0xf0]  ;;  %v9829_v30 = vld [vmem:[%s16619_s1 + $0x1720] sm:$0xf] }
 0x16e   :  { %5772 = vmatpush.bf16.msrb.mxu2 %v9854_v54  ;;  %v9837_v54 = vld [vmem:[%s16619_s1 + $0x1730] sm:$0xf]  ;;  %v9774_v57 = vor.u32 %v10846_v49, %v9773_v14  ;;  %v9893_v14 = vld [vmem:[%s16619_s1 + $0x17a0] sm:$0xf]  ;;  %v9702_v49 = vor.u32 %v10828_v7, %v9701_v0 }
 0x16f   :  { %5786 = vmatpush.bf16.msrb.mxu3 %v9918_v13  ;;  %v10878_v13 = vld [vmem:[%s16619_s1 + $0x17b4] sm:$0xf0]  ;;  %v9838_v29 = vor.u32 %v10862_v11, %v9837_v54  ;;  %v9693_v54 = vld [vmem:[%s16619_s1 + $0x1610] sm:$0xf] }
 0x170   :  { %5745 = vmatpush.bf16.msrb.mxu0 %v9718_v22  ;;  %v9902_v42 = vor.u32 %v10878_v13, %v9901_v19  ;;  %v5499_v22 = vpop.f32.mrf.mxu2  ;;  %v10826_v13 = vld [vmem:[%s16619_s1 + $0x1614] sm:$0xf0]  ;;  %v9885_v7 = vld [vmem:[%s16619_s1 + $0x1790] sm:$0xf] }
 0x171   :  { %5759 = vmatpush.bf16.msrb.mxu1 %v9782_v18  ;;  %v10860_v18 = vld [vmem:[%s16619_s1 + $0x1724] sm:$0xf0] }
 0x172   :  { %5773 = vmatpush.bf16.msrb.mxu2 %v9846_v53  ;;  %v5500_v53 = vadd.f32 %v5499_v22, %v5486_v23  ;;  %v5513_v15 = vpop.f32.mrf.mxu3  ;;  %v9766_v23 = vor.u32 %v10844_v20, %v9765_v28  ;;  %v9830_v19 = vor.u32 %v10860_v18, %v9829_v30  ;;  %v9757_v22 = vld [vmem:[%s16619_s1 + $0x1690] sm:$0xf]  ;;  %v10874_v28 = vld [vmem:[%s16619_s1 + $0x1794] sm:$0xf0]  ;;  %v10824_v20 = vld [vmem:[%s16619_s1 + $0x1604] sm:$0xf0]  ;;  %v9694_v30 = vor.u32 %v10826_v13, %v9693_v54 }
 0x173   :  { %5787 = vmatpush.bf16.msrb.mxu3 %v9910_v12  ;;  %v10876_v12 = vld [vmem:[%s16619_s1 + $0x17a4] sm:$0xf0]  ;;  %v9749_v18 = vld [vmem:[%s16619_s1 + $0x1680] sm:$0xf]  ;;  %v9886_v37 = vor.u32 %v10874_v28, %v9885_v7  ;;  %v6991_v7 = vld [vmem:[%s16619_s1 + $0xf8] sm:$0xf0] }
 0x174   :  { %5746 = vmatpush.bf16.msrb.mxu0 %v9710_v50  ;;  %v13704_v11 = vadd.f32 %v5513_v15, %v5500_v53  ;;  %v10842_v50 = vld [vmem:[%s16619_s1 + $0x1694] sm:$0xf0]  ;;  %v9894_v0 = vor.u32 %v10876_v12, %v9893_v14  ;;  %v10840_v53 = vld [vmem:[%s16619_s1 + $0x1684] sm:$0xf0]  ;;  %v9813_v15 = vld [vmem:[%s16619_s1 + $0x1700] sm:$0xf] }
 0x175   :  { %5760 = vmatpush.bf16.msrb.mxu1 %v9774_v57  ;;  %v9821_v57 = vld [vmem:[%s16619_s1 + $0x1710] sm:$0xf]  ;;  %v10856_v14 = vld [vmem:[%s16619_s1 + $0x1704] sm:$0xf0]  ;;  %v9758_v12 = vor.u32 %v10842_v50, %v9757_v22  ;;  %v9877_v54 = vld [vmem:[%s16619_s1 + $0x1780] sm:$0xf]  ;;  %v9750_v61 = vor.u32 %v10840_v53, %v9749_v18 }
 0x176   :  { %5774 = vmatpush.bf16.msrb.mxu2 %v9838_v29  ;;  %v10858_v29 = vld [vmem:[%s16619_s1 + $0x1714] sm:$0xf0]  ;;  %v10872_v13 = vld [vmem:[%s16619_s1 + $0x1784] sm:$0xf0]  ;;  %v10133_v50 = vld [vmem:[%s16619_s1 + $0x74] sm:$0xf]  ;;  %v9814_v52 = vor.u32 %v10856_v14, %v9813_v15 }
 0x177   :  { %5788 = vmatpush.bf16.msrb.mxu3 %v9902_v42  ;;  %v9685_v42 = vld [vmem:[%s16619_s1 + $0x1600] sm:$0xf]  ;;  %v10918_v22 = vld [vmem:[%s16619_s1 + $0x18f4] sm:$0xf0]  ;;  %v6845_v28 = vld [vmem:[%s16620_s0 + $0xb0] sm:$0xf]  ;;  %v9878_v63 = vor.u32 %v10872_v13, %v9877_v54 }
 0x178   :  { %5747 = vmatpush.bf16.msrb.mxu0 %v9702_v49  ;;  %v9822_v49 = vor.u32 %v10858_v29, %v9821_v57  ;;  %v10149_v57 = vld [vmem:[%s16619_s1 + $0xf4] sm:$0xf]  ;;  %v9686_v29 = vor.u32 %v10824_v20, %v9685_v42  ;;  %v6853_v42 = vld [vmem:[%s16620_s0 + $0xb8] sm:$0xf]  ;;  %v10117_v20 = vld [vmem:[%s16620_s0 + $0x17c] sm:$0xf0]  ;;  %v13808_v13 = vor.u32 %v10116_v6, %v6845_v28 }
 0x179   :  { %5761 = vmatpush.bf16.msrb.mxu1 %v9766_v23  ;;  %v10902_v23 = vld [vmem:[%s16619_s1 + $0x1874] sm:$0xf0]  ;;  %v6847_v18 = vld [vmem:[%s16620_s0 + $0x178] sm:$0xf0]  ;;  %v6855_v15 = vld [vmem:[%s16620_s0 + $0x180] sm:$0xf0]  ;;  %v6994_v54 = vor.u32 %v10149_v57, %v6991_v7  ;;  %v13831_v7 = vpop.f32.mrf.mxu1 }
 0x17a   :  { %5775 = vmatpush.bf16.msrb.mxu2 %v9830_v19  ;;  %v10061_v19 = vld [vmem:[%s16619_s1 + $0x18f0] sm:$0xf]  ;;  %v9998_v8 = vor.u32 %v10902_v23, %v9997_v62  ;;  %v10092_v53 = vld [vmem:[%s16620_s0 + $0xbc] sm:$0xf]  ;;  %v10900_v62 = vld [vmem:[%s16619_s1 + $0x1864] sm:$0xf0] }
 0x17b   :  { %5789 = vmatpush.bf16.msrb.mxu3 %v9894_v0  ;;  %v6927_v0 = vld [vmem:[%s16619_s1 + $0x78] sm:$0xf0]  ;;  %v10062_v14 = vor.u32 %v10918_v22, %v10061_v19  ;;  %16678 = vst [vmem:[#allocation35_spill] sm:$0xff] %v13808_v13  ;;  %v10916_v23 = vld [vmem:[%s16619_s1 + $0x18e4] sm:$0xf0]  ;;  %v13833_v28 = vor.u32 %v10092_v53, %v6855_v15 }
 0x17c   :  { %5748 = vmatpush.bf16.msrb.mxu0 %v9694_v30  ;;  %v10091_v30 = vld [vmem:[%s16620_s0 + $0xb4] sm:$0xf]  ;;  %v10131_v19 = vld [vmem:[%s16619_s1 + $0x64] sm:$0xf]  ;;  %v6919_v22 = vld [vmem:[%s16619_s1 + $0x68] sm:$0xf0] }
 0x17d   :  { %5762 = vmatpush.bf16.msrb.mxu1 %v9758_v12  ;;  %v6930_v12 = vor.u32 %v10133_v50, %v6927_v0  ;;  %v13819_v50 = vpop.f32.mrf.mxu0  ;;  %v13821_v0 = vor.u32 %v10117_v20, %v6853_v42  ;;  %v13823_v6 = vor.u32 %v10091_v30, %v6847_v18  ;;  %v10147_v57 = vld [vmem:[%s16619_s1 + $0xe4] sm:$0xf]  ;;  %16681 = vst [vmem:[#allocation38_spill] sm:$0xff] %v13833_v28  ;;  %v9981_v20 = vld [vmem:[%s16619_s1 + $0x1850] sm:$0xf] }
 0x17e   :  { %5776 = vmatpush.bf16.msrb.mxu2 %v9822_v49  ;;  %v10053_v49 = vld [vmem:[%s16619_s1 + $0x18e0] sm:$0xf]  ;;  %v6922_v42 = vor.u32 %v10131_v19, %v6919_v22  ;;  %v10898_v30 = vld [vmem:[%s16619_s1 + $0x1854] sm:$0xf0]  ;;  %v10129_v53 = vld [vmem:[%s16619_s1 + $0x54] sm:$0xf]  ;;  %v13872_v22 = vpop.f32.mrf.mxu2 }
 0x17f   :  { %5790 = vmatpush.bf16.msrb.mxu3 %v9886_v37  ;;  %v9989_v37 = vld [vmem:[%s16619_s1 + $0x1860] sm:$0xf]  ;;  %16679 = vst [vmem:[#allocation36_spill] sm:$0xff] %v13821_v0  ;;  %v10914_v18 = vld [vmem:[%s16619_s1 + $0x18d4] sm:$0xf0] }
 0x180   :  { %5749 = vmatpush.bf16.msrb.mxu0 %v9686_v29  ;;  %16680 = vst [vmem:[#allocation37_spill] sm:$0xff] %v13823_v6  ;;  %v6983_v29 = vld [vmem:[%s16619_s1 + $0xe8] sm:$0xf0]  ;;  %v6911_v15 = vld [vmem:[%s16619_s1 + $0x58] sm:$0xf0] }
 0x181   :  { %5763 = vmatpush.bf16.msrb.mxu1 %v9750_v61  ;;  %v9990_v61 = vor.u32 %v10900_v62, %v9989_v37  ;;  %v9982_v37 = vor.u32 %v10898_v30, %v9981_v20  ;;  %v10037_v19 = vld [vmem:[%s16619_s1 + $0x18c0] sm:$0xf]  ;;  %v10143_v30 = vld [vmem:[%s16619_s1 + $0xc4] sm:$0xf] }
 0x182   :  { %5777 = vmatpush.bf16.msrb.mxu2 %v9814_v52  ;;  %v10054_v52 = vor.u32 %v10916_v23, %v10053_v49  ;;  %v6914_v49 = vor.u32 %v10129_v53, %v6911_v15  ;;  %v10896_v23 = vld [vmem:[%s16619_s1 + $0x1844] sm:$0xf0]  ;;  %v5541_v53 = vpop.f32.mrf.mxu1 }
 0x183   :  { %5791 = vmatpush.bf16.msrb.mxu3 %v9878_v63  ;;  %v10045_v63 = vld [vmem:[%s16619_s1 + $0x18d0] sm:$0xf]  ;;  %5750 = vmatmul.bf16.vlgmr.msrb.gmra.mxu0 %v13808_v13 }
 0x184   :  { %5798 = vmatpush.bf16.msra.mxu0 %v9998_v8  ;;  %v6986_v8 = vor.u32 %v10147_v57, %v6983_v29  ;;  %5764 = vmatmul.bf16.vlgmr.msrb.gmra.mxu1 %v13823_v6  ;;  %v10046_v62 = vor.u32 %v10914_v18, %v10045_v63  ;;  %v10912_v29 = vld [vmem:[%s16619_s1 + $0x18c4] sm:$0xf0]  ;;  %v6967_v63 = vld [vmem:[%s16619_s1 + $0xc8] sm:$0xf0] }
 0x185   :  { %5812 = vmatpush.bf16.msra.mxu1 %v10062_v14  ;;  %5778 = vmatmul.bf16.vlgmr.msrb.gmra.mxu2 %v13821_v0  ;;  %v10145_v14 = vld [vmem:[%s16619_s1 + $0xd4] sm:$0xf]  ;;  %v5527_v20 = vpop.f32.mrf.mxu0  ;;  %v10038_v15 = vor.u32 %v10912_v29, %v10037_v19 }
 0x186   :  { %5826 = vmatpush.bf16.msra.mxu2 %v6930_v12  ;;  %v6975_v12 = vld [vmem:[%s16619_s1 + $0xd8] sm:$0xf0]  ;;  %5792 = vmatmul.bf16.vlgmr.msrb.gmra.mxu3 %v13833_v28  ;;  %v10894_v28 = vld [vmem:[%s16619_s1 + $0x1834] sm:$0xf0]  ;;  %v10141_v19 = vld [vmem:[%s16619_s1 + $0xb4] sm:$0xf] }
 0x187   :  { %5840 = vmatpush.bf16.msra.mxu3 %v6994_v54  ;;  %v9973_v54 = vld [vmem:[%s16619_s1 + $0x1840] sm:$0xf]  ;;  %v6978_v57 = vor.u32 %v10145_v14, %v6975_v12  ;;  %v9965_v12 = vld [vmem:[%s16619_s1 + $0x1830] sm:$0xf] }
 0x188   :  { %5799 = vmatpush.bf16.msra.mxu0 %v9990_v61  ;;  %v10127_v61 = vld [vmem:[%s16619_s1 + $0x44] sm:$0xf]  ;;  %v9974_v18 = vor.u32 %v10896_v23, %v9973_v54  ;;  %v6895_v23 = vld [vmem:[%s16619_s1 + $0x38] sm:$0xf0]  ;;  %v9966_v29 = vor.u32 %v10894_v28, %v9965_v12  ;;  %v10908_v28 = vld [vmem:[%s16619_s1 + $0x18a4] sm:$0xf0] }
 0x189   :  { %5813 = vmatpush.bf16.msra.mxu1 %v10054_v52  ;;  %v6903_v52 = vld [vmem:[%s16619_s1 + $0x48] sm:$0xf0] }
 0x18a   :  { %5827 = vmatpush.bf16.msra.mxu2 %v6922_v42  ;;  %v13883_v42 = vpop.f32.mrf.mxu3  ;;  %v6906_v14 = vor.u32 %v10127_v61, %v6903_v52 }
 0x18b   :  { %5841 = vmatpush.bf16.msra.mxu3 %v6986_v8  ;;  %16682 = vst [vmem:[#allocation39_spill] sm:$0xff] %v13883_v42  ;;  %v5528_v8 = vadd.f32 %v5527_v20, %v13704_v11  ;;  %v6970_v11 = vor.u32 %v10143_v30, %v6967_v63  ;;  %v9957_v20 = vld [vmem:[%s16619_s1 + $0x1820] sm:$0xf]  ;;  %v10892_v30 = vld [vmem:[%s16619_s1 + $0x1824] sm:$0xf0] }
 0x18c   :  { %5800 = vmatpush.bf16.msra.mxu0 %v9982_v37  ;;  %v10029_v37 = vld [vmem:[%s16619_s1 + $0x18b0] sm:$0xf]  ;;  %v10021_v63 = vld [vmem:[%s16619_s1 + $0x18a0] sm:$0xf] }
 0x18d   :  { %5814 = vmatpush.bf16.msra.mxu1 %v10046_v62  ;;  %v5542_v54 = vadd.f32 %v5541_v53, %v5528_v8  ;;  %v10910_v62 = vld [vmem:[%s16619_s1 + $0x18b4] sm:$0xf0]  ;;  %v10123_v53 = vld [vmem:[%s16619_s1 + $0x24] sm:$0xf] }
 0x18e   :  { %5828 = vmatpush.bf16.msra.mxu2 %v6914_v49  ;;  %v10125_v49 = vld [vmem:[%s16619_s1 + $0x34] sm:$0xf]  ;;  %v10030_v61 = vor.u32 %v10910_v62, %v10029_v37  ;;  %v10139_v37 = vld [vmem:[%s16619_s1 + $0xa4] sm:$0xf]  ;;  %v9958_v62 = vor.u32 %v10892_v30, %v9957_v20  ;;  %v6879_v20 = vld [vmem:[%s16619_s1 + $0x18] sm:$0xf0] }
 0x18f   :  { %5842 = vmatpush.bf16.msra.mxu3 %v6978_v57  ;;  %v6959_v57 = vld [vmem:[%s16619_s1 + $0xb8] sm:$0xf0]  ;;  %v6898_v52 = vor.u32 %v10125_v49, %v6895_v23  ;;  %v10022_v23 = vor.u32 %v10908_v28, %v10021_v63  ;;  %v10137_v30 = vld [vmem:[%s16619_s1 + $0x94] sm:$0xf]  ;;  %v9941_v28 = vld [vmem:[%s16619_s1 + $0x1800] sm:$0xf] }
 0x190   :  { %5801 = vmatpush.bf16.msra.mxu0 %v9974_v18  ;;  %v6962_v8 = vor.u32 %v10141_v19, %v6959_v57  ;;  %v5555_v18 = vpop.f32.mrf.mxu2  ;;  %v10890_v57 = vld [vmem:[%s16619_s1 + $0x1814] sm:$0xf0]  ;;  %v6943_v63 = vld [vmem:[%s16619_s1 + $0x98] sm:$0xf0] }
 0x191   :  { %5815 = vmatpush.bf16.msra.mxu1 %v10038_v15  ;;  %v6887_v15 = vld [vmem:[%s16619_s1 + $0x28] sm:$0xf0] }
 0x192   :  { %5829 = vmatpush.bf16.msra.mxu2 %v6906_v14  ;;  %v5556_v14 = vadd.f32 %v5555_v18, %v5542_v54  ;;  %v5569_v12 = vpop.f32.mrf.mxu3  ;;  %v6890_v19 = vor.u32 %v10123_v53, %v6887_v15  ;;  %v9949_v54 = vld [vmem:[%s16619_s1 + $0x1810] sm:$0xf]  ;;  %v10888_v53 = vld [vmem:[%s16619_s1 + $0x1804] sm:$0xf0]  ;;  %v10005_v15 = vld [vmem:[%s16619_s1 + $0x1880] sm:$0xf] }
 0x193   :  { %5843 = vmatpush.bf16.msra.mxu3 %v6970_v11  ;;  %v6951_v11 = vld [vmem:[%s16619_s1 + $0xa8] sm:$0xf0]  ;;  %v10013_v18 = vld [vmem:[%s16619_s1 + $0x1890] sm:$0xf] }
 0x194   :  { %5802 = vmatpush.bf16.msra.mxu0 %v9966_v29  ;;  %v13940_v49 = vadd.f32 %v5569_v12, %v5556_v14  ;;  %v6954_v29 = vor.u32 %v10139_v37, %v6951_v11  ;;  %v10904_v37 = vld [vmem:[%s16619_s1 + $0x1884] sm:$0xf0]  ;;  %v10119_v11 = vld [vmem:[%s16619_s1 + $0x4] sm:$0xf] }
 0x195   :  { %5816 = vmatpush.bf16.msra.mxu1 %v10030_v61  ;;  %v10906_v61 = vld [vmem:[%s16619_s1 + $0x1894] sm:$0xf0]  ;;  %v10006_v0 = vor.u32 %v10904_v37, %v10005_v15  ;;  %v10093_v15 = vld [vmem:[%s16620_s0 + $0xc4] sm:$0xf] }
 0x196   :  { %5830 = vmatpush.bf16.msra.mxu2 %v6898_v52  ;;  %v10121_v52 = vld [vmem:[%s16619_s1 + $0x14] sm:$0xf]  ;;  %v10014_v14 = vor.u32 %v10906_v61, %v10013_v18  ;;  %v7055_v18 = vld [vmem:[%s16619_s1 + $0x178] sm:$0xf0] }
 0x197   :  { %5844 = vmatpush.bf16.msra.mxu3 %v6962_v8  ;;  %v9950_v8 = vor.u32 %v10890_v57, %v9949_v54  ;;  %v6882_v12 = vor.u32 %v10121_v52, %v6879_v20  ;;  %v6946_v54 = vor.u32 %v10137_v30, %v6943_v63  ;;  %v10165_v57 = vld [vmem:[%s16619_s1 + $0x174] sm:$0xf]  ;;  %v7119_v61 = vld [vmem:[%s16619_s1 + $0x1f8] sm:$0xf0]  ;;  %v9942_v52 = vor.u32 %v10888_v53, %v9941_v28  ;;  %v6861_v28 = vld [vmem:[%s16620_s0 + $0xc0] sm:$0xf] }
 0x198   :  { %5803 = vmatpush.bf16.msra.mxu0 %v9958_v62  ;;  %v6871_v62 = vld [vmem:[%s16619_s1 + $0x8] sm:$0xf0]  ;;  %v10197_v20 = vld [vmem:[%s16619_s1 + $0x274] sm:$0xf]  ;;  %v7183_v30 = vld [vmem:[%s16619_s1 + $0x278] sm:$0xf0]  ;;  %v7058_v42 = vor.u32 %v10165_v57, %v7055_v18 }
 0x199   :  { %5817 = vmatpush.bf16.msra.mxu1 %v10022_v23  ;;  %v10135_v23 = vld [vmem:[%s16619_s1 + $0x84] sm:$0xf]  ;;  %v10213_v63 = vld [vmem:[%s16619_s1 + $0x2f4] sm:$0xf]  ;;  %v6874_v6 = vor.u32 %v10119_v11, %v6871_v62  ;;  %v10118_v53 = vld [vmem:[%s16620_s0 + $0x184] sm:$0xf0]  ;;  %v7186_v37 = vor.u32 %v10197_v20, %v7183_v30 }
 0x19a   :  { %5831 = vmatpush.bf16.msra.mxu2 %v6890_v19  ;;  %v6935_v19 = vld [vmem:[%s16619_s1 + $0x88] sm:$0xf0]  ;;  %v10163_v11 = vld [vmem:[%s16619_s1 + $0x164] sm:$0xf] }
 0x19b   :  { %5845 = vmatpush.bf16.msra.mxu3 %v6954_v29  ;;  %v10181_v29 = vld [vmem:[%s16619_s1 + $0x1f4] sm:$0xf]  ;;  %v6938_v13 = vor.u32 %v10135_v23, %v6935_v19  ;;  %v7047_v62 = vld [vmem:[%s16619_s1 + $0x168] sm:$0xf0]  ;;  %v14035_v19 = vor.u32 %v10118_v53, %v6861_v28  ;;  %v10195_v18 = vld [vmem:[%s16619_s1 + $0x264] sm:$0xf] }
 0x19c   :  { %5804 = vmatpush.bf16.msra.mxu0 %v9950_v8  ;;  %v7247_v8 = vld [vmem:[%s16619_s1 + $0x2f8] sm:$0xf0]  ;;  %v7111_v57 = vld [vmem:[%s16619_s1 + $0x1e8] sm:$0xf0]  ;;  %v10211_v20 = vld [vmem:[%s16619_s1 + $0x2e4] sm:$0xf] }
 0x19d   :  { %5818 = vmatpush.bf16.msra.mxu1 %v10014_v14  ;;  %v6863_v14 = vld [vmem:[%s16620_s0 + $0x188] sm:$0xf0]  ;;  %v7250_v23 = vor.u32 %v10213_v63, %v7247_v8  ;;  %16683 = vst [vmem:[#allocation40_spill] sm:$0xff] %v14035_v19  ;;  %v14056_v63 = vpop.f32.mrf.mxu1  ;;  %v7050_v8 = vor.u32 %v10163_v11, %v7047_v62  ;;  %v7039_v53 = vld [vmem:[%s16619_s1 + $0x158] sm:$0xf0] }
 0x19e   :  { %5832 = vmatpush.bf16.msra.mxu2 %v6882_v12  ;;  %v7122_v12 = vor.u32 %v10181_v29, %v7119_v61  ;;  %v7175_v29 = vld [vmem:[%s16619_s1 + $0x268] sm:$0xf0]  ;;  %v14046_v61 = vpop.f32.mrf.mxu0  ;;  %v7231_v11 = vld [vmem:[%s16619_s1 + $0x2d8] sm:$0xf0] }
 0x19f   :  { %5846 = vmatpush.bf16.msra.mxu3 %v6946_v54  ;;  %v10179_v54 = vld [vmem:[%s16619_s1 + $0x1e4] sm:$0xf]  ;;  %v7239_v30 = vld [vmem:[%s16619_s1 + $0x2e8] sm:$0xf0] }
 0x1a0   :  { %5805 = vmatpush.bf16.msra.mxu0 %v9942_v52  ;;  %v14048_v52 = vor.u32 %v10093_v15, %v6863_v14  ;;  %v7114_v28 = vor.u32 %v10179_v54, %v7111_v57  ;;  %v10177_v15 = vld [vmem:[%s16619_s1 + $0x1d4] sm:$0xf]  ;;  %v10159_v57 = vld [vmem:[%s16619_s1 + $0x144] sm:$0xf] }
 0x1a1   :  { %5819 = vmatpush.bf16.msra.mxu1 %v10006_v0  ;;  %v7178_v0 = vor.u32 %v10195_v18, %v7175_v29  ;;  %v10193_v14 = vld [vmem:[%s16619_s1 + $0x254] sm:$0xf]  ;;  %v7031_v18 = vld [vmem:[%s16619_s1 + $0x148] sm:$0xf0]  ;;  %v14095_v29 = vpop.f32.mrf.mxu2 }
 0x1a2   :  { %5833 = vmatpush.bf16.msra.mxu2 %v6874_v6  ;;  %16684 = vst [vmem:[#allocation41_spill] sm:$0xff] %v14048_v52  ;;  %v10161_v6 = vld [vmem:[%s16619_s1 + $0x154] sm:$0xf] }
 0x1a3   :  { %5847 = vmatpush.bf16.msra.mxu3 %v6938_v13  ;;  %5806 = vmatmul.bf16.vlgmr.msra.gmra.mxu0 %v14035_v19  ;;  %v7242_v13 = vor.u32 %v10211_v20, %v7239_v30  ;;  %v7042_v62 = vor.u32 %v10161_v6, %v7039_v53  ;;  %16685 = vst [vmem:[#allocation42_spill] sm:$0xff] %v14095_v29  ;;  %v7095_v20 = vld [vmem:[%s16619_s1 + $0x1c8] sm:$0xf0]  ;;  %v10191_v30 = vld [vmem:[%s16619_s1 + $0x244] sm:$0xf] }
 0x1a4   :  { %5854 = vmatpush.bf16.msrb.mxu0 %v7058_v42  ;;  %v7103_v42 = vld [vmem:[%s16619_s1 + $0x1d8] sm:$0xf0]  ;;  %5820 = vmatmul.bf16.vlgmr.msra.gmra.mxu1 %v14048_v52  ;;  %v10207_v6 = vld [vmem:[%s16619_s1 + $0x2c4] sm:$0xf]  ;;  %v7223_v53 = vld [vmem:[%s16619_s1 + $0x2c8] sm:$0xf0] }
 0x1a5   :  { %5868 = vmatpush.bf16.msrb.mxu1 %v7122_v12  ;;  %v7167_v12 = vld [vmem:[%s16619_s1 + $0x258] sm:$0xf0]  ;;  %5834 = vmatmul.bf16.vlgmr.msra.gmra.mxu2 %v11230_v58  ;;  %v7106_v54 = vor.u32 %v10177_v15, %v7103_v42  ;;  %v10175_v58 = vld [vmem:[%s16619_s1 + $0x1c4] sm:$0xf]  ;;  %v5597_v42 = vpop.f32.mrf.mxu1 }
 0x1a6   :  { %5882 = vmatpush.bf16.msrb.mxu2 %v7186_v37  ;;  %v10209_v37 = vld [vmem:[%s16619_s1 + $0x2d4] sm:$0xf]  ;;  %5848 = vmatmul.bf16.vlgmr.msra.gmra.mxu3 %v11266_v10 }
 0x1a7   :  { %5896 = vmatpush.bf16.msrb.mxu3 %v7250_v23  ;;  %v7170_v23 = vor.u32 %v10193_v14, %v7167_v12  ;;  %v7234_v10 = vor.u32 %v10209_v37, %v7231_v11  ;;  %v7098_v14 = vor.u32 %v10175_v58, %v7095_v20  ;;  %v10157_v37 = vld [vmem:[%s16619_s1 + $0x134] sm:$0xf]  ;;  %v7023_v11 = vld [vmem:[%s16619_s1 + $0x138] sm:$0xf0] }
 0x1a8   :  { %5855 = vmatpush.bf16.msrb.mxu0 %v7050_v8  ;;  %v7159_v8 = vld [vmem:[%s16619_s1 + $0x248] sm:$0xf0]  ;;  %v10205_v58 = vld [vmem:[%s16619_s1 + $0x2b4] sm:$0xf]  ;;  %v7026_v20 = vor.u32 %v10157_v37, %v7023_v11 }
 0x1a9   :  { %5869 = vmatpush.bf16.msrb.mxu1 %v7114_v28  ;;  %v14106_v28 = vpop.f32.mrf.mxu3  ;;  %v7162_v12 = vor.u32 %v10191_v30, %v7159_v8 }
 0x1aa   :  { %5883 = vmatpush.bf16.msrb.mxu2 %v7178_v0  ;;  %16686 = vst [vmem:[#allocation43_spill] sm:$0xff] %v14106_v28  ;;  %v5583_v0 = vpop.f32.mrf.mxu0 }
 0x1ab   :  { %5897 = vmatpush.bf16.msrb.mxu3 %v7242_v13  ;;  %v5584_v15 = vadd.f32 %v5583_v0, %v13940_v49  ;;  %v7034_v13 = vor.u32 %v10159_v57, %v7031_v18  ;;  %v7226_v49 = vor.u32 %v10207_v6, %v7223_v53  ;;  %v7151_v18 = vld [vmem:[%s16619_s1 + $0x238] sm:$0xf0]  ;;  %v10155_v0 = vld [vmem:[%s16619_s1 + $0x124] sm:$0xf]  ;;  %v7015_v6 = vld [vmem:[%s16619_s1 + $0x128] sm:$0xf0] }
 0x1ac   :  { %5856 = vmatpush.bf16.msrb.mxu0 %v7042_v62  ;;  %v10173_v62 = vld [vmem:[%s16619_s1 + $0x1b4] sm:$0xf]  ;;  %v10171_v53 = vld [vmem:[%s16619_s1 + $0x1a4] sm:$0xf] }
 0x1ad   :  { %5870 = vmatpush.bf16.msrb.mxu1 %v7106_v54  ;;  %v5598_v57 = vadd.f32 %v5597_v42, %v5584_v15  ;;  %v7087_v54 = vld [vmem:[%s16619_s1 + $0x1b8] sm:$0xf0]  ;;  %v7079_v42 = vld [vmem:[%s16619_s1 + $0x1a8] sm:$0xf0] }
 0x1ae   :  { %5884 = vmatpush.bf16.msrb.mxu2 %v7170_v23  ;;  %v10189_v23 = vld [vmem:[%s16619_s1 + $0x234] sm:$0xf]  ;;  %v7090_v30 = vor.u32 %v10173_v62, %v7087_v54  ;;  %v10203_v62 = vld [vmem:[%s16619_s1 + $0x2a4] sm:$0xf]  ;;  %v7018_v54 = vor.u32 %v10155_v0, %v7015_v6  ;;  %v7135_v0 = vld [vmem:[%s16619_s1 + $0x218] sm:$0xf0] }
 0x1af   :  { %5898 = vmatpush.bf16.msrb.mxu3 %v7234_v10  ;;  %v7215_v10 = vld [vmem:[%s16619_s1 + $0x2b8] sm:$0xf0]  ;;  %v7154_v8 = vor.u32 %v10189_v23, %v7151_v18  ;;  %v7082_v18 = vor.u32 %v10171_v53, %v7079_v42  ;;  %v10201_v6 = vld [vmem:[%s16619_s1 + $0x294] sm:$0xf]  ;;  %v10151_v42 = vld [vmem:[%s16619_s1 + $0x104] sm:$0xf] }
 0x1b0   :  { %5857 = vmatpush.bf16.msrb.mxu0 %v7034_v13  ;;  %v7218_v15 = vor.u32 %v10205_v58, %v7215_v10  ;;  %v5611_v13 = vpop.f32.mrf.mxu2  ;;  %v7007_v10 = vld [vmem:[%s16619_s1 + $0x118] sm:$0xf0] }
 0x1b1   :  { %5871 = vmatpush.bf16.msrb.mxu1 %v7098_v14  ;;  %v10187_v14 = vld [vmem:[%s16619_s1 + $0x224] sm:$0xf]  ;;  %v5612_v37 = vadd.f32 %v5611_v13, %v5598_v57  ;;  %v5625_v11 = vpop.f32.mrf.mxu3  ;;  %v10153_v57 = vld [vmem:[%s16619_s1 + $0x114] sm:$0xf]  ;;  %v7199_v53 = vld [vmem:[%s16619_s1 + $0x298] sm:$0xf0] }
 0x1b2   :  { %5885 = vmatpush.bf16.msrb.mxu2 %v7162_v12  ;;  %v7143_v12 = vld [vmem:[%s16619_s1 + $0x228] sm:$0xf0]  ;;  %v10169_v13 = vld [vmem:[%s16619_s1 + $0x194] sm:$0xf] }
 0x1b3   :  { %5899 = vmatpush.bf16.msrb.mxu3 %v7226_v49  ;;  %v7207_v49 = vld [vmem:[%s16619_s1 + $0x2a8] sm:$0xf0]  ;;  %v14163_v23 = vadd.f32 %v5625_v11, %v5612_v37  ;;  %v7146_v58 = vor.u32 %v10187_v14, %v7143_v12  ;;  %v10167_v11 = vld [vmem:[%s16619_s1 + $0x184] sm:$0xf] }
 0x1b4   :  { %5858 = vmatpush.bf16.msrb.mxu0 %v7026_v20  ;;  %v7210_v20 = vor.u32 %v10203_v62, %v7207_v49  ;;  %v6999_v14 = vld [vmem:[%s16619_s1 + $0x108] sm:$0xf0]  ;;  %v10183_v49 = vld [vmem:[%s16619_s1 + $0x204] sm:$0xf] }
 0x1b5   :  { %5872 = vmatpush.bf16.msrb.mxu1 %v7090_v30  ;;  %v7071_v30 = vld [vmem:[%s16619_s1 + $0x198] sm:$0xf0]  ;;  %v7063_v62 = vld [vmem:[%s16619_s1 + $0x188] sm:$0xf0] }
 0x1b6   :  { %5886 = vmatpush.bf16.msrb.mxu2 %v7154_v8  ;;  %v10185_v8 = vld [vmem:[%s16619_s1 + $0x214] sm:$0xf]  ;;  %v7074_v12 = vor.u32 %v10169_v13, %v7071_v30  ;;  %v7311_v13 = vld [vmem:[%s16619_s1 + $0x378] sm:$0xf0]  ;;  %v7002_v30 = vor.u32 %v10151_v42, %v6999_v14 }
 0x1b7   :  { %5900 = vmatpush.bf16.msrb.mxu3 %v7218_v15  ;;  %v7010_v15 = vor.u32 %v10153_v57, %v7007_v10  ;;  %v7138_v37 = vor.u32 %v10185_v8, %v7135_v0  ;;  %v7191_v57 = vld [vmem:[%s16619_s1 + $0x288] sm:$0xf0]  ;;  %v10229_v10 = vld [vmem:[%s16619_s1 + $0x374] sm:$0xf]  ;;  %v7375_v8 = vld [vmem:[%s16619_s1 + $0x3f8] sm:$0xf0] }
 0x1b8   :  { %5859 = vmatpush.bf16.msrb.mxu0 %v7018_v54  ;;  %v7202_v54 = vor.u32 %v10201_v6, %v7199_v53  ;;  %v10261_v0 = vld [vmem:[%s16619_s1 + $0x474] sm:$0xf]  ;;  %v7439_v6 = vld [vmem:[%s16619_s1 + $0x478] sm:$0xf0]  ;;  %v7066_v53 = vor.u32 %v10167_v11, %v7063_v62  ;;  %v7314_v19 = vor.u32 %v10229_v10, %v7311_v13  ;;  %v10243_v11 = vld [vmem:[%s16619_s1 + $0x3e4] sm:$0xf]  ;;  %v14263_v13 = vpop.f32.mrf.mxu1 }
 0x1b9   :  { %5873 = vmatpush.bf16.msrb.mxu1 %v7082_v18  ;;  %v7127_v18 = vld [vmem:[%s16619_s1 + $0x208] sm:$0xf0]  ;;  %v7503_v42 = vld [vmem:[%s16619_s1 + $0x4f8] sm:$0xf0]  ;;  %v7442_v29 = vor.u32 %v10261_v0, %v7439_v6  ;;  %v10241_v6 = vld [vmem:[%s16619_s1 + $0x3d4] sm:$0xf] }
 0x1ba   :  { %5887 = vmatpush.bf16.msrb.mxu2 %v7146_v58  ;;  %v10199_v58 = vld [vmem:[%s16619_s1 + $0x284] sm:$0xf]  ;;  %v7130_v52 = vor.u32 %v10183_v49, %v7127_v18  ;;  %v7367_v49 = vld [vmem:[%s16619_s1 + $0x3e8] sm:$0xf0]  ;;  %v7295_v0 = vld [vmem:[%s16619_s1 + $0x358] sm:$0xf0] }
 0x1bb   :  { %5901 = vmatpush.bf16.msrb.mxu3 %v7210_v20  ;;  %v10245_v20 = vld [vmem:[%s16619_s1 + $0x3f4] sm:$0xf]  ;;  %v7194_v14 = vor.u32 %v10199_v58, %v7191_v57  ;;  %v7431_v18 = vld [vmem:[%s16619_s1 + $0x468] sm:$0xf0]  ;;  %v14255_v58 = vpop.f32.mrf.mxu0  ;;  %v10275_v57 = vld [vmem:[%s16619_s1 + $0x4e4] sm:$0xf] }
 0x1bc   :  { %5860 = vmatpush.bf16.msrb.mxu0 %v7010_v15  ;;  %v10277_v15 = vld [vmem:[%s16619_s1 + $0x4f4] sm:$0xf]  ;;  %v7378_v28 = vor.u32 %v10245_v20, %v7375_v8  ;;  %v7495_v10 = vld [vmem:[%s16619_s1 + $0x4e8] sm:$0xf0] }
 0x1bd   :  { %5874 = vmatpush.bf16.msrb.mxu1 %v7074_v12  ;;  %v10227_v12 = vld [vmem:[%s16619_s1 + $0x364] sm:$0xf]  ;;  %v7506_v62 = vor.u32 %v10277_v15, %v7503_v42  ;;  %v7487_v15 = vld [vmem:[%s16619_s1 + $0x4d8] sm:$0xf0] }
 0x1be   :  { %5888 = vmatpush.bf16.msrb.mxu2 %v7138_v37  ;;  %v7303_v37 = vld [vmem:[%s16619_s1 + $0x368] sm:$0xf0] }
 0x1bf   :  { %5902 = vmatpush.bf16.msrb.mxu3 %v7202_v54  ;;  %v10259_v54 = vld [vmem:[%s16619_s1 + $0x464] sm:$0xf]  ;;  %v7306_v20 = vor.u32 %v10227_v12, %v7303_v37 }
 0x1c0   :  { %5861 = vmatpush.bf16.msrb.mxu0 %v7002_v30  ;;  %v7370_v30 = vor.u32 %v10243_v11, %v7367_v49  ;;  %v7434_v8 = vor.u32 %v10259_v54, %v7431_v18  ;;  %v10239_v37 = vld [vmem:[%s16619_s1 + $0x3c4] sm:$0xf]  ;;  %v14302_v11 = vpop.f32.mrf.mxu2  ;;  %v7415_v54 = vld [vmem:[%s16619_s1 + $0x448] sm:$0xf0]  ;;  %v14313_v18 = vpop.f32.mrf.mxu3 }
 0x1c1   :  { %5875 = vmatpush.bf16.msrb.mxu1 %v7066_v53  ;;  %v7423_v53 = vld [vmem:[%s16619_s1 + $0x458] sm:$0xf0]  ;;  %v10255_v49 = vld [vmem:[%s16619_s1 + $0x444] sm:$0xf] }
 0x1c2   :  { %5889 = vmatpush.bf16.msrb.mxu2 %v7130_v52  ;;  %v10225_v52 = vld [vmem:[%s16619_s1 + $0x354] sm:$0xf] }
 0x1c3   :  { %5903 = vmatpush.bf16.msrb.mxu3 %v7194_v14  ;;  %5862 = vmatmul.bf16.vlgmr.msrb.gmra.mxu0 %v11244_v1  ;;  %v10273_v1 = vld [vmem:[%s16619_s1 + $0x4d4] sm:$0xf]  ;;  %v7298_v42 = vor.u32 %v10225_v52, %v7295_v0  ;;  %v5653_v52 = vpop.f32.mrf.mxu1 }
 0x1c4   :  { %5910 = vmatpush.bf16.msra.mxu0 %v7314_v19  ;;  %v7498_v19 = vor.u32 %v10275_v57, %v7495_v10  ;;  %5876 = vmatmul.bf16.vlgmr.msrb.gmra.mxu1 %v11280_v17  ;;  %v10223_v17 = vld [vmem:[%s16619_s1 + $0x344] sm:$0xf]  ;;  %v5639_v57 = vpop.f32.mrf.mxu0 }
 0x1c5   :  { %5924 = vmatpush.bf16.msra.mxu1 %v7378_v28  ;;  %v10257_v28 = vld [vmem:[%s16619_s1 + $0x454] sm:$0xf]  ;;  %5890 = vmatmul.bf16.vlgmr.msrb.gmra.mxu2 %v11452_v39  ;;  %v7287_v39 = vld [vmem:[%s16619_s1 + $0x348] sm:$0xf0]  ;;  %v10271_v10 = vld [vmem:[%s16619_s1 + $0x4c4] sm:$0xf] }
 0x1c6   :  { %5938 = vmatpush.bf16.msra.mxu2 %v7442_v29  ;;  %v7359_v29 = vld [vmem:[%s16619_s1 + $0x3d8] sm:$0xf0]  ;;  %5904 = vmatmul.bf16.vlgmr.msrb.gmra.mxu3 %v11465_v44  ;;  %v7426_v12 = vor.u32 %v10257_v28, %v7423_v53  ;;  %v7490_v44 = vor.u32 %v10273_v1, %v7487_v15  ;;  %v10237_v28 = vld [vmem:[%s16619_s1 + $0x3b4] sm:$0xf] }
 0x1c7   :  { %5952 = vmatpush.bf16.msra.mxu3 %v7506_v62  ;;  %v7362_v14 = vor.u32 %v10241_v6, %v7359_v29  ;;  %v7351_v62 = vld [vmem:[%s16619_s1 + $0x3c8] sm:$0xf0]  ;;  %v7418_v6 = vor.u32 %v10255_v49, %v7415_v54  ;;  %v7279_v29 = vld [vmem:[%s16619_s1 + $0x338] sm:$0xf0]  ;;  %v10253_v15 = vld [vmem:[%s16619_s1 + $0x434] sm:$0xf] }
 0x1c8   :  { %5911 = vmatpush.bf16.msra.mxu0 %v7306_v20  ;;  %v7479_v20 = vld [vmem:[%s16619_s1 + $0x4c8] sm:$0xf0]  ;;  %v7354_v0 = vor.u32 %v10239_v37, %v7351_v62  ;;  %v7343_v1 = vld [vmem:[%s16619_s1 + $0x3b8] sm:$0xf0]  ;;  %v10235_v49 = vld [vmem:[%s16619_s1 + $0x3a4] sm:$0xf] }
 0x1c9   :  { %5925 = vmatpush.bf16.msra.mxu1 %v7370_v30  ;;  %v5640_v30 = vadd.f32 %v5639_v57, %v14163_v23  ;;  %v7482_v23 = vor.u32 %v10271_v10, %v7479_v20  ;;  %v7271_v62 = vld [vmem:[%s16619_s1 + $0x328] sm:$0xf0]  ;;  %v5667_v57 = vpop.f32.mrf.mxu2  ;;  %v10251_v20 = vld [vmem:[%s16619_s1 + $0x424] sm:$0xf] }
 0x1ca   :  { %5939 = vmatpush.bf16.msra.mxu2 %v7434_v8  ;;  %v7290_v8 = vor.u32 %v10223_v17, %v7287_v39  ;;  %v7346_v39 = vor.u32 %v10237_v28, %v7343_v1  ;;  %v7335_v10 = vld [vmem:[%s16619_s1 + $0x3a8] sm:$0xf0]  ;;  %v7263_v1 = vld [vmem:[%s16619_s1 + $0x318] sm:$0xf0] }
 0x1cb   :  { %5953 = vmatpush.bf16.msra.mxu3 %v7498_v19  ;;  %v10221_v19 = vld [vmem:[%s16619_s1 + $0x334] sm:$0xf]  ;;  %v5654_v53 = vadd.f32 %v5653_v52, %v5640_v30  ;;  %v7399_v30 = vld [vmem:[%s16619_s1 + $0x428] sm:$0xf0]  ;;  %v5681_v52 = vpop.f32.mrf.mxu3  ;;  %v7338_v28 = vor.u32 %v10235_v49, %v7335_v10  ;;  %v10231_v10 = vld [vmem:[%s16619_s1 + $0x384] sm:$0xf] }
 0x1cc   :  { %5912 = vmatpush.bf16.msra.mxu0 %v7298_v42  ;;  %v7407_v42 = vld [vmem:[%s16619_s1 + $0x438] sm:$0xf0]  ;;  %v7282_v17 = vor.u32 %v10221_v19, %v7279_v29  ;;  %v7255_v49 = vld [vmem:[%s16619_s1 + $0x308] sm:$0xf0] }
 0x1cd   :  { %5926 = vmatpush.bf16.msra.mxu1 %v7362_v14  ;;  %v10269_v14 = vld [vmem:[%s16619_s1 + $0x4b4] sm:$0xf]  ;;  %v7410_v37 = vor.u32 %v10253_v15, %v7407_v42 }
 0x1ce   :  { %5940 = vmatpush.bf16.msra.mxu2 %v7426_v12  ;;  %v7471_v12 = vld [vmem:[%s16619_s1 + $0x4b8] sm:$0xf0]  ;;  %v10233_v15 = vld [vmem:[%s16619_s1 + $0x394] sm:$0xf] }
 0x1cf   :  { %5954 = vmatpush.bf16.msra.mxu3 %v7490_v44  ;;  %v10219_v44 = vld [vmem:[%s16619_s1 + $0x324] sm:$0xf]  ;;  %v7474_v54 = vor.u32 %v10269_v14, %v7471_v12  ;;  %v7327_v14 = vld [vmem:[%s16619_s1 + $0x398] sm:$0xf0]  ;;  %v10249_v12 = vld [vmem:[%s16619_s1 + $0x414] sm:$0xf] }
 0x1d0   :  { %5913 = vmatpush.bf16.msra.mxu0 %v7290_v8  ;;  %v5668_v8 = vadd.f32 %v5667_v57, %v5654_v53  ;;  %v7274_v19 = vor.u32 %v10219_v44, %v7271_v62  ;;  %v10217_v53 = vld [vmem:[%s16619_s1 + $0x314] sm:$0xf]  ;;  %v10215_v62 = vld [vmem:[%s16619_s1 + $0x304] sm:$0xf] }
 0x1d1   :  { %5927 = vmatpush.bf16.msra.mxu1 %v7354_v0  ;;  %v10267_v0 = vld [vmem:[%s16619_s1 + $0x4a4] sm:$0xf]  ;;  %v7266_v44 = vor.u32 %v10217_v53, %v7263_v1  ;;  %v7258_v53 = vor.u32 %v10215_v62, %v7255_v49  ;;  %v7631_v1 = vld [vmem:[%s16619_s1 + $0x5f8] sm:$0xf0] }
 0x1d2   :  { %5941 = vmatpush.bf16.msra.mxu2 %v7418_v6  ;;  %v7463_v6 = vld [vmem:[%s16619_s1 + $0x4a8] sm:$0xf0]  ;;  %v14370_v29 = vadd.f32 %v5681_v52, %v5668_v8 }
 0x1d3   :  { %5955 = vmatpush.bf16.msra.mxu3 %v7482_v23  ;;  %v7402_v23 = vor.u32 %v10251_v20, %v7399_v30  ;;  %v7466_v42 = vor.u32 %v10267_v0, %v7463_v6  ;;  %v7319_v20 = vld [vmem:[%s16619_s1 + $0x388] sm:$0xf0]  ;;  %v10247_v30 = vld [vmem:[%s16619_s1 + $0x404] sm:$0xf] }
 0x1d4   :  { %5914 = vmatpush.bf16.msra.mxu0 %v7282_v17  ;;  %v7391_v17 = vld [vmem:[%s16619_s1 + $0x418] sm:$0xf0]  ;;  %v7383_v52 = vld [vmem:[%s16619_s1 + $0x408] sm:$0xf0]  ;;  %v10263_v0 = vld [vmem:[%s16619_s1 + $0x484] sm:$0xf] }
 0x1d5   :  { %5928 = vmatpush.bf16.msra.mxu1 %v7346_v39  ;;  %v10265_v39 = vld [vmem:[%s16619_s1 + $0x494] sm:$0xf]  ;;  %v7394_v57 = vor.u32 %v10249_v12, %v7391_v17  ;;  %v7447_v6 = vld [vmem:[%s16619_s1 + $0x488] sm:$0xf0]  ;;  %v7386_v12 = vor.u32 %v10247_v30, %v7383_v52 }
 0x1d6   :  { %5942 = vmatpush.bf16.msra.mxu2 %v7410_v37  ;;  %v7455_v37 = vld [vmem:[%s16619_s1 + $0x498] sm:$0xf0]  ;;  %v10341_v17 = vld [vmem:[%s16619_s1 + $0x6f4] sm:$0xf]  ;;  %v7623_v30 = vld [vmem:[%s16619_s1 + $0x5e8] sm:$0xf0] }
 0x1d7   :  { %5956 = vmatpush.bf16.msra.mxu3 %v7474_v54  ;;  %v7330_v54 = vor.u32 %v10233_v15, %v7327_v14  ;;  %v7458_v8 = vor.u32 %v10265_v39, %v7455_v37  ;;  %v10325_v15 = vld [vmem:[%s16619_s1 + $0x674] sm:$0xf]  ;;  %v7322_v14 = vor.u32 %v10231_v10, %v7319_v20  ;;  %v7759_v39 = vld [vmem:[%s16619_s1 + $0x6f8] sm:$0xf0]  ;;  %v7450_v37 = vor.u32 %v10263_v0, %v7447_v6  ;;  %v10307_v10 = vld [vmem:[%s16619_s1 + $0x5e4] sm:$0xf]  ;;  %v14462_v0 = vpop.f32.mrf.mxu0 }
 0x1d8   :  { %5915 = vmatpush.bf16.msra.mxu0 %v7274_v19  ;;  %v10293_v19 = vld [vmem:[%s16619_s1 + $0x574] sm:$0xf]  ;;  %v7762_v20 = vor.u32 %v10341_v17, %v7759_v39  ;;  %v7687_v52 = vld [vmem:[%s16619_s1 + $0x668] sm:$0xf0]  ;;  %v10339_v6 = vld [vmem:[%s16619_s1 + $0x6e4] sm:$0xf] }
 0x1d9   :  { %5929 = vmatpush.bf16.msra.mxu1 %v7338_v28  ;;  %v7567_v28 = vld [vmem:[%s16619_s1 + $0x578] sm:$0xf0]  ;;  %v10321_v39 = vld [vmem:[%s16619_s1 + $0x654] sm:$0xf] }
 0x1da   :  { %5943 = vmatpush.bf16.msra.mxu2 %v7402_v23  ;;  %v10309_v23 = vld [vmem:[%s16619_s1 + $0x5f4] sm:$0xf]  ;;  %v7615_v17 = vld [vmem:[%s16619_s1 + $0x5d8] sm:$0xf0] }
 0x1db   :  { %5957 = vmatpush.bf16.msra.mxu3 %v7466_v42  ;;  %v7695_v42 = vld [vmem:[%s16619_s1 + $0x678] sm:$0xf0]  ;;  %v7634_v62 = vor.u32 %v10309_v23, %v7631_v1 }
 0x1dc   :  { %5916 = vmatpush.bf16.msra.mxu0 %v7266_v44  ;;  %v7570_v44 = vor.u32 %v10293_v19, %v7567_v28  ;;  %v7698_v49 = vor.u32 %v10325_v15, %v7695_v42  ;;  %v7751_v19 = vld [vmem:[%s16619_s1 + $0x6e8] sm:$0xf0]  ;;  %v14470_v28 = vpop.f32.mrf.mxu1  ;;  %v10289_v15 = vld [vmem:[%s16619_s1 + $0x554] sm:$0xf]  ;;  %v7551_v42 = vld [vmem:[%s16619_s1 + $0x558] sm:$0xf0] }
 0x1dd   :  { %5930 = vmatpush.bf16.msra.mxu1 %v7330_v54  ;;  %v10291_v54 = vld [vmem:[%s16619_s1 + $0x564] sm:$0xf] }
 0x1de   :  { %5944 = vmatpush.bf16.msra.mxu2 %v7394_v57  ;;  %v7559_v57 = vld [vmem:[%s16619_s1 + $0x568] sm:$0xf0] }
 0x1df   :  { %5958 = vmatpush.bf16.msra.mxu3 %v7458_v8  ;;  %v10323_v8 = vld [vmem:[%s16619_s1 + $0x664] sm:$0xf]  ;;  %v7562_v23 = vor.u32 %v10291_v54, %v7559_v57 }
 0x1e0   :  { %5917 = vmatpush.bf16.msra.mxu0 %v7258_v53  ;;  %v7626_v53 = vor.u32 %v10307_v10, %v7623_v30  ;;  %v7690_v1 = vor.u32 %v10323_v8, %v7687_v52  ;;  %v10303_v57 = vld [vmem:[%s16619_s1 + $0x5c4] sm:$0xf]  ;;  %v14509_v10 = vpop.f32.mrf.mxu2  ;;  %v7671_v8 = vld [vmem:[%s16619_s1 + $0x648] sm:$0xf0]  ;;  %v14520_v52 = vpop.f32.mrf.mxu3 }
 0x1e1   :  { %5931 = vmatpush.bf16.msra.mxu1 %v7322_v14  ;;  %v10305_v14 = vld [vmem:[%s16619_s1 + $0x5d4] sm:$0xf]  ;;  %v10319_v30 = vld [vmem:[%s16619_s1 + $0x644] sm:$0xf] }
 0x1e2   :  { %5945 = vmatpush.bf16.msra.mxu2 %v7386_v12  ;;  %v7754_v12 = vor.u32 %v10339_v6, %v7751_v19  ;;  %v5695_v6 = vpop.f32.mrf.mxu0  ;;  %v10335_v19 = vld [vmem:[%s16619_s1 + $0x6c4] sm:$0xf] }
 0x1e3   :  { %5959 = vmatpush.bf16.msra.mxu3 %v7450_v37  ;;  %5918 = vmatmul.bf16.vlgmr.msra.gmra.mxu0 %v11463_v43  ;;  %v7679_v37 = vld [vmem:[%s16619_s1 + $0x658] sm:$0xf0]  ;;  %v10337_v43 = vld [vmem:[%s16619_s1 + $0x6d4] sm:$0xf] }
 0x1e4   :  { %5966 = vmatpush.bf16.msrb.mxu0 %v7570_v44  ;;  %5932 = vmatmul.bf16.vlgmr.msra.gmra.mxu1 %v11473_v47  ;;  %v7743_v44 = vld [vmem:[%s16619_s1 + $0x6d8] sm:$0xf0]  ;;  %v7682_v54 = vor.u32 %v10321_v39, %v7679_v37  ;;  %v10287_v47 = vld [vmem:[%s16619_s1 + $0x544] sm:$0xf]  ;;  %v10301_v39 = vld [vmem:[%s16619_s1 + $0x5b4] sm:$0xf] }
 0x1e5   :  { %5980 = vmatpush.bf16.msrb.mxu1 %v7634_v62  ;;  %5946 = vmatmul.bf16.vlgmr.msra.gmra.mxu2 %v11680_v31  ;;  %v7554_v62 = vor.u32 %v10289_v15, %v7551_v42  ;;  %v7543_v31 = vld [vmem:[%s16619_s1 + $0x548] sm:$0xf0]  ;;  %v5709_v15 = vpop.f32.mrf.mxu1 }
 0x1e6   :  { %5994 = vmatpush.bf16.msrb.mxu2 %v7698_v49  ;;  %5960 = vmatmul.bf16.vlgmr.msra.gmra.mxu3 %v11693_v36  ;;  %v7618_v49 = vor.u32 %v10305_v14, %v7615_v17  ;;  %v7746_v36 = vor.u32 %v10337_v43, %v7743_v44  ;;  %v7674_v14 = vor.u32 %v10319_v30, %v7671_v8  ;;  %v7535_v17 = vld [vmem:[%s16619_s1 + $0x538] sm:$0xf0]  ;;  %v10317_v44 = vld [vmem:[%s16619_s1 + $0x634] sm:$0xf]  ;;  %v10299_v30 = vld [vmem:[%s16619_s1 + $0x5a4] sm:$0xf] }
 0x1e7   :  { %6008 = vmatpush.bf16.msrb.mxu3 %v7762_v20  ;;  %v7607_v20 = vld [vmem:[%s16619_s1 + $0x5c8] sm:$0xf0]  ;;  %v7599_v43 = vld [vmem:[%s16619_s1 + $0x5b8] sm:$0xf0] }
 0x1e8   :  { %5967 = vmatpush.bf16.msrb.mxu0 %v7562_v23  ;;  %v7735_v23 = vld [vmem:[%s16619_s1 + $0x6c8] sm:$0xf0]  ;;  %v7610_v42 = vor.u32 %v10303_v57, %v7607_v20 }
 0x1e9   :  { %5981 = vmatpush.bf16.msrb.mxu1 %v7626_v53  ;;  %v5696_v53 = vadd.f32 %v5695_v6, %v14370_v29  ;;  %v7738_v29 = vor.u32 %v10335_v19, %v7735_v23  ;;  %v7527_v20 = vld [vmem:[%s16619_s1 + $0x528] sm:$0xf0]  ;;  %v5723_v6 = vpop.f32.mrf.mxu2  ;;  %v10315_v23 = vld [vmem:[%s16619_s1 + $0x624] sm:$0xf] }
 0x1ea   :  { %5995 = vmatpush.bf16.msrb.mxu2 %v7690_v1  ;;  %v7546_v1 = vor.u32 %v10287_v47, %v7543_v31  ;;  %v7602_v31 = vor.u32 %v10301_v39, %v7599_v43  ;;  %v7591_v19 = vld [vmem:[%s16619_s1 + $0x5a8] sm:$0xf0]  ;;  %v7519_v43 = vld [vmem:[%s16619_s1 + $0x518] sm:$0xf0] }
 0x1eb   :  { %6009 = vmatpush.bf16.msrb.mxu3 %v7754_v12  ;;  %v10285_v12 = vld [vmem:[%s16619_s1 + $0x534] sm:$0xf]  ;;  %v5710_v37 = vadd.f32 %v5709_v15, %v5696_v53  ;;  %v7655_v53 = vld [vmem:[%s16619_s1 + $0x628] sm:$0xf0]  ;;  %v5737_v15 = vpop.f32.mrf.mxu3  ;;  %v7594_v39 = vor.u32 %v10299_v30, %v7591_v19  ;;  %v10295_v19 = vld [vmem:[%s16619_s1 + $0x584] sm:$0xf] }
 0x1ec   :  { %5968 = vmatpush.bf16.msrb.mxu0 %v7554_v62  ;;  %v7663_v62 = vld [vmem:[%s16619_s1 + $0x638] sm:$0xf0]  ;;  %v7538_v47 = vor.u32 %v10285_v12, %v7535_v17  ;;  %v7511_v30 = vld [vmem:[%s16619_s1 + $0x508] sm:$0xf0] }
 0x1ed   :  { %5982 = vmatpush.bf16.msrb.mxu1 %v7618_v49  ;;  %v10333_v49 = vld [vmem:[%s16619_s1 + $0x6b4] sm:$0xf]  ;;  %v7666_v57 = vor.u32 %v10317_v44, %v7663_v62 }
 0x1ee   :  { %5996 = vmatpush.bf16.msrb.mxu2 %v7682_v54  ;;  %v7727_v54 = vld [vmem:[%s16619_s1 + $0x6b8] sm:$0xf0]  ;;  %v10297_v44 = vld [vmem:[%s16619_s1 + $0x594] sm:$0xf] }
 0x1ef   :  { %6010 = vmatpush.bf16.msrb.mxu3 %v7746_v36  ;;  %v10283_v36 = vld [vmem:[%s16619_s1 + $0x524] sm:$0xf]  ;;  %v7730_v8 = vor.u32 %v10333_v49, %v7727_v54  ;;  %v7583_v49 = vld [vmem:[%s16619_s1 + $0x598] sm:$0xf0]  ;;  %v10313_v54 = vld [vmem:[%s16619_s1 + $0x614] sm:$0xf] }
 0x1f0   :  { %5969 = vmatpush.bf16.msrb.mxu0 %v7546_v1  ;;  %v5724_v1 = vadd.f32 %v5723_v6, %v5710_v37  ;;  %v7530_v12 = vor.u32 %v10283_v36, %v7527_v20  ;;  %v10281_v37 = vld [vmem:[%s16619_s1 + $0x514] sm:$0xf]  ;;  %v10279_v20 = vld [vmem:[%s16619_s1 + $0x504] sm:$0xf] }
 0x1f1   :  { %5983 = vmatpush.bf16.msrb.mxu1 %v7610_v42  ;;  %v10331_v42 = vld [vmem:[%s16619_s1 + $0x6a4] sm:$0xf]  ;;  %v7522_v36 = vor.u32 %v10281_v37, %v7519_v43  ;;  %v7514_v37 = vor.u32 %v10279_v20, %v7511_v30  ;;  %v7887_v43 = vld [vmem:[%s16619_s1 + $0x7f8] sm:$0xf0] }
 0x1f2   :  { %5997 = vmatpush.bf16.msrb.mxu2 %v7674_v14  ;;  %v7719_v14 = vld [vmem:[%s16619_s1 + $0x6a8] sm:$0xf0]  ;;  %v14577_v17 = vadd.f32 %v5737_v15, %v5724_v1 }
 0x1f3   :  { %6011 = vmatpush.bf16.msrb.mxu3 %v7738_v29  ;;  %v7658_v29 = vor.u32 %v10315_v23, %v7655_v53  ;;  %v7722_v62 = vor.u32 %v10331_v42, %v7719_v14  ;;  %v7575_v23 = vld [vmem:[%s16619_s1 + $0x588] sm:$0xf0]  ;;  %v10311_v53 = vld [vmem:[%s16619_s1 + $0x604] sm:$0xf] }
 0x1f4   :  { %5970 = vmatpush.bf16.msrb.mxu0 %v7538_v47  ;;  %v7647_v47 = vld [vmem:[%s16619_s1 + $0x618] sm:$0xf0]  ;;  %v7639_v15 = vld [vmem:[%s16619_s1 + $0x608] sm:$0xf0]  ;;  %v10327_v42 = vld [vmem:[%s16619_s1 + $0x684] sm:$0xf] }
 0x1f5   :  { %5984 = vmatpush.bf16.msrb.mxu1 %v7602_v31  ;;  %v10329_v31 = vld [vmem:[%s16619_s1 + $0x694] sm:$0xf]  ;;  %v7650_v6 = vor.u32 %v10313_v54, %v7647_v47  ;;  %v7703_v14 = vld [vmem:[%s16619_s1 + $0x688] sm:$0xf0]  ;;  %v7642_v54 = vor.u32 %v10311_v53, %v7639_v15 }
 0x1f6   :  { %5998 = vmatpush.bf16.msrb.mxu2 %v7666_v57  ;;  %v7711_v57 = vld [vmem:[%s16619_s1 + $0x698] sm:$0xf0]  ;;  %v10405_v47 = vld [vmem:[%s16619_s1 + $0x8f4] sm:$0xf]  ;;  %v7879_v53 = vld [vmem:[%s16619_s1 + $0x7e8] sm:$0xf0] }
 0x1f7   :  { %6012 = vmatpush.bf16.msrb.mxu3 %v7730_v8  ;;  %v7586_v8 = vor.u32 %v10297_v44, %v7583_v49  ;;  %v7714_v1 = vor.u32 %v10329_v31, %v7711_v57  ;;  %v10389_v44 = vld [vmem:[%s16619_s1 + $0x874] sm:$0xf]  ;;  %v7578_v49 = vor.u32 %v10295_v19, %v7575_v23  ;;  %v8015_v31 = vld [vmem:[%s16619_s1 + $0x8f8] sm:$0xf0]  ;;  %v7706_v57 = vor.u32 %v10327_v42, %v7703_v14  ;;  %v10371_v19 = vld [vmem:[%s16619_s1 + $0x7e4] sm:$0xf]  ;;  %v14669_v42 = vpop.f32.mrf.mxu0 }
 0x1f8   :  { %5971 = vmatpush.bf16.msrb.mxu0 %v7530_v12  ;;  %v10357_v12 = vld [vmem:[%s16619_s1 + $0x774] sm:$0xf]  ;;  %v8018_v23 = vor.u32 %v10405_v47, %v8015_v31  ;;  %v7943_v15 = vld [vmem:[%s16619_s1 + $0x868] sm:$0xf0]  ;;  %v10403_v14 = vld [vmem:[%s16619_s1 + $0x8e4] sm:$0xf] }
 0x1f9   :  { %5985 = vmatpush.bf16.msrb.mxu1 %v7594_v39  ;;  %v7823_v39 = vld [vmem:[%s16619_s1 + $0x778] sm:$0xf0]  ;;  %v10385_v31 = vld [vmem:[%s16619_s1 + $0x854] sm:$0xf] }
 0x1fa   :  { %5999 = vmatpush.bf16.msrb.mxu2 %v7658_v29  ;;  %v10373_v29 = vld [vmem:[%s16619_s1 + $0x7f4] sm:$0xf]  ;;  %v7871_v47 = vld [vmem:[%s16619_s1 + $0x7d8] sm:$0xf0] }
 0x1fb   :  { %6013 = vmatpush.bf16.msrb.mxu3 %v7722_v62  ;;  %v7951_v62 = vld [vmem:[%s16619_s1 + $0x878] sm:$0xf0]  ;;  %v7890_v20 = vor.u32 %v10373_v29, %v7887_v43 }
 0x1fc   :  { %5972 = vmatpush.bf16.msrb.mxu0 %v7522_v36  ;;  %v7826_v36 = vor.u32 %v10357_v12, %v7823_v39  ;;  %v7954_v30 = vor.u32 %v10389_v44, %v7951_v62  ;;  %v8007_v12 = vld [vmem:[%s16619_s1 + $0x8e8] sm:$0xf0]  ;;  %v14677_v39 = vpop.f32.mrf.mxu1  ;;  %v10353_v44 = vld [vmem:[%s16619_s1 + $0x754] sm:$0xf]  ;;  %v7807_v62 = vld [vmem:[%s16619_s1 + $0x758] sm:$0xf0] }
 0x1fd   :  { %5986 = vmatpush.bf16.msrb.mxu1 %v7586_v8  ;;  %v10355_v8 = vld [vmem:[%s16619_s1 + $0x764] sm:$0xf] }
 0x1fe   :  { %6000 = vmatpush.bf16.msrb.mxu2 %v7650_v6  ;;  %v7815_v6 = vld [vmem:[%s16619_s1 + $0x768] sm:$0xf0] }
 0x1ff   :  { %6014 = vmatpush.bf16.msrb.mxu3 %v7714_v1  ;;  %v10387_v1 = vld [vmem:[%s16619_s1 + $0x864] sm:$0xf]  ;;  %v7818_v29 = vor.u32 %v10355_v8, %v7815_v6 }
 0x200   :  { %5973 = vmatpush.bf16.msrb.mxu0 %v7514_v37  ;;  %v7882_v37 = vor.u32 %v10371_v19, %v7879_v53  ;;  %v7946_v43 = vor.u32 %v10387_v1, %v7943_v15  ;;  %v10367_v6 = vld [vmem:[%s16619_s1 + $0x7c4] sm:$0xf]  ;;  %v14716_v19 = vpop.f32.mrf.mxu2  ;;  %v7927_v1 = vld [vmem:[%s16619_s1 + $0x848] sm:$0xf0]  ;;  %v14727_v15 = vpop.f32.mrf.mxu3 }
 0x201   :  { %5987 = vmatpush.bf16.msrb.mxu1 %v7578_v49  ;;  %v10369_v49 = vld [vmem:[%s16619_s1 + $0x7d4] sm:$0xf]  ;;  %v10383_v53 = vld [vmem:[%s16619_s1 + $0x844] sm:$0xf] }
 0x202   :  { %6001 = vmatpush.bf16.msrb.mxu2 %v7642_v54  ;;  %v8010_v54 = vor.u32 %v10403_v14, %v8007_v12  ;;  %v5751_v14 = vpop.f32.mrf.mxu0  ;;  %v10399_v12 = vld [vmem:[%s16619_s1 + $0x8c4] sm:$0xf] }
 0x203   :  { %6015 = vmatpush.bf16.msrb.mxu3 %v7706_v57  ;;  %5974 = vmatmul.bf16.vlgmr.msrb.gmra.mxu0 %v11691_v35  ;;  %v7935_v57 = vld [vmem:[%s16619_s1 + $0x858] sm:$0xf0]  ;;  %v10401_v35 = vld [vmem:[%s16619_s1 + $0x8d4] sm:$0xf] }
 0x204   :  { %6022 = vmatpush.bf16.msra.mxu0 %v7826_v36  ;;  %5988 = vmatmul.bf16.vlgmr.msrb.gmra.mxu1 %v11701_v40  ;;  %v7999_v36 = vld [vmem:[%s16619_s1 + $0x8d8] sm:$0xf0]  ;;  %v7938_v8 = vor.u32 %v10385_v31, %v7935_v57  ;;  %v10351_v40 = vld [vmem:[%s16619_s1 + $0x744] sm:$0xf]  ;;  %v10365_v31 = vld [vmem:[%s16619_s1 + $0x7b4] sm:$0xf] }
 0x205   :  { %6036 = vmatpush.bf16.msra.mxu1 %v7890_v20  ;;  %6002 = vmatmul.bf16.vlgmr.msrb.gmra.mxu2 %v11908_v32  ;;  %v7810_v20 = vor.u32 %v10353_v44, %v7807_v62  ;;  %v7799_v32 = vld [vmem:[%s16619_s1 + $0x748] sm:$0xf0]  ;;  %v5765_v44 = vpop.f32.mrf.mxu1 }
 0x206   :  { %6050 = vmatpush.bf16.msra.mxu2 %v7954_v30  ;;  %6016 = vmatmul.bf16.vlgmr.msrb.gmra.mxu3 %v11921_v41  ;;  %v7874_v30 = vor.u32 %v10369_v49, %v7871_v47  ;;  %v8002_v41 = vor.u32 %v10401_v35, %v7999_v36  ;;  %v7930_v49 = vor.u32 %v10383_v53, %v7927_v1  ;;  %v7791_v47 = vld [vmem:[%s16619_s1 + $0x738] sm:$0xf0]  ;;  %v10381_v36 = vld [vmem:[%s16619_s1 + $0x834] sm:$0xf]  ;;  %v10363_v53 = vld [vmem:[%s16619_s1 + $0x7a4] sm:$0xf] }
 0x207   :  { %6064 = vmatpush.bf16.msra.mxu3 %v8018_v23  ;;  %v7863_v23 = vld [vmem:[%s16619_s1 + $0x7c8] sm:$0xf0]  ;;  %v7855_v35 = vld [vmem:[%s16619_s1 + $0x7b8] sm:$0xf0] }
 0x208   :  { %6023 = vmatpush.bf16.msra.mxu0 %v7818_v29  ;;  %v7991_v29 = vld [vmem:[%s16619_s1 + $0x8c8] sm:$0xf0]  ;;  %v7866_v62 = vor.u32 %v10367_v6, %v7863_v23 }
 0x209   :  { %6037 = vmatpush.bf16.msra.mxu1 %v7882_v37  ;;  %v5752_v37 = vadd.f32 %v5751_v14, %v14577_v17  ;;  %v7994_v17 = vor.u32 %v10399_v12, %v7991_v29  ;;  %v7783_v23 = vld [vmem:[%s16619_s1 + $0x728] sm:$0xf0]  ;;  %v5779_v14 = vpop.f32.mrf.mxu2  ;;  %v10379_v29 = vld [vmem:[%s16619_s1 + $0x824] sm:$0xf] }
 0x20a   :  { %6051 = vmatpush.bf16.msra.mxu2 %v7946_v43  ;;  %v7802_v43 = vor.u32 %v10351_v40, %v7799_v32  ;;  %v7858_v32 = vor.u32 %v10365_v31, %v7855_v35  ;;  %v7847_v12 = vld [vmem:[%s16619_s1 + $0x7a8] sm:$0xf0]  ;;  %v7775_v35 = vld [vmem:[%s16619_s1 + $0x718] sm:$0xf0] }
 0x20b   :  { %6065 = vmatpush.bf16.msra.mxu3 %v8010_v54  ;;  %v10349_v54 = vld [vmem:[%s16619_s1 + $0x734] sm:$0xf]  ;;  %v5766_v57 = vadd.f32 %v5765_v44, %v5752_v37  ;;  %v7911_v37 = vld [vmem:[%s16619_s1 + $0x828] sm:$0xf0]  ;;  %v5793_v44 = vpop.f32.mrf.mxu3  ;;  %v7850_v31 = vor.u32 %v10363_v53, %v7847_v12  ;;  %v10359_v12 = vld [vmem:[%s16619_s1 + $0x784] sm:$0xf] }
 0x20c   :  { %6024 = vmatpush.bf16.msra.mxu0 %v7810_v20  ;;  %v7919_v20 = vld [vmem:[%s16619_s1 + $0x838] sm:$0xf0]  ;;  %v7794_v40 = vor.u32 %v10349_v54, %v7791_v47  ;;  %v7767_v53 = vld [vmem:[%s16619_s1 + $0x708] sm:$0xf0] }
 0x20d   :  { %6038 = vmatpush.bf16.msra.mxu1 %v7874_v30  ;;  %v10397_v30 = vld [vmem:[%s16619_s1 + $0x8b4] sm:$0xf]  ;;  %v7922_v6 = vor.u32 %v10381_v36, %v7919_v20 }
 0x20e   :  { %6052 = vmatpush.bf16.msra.mxu2 %v7938_v8  ;;  %v7983_v8 = vld [vmem:[%s16619_s1 + $0x8b8] sm:$0xf0]  ;;  %v10361_v36 = vld [vmem:[%s16619_s1 + $0x794] sm:$0xf] }
 0x20f   :  { %6066 = vmatpush.bf16.msra.mxu3 %v8002_v41  ;;  %v10347_v41 = vld [vmem:[%s16619_s1 + $0x724] sm:$0xf]  ;;  %v7986_v1 = vor.u32 %v10397_v30, %v7983_v8  ;;  %v7839_v30 = vld [vmem:[%s16619_s1 + $0x798] sm:$0xf0]  ;;  %v10377_v8 = vld [vmem:[%s16619_s1 + $0x814] sm:$0xf] }
 0x210   :  { %6025 = vmatpush.bf16.msra.mxu0 %v7802_v43  ;;  %v5780_v43 = vadd.f32 %v5779_v14, %v5766_v57  ;;  %v7786_v54 = vor.u32 %v10347_v41, %v7783_v23  ;;  %v10345_v57 = vld [vmem:[%s16619_s1 + $0x714] sm:$0xf]  ;;  %v10343_v23 = vld [vmem:[%s16619_s1 + $0x704] sm:$0xf] }
 0x211   :  { %6039 = vmatpush.bf16.msra.mxu1 %v7866_v62  ;;  %v10395_v62 = vld [vmem:[%s16619_s1 + $0x8a4] sm:$0xf]  ;;  %v7778_v41 = vor.u32 %v10345_v57, %v7775_v35  ;;  %v7770_v57 = vor.u32 %v10343_v23, %v7767_v53  ;;  %v8143_v35 = vld [vmem:[%s16619_s1 + $0x9f8] sm:$0xf0] }
 0x212   :  { %6053 = vmatpush.bf16.msra.mxu2 %v7930_v49  ;;  %v7975_v49 = vld [vmem:[%s16619_s1 + $0x8a8] sm:$0xf0]  ;;  %v14784_v47 = vadd.f32 %v5793_v44, %v5780_v43 }
 0x213   :  { %6067 = vmatpush.bf16.msra.mxu3 %v7994_v17  ;;  %v7914_v17 = vor.u32 %v10379_v29, %v7911_v37  ;;  %v7978_v20 = vor.u32 %v10395_v62, %v7975_v49  ;;  %v7831_v29 = vld [vmem:[%s16619_s1 + $0x788] sm:$0xf0]  ;;  %v10375_v37 = vld [vmem:[%s16619_s1 + $0x804] sm:$0xf] }
 0x214   :  { %6026 = vmatpush.bf16.msra.mxu0 %v7794_v40  ;;  %v7903_v40 = vld [vmem:[%s16619_s1 + $0x818] sm:$0xf0]  ;;  %v7895_v44 = vld [vmem:[%s16619_s1 + $0x808] sm:$0xf0]  ;;  %v10391_v62 = vld [vmem:[%s16619_s1 + $0x884] sm:$0xf] }
 0x215   :  { %6040 = vmatpush.bf16.msra.mxu1 %v7858_v32  ;;  %v10393_v32 = vld [vmem:[%s16619_s1 + $0x894] sm:$0xf]  ;;  %v7906_v14 = vor.u32 %v10377_v8, %v7903_v40  ;;  %v7959_v49 = vld [vmem:[%s16619_s1 + $0x888] sm:$0xf0]  ;;  %v7898_v8 = vor.u32 %v10375_v37, %v7895_v44 }
 0x216   :  { %6054 = vmatpush.bf16.msra.mxu2 %v7922_v6  ;;  %v7967_v6 = vld [vmem:[%s16619_s1 + $0x898] sm:$0xf0]  ;;  %v10469_v40 = vld [vmem:[%s16619_s1 + $0xaf4] sm:$0xf]  ;;  %v8135_v37 = vld [vmem:[%s16619_s1 + $0x9e8] sm:$0xf0] }
 0x217   :  { %6068 = vmatpush.bf16.msra.mxu3 %v7986_v1  ;;  %v7842_v1 = vor.u32 %v10361_v36, %v7839_v30  ;;  %v7970_v43 = vor.u32 %v10393_v32, %v7967_v6  ;;  %v10453_v36 = vld [vmem:[%s16619_s1 + $0xa74] sm:$0xf]  ;;  %v7834_v30 = vor.u32 %v10359_v12, %v7831_v29  ;;  %v8271_v32 = vld [vmem:[%s16619_s1 + $0xaf8] sm:$0xf0]  ;;  %v7962_v6 = vor.u32 %v10391_v62, %v7959_v49  ;;  %v10435_v12 = vld [vmem:[%s16619_s1 + $0x9e4] sm:$0xf]  ;;  %v14876_v62 = vpop.f32.mrf.mxu0 }
 0x218   :  { %6027 = vmatpush.bf16.msra.mxu0 %v7786_v54  ;;  %v10421_v54 = vld [vmem:[%s16619_s1 + $0x974] sm:$0xf]  ;;  %v8274_v29 = vor.u32 %v10469_v40, %v8271_v32  ;;  %v8199_v44 = vld [vmem:[%s16619_s1 + $0xa68] sm:$0xf0]  ;;  %v10467_v49 = vld [vmem:[%s16619_s1 + $0xae4] sm:$0xf] }
 0x219   :  { %6041 = vmatpush.bf16.msra.mxu1 %v7850_v31  ;;  %v8079_v31 = vld [vmem:[%s16619_s1 + $0x978] sm:$0xf0]  ;;  %v10449_v32 = vld [vmem:[%s16619_s1 + $0xa54] sm:$0xf] }
 0x21a   :  { %6055 = vmatpush.bf16.msra.mxu2 %v7914_v17  ;;  %v10437_v17 = vld [vmem:[%s16619_s1 + $0x9f4] sm:$0xf]  ;;  %v8127_v40 = vld [vmem:[%s16619_s1 + $0x9d8] sm:$0xf0] }
 0x21b   :  { %6069 = vmatpush.bf16.msra.mxu3 %v7978_v20  ;;  %v8207_v20 = vld [vmem:[%s16619_s1 + $0xa78] sm:$0xf0]  ;;  %v8146_v23 = vor.u32 %v10437_v17, %v8143_v35 }
 0x21c   :  { %6028 = vmatpush.bf16.msra.mxu0 %v7778_v41  ;;  %v8082_v41 = vor.u32 %v10421_v54, %v8079_v31  ;;  %v8210_v53 = vor.u32 %v10453_v36, %v8207_v20  ;;  %v8263_v54 = vld [vmem:[%s16619_s1 + $0xae8] sm:$0xf0]  ;;  %v14884_v31 = vpop.f32.mrf.mxu1  ;;  %v10417_v36 = vld [vmem:[%s16619_s1 + $0x954] sm:$0xf]  ;;  %v8063_v20 = vld [vmem:[%s16619_s1 + $0x958] sm:$0xf0] }
 0x21d   :  { %6042 = vmatpush.bf16.msra.mxu1 %v7842_v1  ;;  %v10419_v1 = vld [vmem:[%s16619_s1 + $0x964] sm:$0xf] }
 0x21e   :  { %6056 = vmatpush.bf16.msra.mxu2 %v7906_v14  ;;  %v8071_v14 = vld [vmem:[%s16619_s1 + $0x968] sm:$0xf0] }
 0x21f   :  { %6070 = vmatpush.bf16.msra.mxu3 %v7970_v43  ;;  %v10451_v43 = vld [vmem:[%s16619_s1 + $0xa64] sm:$0xf]  ;;  %v8074_v17 = vor.u32 %v10419_v1, %v8071_v14 }
 0x220   :  { %6029 = vmatpush.bf16.msra.mxu0 %v7770_v57  ;;  %v8138_v57 = vor.u32 %v10435_v12, %v8135_v37  ;;  %v8202_v35 = vor.u32 %v10451_v43, %v8199_v44  ;;  %v10431_v14 = vld [vmem:[%s16619_s1 + $0x9c4] sm:$0xf]  ;;  %v14923_v12 = vpop.f32.mrf.mxu2  ;;  %v8183_v43 = vld [vmem:[%s16619_s1 + $0xa48] sm:$0xf0]  ;;  %v5807_v44 = vpop.f32.mrf.mxu0 }
 0x221   :  { %6043 = vmatpush.bf16.msra.mxu1 %v7834_v30  ;;  %v10433_v30 = vld [vmem:[%s16619_s1 + $0x9d4] sm:$0xf]  ;;  %v10447_v37 = vld [vmem:[%s16619_s1 + $0xa44] sm:$0xf] }
 0x222   :  { %6057 = vmatpush.bf16.msra.mxu2 %v7898_v8  ;;  %v8266_v8 = vor.u32 %v10467_v49, %v8263_v54  ;;  %v10463_v49 = vld [vmem:[%s16619_s1 + $0xac4] sm:$0xf]  ;;  %v8247_v54 = vld [vmem:[%s16619_s1 + $0xac8] sm:$0xf0] }
 0x223   :  { %6071 = vmatpush.bf16.msra.mxu3 %v7962_v6  ;;  %6030 = vmatmul.bf16.vlgmr.msra.gmra.mxu0 %v11919_v38  ;;  %v8191_v6 = vld [vmem:[%s16619_s1 + $0xa58] sm:$0xf0]  ;;  %v10465_v38 = vld [vmem:[%s16619_s1 + $0xad4] sm:$0xf] }
 0x224   :  { %6078 = vmatpush.bf16.msrb.mxu0 %v8082_v41  ;;  %6044 = vmatmul.bf16.vlgmr.msra.gmra.mxu1 %v11929_v46  ;;  %v8255_v41 = vld [vmem:[%s16619_s1 + $0xad8] sm:$0xf0]  ;;  %v8194_v1 = vor.u32 %v10449_v32, %v8191_v6  ;;  %v10415_v46 = vld [vmem:[%s16619_s1 + $0x944] sm:$0xf]  ;;  %v10429_v32 = vld [vmem:[%s16619_s1 + $0x9b4] sm:$0xf] }
 0x225   :  { %6092 = vmatpush.bf16.msrb.mxu1 %v8146_v23  ;;  %6058 = vmatmul.bf16.vlgmr.msra.gmra.mxu2 %v12136_v51  ;;  %v8066_v23 = vor.u32 %v10417_v36, %v8063_v20  ;;  %v8055_v51 = vld [vmem:[%s16619_s1 + $0x948] sm:$0xf0]  ;;  %v5821_v36 = vpop.f32.mrf.mxu1 }
 0x226   :  { %6106 = vmatpush.bf16.msrb.mxu2 %v8210_v53  ;;  %6072 = vmatmul.bf16.vlgmr.msra.gmra.mxu3 %v12149_v56  ;;  %v8130_v53 = vor.u32 %v10433_v30, %v8127_v40  ;;  %v8258_v56 = vor.u32 %v10465_v38, %v8255_v41  ;;  %v8186_v30 = vor.u32 %v10447_v37, %v8183_v43  ;;  %v8047_v40 = vld [vmem:[%s16619_s1 + $0x938] sm:$0xf0]  ;;  %v10445_v41 = vld [vmem:[%s16619_s1 + $0xa34] sm:$0xf]  ;;  %v10411_v37 = vld [vmem:[%s16619_s1 + $0x924] sm:$0xf] }
 0x227   :  { %6120 = vmatpush.bf16.msrb.mxu3 %v8274_v29  ;;  %v8119_v29 = vld [vmem:[%s16619_s1 + $0x9c8] sm:$0xf0]  ;;  %v8111_v38 = vld [vmem:[%s16619_s1 + $0x9b8] sm:$0xf0] }
 0x228   :  { %6079 = vmatpush.bf16.msrb.mxu0 %v8074_v17  ;;  %v14940_v17 = vpop.f32.mrf.mxu3  ;;  %v8122_v20 = vor.u32 %v10431_v14, %v8119_v29  ;;  %v8039_v43 = vld [vmem:[%s16619_s1 + $0x928] sm:$0xf0] }
 0x229   :  { %6093 = vmatpush.bf16.msrb.mxu1 %v8138_v57  ;;  %16687 = vst [vmem:[#allocation44_spill] sm:$0xff] %v14940_v17  ;;  %v5808_v57 = vadd.f32 %v5807_v44, %v14784_v47  ;;  %v8250_v47 = vor.u32 %v10463_v49, %v8247_v54  ;;  %v10427_v44 = vld [vmem:[%s16619_s1 + $0x9a4] sm:$0xf]  ;;  %v8103_v54 = vld [vmem:[%s16619_s1 + $0x9a8] sm:$0xf0] }
 0x22a   :  { %6107 = vmatpush.bf16.msrb.mxu2 %v8202_v35  ;;  %v8058_v35 = vor.u32 %v10415_v46, %v8055_v51  ;;  %v14972_v46 = vld [vmem:[%s16621_s2] sm:$0x3] }
 0x22b   :  { %6121 = vmatpush.bf16.msrb.mxu3 %v8266_v8  ;;  %v10413_v8 = vld [vmem:[%s16619_s1 + $0x934] sm:$0xf]  ;;  %v14952_v6 = vadd.f32 %v5821_v36, %v5808_v57  ;;  %v16644_v51 = vperm.slane %v14972_v46, 1  ;;  %v10443_v57 = vld [vmem:[%s16619_s1 + $0xa24] sm:$0xf]  ;;  %v5835_v36 = vpop.f32.mrf.mxu2 }
 0x22c   :  { %6080 = vmatpush.bf16.msrb.mxu0 %v8066_v23  ;;  %v8175_v23 = vld [vmem:[%s16619_s1 + $0xa38] sm:$0xf0]  ;;  %v8050_v14 = vor.u32 %v10413_v8, %v8047_v40  ;;  %v8042_v40 = vor.u32 %v10411_v37, %v8039_v43  ;;  %v10457_v43 = vld [vmem:[%s16619_s1 + $0xa94] sm:$0xf] }
 0x22d   :  { %6094 = vmatpush.bf16.msrb.mxu1 %v8130_v53  ;;  %16688 = vst [vmem:[#allocation45_spill] sm:$0xff] %v14952_v6  ;;  %v10461_v53 = vld [vmem:[%s16619_s1 + $0xab4] sm:$0xf]  ;;  %v8178_v29 = vor.u32 %v10445_v41, %v8175_v23  ;;  %v5836_v8 = vadd.f32 %v5835_v36, %v16644_v51  ;;  %v8031_v23 = vld [vmem:[%s16619_s1 + $0x918] sm:$0xf0] }
 0x22e   :  { %6108 = vmatpush.bf16.msrb.mxu2 %v8194_v1  ;;  %v8239_v1 = vld [vmem:[%s16619_s1 + $0xab8] sm:$0xf0]  ;;  %v10409_v41 = vld [vmem:[%s16619_s1 + $0x914] sm:$0xf] }
 0x22f   :  { %6122 = vmatpush.bf16.msrb.mxu3 %v8258_v56  ;;  %v8114_v56 = vor.u32 %v10429_v32, %v8111_v38  ;;  %v8242_v49 = vor.u32 %v10461_v53, %v8239_v1  ;;  %v10425_v53 = vld [vmem:[%s16619_s1 + $0x994] sm:$0xf]  ;;  %v8159_v37 = vld [vmem:[%s16619_s1 + $0xa18] sm:$0xf0] }
 0x230   :  { %6081 = vmatpush.bf16.msrb.mxu0 %v8058_v35  ;;  %v8167_v35 = vld [vmem:[%s16619_s1 + $0xa28] sm:$0xf0]  ;;  %v5849_v32 = vpop.f32.mrf.mxu3 }
 0x231   :  { %6095 = vmatpush.bf16.msrb.mxu1 %v8122_v20  ;;  %v10459_v20 = vld [vmem:[%s16619_s1 + $0xaa4] sm:$0xf]  ;;  %v8170_v38 = vor.u32 %v10443_v57, %v8167_v35  ;;  %v15010_v1 = vadd.f32 %v5849_v32, %v5836_v8  ;;  %v8023_v57 = vld [vmem:[%s16619_s1 + $0x908] sm:$0xf0] }
 0x232   :  { %6109 = vmatpush.bf16.msrb.mxu2 %v8186_v30  ;;  %v8231_v30 = vld [vmem:[%s16619_s1 + $0xaa8] sm:$0xf0]  ;;  %v10439_v8 = vld [vmem:[%s16619_s1 + $0xa04] sm:$0xf] }
 0x233   :  { %6123 = vmatpush.bf16.msrb.mxu3 %v8250_v47  ;;  %v8106_v47 = vor.u32 %v10427_v44, %v8103_v54  ;;  %v8223_v44 = vld [vmem:[%s16619_s1 + $0xa98] sm:$0xf0]  ;;  %v10407_v54 = vld [vmem:[%s16619_s1 + $0x904] sm:$0xf]  ;;  %v8151_v32 = vld [vmem:[%s16619_s1 + $0xa08] sm:$0xf0] }
 0x234   :  { %6082 = vmatpush.bf16.msrb.mxu0 %v8050_v14  ;;  %v8234_v14 = vor.u32 %v10459_v20, %v8231_v30  ;;  %v10423_v20 = vld [vmem:[%s16619_s1 + $0x984] sm:$0xf]  ;;  %v8087_v30 = vld [vmem:[%s16619_s1 + $0x988] sm:$0xf0] }
 0x235   :  { %6096 = vmatpush.bf16.msrb.mxu1 %v8114_v56  ;;  %v8095_v56 = vld [vmem:[%s16619_s1 + $0x998] sm:$0xf0] }
 0x236   :  { %6110 = vmatpush.bf16.msrb.mxu2 %v8178_v29  ;;  %v10441_v29 = vld [vmem:[%s16619_s1 + $0xa14] sm:$0xf]  ;;  %v8098_v35 = vor.u32 %v10425_v53, %v8095_v56  ;;  %v8399_v56 = vld [vmem:[%s16619_s1 + $0xbf8] sm:$0xf0] }
 0x237   :  { %6124 = vmatpush.bf16.msrb.mxu3 %v8242_v49  ;;  %v8034_v49 = vor.u32 %v10409_v41, %v8031_v23  ;;  %v8162_v36 = vor.u32 %v10441_v29, %v8159_v37  ;;  %v10485_v41 = vld [vmem:[%s16619_s1 + $0xb74] sm:$0xf]  ;;  %v8335_v23 = vld [vmem:[%s16619_s1 + $0xb78] sm:$0xf0] }
 0x238   :  { %6083 = vmatpush.bf16.msrb.mxu0 %v8042_v40  ;;  %v8226_v40 = vor.u32 %v10457_v43, %v8223_v44  ;;  %v10501_v53 = vld [vmem:[%s16619_s1 + $0xbf4] sm:$0xf]  ;;  %v8463_v37 = vld [vmem:[%s16619_s1 + $0xc78] sm:$0xf0]  ;;  %v8090_v43 = vor.u32 %v10423_v20, %v8087_v30  ;;  %v8154_v44 = vor.u32 %v10439_v8, %v8151_v32  ;;  %v8338_v51 = vor.u32 %v10485_v41, %v8335_v23  ;;  %v10499_v20 = vld [vmem:[%s16619_s1 + $0xbe4] sm:$0xf]  ;;  %v15101_v23 = vpop.f32.mrf.mxu1 }
 0x239   :  { %6097 = vmatpush.bf16.msrb.mxu1 %v8106_v47  ;;  %v10455_v47 = vld [vmem:[%s16619_s1 + $0xa84] sm:$0xf]  ;;  %v10517_v29 = vld [vmem:[%s16619_s1 + $0xc74] sm:$0xf]  ;;  %v8402_v6 = vor.u32 %v10501_v53, %v8399_v56  ;;  %v8391_v8 = vld [vmem:[%s16619_s1 + $0xbe8] sm:$0xf0] }
 0x23a   :  { %6111 = vmatpush.bf16.msrb.mxu2 %v8170_v38  ;;  %v8215_v38 = vld [vmem:[%s16619_s1 + $0xa88] sm:$0xf0]  ;;  %v8466_v17 = vor.u32 %v10517_v29, %v8463_v37  ;;  %v10481_v29 = vld [vmem:[%s16619_s1 + $0xb54] sm:$0xf]  ;;  %v8319_v37 = vld [vmem:[%s16619_s1 + $0xb58] sm:$0xf0] }
 0x23b   :  { %6125 = vmatpush.bf16.msrb.mxu3 %v8234_v14  ;;  %v8026_v14 = vor.u32 %v10407_v54, %v8023_v57  ;;  %v8527_v54 = vld [vmem:[%s16619_s1 + $0xcf8] sm:$0xf0]  ;;  %v8218_v57 = vor.u32 %v10455_v47, %v8215_v38  ;;  %v8455_v32 = vld [vmem:[%s16619_s1 + $0xc68] sm:$0xf0]  ;;  %v15093_v47 = vpop.f32.mrf.mxu0  ;;  %v10531_v38 = vld [vmem:[%s16619_s1 + $0xce4] sm:$0xf] }
 0x23c   :  { %6084 = vmatpush.bf16.msrb.mxu0 %v8034_v49  ;;  %v10533_v49 = vld [vmem:[%s16619_s1 + $0xcf4] sm:$0xf]  ;;  %v8519_v41 = vld [vmem:[%s16619_s1 + $0xce8] sm:$0xf0] }
 0x23d   :  { %6098 = vmatpush.bf16.msrb.mxu1 %v8098_v35  ;;  %v10483_v35 = vld [vmem:[%s16619_s1 + $0xb64] sm:$0xf]  ;;  %v8530_v30 = vor.u32 %v10533_v49, %v8527_v54  ;;  %v8511_v49 = vld [vmem:[%s16619_s1 + $0xcd8] sm:$0xf0]  ;;  %v8322_v54 = vor.u32 %v10481_v29, %v8319_v37  ;;  %v16689_v37 = vperm.slane %v14972_v46, 1 }
 0x23e   :  { %6112 = vmatpush.bf16.msrb.mxu2 %v8162_v36  ;;  %v8327_v36 = vld [vmem:[%s16619_s1 + $0xb68] sm:$0xf0]  ;;  %v8367_v46 = vld [vmem:[%s16619_s1 + $0xbb8] sm:$0xf0] }
 0x23f   :  { %6126 = vmatpush.bf16.msrb.mxu3 %v8226_v40  ;;  %v10515_v40 = vld [vmem:[%s16619_s1 + $0xc64] sm:$0xf]  ;;  %v8330_v53 = vor.u32 %v10483_v35, %v8327_v36 }
 0x240   :  { %6085 = vmatpush.bf16.msrb.mxu0 %v8026_v14  ;;  %v8394_v14 = vor.u32 %v10499_v20, %v8391_v8  ;;  %v8458_v56 = vor.u32 %v10515_v40, %v8455_v32  ;;  %v8311_v20 = vld [vmem:[%s16619_s1 + $0xb48] sm:$0xf0]  ;;  %v10511_v40 = vld [vmem:[%s16619_s1 + $0xc44] sm:$0xf] }
 0x241   :  { %6099 = vmatpush.bf16.msrb.mxu1 %v8090_v43  ;;  %v10497_v43 = vld [vmem:[%s16619_s1 + $0xbd4] sm:$0xf]  ;;  %v8375_v8 = vld [vmem:[%s16619_s1 + $0xbc8] sm:$0xf0]  ;;  %v5877_v29 = vpop.f32.mrf.mxu1 }
 0x242   :  { %6113 = vmatpush.bf16.msrb.mxu2 %v8154_v44  ;;  %v8447_v44 = vld [vmem:[%s16619_s1 + $0xc58] sm:$0xf0]  ;;  %v8439_v32 = vld [vmem:[%s16619_s1 + $0xc48] sm:$0xf0] }
 0x243   :  { %6127 = vmatpush.bf16.msrb.mxu3 %v8218_v57  ;;  %6086 = vmatmul.bf16.vlgmr.msrb.gmra.mxu0 %v12147_v55  ;;  %v10529_v55 = vld [vmem:[%s16619_s1 + $0xcd4] sm:$0xf]  ;;  %v5837_v57 = vpop.f32.mrf.mxu2 }
 0x244   :  { %6134 = vmatpush.bf16.msra.mxu0 %v8338_v51  ;;  %v8522_v51 = vor.u32 %v10531_v38, %v8519_v41  ;;  %6100 = vmatmul.bf16.vlgmr.msrb.gmra.mxu1 %v12157_v60  ;;  %v10479_v60 = vld [vmem:[%s16619_s1 + $0xb44] sm:$0xf]  ;;  %v5863_v38 = vpop.f32.mrf.mxu0 }
 0x245   :  { %6148 = vmatpush.bf16.msra.mxu1 %v8402_v6  ;;  %v10513_v6 = vld [vmem:[%s16619_s1 + $0xc54] sm:$0xf]  ;;  %6114 = vmatmul.bf16.vlgmr.msrb.gmra.mxu2 %v12376_v26  ;;  %v5851_v26 = vpop.f32.mrf.mxu3  ;;  %v10527_v41 = vld [vmem:[%s16619_s1 + $0xcc4] sm:$0xf] }
 0x246   :  { %6162 = vmatpush.bf16.msra.mxu2 %v8466_v17  ;;  %v8383_v17 = vld [vmem:[%s16619_s1 + $0xbd8] sm:$0xf0]  ;;  %6128 = vmatmul.bf16.vlgmr.msrb.gmra.mxu3 %v12389_v34  ;;  %v8450_v36 = vor.u32 %v10513_v6, %v8447_v44  ;;  %v10495_v34 = vld [vmem:[%s16619_s1 + $0xbc4] sm:$0xf]  ;;  %v10477_v6 = vld [vmem:[%s16619_s1 + $0xb34] sm:$0xf] }
 0x247   :  { %6176 = vmatpush.bf16.msra.mxu3 %v8530_v30  ;;  %v8386_v35 = vor.u32 %v10497_v43, %v8383_v17  ;;  %v8514_v30 = vor.u32 %v10529_v55, %v8511_v49  ;;  %v5838_v43 = vadd.f32 %v5837_v57, %v16689_v37  ;;  %v8442_v17 = vor.u32 %v10511_v40, %v8439_v32  ;;  %v8303_v44 = vld [vmem:[%s16619_s1 + $0xb38] sm:$0xf0]  ;;  %v10509_v49 = vld [vmem:[%s16619_s1 + $0xc34] sm:$0xf]  ;;  %v8295_v40 = vld [vmem:[%s16619_s1 + $0xb28] sm:$0xf0] }
 0x248   :  { %6135 = vmatpush.bf16.msra.mxu0 %v8330_v53  ;;  %v8503_v53 = vld [vmem:[%s16619_s1 + $0xcc8] sm:$0xf0]  ;;  %v10491_v32 = vld [vmem:[%s16619_s1 + $0xba4] sm:$0xf] }
 0x249   :  { %6149 = vmatpush.bf16.msra.mxu1 %v8394_v14  ;;  %v5864_v14 = vadd.f32 %v5863_v38, %v15010_v1  ;;  %v10493_v1 = vld [vmem:[%s16619_s1 + $0xbb4] sm:$0xf]  ;;  %v8506_v55 = vor.u32 %v10527_v41, %v8503_v53  ;;  %v8359_v38 = vld [vmem:[%s16619_s1 + $0xba8] sm:$0xf0] }
 0x24a   :  { %6163 = vmatpush.bf16.msra.mxu2 %v8458_v56  ;;  %v8314_v56 = vor.u32 %v10479_v60, %v8311_v20  ;;  %v8306_v60 = vor.u32 %v10477_v6, %v8303_v44  ;;  %v10475_v20 = vld [vmem:[%s16619_s1 + $0xb24] sm:$0xf]  ;;  %v8362_v6 = vor.u32 %v10491_v32, %v8359_v38  ;;  %v8279_v32 = vld [vmem:[%s16619_s1 + $0xb08] sm:$0xf0] }
 0x24b   :  { %6177 = vmatpush.bf16.msra.mxu3 %v8522_v51  ;;  %v8378_v51 = vor.u32 %v10495_v34, %v8375_v8  ;;  %v5878_v57 = vadd.f32 %v5877_v29, %v5864_v14  ;;  %v5852_v34 = vadd.f32 %v5851_v26, %v5838_v43  ;;  %v5891_v53 = vpop.f32.mrf.mxu2  ;;  %v10507_v26 = vld [vmem:[%s16619_s1 + $0xc24] sm:$0xf]  ;;  %v8423_v14 = vld [vmem:[%s16619_s1 + $0xc28] sm:$0xf0] }
 0x24c   :  { %6136 = vmatpush.bf16.msra.mxu0 %v8322_v54  ;;  %v8431_v54 = vld [vmem:[%s16619_s1 + $0xc38] sm:$0xf0]  ;;  %v5865_v29 = vpop.f32.mrf.mxu0  ;;  %v10523_v43 = vld [vmem:[%s16619_s1 + $0xca4] sm:$0xf] }
 0x24d   :  { %6150 = vmatpush.bf16.msra.mxu1 %v8386_v35  ;;  %v10525_v35 = vld [vmem:[%s16619_s1 + $0xcb4] sm:$0xf]  ;;  %v8434_v8 = vor.u32 %v10509_v49, %v8431_v54  ;;  %v5905_v37 = vpop.f32.mrf.mxu3  ;;  %v5866_v44 = vadd.f32 %v5865_v29, %v5852_v34  ;;  %v8287_v49 = vld [vmem:[%s16619_s1 + $0xb18] sm:$0xf0] }
 0x24e   :  { %6164 = vmatpush.bf16.msra.mxu2 %v8450_v36  ;;  %v8495_v36 = vld [vmem:[%s16619_s1 + $0xcb8] sm:$0xf0]  ;;  %v10489_v54 = vld [vmem:[%s16619_s1 + $0xb94] sm:$0xf] }
 0x24f   :  { %6178 = vmatpush.bf16.msra.mxu3 %v8514_v30  ;;  %v8370_v30 = vor.u32 %v10493_v1, %v8367_v46  ;;  %v8498_v41 = vor.u32 %v10525_v35, %v8495_v36  ;;  %v10473_v46 = vld [vmem:[%s16619_s1 + $0xb14] sm:$0xf]  ;;  %v5879_v35 = vpop.f32.mrf.mxu1  ;;  %v8351_v36 = vld [vmem:[%s16619_s1 + $0xb98] sm:$0xf0] }
 0x250   :  { %6137 = vmatpush.bf16.msra.mxu0 %v8314_v56  ;;  %v5892_v56 = vadd.f32 %v5891_v53, %v5878_v57  ;;  %v10521_v34 = vld [vmem:[%s16619_s1 + $0xc94] sm:$0xf]  ;;  %v5880_v38 = vadd.f32 %v5879_v35, %v5866_v44 }
 0x251   :  { %6151 = vmatpush.bf16.msra.mxu1 %v8378_v51  ;;  %v8487_v51 = vld [vmem:[%s16619_s1 + $0xca8] sm:$0xf0]  ;;  %v10581_v35 = vld [vmem:[%s16619_s1 + $0xe74] sm:$0xf] }
 0x252   :  { %6165 = vmatpush.bf16.msra.mxu2 %v8442_v17  ;;  %v8298_v17 = vor.u32 %v10475_v20, %v8295_v40  ;;  %v15206_v1 = vadd.f32 %v5905_v37, %v5892_v56  ;;  %v8490_v57 = vor.u32 %v10523_v43, %v8487_v51  ;;  %v8415_v20 = vld [vmem:[%s16619_s1 + $0xc18] sm:$0xf0]  ;;  %v10471_v40 = vld [vmem:[%s16619_s1 + $0xb04] sm:$0xf]  ;;  %v8407_v43 = vld [vmem:[%s16619_s1 + $0xc08] sm:$0xf0] }
 0x253   :  { %6179 = vmatpush.bf16.msra.mxu3 %v8506_v55  ;;  %v8426_v55 = vor.u32 %v10507_v26, %v8423_v14  ;;  %v10487_v26 = vld [vmem:[%s16619_s1 + $0xb84] sm:$0xf]  ;;  %v8343_v14 = vld [vmem:[%s16619_s1 + $0xb88] sm:$0xf0]  ;;  %v5893_v37 = vpop.f32.mrf.mxu2 }
 0x254   :  { %6138 = vmatpush.bf16.msra.mxu0 %v8306_v60  ;;  %v10505_v60 = vld [vmem:[%s16619_s1 + $0xc14] sm:$0xf]  ;;  %v10503_v56 = vld [vmem:[%s16619_s1 + $0xc04] sm:$0xf] }
 0x255   :  { %6152 = vmatpush.bf16.msra.mxu1 %v8370_v30  ;;  %v8479_v30 = vld [vmem:[%s16619_s1 + $0xc98] sm:$0xf0]  ;;  %v8418_v53 = vor.u32 %v10505_v60, %v8415_v20  ;;  %v10519_v51 = vld [vmem:[%s16619_s1 + $0xc84] sm:$0xf]  ;;  %v5907_v44 = vpop.f32.mrf.mxu3  ;;  %v8346_v20 = vor.u32 %v10487_v26, %v8343_v14 }
 0x256   :  { %6166 = vmatpush.bf16.msra.mxu2 %v8434_v8  ;;  %v8290_v8 = vor.u32 %v10473_v46, %v8287_v49  ;;  %v8482_v29 = vor.u32 %v10521_v34, %v8479_v30  ;;  %v8591_v46 = vld [vmem:[%s16619_s1 + $0xd78] sm:$0xf0]  ;;  %v10565_v49 = vld [vmem:[%s16619_s1 + $0xdf4] sm:$0xf]  ;;  %v8410_v34 = vor.u32 %v10503_v56, %v8407_v43  ;;  %v10563_v26 = vld [vmem:[%s16619_s1 + $0xde4] sm:$0xf] }
 0x257   :  { %6180 = vmatpush.bf16.msra.mxu3 %v8498_v41  ;;  %v8354_v41 = vor.u32 %v10489_v54, %v8351_v36  ;;  %v8282_v54 = vor.u32 %v10471_v40, %v8279_v32  ;;  %v8719_v36 = vld [vmem:[%s16619_s1 + $0xe78] sm:$0xf0]  ;;  %v10597_v30 = vld [vmem:[%s16619_s1 + $0xef4] sm:$0xf]  ;;  %v8647_v56 = vld [vmem:[%s16619_s1 + $0xde8] sm:$0xf0] }
 0x258   :  { %6139 = vmatpush.bf16.msra.mxu0 %v8298_v17  ;;  %v8471_v17 = vld [vmem:[%s16619_s1 + $0xc88] sm:$0xf0] }
 0x259   :  { %6153 = vmatpush.bf16.msra.mxu1 %v8362_v6  ;;  %v5894_v6 = vadd.f32 %v5893_v37, %v5880_v38  ;;  %v8474_v40 = vor.u32 %v10519_v51, %v8471_v17  ;;  %v8722_v37 = vor.u32 %v10581_v35, %v8719_v36  ;;  %v8711_v43 = vld [vmem:[%s16619_s1 + $0xe68] sm:$0xf0]  ;;  %v10595_v51 = vld [vmem:[%s16619_s1 + $0xee4] sm:$0xf]  ;;  %v8639_v35 = vld [vmem:[%s16619_s1 + $0xdd8] sm:$0xf0] }
 0x25a   :  { %6167 = vmatpush.bf16.msra.mxu2 %v8426_v55  ;;  %v10549_v55 = vld [vmem:[%s16619_s1 + $0xd74] sm:$0xf]  ;;  %v8775_v17 = vld [vmem:[%s16619_s1 + $0xee8] sm:$0xf0] }
 0x25b   :  { %6181 = vmatpush.bf16.msra.mxu3 %v8490_v57  ;;  %v8655_v57 = vld [vmem:[%s16619_s1 + $0xdf8] sm:$0xf0]  ;;  %v15274_v60 = vadd.f32 %v5907_v44, %v5894_v6  ;;  %v8594_v32 = vor.u32 %v10549_v55, %v8591_v46  ;;  %v8650_v44 = vor.u32 %v10563_v26, %v8647_v56  ;;  %v10545_v46 = vld [vmem:[%s16619_s1 + $0xd54] sm:$0xf]  ;;  %v10591_v26 = vld [vmem:[%s16619_s1 + $0xec4] sm:$0xf] }
 0x25c   :  { %6140 = vmatpush.bf16.msra.mxu0 %v8290_v8  ;;  %v8783_v8 = vld [vmem:[%s16619_s1 + $0xef8] sm:$0xf0]  ;;  %v8658_v38 = vor.u32 %v10565_v49, %v8655_v57  ;;  %v8778_v57 = vor.u32 %v10595_v51, %v8775_v17  ;;  %v10577_v36 = vld [vmem:[%s16619_s1 + $0xe54] sm:$0xf] }
 0x25d   :  { %6154 = vmatpush.bf16.msra.mxu1 %v8354_v41  ;;  %v10547_v41 = vld [vmem:[%s16619_s1 + $0xd64] sm:$0xf]  ;;  %v8786_v14 = vor.u32 %v10597_v30, %v8783_v8  ;;  %v8575_v49 = vld [vmem:[%s16619_s1 + $0xd58] sm:$0xf0] }
 0x25e   :  { %6168 = vmatpush.bf16.msra.mxu2 %v8418_v53  ;;  %v8583_v53 = vld [vmem:[%s16619_s1 + $0xd68] sm:$0xf0]  ;;  %v8578_v30 = vor.u32 %v10545_v46, %v8575_v49  ;;  %v8623_v49 = vld [vmem:[%s16619_s1 + $0xdb8] sm:$0xf0] }
 0x25f   :  { %6182 = vmatpush.bf16.msra.mxu3 %v8482_v29  ;;  %v10579_v29 = vld [vmem:[%s16619_s1 + $0xe64] sm:$0xf]  ;;  %v8586_v6 = vor.u32 %v10547_v41, %v8583_v53  ;;  %v8695_v41 = vld [vmem:[%s16619_s1 + $0xe48] sm:$0xf0] }
 0x260   :  { %6141 = vmatpush.bf16.msra.mxu0 %v8282_v54  ;;  %v8714_v55 = vor.u32 %v10579_v29, %v8711_v43  ;;  %v10561_v54 = vld [vmem:[%s16619_s1 + $0xdd4] sm:$0xf]  ;;  %v5919_v53 = vpop.f32.mrf.mxu0 }
 0x261   :  { %6155 = vmatpush.bf16.msra.mxu1 %v8346_v20  ;;  %v8703_v20 = vld [vmem:[%s16619_s1 + $0xe58] sm:$0xf0]  ;;  %v8642_v8 = vor.u32 %v10561_v54, %v8639_v35  ;;  %v5920_v56 = vadd.f32 %v5919_v53, %v15206_v1  ;;  %v5933_v43 = vpop.f32.mrf.mxu1  ;;  %v10573_v54 = vld [vmem:[%s16619_s1 + $0xe34] sm:$0xf] }
 0x262   :  { %6169 = vmatpush.bf16.msra.mxu2 %v8410_v34  ;;  %v8767_v34 = vld [vmem:[%s16619_s1 + $0xed8] sm:$0xf0]  ;;  %v10589_v35 = vld [vmem:[%s16619_s1 + $0xeb4] sm:$0xf] }
 0x263   :  { %6183 = vmatpush.bf16.msra.mxu3 %v8474_v40  ;;  %6142 = vmatmul.bf16.vlgmr.msra.gmra.mxu0 %v12387_v33  ;;  %v10593_v33 = vld [vmem:[%s16619_s1 + $0xed4] sm:$0xf]  ;;  %v8706_v40 = vor.u32 %v10577_v36, %v8703_v20  ;;  %v5934_v46 = vadd.f32 %v5933_v43, %v5920_v56  ;;  %v8751_v36 = vld [vmem:[%s16619_s1 + $0xeb8] sm:$0xf0] }
 0x264   :  { %6190 = vmatpush.bf16.msrb.mxu0 %v8594_v32  ;;  %6156 = vmatmul.bf16.vlgmr.msra.gmra.mxu1 %v12399_v48  ;;  %v10543_v48 = vld [vmem:[%s16619_s1 + $0xd44] sm:$0xf] }
 0x265   :  { %6204 = vmatpush.bf16.msrb.mxu1 %v8658_v38  ;;  %6170 = vmatmul.bf16.vlgmr.msra.gmra.mxu2 %v12613_v59  ;;  %v8567_v59 = vld [vmem:[%s16619_s1 + $0xd48] sm:$0xf0]  ;;  %v10559_v32 = vld [vmem:[%s16619_s1 + $0xdc4] sm:$0xf] }
 0x266   :  { %6218 = vmatpush.bf16.msrb.mxu2 %v8722_v37  ;;  %6184 = vmatmul.bf16.vlgmr.msra.gmra.mxu3 %v12628_v3  ;;  %v8770_v3 = vor.u32 %v10593_v33, %v8767_v34  ;;  %v8631_v38 = vld [vmem:[%s16619_s1 + $0xdc8] sm:$0xf0]  ;;  %v10575_v37 = vld [vmem:[%s16619_s1 + $0xe44] sm:$0xf]  ;;  %v8570_v29 = vor.u32 %v10543_v48, %v8567_v59  ;;  %v8754_v48 = vor.u32 %v10589_v35, %v8751_v36  ;;  %v10585_v35 = vld [vmem:[%s16619_s1 + $0xe94] sm:$0xf] }
 0x267   :  { %6232 = vmatpush.bf16.msrb.mxu3 %v8786_v14  ;;  %v8759_v14 = vld [vmem:[%s16619_s1 + $0xec8] sm:$0xf0]  ;;  %v8634_v51 = vor.u32 %v10559_v32, %v8631_v38  ;;  %v8698_v17 = vor.u32 %v10575_v37, %v8695_v41  ;;  %v8735_v36 = vld [vmem:[%s16619_s1 + $0xe98] sm:$0xf0] }
 0x268   :  { %6191 = vmatpush.bf16.msrb.mxu0 %v8586_v6  ;;  %v10541_v6 = vld [vmem:[%s16619_s1 + $0xd34] sm:$0xf]  ;;  %v8762_v1 = vor.u32 %v10591_v26, %v8759_v14  ;;  %v5947_v59 = vpop.f32.mrf.mxu2  ;;  %v8615_v32 = vld [vmem:[%s16619_s1 + $0xda8] sm:$0xf0]  ;;  %v5921_v41 = vpop.f32.mrf.mxu0  ;;  %v10587_v26 = vld [vmem:[%s16619_s1 + $0xea4] sm:$0xf] }
 0x269   :  { %6205 = vmatpush.bf16.msrb.mxu1 %v8650_v44  ;;  %v8559_v44 = vld [vmem:[%s16619_s1 + $0xd38] sm:$0xf0]  ;;  %v8679_v38 = vld [vmem:[%s16619_s1 + $0xe28] sm:$0xf0]  ;;  %v5948_v37 = vadd.f32 %v5947_v59, %v5934_v46  ;;  %v5961_v53 = vpop.f32.mrf.mxu3  ;;  %v5922_v56 = vadd.f32 %v5921_v41, %v15274_v60  ;;  %v5935_v43 = vpop.f32.mrf.mxu1  ;;  %v10553_v60 = vld [vmem:[%s16619_s1 + $0xd94] sm:$0xf] }
 0x26a   :  { %6219 = vmatpush.bf16.msrb.mxu2 %v8714_v55  ;;  %v10557_v55 = vld [vmem:[%s16619_s1 + $0xdb4] sm:$0xf]  ;;  %v8562_v20 = vor.u32 %v10541_v6, %v8559_v44  ;;  %v8743_v14 = vld [vmem:[%s16619_s1 + $0xea8] sm:$0xf0]  ;;  %v10567_v59 = vld [vmem:[%s16619_s1 + $0xe04] sm:$0xf] }
 0x26b   :  { %6233 = vmatpush.bf16.msrb.mxu3 %v8778_v57  ;;  %v8687_v57 = vld [vmem:[%s16619_s1 + $0xe38] sm:$0xf0]  ;;  %v8626_v33 = vor.u32 %v10557_v55, %v8623_v49  ;;  %v10537_v44 = vld [vmem:[%s16619_s1 + $0xd14] sm:$0xf]  ;;  %v5936_v46 = vadd.f32 %v5935_v43, %v5922_v56  ;;  %v8727_v41 = vld [vmem:[%s16619_s1 + $0xe88] sm:$0xf0] }
 0x26c   :  { %6192 = vmatpush.bf16.msrb.mxu0 %v8578_v30  ;;  %v8690_v34 = vor.u32 %v10573_v54, %v8687_v57  ;;  %v10539_v30 = vld [vmem:[%s16619_s1 + $0xd24] sm:$0xf]  ;;  %v8543_v55 = vld [vmem:[%s16619_s1 + $0xd18] sm:$0xf0]  ;;  %v10569_v54 = vld [vmem:[%s16619_s1 + $0xe14] sm:$0xf] }
 0x26d   :  { %6206 = vmatpush.bf16.msrb.mxu1 %v8642_v8  ;;  %v8551_v8 = vld [vmem:[%s16619_s1 + $0xd28] sm:$0xf0]  ;;  %v8607_v49 = vld [vmem:[%s16619_s1 + $0xd98] sm:$0xf0] }
 0x26e   :  { %6220 = vmatpush.bf16.msrb.mxu2 %v8706_v40  ;;  %v10555_v40 = vld [vmem:[%s16619_s1 + $0xda4] sm:$0xf]  ;;  %v8671_v57 = vld [vmem:[%s16619_s1 + $0xe18] sm:$0xf0] }
 0x26f   :  { %6234 = vmatpush.bf16.msrb.mxu3 %v8770_v3  ;;  %v10571_v3 = vld [vmem:[%s16619_s1 + $0xe24] sm:$0xf]  ;;  %v8847_v56 = vld [vmem:[%s16619_s1 + $0xf78] sm:$0xf0] }
 0x270   :  { %6193 = vmatpush.bf16.msrb.mxu0 %v8570_v29  ;;  %v8554_v29 = vor.u32 %v10539_v30, %v8551_v8  ;;  %v8682_v6 = vor.u32 %v10571_v3, %v8679_v38  ;;  %v8610_v30 = vor.u32 %v10553_v60, %v8607_v49  ;;  %v8674_v8 = vor.u32 %v10569_v54, %v8671_v57  ;;  %v5949_v3 = vpop.f32.mrf.mxu2  ;;  %v8663_v38 = vld [vmem:[%s16619_s1 + $0xe08] sm:$0xf0]  ;;  %v9039_v49 = vld [vmem:[%s16619_s1 + $0x10f8] sm:$0xf0] }
 0x271   :  { %6207 = vmatpush.bf16.msrb.mxu1 %v8634_v51  ;;  %v15408_v51 = vadd.f32 %v5961_v53, %v5948_v37  ;;  %v10583_v37 = vld [vmem:[%s16619_s1 + $0xe84] sm:$0xf]  ;;  %v5950_v53 = vadd.f32 %v5949_v3, %v5936_v46  ;;  %v10661_v46 = vld [vmem:[%s16619_s1 + $0x10f4] sm:$0xf] }
 0x272   :  { %6221 = vmatpush.bf16.msrb.mxu2 %v8698_v17  ;;  %v8618_v17 = vor.u32 %v10555_v40, %v8615_v32  ;;  %v10551_v40 = vld [vmem:[%s16619_s1 + $0xd84] sm:$0xf]  ;;  %v8738_v32 = vor.u32 %v10585_v35, %v8735_v36  ;;  %v8730_v54 = vor.u32 %v10583_v37, %v8727_v41  ;;  %v10609_v41 = vld [vmem:[%s16619_s1 + $0xf54] sm:$0xf] }
 0x273   :  { %6235 = vmatpush.bf16.msrb.mxu3 %v8762_v1  ;;  %v8746_v1 = vor.u32 %v10587_v26, %v8743_v14  ;;  %v5963_v26 = vpop.f32.mrf.mxu3  ;;  %v10613_v14 = vld [vmem:[%s16619_s1 + $0xf74] sm:$0xf] }
 0x274   :  { %6194 = vmatpush.bf16.msrb.mxu0 %v8562_v20  ;;  %v8546_v20 = vor.u32 %v10537_v44, %v8543_v55  ;;  %v8975_v44 = vld [vmem:[%s16619_s1 + $0x1078] sm:$0xf0]  ;;  %v15476_v55 = vadd.f32 %v5963_v26, %v5950_v53  ;;  %v8850_v57 = vor.u32 %v10613_v14, %v8847_v56  ;;  %v10625_v26 = vld [vmem:[%s16619_s1 + $0xfd4] sm:$0xf] }
 0x275   :  { %6208 = vmatpush.bf16.msrb.mxu1 %v8626_v33  ;;  %v10535_v33 = vld [vmem:[%s16619_s1 + $0xd04] sm:$0xf]  ;;  %v8831_v53 = vld [vmem:[%s16619_s1 + $0xf58] sm:$0xf0] }
 0x276   :  { %6222 = vmatpush.bf16.msrb.mxu2 %v8690_v34  ;;  %v8535_v34 = vld [vmem:[%s16619_s1 + $0xd08] sm:$0xf0]  ;;  %v8895_v56 = vld [vmem:[%s16619_s1 + $0xfd8] sm:$0xf0] }
 0x277   :  { %6236 = vmatpush.bf16.msrb.mxu3 %v8754_v48  ;;  %v8599_v48 = vld [vmem:[%s16619_s1 + $0xd88] sm:$0xf0]  ;;  %v8538_v43 = vor.u32 %v10535_v33, %v8535_v34  ;;  %v10627_v34 = vld [vmem:[%s16619_s1 + $0xfe4] sm:$0xf] }
 0x278   :  { %6195 = vmatpush.bf16.msrb.mxu0 %v8554_v29  ;;  %v10629_v29 = vld [vmem:[%s16619_s1 + $0xff4] sm:$0xf]  ;;  %v8602_v60 = vor.u32 %v10551_v40, %v8599_v48  ;;  %v8839_v33 = vld [vmem:[%s16619_s1 + $0xf68] sm:$0xf0]  ;;  %v10643_v40 = vld [vmem:[%s16619_s1 + $0x1064] sm:$0xf] }
 0x279   :  { %6209 = vmatpush.bf16.msrb.mxu1 %v8618_v17  ;;  %v8911_v17 = vld [vmem:[%s16619_s1 + $0xff8] sm:$0xf0]  ;;  %v8967_v48 = vld [vmem:[%s16619_s1 + $0x1068] sm:$0xf0] }
 0x27a   :  { %6223 = vmatpush.bf16.msrb.mxu2 %v8682_v6  ;;  %v10645_v6 = vld [vmem:[%s16619_s1 + $0x1074] sm:$0xf]  ;;  %v8914_v35 = vor.u32 %v10629_v29, %v8911_v17  ;;  %v8970_v37 = vor.u32 %v10643_v40, %v8967_v48  ;;  %v9023_v17 = vld [vmem:[%s16619_s1 + $0x10d8] sm:$0xf0] }
 0x27b   :  { %6237 = vmatpush.bf16.msrb.mxu3 %v8746_v1  ;;  %v8666_v1 = vor.u32 %v10567_v59, %v8663_v38  ;;  %v8978_v36 = vor.u32 %v10645_v6, %v8975_v44  ;;  %v10659_v59 = vld [vmem:[%s16619_s1 + $0x10e4] sm:$0xf]  ;;  %v10641_v29 = vld [vmem:[%s16619_s1 + $0x1054] sm:$0xf]  ;;  %v8834_v6 = vor.u32 %v10609_v41, %v8831_v53  ;;  %v8898_v44 = vor.u32 %v10625_v26, %v8895_v56  ;;  %v8815_v48 = vld [vmem:[%s16619_s1 + $0xf38] sm:$0xf0] }
 0x27c   :  { %6196 = vmatpush.bf16.msrb.mxu0 %v8546_v20  ;;  %v10611_v20 = vld [vmem:[%s16619_s1 + $0xf64] sm:$0xf]  ;;  %v10605_v40 = vld [vmem:[%s16619_s1 + $0xf34] sm:$0xf]  ;;  %v9007_v53 = vld [vmem:[%s16619_s1 + $0x10b8] sm:$0xf0] }
 0x27d   :  { %6210 = vmatpush.bf16.msrb.mxu1 %v8610_v30  ;;  %v9042_v30 = vor.u32 %v10661_v46, %v9039_v49  ;;  %v8842_v3 = vor.u32 %v10611_v20, %v8839_v33  ;;  %v8887_v46 = vld [vmem:[%s16619_s1 + $0xfc8] sm:$0xf0]  ;;  %v10639_v49 = vld [vmem:[%s16619_s1 + $0x1044] sm:$0xf]  ;;  %v10653_v41 = vld [vmem:[%s16619_s1 + $0x10b4] sm:$0xf]  ;;  %v8818_v26 = vor.u32 %v10605_v40, %v8815_v48 }
 0x27e   :  { %6224 = vmatpush.bf16.msrb.mxu2 %v8674_v8  ;;  %v8903_v8 = vld [vmem:[%s16619_s1 + $0xfe8] sm:$0xf0]  ;;  %v8863_v48 = vld [vmem:[%s16619_s1 + $0xf98] sm:$0xf0] }
 0x27f   :  { %6238 = vmatpush.bf16.msrb.mxu3 %v8738_v32  ;;  %v9031_v32 = vld [vmem:[%s16619_s1 + $0x10e8] sm:$0xf0]  ;;  %v8906_v38 = vor.u32 %v10627_v34, %v8903_v8 }
 0x280   :  { %6197 = vmatpush.bf16.msrb.mxu0 %v8538_v43  ;;  %v9034_v14 = vor.u32 %v10659_v59, %v9031_v32  ;;  %v8959_v43 = vld [vmem:[%s16619_s1 + $0x1058] sm:$0xf0]  ;;  %v10621_v59 = vld [vmem:[%s16619_s1 + $0xfb4] sm:$0xf] }
 0x281   :  { %6211 = vmatpush.bf16.msrb.mxu1 %v8602_v60  ;;  %v8962_v60 = vor.u32 %v10641_v29, %v8959_v43  ;;  %v5989_v34 = vpop.f32.mrf.mxu1  ;;  %v10603_v29 = vld [vmem:[%s16619_s1 + $0xf24] sm:$0xf]  ;;  %v8807_v43 = vld [vmem:[%s16619_s1 + $0xf28] sm:$0xf0] }
 0x282   :  { %6225 = vmatpush.bf16.msrb.mxu2 %v8666_v1  ;;  %v10623_v1 = vld [vmem:[%s16619_s1 + $0xfc4] sm:$0xf] }
 0x283   :  { %6239 = vmatpush.bf16.msrb.mxu3 %v8730_v54  ;;  %6198 = vmatmul.bf16.vlgmr.msrb.gmra.mxu0 %v12626_v2  ;;  %v10657_v2 = vld [vmem:[%s16619_s1 + $0x10d4] sm:$0xf]  ;;  %v8951_v54 = vld [vmem:[%s16619_s1 + $0x1048] sm:$0xf0] }
 0x284   :  { %6246 = vmatpush.bf16.msra.mxu0 %v8850_v57  ;;  %6212 = vmatmul.bf16.vlgmr.msrb.gmra.mxu1 %v12638_v9  ;;  %v10607_v9 = vld [vmem:[%s16619_s1 + $0xf44] sm:$0xf]  ;;  %v5975_v57 = vpop.f32.mrf.mxu0  ;;  %v8954_v8 = vor.u32 %v10639_v49, %v8951_v54  ;;  %v8999_v49 = vld [vmem:[%s16619_s1 + $0x10a8] sm:$0xf0] }
 0x285   :  { %6260 = vmatpush.bf16.msra.mxu1 %v8914_v35  ;;  %6226 = vmatmul.bf16.vlgmr.msrb.gmra.mxu2 %v12852_v16  ;;  %v8823_v16 = vld [vmem:[%s16619_s1 + $0xf48] sm:$0xf0]  ;;  %v10655_v35 = vld [vmem:[%s16619_s1 + $0x10c4] sm:$0xf]  ;;  %v5976_v20 = vadd.f32 %v5975_v57, %v15408_v51  ;;  %v8810_v57 = vor.u32 %v10603_v29, %v8807_v43 }
 0x286   :  { %6274 = vmatpush.bf16.msra.mxu2 %v8978_v36  ;;  %6240 = vmatmul.bf16.vlgmr.msrb.gmra.mxu3 %v12867_v25  ;;  %v9026_v25 = vor.u32 %v10657_v2, %v9023_v17  ;;  %v9015_v36 = vld [vmem:[%s16619_s1 + $0x10c8] sm:$0xf0]  ;;  %v8826_v33 = vor.u32 %v10607_v9, %v8823_v16  ;;  %v10619_v2 = vld [vmem:[%s16619_s1 + $0xfa4] sm:$0xf]  ;;  %v9010_v17 = vor.u32 %v10653_v41, %v9007_v53 }
 0x287   :  { %6288 = vmatpush.bf16.msra.mxu3 %v9042_v30  ;;  %v8890_v30 = vor.u32 %v10623_v1, %v8887_v46  ;;  %v9018_v51 = vor.u32 %v10655_v35, %v9015_v36  ;;  %v5990_v32 = vadd.f32 %v5989_v34, %v5976_v20  ;;  %v8935_v9 = vld [vmem:[%s16619_s1 + $0x1028] sm:$0xf0]  ;;  %v10651_v46 = vld [vmem:[%s16619_s1 + $0x10a4] sm:$0xf]  ;;  %v10601_v34 = vld [vmem:[%s16619_s1 + $0xf14] sm:$0xf] }
 0x288   :  { %6247 = vmatpush.bf16.msra.mxu0 %v8842_v3  ;;  %v8879_v3 = vld [vmem:[%s16619_s1 + $0xfb8] sm:$0xf0]  ;;  %v8791_v41 = vld [vmem:[%s16619_s1 + $0xf08] sm:$0xf0]  ;;  %v10631_v29 = vld [vmem:[%s16619_s1 + $0x1004] sm:$0xf] }
 0x289   :  { %6261 = vmatpush.bf16.msra.mxu1 %v8906_v38  ;;  %v10637_v38 = vld [vmem:[%s16619_s1 + $0x1034] sm:$0xf]  ;;  %v5991_v35 = vpop.f32.mrf.mxu1 }
 0x28a   :  { %6275 = vmatpush.bf16.msra.mxu2 %v8970_v37  ;;  %v8943_v37 = vld [vmem:[%s16619_s1 + $0x1038] sm:$0xf0] }
 0x28b   :  { %6289 = vmatpush.bf16.msra.mxu3 %v9034_v14  ;;  %v8882_v14 = vor.u32 %v10621_v59, %v8879_v3  ;;  %v8946_v56 = vor.u32 %v10637_v38, %v8943_v37  ;;  %v10633_v59 = vld [vmem:[%s16619_s1 + $0x1014] sm:$0xf]  ;;  %v8991_v3 = vld [vmem:[%s16619_s1 + $0x1098] sm:$0xf0]  ;;  %v10599_v37 = vld [vmem:[%s16619_s1 + $0xf04] sm:$0xf] }
 0x28c   :  { %6248 = vmatpush.bf16.msra.mxu0 %v8834_v6  ;;  %v6003_v6 = vpop.f32.mrf.mxu2  ;;  %v5977_v1 = vpop.f32.mrf.mxu0 }
 0x28d   :  { %6262 = vmatpush.bf16.msra.mxu1 %v8898_v44  ;;  %v8871_v44 = vld [vmem:[%s16619_s1 + $0xfa8] sm:$0xf0]  ;;  %v6004_v16 = vadd.f32 %v6003_v6, %v5990_v32  ;;  %v5978_v54 = vadd.f32 %v5977_v1, %v15476_v55  ;;  %v10617_v55 = vld [vmem:[%s16619_s1 + $0xf94] sm:$0xf]  ;;  %v10647_v6 = vld [vmem:[%s16619_s1 + $0x1084] sm:$0xf] }
 0x28e   :  { %6276 = vmatpush.bf16.msra.mxu2 %v8962_v60  ;;  %v10635_v60 = vld [vmem:[%s16619_s1 + $0x1024] sm:$0xf]  ;;  %v8874_v20 = vor.u32 %v10619_v2, %v8871_v44  ;;  %v10649_v32 = vld [vmem:[%s16619_s1 + $0x1094] sm:$0xf]  ;;  %v8866_v53 = vor.u32 %v10617_v55, %v8863_v48  ;;  %v8983_v44 = vld [vmem:[%s16619_s1 + $0x1088] sm:$0xf0] }
 0x28f   :  { %6290 = vmatpush.bf16.msra.mxu3 %v9026_v25  ;;  %v6017_v25 = vpop.f32.mrf.mxu3  ;;  %v5992_v40 = vadd.f32 %v5991_v35, %v5978_v54  ;;  %v8994_v43 = vor.u32 %v10649_v32, %v8991_v3  ;;  %v9103_v1 = vld [vmem:[%s16619_s1 + $0x1178] sm:$0xf0]  ;;  %v8794_v54 = vor.u32 %v10599_v37, %v8791_v41  ;;  %v10709_v35 = vld [vmem:[%s16619_s1 + $0x1274] sm:$0xf]  ;;  %v8986_v55 = vor.u32 %v10647_v6, %v8983_v44  ;;  %v10691_v32 = vld [vmem:[%s16619_s1 + $0x11e4] sm:$0xf] }
 0x290   :  { %6249 = vmatpush.bf16.msra.mxu0 %v8826_v33  ;;  %v15610_v36 = vadd.f32 %v6017_v25, %v6004_v16  ;;  %v8938_v33 = vor.u32 %v10635_v60, %v8935_v9  ;;  %v10677_v16 = vld [vmem:[%s16619_s1 + $0x1174] sm:$0xf]  ;;  %v9159_v37 = vld [vmem:[%s16619_s1 + $0x11e8] sm:$0xf0]  ;;  %v10707_v41 = vld [vmem:[%s16619_s1 + $0x1264] sm:$0xf] }
 0x291   :  { %6263 = vmatpush.bf16.msra.mxu1 %v8890_v30  ;;  %v8799_v30 = vld [vmem:[%s16619_s1 + $0xf18] sm:$0xf0]  ;;  %v10693_v25 = vld [vmem:[%s16619_s1 + $0x11f4] sm:$0xf] }
 0x292   :  { %6277 = vmatpush.bf16.msra.mxu2 %v8954_v8  ;;  %v9002_v8 = vor.u32 %v10651_v46, %v8999_v49  ;;  %v8802_v38 = vor.u32 %v10601_v34, %v8799_v30  ;;  %v16690_v46 = vperm.slane %v12171_v4, 0  ;;  %v10725_v34 = vld [vmem:[%s16619_s1 + $0x12f4] sm:$0xf]  ;;  %v9295_v30 = vld [vmem:[%s16619_s1 + $0x12f8] sm:$0xf0] }
 0x293   :  { %6291 = vmatpush.bf16.msra.mxu3 %v9018_v51  ;;  %v8927_v51 = vld [vmem:[%s16619_s1 + $0x1018] sm:$0xf0] }
 0x294   :  { %6250 = vmatpush.bf16.msra.mxu0 %v8818_v26  ;;  %v8930_v26 = vor.u32 %v10633_v59, %v8927_v51  ;;  %v6005_v2 = vpop.f32.mrf.mxu2  ;;  %v5138_v49 = vadd.f32 %v12365_v21, %v16690_v46  ;;  %v10675_v59 = vld [vmem:[%s16619_s1 + $0x1164] sm:$0xf]  ;;  %v9095_v51 = vld [vmem:[%s16619_s1 + $0x1168] sm:$0xf0] }
 0x295   :  { %6264 = vmatpush.bf16.msra.mxu1 %v8882_v14  ;;  %v10615_v14 = vld [vmem:[%s16619_s1 + $0xf84] sm:$0xf]  ;;  %v6006_v60 = vadd.f32 %v6005_v2, %v5992_v40  ;;  %v9087_v2 = vld [vmem:[%s16619_s1 + $0x1158] sm:$0xf0] }
 0x296   :  { %6278 = vmatpush.bf16.msra.mxu2 %v8946_v56  ;;  %v8855_v56 = vld [vmem:[%s16619_s1 + $0xf88] sm:$0xf0]  ;;  %v5152_v3 = vadd.f32 %v12397_v45, %v5138_v49  ;;  %v10723_v45 = vld [vmem:[%s16619_s1 + $0x12e4] sm:$0xf] }
 0x297   :  { %6292 = vmatpush.bf16.msra.mxu3 %v9010_v17  ;;  %v8919_v17 = vld [vmem:[%s16619_s1 + $0x1008] sm:$0xf0]  ;;  %v6019_v9 = vpop.f32.mrf.mxu3  ;;  %v8858_v4 = vor.u32 %v10615_v14, %v8855_v56  ;;  %v9098_v14 = vor.u32 %v10675_v59, %v9095_v51  ;;  %v9162_v56 = vor.u32 %v10691_v32, %v9159_v37  ;;  %v10669_v37 = vld [vmem:[%s16619_s1 + $0x1134] sm:$0xf] }
 0x298   :  { %6251 = vmatpush.bf16.msra.mxu0 %v8810_v57  ;;  %v9167_v57 = vld [vmem:[%s16619_s1 + $0x11f8] sm:$0xf0]  ;;  %v8922_v21 = vor.u32 %v10631_v29, %v8919_v17  ;;  %v10689_v17 = vld [vmem:[%s16619_s1 + $0x11d4] sm:$0xf]  ;;  %v5166_v6 = vadd.f32 %v12429_v5, %v5152_v3 }
 0x299   :  { %6265 = vmatpush.bf16.msra.mxu1 %v8874_v20  ;;  %v9231_v20 = vld [vmem:[%s16619_s1 + $0x1278] sm:$0xf0]  ;;  %v9170_v40 = vor.u32 %v10693_v25, %v9167_v57  ;;  %v10721_v5 = vld [vmem:[%s16619_s1 + $0x12d4] sm:$0xf]  ;;  %v16692_v25 = vld [vmem:[#allocation14_spill] sm:$0xff] }
 0x29a   :  { %6279 = vmatpush.bf16.msra.mxu2 %v8938_v33  ;;  %v15681_v33 = vadd.f32 %v6019_v9, %v6006_v60  ;;  %v9234_v48 = vor.u32 %v10709_v35, %v9231_v20  ;;  %v9151_v60 = vld [vmem:[%s16619_s1 + $0x11d8] sm:$0xf0]  ;;  %v10705_v9 = vld [vmem:[%s16619_s1 + $0x1254] sm:$0xf]  ;;  %v9079_v57 = vld [vmem:[%s16619_s1 + $0x1148] sm:$0xf0] }
 0x29b   :  { %6293 = vmatpush.bf16.msra.mxu3 %v9002_v8  ;;  %v9106_v8 = vor.u32 %v10677_v16, %v9103_v1  ;;  %v9215_v16 = vld [vmem:[%s16619_s1 + $0x1258] sm:$0xf0]  ;;  %v9154_v49 = vor.u32 %v10689_v17, %v9151_v60  ;;  %v10687_v35 = vld [vmem:[%s16619_s1 + $0x11c4] sm:$0xf] }
 0x29c   :  { %6252 = vmatpush.bf16.msra.mxu0 %v8802_v38  ;;  %v9298_v38 = vor.u32 %v10725_v34, %v9295_v30  ;;  %v16691_v1 = vld [vmem:[#allocation9_spill] sm:$0xff]  ;;  %v16693_v20 = vld [vmem:[#allocation2_spill] sm:$0xff]  ;;  %v9143_v34 = vld [vmem:[%s16619_s1 + $0x11c8] sm:$0xf0] }
 0x29d   :  { %6266 = vmatpush.bf16.msra.mxu1 %v8866_v53  ;;  %v9223_v53 = vld [vmem:[%s16619_s1 + $0x1268] sm:$0xf0]  ;;  %v10703_v30 = vld [vmem:[%s16619_s1 + $0x1244] sm:$0xf]  ;;  %v9146_v3 = vor.u32 %v10687_v35, %v9143_v34  ;;  %v9263_v17 = vld [vmem:[%s16619_s1 + $0x12b8] sm:$0xf0] }
 0x29e   :  { %6280 = vmatpush.bf16.msra.mxu2 %v8930_v26  ;;  %v9287_v26 = vld [vmem:[%s16619_s1 + $0x12e8] sm:$0xf0]  ;;  %v9226_v29 = vor.u32 %v10707_v41, %v9223_v53  ;;  %v9071_v41 = vld [vmem:[%s16619_s1 + $0x1138] sm:$0xf0]  ;;  %v10685_v53 = vld [vmem:[%s16619_s1 + $0x11b4] sm:$0xf] }
 0x29f   :  { %6294 = vmatpush.bf16.msra.mxu3 %v8994_v43  ;;  %v10673_v43 = vld [vmem:[%s16619_s1 + $0x1154] sm:$0xf]  ;;  %v9290_v44 = vor.u32 %v10723_v45, %v9287_v26  ;;  %v16694_v45 = vld [vmem:[#allocation3_spill] sm:$0xff]  ;;  %v16696_v34 = vld [vmem:[#allocation5_spill] sm:$0xff] }
 0x2a0   :  { %6253 = vmatpush.bf16.msra.mxu0 %v8794_v54  ;;  %v9090_v46 = vor.u32 %v10673_v43, %v9087_v2  ;;  %v9218_v54 = vor.u32 %v10705_v9, %v9215_v16  ;;  %v9199_v43 = vld [vmem:[%s16619_s1 + $0x1238] sm:$0xf0]  ;;  %v10717_v2 = vld [vmem:[%s16619_s1 + $0x12b4] sm:$0xf]  ;;  %v10667_v9 = vld [vmem:[%s16619_s1 + $0x1124] sm:$0xf] }
 0x2a1   :  { %6267 = vmatpush.bf16.msra.mxu1 %v8858_v4  ;;  %v5180_v4 = vadd.f32 %v16693_v20, %v5166_v6  ;;  %v6045_v32 = vpop.f32.mrf.mxu1  ;;  %v9074_v6 = vor.u32 %v10669_v37, %v9071_v41  ;;  %v9063_v16 = vld [vmem:[%s16619_s1 + $0x1128] sm:$0xf0]  ;;  %v9119_v41 = vld [vmem:[%s16619_s1 + $0x1198] sm:$0xf0] }
 0x2a2   :  { %6281 = vmatpush.bf16.msra.mxu2 %v8922_v21 }
 0x2a3   :  { %6295 = vmatpush.bf16.msra.mxu3 %v8986_v55  ;;  %6254 = vmatmul.bf16.vlgmr.msra.gmra.mxu0 %v12865_v24  ;;  %v9279_v24 = vld [vmem:[%s16619_s1 + $0x12d8] sm:$0xf0]  ;;  %v9207_v55 = vld [vmem:[%s16619_s1 + $0x1248] sm:$0xf0] }
 0x2a4   :  { %6302 = vmatpush.bf16.msrb.mxu0 %v9106_v8  ;;  %6268 = vmatmul.bf16.vlgmr.msra.gmra.mxu1 %v16691_v1  ;;  %v9282_v21 = vor.u32 %v10721_v5, %v9279_v24  ;;  %v6031_v8 = vpop.f32.mrf.mxu0  ;;  %v10683_v1 = vld [vmem:[%s16619_s1 + $0x11a4] sm:$0xf]  ;;  %v16695_v5 = vld [vmem:[#allocation4_spill] sm:$0xff] }
 0x2a5   :  { %6316 = vmatpush.bf16.msrb.mxu1 %v9170_v40  ;;  %6282 = vmatmul.bf16.vlgmr.msra.gmra.mxu2 %v13091_v27  ;;  %v10671_v27 = vld [vmem:[%s16619_s1 + $0x1144] sm:$0xf]  ;;  %v6032_v59 = vadd.f32 %v6031_v8, %v15610_v36  ;;  %v5194_v36 = vadd.f32 %v16694_v45, %v5180_v4  ;;  %v9066_v8 = vor.u32 %v10667_v9, %v9063_v16  ;;  %v9183_v45 = vld [vmem:[%s16619_s1 + $0x1218] sm:$0xf0] }
 0x2a6   :  { %6330 = vmatpush.bf16.msrb.mxu2 %v9234_v48  ;;  %6296 = vmatmul.bf16.vlgmr.msra.gmra.mxu3 %v16692_v25  ;;  %v10719_v40 = vld [vmem:[%s16619_s1 + $0x12c4] sm:$0xf]  ;;  %v9271_v48 = vld [vmem:[%s16619_s1 + $0x12c8] sm:$0xf0]  ;;  %v9082_v51 = vor.u32 %v10671_v27, %v9079_v57  ;;  %v9266_v25 = vor.u32 %v10717_v2, %v9263_v17 }
 0x2a7   :  { %6344 = vmatpush.bf16.msrb.mxu3 %v9298_v38  ;;  %v9210_v38 = vor.u32 %v10703_v30, %v9207_v55  ;;  %v9274_v26 = vor.u32 %v10719_v40, %v9271_v48  ;;  %v5208_v24 = vadd.f32 %v16695_v5, %v5194_v36  ;;  %v9191_v27 = vld [vmem:[%s16619_s1 + $0x1228] sm:$0xf0]  ;;  %v10715_v4 = vld [vmem:[%s16619_s1 + $0x12a4] sm:$0xf]  ;;  %v10713_v36 = vld [vmem:[%s16619_s1 + $0x1294] sm:$0xf] }
 0x2a8   :  { %6303 = vmatpush.bf16.msrb.mxu0 %v9098_v14  ;;  %v6046_v14 = vadd.f32 %v6045_v32, %v6032_v59  ;;  %v10665_v32 = vld [vmem:[%s16619_s1 + $0x1114] sm:$0xf]  ;;  %v10695_v9 = vld [vmem:[%s16619_s1 + $0x1204] sm:$0xf]  ;;  %v9175_v5 = vld [vmem:[%s16619_s1 + $0x1208] sm:$0xf0] }
 0x2a9   :  { %6317 = vmatpush.bf16.msrb.mxu1 %v9162_v56  ;;  %v9135_v56 = vld [vmem:[%s16619_s1 + $0x11b8] sm:$0xf0]  ;;  %v6073_v20 = vpop.f32.mrf.mxu3  ;;  %v5222_v30 = vadd.f32 %v16696_v34, %v5208_v24  ;;  %v6047_v40 = vpop.f32.mrf.mxu1  ;;  %v10711_v24 = vld [vmem:[%s16619_s1 + $0x1284] sm:$0xf]  ;;  %v10773_v34 = vld [vmem:[%s16619_s1 + $0x1474] sm:$0xf] }
 0x2aa   :  { %6331 = vmatpush.bf16.msrb.mxu2 %v9226_v29  ;;  %v10701_v29 = vld [vmem:[%s16619_s1 + $0x1234] sm:$0xf] }
 0x2ab   :  { %6345 = vmatpush.bf16.msrb.mxu3 %v9290_v44  ;;  %v9138_v44 = vor.u32 %v10685_v53, %v9135_v56  ;;  %v9202_v60 = vor.u32 %v10701_v29, %v9199_v43  ;;  %v10697_v53 = vld [vmem:[%s16619_s1 + $0x1214] sm:$0xf]  ;;  %v10663_v56 = vld [vmem:[%s16619_s1 + $0x1104] sm:$0xf]  ;;  %v9047_v29 = vld [vmem:[%s16619_s1 + $0x1108] sm:$0xf0] }
 0x2ac   :  { %6304 = vmatpush.bf16.msrb.mxu0 %v9090_v46  ;;  %v6059_v46 = vpop.f32.mrf.mxu2  ;;  %v6033_v35 = vpop.f32.mrf.mxu0  ;;  %v16697_v43 = vld [vmem:[#allocation6_spill] sm:$0xff] }
 0x2ad   :  { %6318 = vmatpush.bf16.msrb.mxu1 %v9154_v49  ;;  %v9127_v49 = vld [vmem:[%s16619_s1 + $0x11a8] sm:$0xf0]  ;;  %v6060_v57 = vadd.f32 %v6059_v46, %v6046_v14  ;;  %v6034_v55 = vadd.f32 %v6033_v35, %v15681_v33  ;;  %v10681_v33 = vld [vmem:[%s16619_s1 + $0x1194] sm:$0xf]  ;;  %v5236_v2 = vadd.f32 %v16697_v43, %v5222_v30  ;;  %v9359_v35 = vld [vmem:[%s16619_s1 + $0x1378] sm:$0xf0] }
 0x2ae   :  { %6332 = vmatpush.bf16.msrb.mxu2 %v9218_v54  ;;  %v10699_v54 = vld [vmem:[%s16619_s1 + $0x1224] sm:$0xf]  ;;  %v9130_v59 = vor.u32 %v10683_v1, %v9127_v49  ;;  %v9122_v17 = vor.u32 %v10681_v33, %v9119_v41  ;;  %v16698_v46 = vld [vmem:[#allocation7_spill] sm:$0xff]  ;;  %v9487_v30 = vld [vmem:[%s16619_s1 + $0x1478] sm:$0xf0] }
 0x2af   :  { %6346 = vmatpush.bf16.msrb.mxu3 %v9282_v21  ;;  %v9255_v21 = vld [vmem:[%s16619_s1 + $0x12a8] sm:$0xf0]  ;;  %v15821_v48 = vadd.f32 %v6073_v20, %v6060_v57  ;;  %v6048_v37 = vadd.f32 %v6047_v40, %v6034_v55  ;;  %v5250_v49 = vadd.f32 %v16698_v46, %v5236_v2  ;;  %v10741_v57 = vld [vmem:[%s16619_s1 + $0x1374] sm:$0xf]  ;;  %v9178_v40 = vor.u32 %v10695_v9, %v9175_v5  ;;  %v16700_v43 = vld [vmem:[#allocation10_spill] sm:$0xff] }
 0x2b0   :  { %6305 = vmatpush.bf16.msrb.mxu0 %v9082_v51  ;;  %v9194_v51 = vor.u32 %v10699_v54, %v9191_v27  ;;  %v10757_v20 = vld [vmem:[%s16619_s1 + $0x13f4] sm:$0xf]  ;;  %v9490_v41 = vor.u32 %v10773_v34, %v9487_v30  ;;  %v9407_v46 = vld [vmem:[%s16619_s1 + $0x13d8] sm:$0xf0]  ;;  %v16705_v34 = vld [vmem:[#allocation22_spill] sm:$0xff] }
 0x2b1   :  { %6319 = vmatpush.bf16.msrb.mxu1 %v9146_v3  ;;  %v9055_v3 = vld [vmem:[%s16619_s1 + $0x1118] sm:$0xf0]  ;;  %v6075_v27 = vpop.f32.mrf.mxu3  ;;  %v16699_v33 = vld [vmem:[#allocation8_spill] sm:$0xff] }
 0x2b2   :  { %6333 = vmatpush.bf16.msrb.mxu2 %v9210_v38  ;;  %v9258_v38 = vor.u32 %v10715_v4, %v9255_v21  ;;  %v9058_v14 = vor.u32 %v10665_v32, %v9055_v3  ;;  %v9050_v4 = vor.u32 %v10663_v56, %v9047_v29  ;;  %v9423_v21 = vld [vmem:[%s16619_s1 + $0x13f8] sm:$0xf0]  ;;  %v9362_v3 = vor.u32 %v10741_v57, %v9359_v35  ;;  %v10771_v56 = vld [vmem:[%s16619_s1 + $0x1464] sm:$0xf]  ;;  %v9479_v29 = vld [vmem:[%s16619_s1 + $0x1468] sm:$0xf0] }
 0x2b3   :  { %6347 = vmatpush.bf16.msrb.mxu3 %v9274_v26  ;;  %v9247_v26 = vld [vmem:[%s16619_s1 + $0x1298] sm:$0xf0]  ;;  %v9482_v9 = vor.u32 %v10771_v56, %v9479_v29  ;;  %v10753_v5 = vld [vmem:[%s16619_s1 + $0x13d4] sm:$0xf]  ;;  %v16703_v35 = vld [vmem:[#allocation19_spill] sm:$0xff] }
 0x2b4   :  { %6306 = vmatpush.bf16.msrb.mxu0 %v9074_v6  ;;  %v9186_v6 = vor.u32 %v10697_v53, %v9183_v45  ;;  %v9250_v16 = vor.u32 %v10713_v36, %v9247_v26  ;;  %v6061_v1 = vpop.f32.mrf.mxu2  ;;  %v10739_v53 = vld [vmem:[%s16619_s1 + $0x1364] sm:$0xf]  ;;  %v9351_v45 = vld [vmem:[%s16619_s1 + $0x1368] sm:$0xf0] }
 0x2b5   :  { %6320 = vmatpush.bf16.msrb.mxu1 %v9138_v44  ;;  %v10679_v44 = vld [vmem:[%s16619_s1 + $0x1184] sm:$0xf]  ;;  %v6062_v54 = vadd.f32 %v6061_v1, %v6048_v37  ;;  %v9426_v37 = vor.u32 %v10757_v20, %v9423_v21  ;;  %v9343_v1 = vld [vmem:[%s16619_s1 + $0x1358] sm:$0xf0]  ;;  %v16704_v20 = vld [vmem:[#allocation16_spill] sm:$0xff] }
 0x2b6   :  { %6334 = vmatpush.bf16.msrb.mxu2 %v9202_v60  ;;  %v9111_v60 = vld [vmem:[%s16619_s1 + $0x1188] sm:$0xf0]  ;;  %v10755_v36 = vld [vmem:[%s16619_s1 + $0x13e4] sm:$0xf]  ;;  %v9535_v21 = vld [vmem:[%s16619_s1 + $0x14d8] sm:$0xf0] }
 0x2b7   :  { %6348 = vmatpush.bf16.msrb.mxu3 %v9266_v25  ;;  %v9239_v25 = vld [vmem:[%s16619_s1 + $0x1288] sm:$0xf0]  ;;  %v15891_v55 = vadd.f32 %v6075_v27, %v6062_v54  ;;  %v9471_v54 = vld [vmem:[%s16619_s1 + $0x1458] sm:$0xf0] }
 0x2b8   :  { %6307 = vmatpush.bf16.msrb.mxu0 %v9066_v8  ;;  %v9114_v8 = vor.u32 %v10679_v44, %v9111_v60  ;;  %v9242_v32 = vor.u32 %v10711_v24, %v9239_v25  ;;  %v9354_v44 = vor.u32 %v10739_v53, %v9351_v45  ;;  %v16701_v24 = vld [vmem:[#allocation13_spill] sm:$0xff]  ;;  %v16702_v27 = vld [vmem:[#allocation11_spill] sm:$0xff]  ;;  %v10783_v45 = vld [vmem:[%s16619_s1 + $0x14c4] sm:$0xf] }
 0x2b9   :  { %6321 = vmatpush.bf16.msrb.mxu1 %v9130_v59  ;;  %v10789_v59 = vld [vmem:[%s16619_s1 + $0x14f4] sm:$0xf]  ;;  %v9463_v53 = vld [vmem:[%s16619_s1 + $0x1448] sm:$0xf0] }
 0x2ba   :  { %6335 = vmatpush.bf16.msrb.mxu2 %v9194_v51  ;;  %v9551_v51 = vld [vmem:[%s16619_s1 + $0x14f8] sm:$0xf0] }
 0x2bb   :  { %6349 = vmatpush.bf16.msrb.mxu3 %v9258_v38  ;;  %v5264_v38 = vadd.f32 %v16699_v33, %v5250_v49  ;;  %v9554_v26 = vor.u32 %v10789_v59, %v9551_v51  ;;  %v10769_v49 = vld [vmem:[%s16619_s1 + $0x1454] sm:$0xf]  ;;  %v9410_v59 = vor.u32 %v10753_v5, %v9407_v46  ;;  %v10751_v33 = vld [vmem:[%s16619_s1 + $0x13c4] sm:$0xf] }
 0x2bc   :  { %6308 = vmatpush.bf16.msrb.mxu0 %v9058_v14  ;;  %v9415_v14 = vld [vmem:[%s16619_s1 + $0x13e8] sm:$0xf0]  ;;  %v9474_v51 = vor.u32 %v10769_v49, %v9471_v54 }
 0x2bd   :  { %6322 = vmatpush.bf16.msrb.mxu1 %v9122_v17  ;;  %v5278_v2 = vadd.f32 %v16700_v43, %v5264_v38  ;;  %v10787_v17 = vld [vmem:[%s16619_s1 + $0x14e4] sm:$0xf]  ;;  %v9418_v60 = vor.u32 %v10755_v36, %v9415_v14  ;;  %v9527_v36 = vld [vmem:[%s16619_s1 + $0x14c8] sm:$0xf0] }
 0x2be   :  { %6336 = vmatpush.bf16.msrb.mxu2 %v9186_v6  ;;  %v9543_v6 = vld [vmem:[%s16619_s1 + $0x14e8] sm:$0xf0] }
 0x2bf   :  { %6350 = vmatpush.bf16.msrb.mxu3 %v9250_v16  ;;  %v10737_v16 = vld [vmem:[%s16619_s1 + $0x1354] sm:$0xf]  ;;  %v9546_v25 = vor.u32 %v10787_v17, %v9543_v6  ;;  %v5292_v57 = vadd.f32 %v16702_v27, %v5278_v2  ;;  %v16707_v14 = vld [vmem:[#allocation15_spill] sm:$0xff]  ;;  %v9327_v17 = vld [vmem:[%s16619_s1 + $0x1338] sm:$0xf0] }
 0x2c0   :  { %6309 = vmatpush.bf16.msrb.mxu0 %v9050_v4  ;;  %v10785_v4 = vld [vmem:[%s16619_s1 + $0x14d4] sm:$0xf]  ;;  %v9346_v30 = vor.u32 %v10737_v16, %v9343_v1  ;;  %v9455_v16 = vld [vmem:[%s16619_s1 + $0x1438] sm:$0xf0]  ;;  %v10731_v27 = vld [vmem:[%s16619_s1 + $0x1324] sm:$0xf] }
 0x2c1   :  { %6323 = vmatpush.bf16.msrb.mxu1 %v9114_v8  ;;  %v16706_v8 = vld [vmem:[#allocation12_spill] sm:$0xff]  ;;  %v9538_v38 = vor.u32 %v10785_v4, %v9535_v21  ;;  %v16708_v1 = vld [vmem:[#allocation17_spill] sm:$0xff]  ;;  %v9383_v4 = vld [vmem:[%s16619_s1 + $0x13a8] sm:$0xf0] }
 0x2c2   :  { %6337 = vmatpush.bf16.msrb.mxu2 %v9178_v40  ;;  %v5306_v40 = vadd.f32 %v16706_v8, %v5292_v57  ;;  %v10733_v2 = vld [vmem:[%s16619_s1 + $0x1334] sm:$0xf]  ;;  %v9319_v57 = vld [vmem:[%s16619_s1 + $0x1328] sm:$0xf0]  ;;  %v10763_v21 = vld [vmem:[%s16619_s1 + $0x1424] sm:$0xf] }
 0x2c3   :  { %6351 = vmatpush.bf16.msrb.mxu3 %v9242_v32  ;;  %6310 = vmatmul.bf16.vlgmr.msrb.gmra.mxu0 %v16701_v24  ;;  %v10735_v32 = vld [vmem:[%s16619_s1 + $0x1344] sm:$0xf]  ;;  %v10749_v6 = vld [vmem:[%s16619_s1 + $0x13b4] sm:$0xf]  ;;  %v9330_v46 = vor.u32 %v10733_v2, %v9327_v17  ;;  %v9303_v17 = vld [vmem:[%s16619_s1 + $0x1308] sm:$0xf0] }
 0x2c4   :  { %6358 = vmatpush.bf16.msra.mxu0 %v9362_v3  ;;  %6324 = vmatmul.bf16.vlgmr.msrb.gmra.mxu1 %v16704_v20  ;;  %v9335_v3 = vld [vmem:[%s16619_s1 + $0x1348] sm:$0xf0]  ;;  %v5320_v56 = vadd.f32 %v16707_v14, %v5306_v40  ;;  %v10781_v24 = vld [vmem:[%s16619_s1 + $0x14b4] sm:$0xf]  ;;  %v10779_v40 = vld [vmem:[%s16619_s1 + $0x14a4] sm:$0xf] }
 0x2c5   :  { %6372 = vmatpush.bf16.msra.mxu1 %v9426_v37  ;;  %6338 = vmatmul.bf16.vlgmr.msrb.gmra.mxu2 %v16703_v35  ;;  %v9399_v37 = vld [vmem:[%s16619_s1 + $0x13c8] sm:$0xf0]  ;;  %v10747_v35 = vld [vmem:[%s16619_s1 + $0x13a4] sm:$0xf]  ;;  %v9439_v14 = vld [vmem:[%s16619_s1 + $0x1418] sm:$0xf0] }
 0x2c6   :  { %6386 = vmatpush.bf16.msra.mxu2 %v9490_v41  ;;  %6352 = vmatmul.bf16.vlgmr.msrb.gmra.mxu3 %v16705_v34  ;;  %v10767_v41 = vld [vmem:[%s16619_s1 + $0x1444] sm:$0xf]  ;;  %v9402_v29 = vor.u32 %v10751_v33, %v9399_v37  ;;  %v5334_v5 = vadd.f32 %v16708_v1, %v5320_v56  ;;  %v9447_v34 = vld [vmem:[%s16619_s1 + $0x1428] sm:$0xf0]  ;;  %v9386_v33 = vor.u32 %v10747_v35, %v9383_v4  ;;  %v10729_v37 = vld [vmem:[%s16619_s1 + $0x1314] sm:$0xf] }
 0x2c7   :  { %6400 = vmatpush.bf16.msra.mxu3 %v9554_v26  ;;  %v9338_v26 = vor.u32 %v10735_v32, %v9335_v3  ;;  %v9466_v43 = vor.u32 %v10767_v41, %v9463_v53  ;;  %v16710_v32 = vld [vmem:[#allocation20_spill] sm:$0xff]  ;;  %v9311_v41 = vld [vmem:[%s16619_s1 + $0x1318] sm:$0xf0]  ;;  %v10727_v2 = vld [vmem:[%s16619_s1 + $0x1304] sm:$0xf] }
 0x2c8   :  { %6359 = vmatpush.bf16.msra.mxu0 %v9354_v44  ;;  %v9530_v44 = vor.u32 %v10783_v45, %v9527_v36  ;;  %v10745_v53 = vld [vmem:[%s16619_s1 + $0x1394] sm:$0xf]  ;;  %v9375_v36 = vld [vmem:[%s16619_s1 + $0x1398] sm:$0xf0]  ;;  %v9367_v1 = vld [vmem:[%s16619_s1 + $0x1388] sm:$0xf0]  ;;  %v9306_v4 = vor.u32 %v10727_v2, %v9303_v17 }
 0x2c9   :  { %6373 = vmatpush.bf16.msra.mxu1 %v9418_v60  ;;  %v9391_v60 = vld [vmem:[%s16619_s1 + $0x13b8] sm:$0xf0]  ;;  %v10777_v56 = vld [vmem:[%s16619_s1 + $0x1494] sm:$0xf]  ;;  %v10851_v17 = vld [vmem:[%s16619_s1 + $0x16e4] sm:$0xf] }
 0x2ca   :  { %6387 = vmatpush.bf16.msra.mxu2 %v9482_v9  ;;  %v10765_v9 = vld [vmem:[%s16619_s1 + $0x1434] sm:$0xf]  ;;  %v9394_v49 = vor.u32 %v10749_v6, %v9391_v60  ;;  %v16711_v6 = vld [vmem:[#allocation23_spill] sm:$0xff]  ;;  %v9378_v60 = vor.u32 %v10745_v53, %v9375_v36  ;;  %v9615_v35 = vld [vmem:[%s16619_s1 + $0x1578] sm:$0xf0] }
 0x2cb   :  { %6401 = vmatpush.bf16.msra.mxu3 %v9546_v25  ;;  %v9519_v25 = vld [vmem:[%s16619_s1 + $0x14b8] sm:$0xf0]  ;;  %v9458_v54 = vor.u32 %v10765_v9, %v9455_v16  ;;  %v10743_v16 = vld [vmem:[%s16619_s1 + $0x1384] sm:$0xf] }
 0x2cc   :  { %6360 = vmatpush.bf16.msra.mxu0 %v9346_v30  ;;  %v9522_v20 = vor.u32 %v10781_v24, %v9519_v25  ;;  %v16709_v30 = vld [vmem:[#allocation18_spill] sm:$0xff]  ;;  %v9431_v25 = vld [vmem:[%s16619_s1 + $0x1408] sm:$0xf0] }
 0x2cd   :  { %6374 = vmatpush.bf16.msra.mxu1 %v9410_v59  ;;  %v5348_v8 = vadd.f32 %v16709_v30, %v5334_v5  ;;  %v9511_v59 = vld [vmem:[%s16619_s1 + $0x14a8] sm:$0xf0]  ;;  %v10759_v5 = vld [vmem:[%s16619_s1 + $0x1404] sm:$0xf]  ;;  %v9743_v30 = vld [vmem:[%s16619_s1 + $0x1678] sm:$0xf0] }
 0x2ce   :  { %6388 = vmatpush.bf16.msra.mxu2 %v9474_v51  ;;  %v9322_v51 = vor.u32 %v10731_v27, %v9319_v57  ;;  %v9514_v45 = vor.u32 %v10779_v40, %v9511_v59  ;;  %v10805_v57 = vld [vmem:[%s16619_s1 + $0x1574] sm:$0xf]  ;;  %v9434_v40 = vor.u32 %v10759_v5, %v9431_v25  ;;  %v10803_v53 = vld [vmem:[%s16619_s1 + $0x1564] sm:$0xf] }
 0x2cf   :  { %6402 = vmatpush.bf16.msra.mxu3 %v9538_v38  ;;  %v5362_v3 = vadd.f32 %v16710_v32, %v5348_v8  ;;  %v9450_v38 = vor.u32 %v10763_v21, %v9447_v34  ;;  %v9679_v21 = vld [vmem:[%s16619_s1 + $0x15f8] sm:$0xf0]  ;;  %v10837_v34 = vld [vmem:[%s16619_s1 + $0x1674] sm:$0xf]  ;;  %v9370_v8 = vor.u32 %v10743_v16, %v9367_v1  ;;  %v10819_v36 = vld [vmem:[%s16619_s1 + $0x15e4] sm:$0xf] }
 0x2d0   :  { %6361 = vmatpush.bf16.msra.mxu0 %v9338_v26  ;;  %v10761_v26 = vld [vmem:[%s16619_s1 + $0x1414] sm:$0xf]  ;;  %v9599_v1 = vld [vmem:[%s16619_s1 + $0x1558] sm:$0xf0] }
 0x2d1   :  { %6375 = vmatpush.bf16.msra.mxu1 %v9402_v29  ;;  %v9503_v29 = vld [vmem:[%s16619_s1 + $0x1498] sm:$0xf0]  ;;  %v9442_v9 = vor.u32 %v10761_v26, %v9439_v14  ;;  %v10853_v59 = vld [vmem:[%s16619_s1 + $0x16f4] sm:$0xf]  ;;  %v9671_v14 = vld [vmem:[%s16619_s1 + $0x15e8] sm:$0xf0] }
 0x2d2   :  { %6389 = vmatpush.bf16.msra.mxu2 %v9466_v43  ;;  %v9314_v43 = vor.u32 %v10729_v37, %v9311_v41  ;;  %v9506_v24 = vor.u32 %v10777_v56, %v9503_v29  ;;  %v9746_v41 = vor.u32 %v10837_v34, %v9743_v30  ;;  %v10835_v56 = vld [vmem:[%s16619_s1 + $0x1664] sm:$0xf]  ;;  %v9735_v29 = vld [vmem:[%s16619_s1 + $0x1668] sm:$0xf0]  ;;  %v10801_v16 = vld [vmem:[%s16619_s1 + $0x1554] sm:$0xf] }
 0x2d3   :  { %6403 = vmatpush.bf16.msra.mxu3 %v9530_v44  ;;  %v5376_v44 = vadd.f32 %v16711_v6, %v5362_v3  ;;  %v9618_v3 = vor.u32 %v10805_v57, %v9615_v35  ;;  %v9799_v6 = vld [vmem:[%s16619_s1 + $0x16e8] sm:$0xf0]  ;;  %v10817_v5 = vld [vmem:[%s16619_s1 + $0x15d4] sm:$0xf]  ;;  %v16719_v34 = vld [vmem:[#allocation30_spill] sm:$0xff]  ;;  %v9602_v30 = vor.u32 %v10801_v16, %v9599_v1 }
 0x2d4   :  { %6362 = vmatpush.bf16.msra.mxu0 %v9330_v46  ;;  %v10775_v46 = vld [vmem:[%s16619_s1 + $0x1484] sm:$0xf]  ;;  %v9802_v25 = vor.u32 %v10851_v17, %v9799_v6  ;;  %v16717_v35 = vld [vmem:[#allocation27_spill] sm:$0xff]  ;;  %v9583_v17 = vld [vmem:[%s16619_s1 + $0x1538] sm:$0xf0] }
 0x2d5   :  { %6376 = vmatpush.bf16.msra.mxu1 %v9394_v49  ;;  %v9495_v49 = vld [vmem:[%s16619_s1 + $0x1488] sm:$0xf0]  ;;  %v10813_v6 = vld [vmem:[%s16619_s1 + $0x15b4] sm:$0xf]  ;;  %v9711_v16 = vld [vmem:[%s16619_s1 + $0x1638] sm:$0xf0] }
 0x2d6   :  { %6390 = vmatpush.bf16.msra.mxu2 %v9458_v54  ;;  %v16712_v54 = vld [vmem:[#allocation25_spill] sm:$0xff]  ;;  %v9498_v32 = vor.u32 %v10775_v46, %v9495_v49  ;;  %v10833_v49 = vld [vmem:[%s16619_s1 + $0x1654] sm:$0xf] }
 0x2d7   :  { %6404 = vmatpush.bf16.msra.mxu3 %v9522_v20  ;;  %v5390_v27 = vadd.f32 %v16712_v54, %v5376_v44  ;;  %v10821_v20 = vld [vmem:[%s16619_s1 + $0x15f4] sm:$0xf]  ;;  %v9663_v46 = vld [vmem:[%s16619_s1 + $0x15d8] sm:$0xf0] }
 0x2d8   :  { %6363 = vmatpush.bf16.msra.mxu0 %v9322_v51  ;;  %v9807_v51 = vld [vmem:[%s16619_s1 + $0x16f8] sm:$0xf0]  ;;  %v9682_v37 = vor.u32 %v10821_v20, %v9679_v21  ;;  %v16718_v20 = vld [vmem:[#allocation24_spill] sm:$0xff] }
 0x2d9   :  { %6377 = vmatpush.bf16.msra.mxu1 %v9386_v33  ;;  %v16713_v33 = vld [vmem:[#allocation26_spill] sm:$0xff]  ;;  %v9810_v26 = vor.u32 %v10853_v59, %v9807_v51  ;;  %v9727_v54 = vld [vmem:[%s16619_s1 + $0x1658] sm:$0xf0]  ;;  %v9666_v59 = vor.u32 %v10817_v5, %v9663_v46  ;;  %v10845_v5 = vld [vmem:[%s16619_s1 + $0x16b4] sm:$0xf] }
 0x2da   :  { %6391 = vmatpush.bf16.msra.mxu2 %v9450_v38  ;;  %v5404_v38 = vadd.f32 %v16713_v33, %v5390_v27  ;;  %v16716_v27 = vld [vmem:[#allocation31_spill] sm:$0xff]  ;;  %v9791_v21 = vld [vmem:[%s16619_s1 + $0x16d8] sm:$0xf0]  ;;  %v9730_v51 = vor.u32 %v10833_v49, %v9727_v54  ;;  %v10815_v33 = vld [vmem:[%s16619_s1 + $0x15c4] sm:$0xf] }
 0x2db   :  { %6405 = vmatpush.bf16.msra.mxu3 %v9514_v45  ;;  %v9607_v45 = vld [vmem:[%s16619_s1 + $0x1568] sm:$0xf0]  ;;  %v10795_v54 = vld [vmem:[%s16619_s1 + $0x1524] sm:$0xf] }
 0x2dc   :  { %6364 = vmatpush.bf16.msra.mxu0 %v9314_v43  ;;  %v16714_v43 = vld [vmem:[#allocation28_spill] sm:$0xff]  ;;  %v9610_v44 = vor.u32 %v10803_v53, %v9607_v45  ;;  %v9719_v53 = vld [vmem:[%s16619_s1 + $0x1648] sm:$0xf0]  ;;  %v10847_v45 = vld [vmem:[%s16619_s1 + $0x16c4] sm:$0xf] }
 0x2dd   :  { %6378 = vmatpush.bf16.msra.mxu1 %v9378_v60  ;;  %v5418_v2 = vadd.f32 %v16714_v43, %v5404_v38  ;;  %v9674_v60 = vor.u32 %v10819_v36, %v9671_v14  ;;  %v9783_v36 = vld [vmem:[%s16619_s1 + $0x16c8] sm:$0xf0]  ;;  %v16721_v14 = vld [vmem:[#allocation34_spill] sm:$0xff] }
 0x2de   :  { %6392 = vmatpush.bf16.msra.mxu2 %v9442_v9  ;;  %v9738_v9 = vor.u32 %v10835_v56, %v9735_v29 }
 0x2df   :  { %6406 = vmatpush.bf16.msra.mxu3 %v9506_v24  ;;  %v16715_v24 = vld [vmem:[#allocation21_spill] sm:$0xff]  ;;  %v5432_v57 = vadd.f32 %v16716_v27, %v5418_v2  ;;  %v10797_v2 = vld [vmem:[%s16619_s1 + $0x1534] sm:$0xf]  ;;  %v10811_v27 = vld [vmem:[%s16619_s1 + $0x15a4] sm:$0xf] }
 0x2e0   :  { %6365 = vmatpush.bf16.msra.mxu0 %v9306_v4  ;;  %v10849_v4 = vld [vmem:[%s16619_s1 + $0x16d4] sm:$0xf] }
 0x2e1   :  { %6379 = vmatpush.bf16.msra.mxu1 %v9370_v8  ;;  %v16720_v8 = vld [vmem:[#allocation33_spill] sm:$0xff]  ;;  %v9794_v38 = vor.u32 %v10849_v4, %v9791_v21  ;;  %v9703_v4 = vld [vmem:[%s16619_s1 + $0x1628] sm:$0xf0] }
 0x2e2   :  { %6393 = vmatpush.bf16.msra.mxu2 %v9434_v40  ;;  %v5446_v40 = vadd.f32 %v16720_v8, %v5432_v57 }
 0x2e3   :  { %6407 = vmatpush.bf16.msra.mxu3 %v9498_v32  ;;  %6366 = vmatmul.bf16.vlgmr.msra.gmra.mxu0 %v16715_v24  ;;  %v10799_v32 = vld [vmem:[%s16619_s1 + $0x1544] sm:$0xf]  ;;  %v9775_v24 = vld [vmem:[%s16619_s1 + $0x16b8] sm:$0xf0] }
 0x2e4   :  { %6414 = vmatpush.bf16.msrb.mxu0 %v9618_v3  ;;  %6380 = vmatmul.bf16.vlgmr.msra.gmra.mxu1 %v16718_v20  ;;  %v9591_v3 = vld [vmem:[%s16619_s1 + $0x1548] sm:$0xf0]  ;;  %v5460_v56 = vadd.f32 %v16721_v14, %v5446_v40  ;;  %v9778_v57 = vor.u32 %v10845_v5, %v9775_v24  ;;  %v10827_v20 = vld [vmem:[%s16619_s1 + $0x1624] sm:$0xf]  ;;  %v10869_v5 = vld [vmem:[%s16619_s1 + $0x1774] sm:$0xf] }
 0x2e5   :  { %6428 = vmatpush.bf16.msrb.mxu1 %v9682_v37  ;;  %6394 = vmatmul.bf16.vlgmr.msra.gmra.mxu2 %v16717_v35  ;;  %v9655_v37 = vld [vmem:[%s16619_s1 + $0x15c8] sm:$0xf0]  ;;  %v9871_v24 = vld [vmem:[%s16619_s1 + $0x1778] sm:$0xf0] }
 0x2e6   :  { %6442 = vmatpush.bf16.msrb.mxu2 %v9746_v41  ;;  %6408 = vmatmul.bf16.vlgmr.msra.gmra.mxu3 %v16719_v34  ;;  %v10831_v41 = vld [vmem:[%s16619_s1 + $0x1644] sm:$0xf]  ;;  %v9658_v29 = vor.u32 %v10815_v33, %v9655_v37  ;;  %v5474_v1 = vadd.f32 %v13819_v50, %v5460_v56  ;;  %v9575_v50 = vld [vmem:[%s16619_s1 + $0x1528] sm:$0xf0]  ;;  %v9695_v37 = vld [vmem:[%s16619_s1 + $0x1618] sm:$0xf0] }
 0x2e7   :  { %6456 = vmatpush.bf16.msrb.mxu3 %v9810_v26  ;;  %v9594_v26 = vor.u32 %v10799_v32, %v9591_v3  ;;  %v9722_v43 = vor.u32 %v10831_v41, %v9719_v53  ;;  %v9639_v35 = vld [vmem:[%s16619_s1 + $0x15a8] sm:$0xf0]  ;;  %v10843_v34 = vld [vmem:[%s16619_s1 + $0x16a4] sm:$0xf]  ;;  %v9578_v8 = vor.u32 %v10795_v54, %v9575_v50  ;;  %v9567_v32 = vld [vmem:[%s16619_s1 + $0x1518] sm:$0xf0] }
 0x2e8   :  { %6415 = vmatpush.bf16.msrb.mxu0 %v9610_v44  ;;  %v9786_v44 = vor.u32 %v10847_v45, %v9783_v36  ;;  %v5488_v21 = vadd.f32 %v13831_v7, %v5474_v1  ;;  %v10793_v7 = vld [vmem:[%s16619_s1 + $0x1514] sm:$0xf]  ;;  %v9759_v53 = vld [vmem:[%s16619_s1 + $0x1698] sm:$0xf0]  ;;  %v10791_v36 = vld [vmem:[%s16619_s1 + $0x1504] sm:$0xf] }
 0x2e9   :  { %6429 = vmatpush.bf16.msrb.mxu1 %v9674_v60  ;;  %v9647_v60 = vld [vmem:[%s16619_s1 + $0x15b8] sm:$0xf0]  ;;  %v10809_v3 = vld [vmem:[%s16619_s1 + $0x1594] sm:$0xf]  ;;  %v9570_v45 = vor.u32 %v10793_v7, %v9567_v32  ;;  %v16722_v14 = vld [vmem:[#allocation39_spill] sm:$0xff] }
 0x2ea   :  { %6443 = vmatpush.bf16.msrb.mxu2 %v9738_v9  ;;  %v10829_v9 = vld [vmem:[%s16619_s1 + $0x1634] sm:$0xf]  ;;  %v9650_v46 = vor.u32 %v10813_v6, %v9647_v60  ;;  %v5502_v40 = vadd.f32 %v13872_v22, %v5488_v21  ;;  %v9631_v22 = vld [vmem:[%s16619_s1 + $0x1598] sm:$0xf0]  ;;  %v10823_v6 = vld [vmem:[%s16619_s1 + $0x1604] sm:$0xf] }
 0x2eb   :  { %6457 = vmatpush.bf16.msrb.mxu3 %v9802_v25  ;;  %v9586_v25 = vor.u32 %v10797_v2, %v9583_v17  ;;  %v9714_v49 = vor.u32 %v10829_v9, %v9711_v16  ;;  %v10841_v41 = vld [vmem:[%s16619_s1 + $0x1694] sm:$0xf]  ;;  %v10807_v2 = vld [vmem:[%s16619_s1 + $0x1584] sm:$0xf]  ;;  %v9623_v17 = vld [vmem:[%s16619_s1 + $0x1588] sm:$0xf0] }
 0x2ec   :  { %6416 = vmatpush.bf16.msrb.mxu0 %v9602_v30  ;;  %v9767_v30 = vld [vmem:[%s16619_s1 + $0x16a8] sm:$0xf0]  ;;  %v5516_v56 = vadd.f32 %v16722_v14, %v5502_v40  ;;  %v10839_v9 = vld [vmem:[%s16619_s1 + $0x1684] sm:$0xf]  ;;  %v9999_v54 = vld [vmem:[%s16619_s1 + $0x1878] sm:$0xf0]  ;;  %v9626_v50 = vor.u32 %v10807_v2, %v9623_v17 }
 0x2ed   :  { %6430 = vmatpush.bf16.msrb.mxu1 %v9666_v59  ;;  %v9642_v59 = vor.u32 %v10811_v27, %v9639_v35  ;;  %v9770_v33 = vor.u32 %v10843_v34, %v9767_v30  ;;  %v9687_v60 = vld [vmem:[%s16619_s1 + $0x1608] sm:$0xf0]  ;;  %v10063_v35 = vld [vmem:[%s16619_s1 + $0x18f8] sm:$0xf0]  ;;  %v10899_v7 = vld [vmem:[%s16619_s1 + $0x1864] sm:$0xf] }
 0x2ee   :  { %6444 = vmatpush.bf16.msrb.mxu2 %v9730_v51  ;;  %v9706_v51 = vor.u32 %v10827_v20, %v9703_v4  ;;  %v9751_v16 = vld [vmem:[%s16619_s1 + $0x1688] sm:$0xf0]  ;;  %v5530_v1 = vadd.f32 %v14046_v61, %v5516_v56  ;;  %v10901_v61 = vld [vmem:[%s16619_s1 + $0x1874] sm:$0xf]  ;;  %v9690_v27 = vor.u32 %v10823_v6, %v9687_v60  ;;  %v9874_v4 = vor.u32 %v10869_v5, %v9871_v24  ;;  %v16724_v14 = vld [vmem:[#allocation29_spill] sm:$0xff] }
 0x2ef   :  { %6458 = vmatpush.bf16.msrb.mxu3 %v9794_v38  ;;  %v10825_v38 = vld [vmem:[%s16619_s1 + $0x1614] sm:$0xf]  ;;  %v9754_v20 = vor.u32 %v10839_v9, %v9751_v16  ;;  %v10002_v30 = vor.u32 %v10901_v61, %v9999_v54  ;;  %v9863_v40 = vld [vmem:[%s16619_s1 + $0x1768] sm:$0xf0]  ;;  %v9983_v2 = vld [vmem:[%s16619_s1 + $0x1858] sm:$0xf0] }
 0x2f0   :  { %6417 = vmatpush.bf16.msrb.mxu0 %v9594_v26  ;;  %v9559_v26 = vld [vmem:[%s16619_s1 + $0x1508] sm:$0xf0]  ;;  %v5544_v21 = vadd.f32 %v14056_v63, %v5530_v1  ;;  %v16727_v60 = vld [vmem:[#allocation32_spill] sm:$0xff]  ;;  %v10047_v16 = vld [vmem:[%s16619_s1 + $0x18d8] sm:$0xf0] }
 0x2f1   :  { %6431 = vmatpush.bf16.msrb.mxu1 %v9658_v29  ;;  %v9634_v29 = vor.u32 %v10809_v3, %v9631_v22  ;;  %v9927_v63 = vld [vmem:[%s16619_s1 + $0x17e8] sm:$0xf0]  ;;  %v16723_v3 = vld [vmem:[#allocation42_spill] sm:$0xff]  ;;  %v10913_v9 = vld [vmem:[%s16619_s1 + $0x18d4] sm:$0xf] }
 0x2f2   :  { %6445 = vmatpush.bf16.msrb.mxu2 %v9722_v43  ;;  %v9698_v43 = vor.u32 %v10825_v38, %v9695_v37  ;;  %v9991_v32 = vld [vmem:[%s16619_s1 + $0x1868] sm:$0xf0]  ;;  %v10915_v22 = vld [vmem:[%s16619_s1 + $0x18e4] sm:$0xf]  ;;  %v16728_v1 = vld [vmem:[#allocation37_spill] sm:$0xff] }
 0x2f3   :  { %6459 = vmatpush.bf16.msrb.mxu3 %v9786_v44  ;;  %v9762_v44 = vor.u32 %v10841_v41, %v9759_v53  ;;  %v10055_v38 = vld [vmem:[%s16619_s1 + $0x18e8] sm:$0xf0]  ;;  %v9994_v53 = vor.u32 %v10899_v7, %v9991_v32  ;;  %v10879_v54 = vld [vmem:[%s16619_s1 + $0x17c4] sm:$0xf]  ;;  %v9967_v7 = vld [vmem:[%s16619_s1 + $0x1838] sm:$0xf0] }
 0x2f4   :  { %6418 = vmatpush.bf16.msrb.mxu0 %v9586_v25  ;;  %v10885_v25 = vld [vmem:[%s16619_s1 + $0x17f4] sm:$0xf]  ;;  %v10058_v56 = vor.u32 %v10915_v22, %v10055_v38  ;;  %v16725_v17 = vld [vmem:[#allocation43_spill] sm:$0xff] }
 0x2f5   :  { %6432 = vmatpush.bf16.msrb.mxu1 %v9650_v46  ;;  %v9562_v46 = vor.u32 %v10791_v36, %v9559_v26  ;;  %v9855_v36 = vld [vmem:[%s16619_s1 + $0x1758] sm:$0xf0]  ;;  %v10881_v26 = vld [vmem:[%s16619_s1 + $0x17d4] sm:$0xf]  ;;  %v9847_v61 = vld [vmem:[%s16619_s1 + $0x1748] sm:$0xf0] }
 0x2f6   :  { %6446 = vmatpush.bf16.msrb.mxu2 %v9714_v49  ;;  %v9935_v49 = vld [vmem:[%s16619_s1 + $0x17f8] sm:$0xf0] }
 0x2f7   :  { %6460 = vmatpush.bf16.msrb.mxu3 %v9778_v57  ;;  %v10917_v57 = vld [vmem:[%s16619_s1 + $0x18f4] sm:$0xf]  ;;  %v9938_v34 = vor.u32 %v10885_v25, %v9935_v49  ;;  %v10863_v49 = vld [vmem:[%s16619_s1 + $0x1744] sm:$0xf] }
 0x2f8   :  { %6419 = vmatpush.bf16.msrb.mxu0 %v9578_v8  ;;  %v10867_v8 = vld [vmem:[%s16619_s1 + $0x1764] sm:$0xf] }
 0x2f9   :  { %6433 = vmatpush.bf16.msrb.mxu1 %v9642_v59  ;;  %v10883_v59 = vld [vmem:[%s16619_s1 + $0x17e4] sm:$0xf]  ;;  %v9866_v37 = vor.u32 %v10867_v8, %v9863_v40  ;;  %v10861_v8 = vld [vmem:[%s16619_s1 + $0x1734] sm:$0xf]  ;;  %v9839_v40 = vld [vmem:[%s16619_s1 + $0x1738] sm:$0xf0] }
 0x2fa   :  { %6447 = vmatpush.bf16.msrb.mxu2 %v9706_v51  ;;  %v10066_v51 = vor.u32 %v10917_v57, %v10063_v35  ;;  %v9930_v41 = vor.u32 %v10883_v59, %v9927_v63  ;;  %v9975_v57 = vld [vmem:[%s16619_s1 + $0x1848] sm:$0xf0]  ;;  %v10911_v35 = vld [vmem:[%s16619_s1 + $0x18c4] sm:$0xf]  ;;  %v10877_v59 = vld [vmem:[%s16619_s1 + $0x17b4] sm:$0xf]  ;;  %v9842_v22 = vor.u32 %v10861_v8, %v9839_v40 }
 0x2fb   :  { %6461 = vmatpush.bf16.msrb.mxu3 %v9770_v33  ;;  %v5558_v33 = vadd.f32 %v16723_v3, %v5544_v21  ;;  %v10893_v63 = vld [vmem:[%s16619_s1 + $0x1834] sm:$0xf] }
 0x2fc   :  { %6420 = vmatpush.bf16.msrb.mxu0 %v9570_v45  ;;  %v10865_v45 = vld [vmem:[%s16619_s1 + $0x1754] sm:$0xf] }
 0x2fd   :  { %6434 = vmatpush.bf16.msrb.mxu1 %v9634_v29  ;;  %v9919_v29 = vld [vmem:[%s16619_s1 + $0x17d8] sm:$0xf0]  ;;  %v5572_v6 = vadd.f32 %v16725_v17, %v5558_v33  ;;  %v9858_v5 = vor.u32 %v10865_v45, %v9855_v36  ;;  %v10909_v3 = vld [vmem:[%s16619_s1 + $0x18b4] sm:$0xf]  ;;  %v9895_v36 = vld [vmem:[%s16619_s1 + $0x17a8] sm:$0xf0] }
 0x2fe   :  { %6448 = vmatpush.bf16.msrb.mxu2 %v9698_v43  ;;  %v10897_v43 = vld [vmem:[%s16619_s1 + $0x1854] sm:$0xf]  ;;  %v9922_v25 = vor.u32 %v10881_v26, %v9919_v29  ;;  %v10031_v33 = vld [vmem:[%s16619_s1 + $0x18b8] sm:$0xf0]  ;;  %v10891_v26 = vld [vmem:[%s16619_s1 + $0x1824] sm:$0xf] }
 0x2ff   :  { %6462 = vmatpush.bf16.msrb.mxu3 %v9762_v44  ;;  %v16726_v44 = vld [vmem:[#allocation35_spill] sm:$0xff]  ;;  %v5586_v24 = vadd.f32 %v14255_v58, %v5572_v6  ;;  %v10034_v45 = vor.u32 %v10909_v3, %v10031_v33  ;;  %v10907_v29 = vld [vmem:[%s16619_s1 + $0x18a4] sm:$0xf]  ;;  %v16731_v3 = vld [vmem:[#allocation40_spill] sm:$0xff] }
 0x300   :  { %6421 = vmatpush.bf16.msrb.mxu0 %v9562_v46  ;;  %v9986_v46 = vor.u32 %v10897_v43, %v9983_v2  ;;  %v9911_v58 = vld [vmem:[%s16619_s1 + $0x17c8] sm:$0xf0] }
 0x301   :  { %6435 = vmatpush.bf16.msrb.mxu1 %v9626_v50  ;;  %v10050_v50 = vor.u32 %v10913_v9, %v10047_v16  ;;  %v5600_v21 = vadd.f32 %v14263_v13, %v5586_v24  ;;  %v9903_v13 = vld [vmem:[%s16619_s1 + $0x17b8] sm:$0xf0]  ;;  %v10023_v43 = vld [vmem:[%s16619_s1 + $0x18a8] sm:$0xf0]  ;;  %v10873_v9 = vld [vmem:[%s16619_s1 + $0x1794] sm:$0xf] }
 0x302   :  { %6449 = vmatpush.bf16.msrb.mxu2 %v9690_v27  ;;  %v10895_v27 = vld [vmem:[%s16619_s1 + $0x1844] sm:$0xf]  ;;  %v9906_v38 = vor.u32 %v10877_v59, %v9903_v13  ;;  %v10026_v16 = vor.u32 %v10907_v29, %v10023_v43  ;;  %v10905_v24 = vld [vmem:[%s16619_s1 + $0x1894] sm:$0xf] }
 0x303   :  { %6463 = vmatpush.bf16.msrb.mxu3 %v9754_v20  ;;  %6422 = vmatmul.bf16.vlgmr.msrb.gmra.mxu0 %v16724_v14  ;;  %v10039_v20 = vld [vmem:[%s16619_s1 + $0x18c8] sm:$0xf0]  ;;  %v5614_v32 = vadd.f32 %v14302_v11, %v5600_v21  ;;  %v10903_v21 = vld [vmem:[%s16619_s1 + $0x1884] sm:$0xf] }
 0x304   :  { %6470 = vmatpush.bf16.msra.mxu0 %v9874_v4  ;;  %6436 = vmatmul.bf16.vlgmr.msrb.gmra.mxu1 %v16727_v60  ;;  %v9850_v4 = vor.u32 %v10863_v49, %v9847_v61  ;;  %v9831_v11 = vld [vmem:[%s16619_s1 + $0x1728] sm:$0xf0]  ;;  %v9823_v60 = vld [vmem:[%s16619_s1 + $0x1718] sm:$0xf0] }
 0x305   :  { %6484 = vmatpush.bf16.msra.mxu1 %v9938_v34  ;;  %6450 = vmatmul.bf16.vlgmr.msrb.gmra.mxu2 %v16726_v44  ;;  %v9914_v34 = vor.u32 %v10879_v54, %v9911_v58  ;;  %v9959_v14 = vld [vmem:[%s16619_s1 + $0x1828] sm:$0xf0] }
 0x306   :  { %6498 = vmatpush.bf16.msra.mxu2 %v10002_v30  ;;  %6464 = vmatmul.bf16.vlgmr.msrb.gmra.mxu3 %v16728_v1  ;;  %v9978_v30 = vor.u32 %v10895_v27, %v9975_v57  ;;  %v9962_v44 = vor.u32 %v10891_v26, %v9959_v14  ;;  %v10889_v1 = vld [vmem:[%s16619_s1 + $0x1814] sm:$0xf]  ;;  %v9815_v58 = vld [vmem:[%s16619_s1 + $0x1708] sm:$0xf0]  ;;  %v10871_v27 = vld [vmem:[%s16619_s1 + $0x1784] sm:$0xf] }
 0x307   :  { %6512 = vmatpush.bf16.msra.mxu3 %v10066_v51  ;;  %v10042_v51 = vor.u32 %v10911_v35, %v10039_v20  ;;  %v10887_v35 = vld [vmem:[%s16619_s1 + $0x1804] sm:$0xf]  ;;  %v9943_v20 = vld [vmem:[%s16619_s1 + $0x1808] sm:$0xf0] }
 0x308   :  { %6471 = vmatpush.bf16.msra.mxu0 %v9866_v37  ;;  %v9970_v37 = vor.u32 %v10893_v63, %v9967_v7  ;;  %v9946_v40 = vor.u32 %v10887_v35, %v9943_v20  ;;  %v16498_v63 = vpop.f32.mrf.mxu0  ;;  %v6544_v7 = vld [vmem:[%s16622_s3 + $0x70] sm:$0xff]  ;;  %v6539_v26 = vld [vmem:[%s16622_s3 + $0x48] sm:$0xff] }
 0x309   :  { %6485 = vmatpush.bf16.msra.mxu1 %v9930_v41  ;;  %v10859_v41 = vld [vmem:[%s16619_s1 + $0x1724] sm:$0xf]  ;;  %v6088_v20 = vadd.f32 %v16498_v63, %v15821_v48 }
 0x30a   :  { %6499 = vmatpush.bf16.msra.mxu2 %v9994_v53  ;;  %v10875_v53 = vld [vmem:[%s16619_s1 + $0x17a4] sm:$0xf]  ;;  %v9834_v2 = vor.u32 %v10859_v41, %v9831_v11  ;;  %v6541_v11 = vld [vmem:[%s16622_s3 + $0x58] sm:$0xff] }
 0x30b   :  { %6513 = vmatpush.bf16.msra.mxu3 %v10058_v56  ;;  %v5628_v56 = vadd.f32 %v14313_v18, %v5614_v32  ;;  %v9898_v6 = vor.u32 %v10875_v53, %v9895_v36  ;;  %v10857_v18 = vld [vmem:[%s16619_s1 + $0x1714] sm:$0xf]  ;;  %v16520_v53 = vpop.f32.mrf.mxu2 }
 0x30c   :  { %6472 = vmatpush.bf16.msra.mxu0 %v9858_v5  ;;  %v9951_v5 = vld [vmem:[%s16619_s1 + $0x1818] sm:$0xf0]  ;;  %v16729_v32 = vld [vmem:[#allocation36_spill] sm:$0xff] }
 0x30d   :  { %6486 = vmatpush.bf16.msra.mxu1 %v9922_v25  ;;  %v5642_v17 = vadd.f32 %v14462_v0, %v5628_v56  ;;  %v9887_v0 = vld [vmem:[%s16619_s1 + $0x1798] sm:$0xf0]  ;;  %v9954_v54 = vor.u32 %v10889_v1, %v9951_v5  ;;  %v6538_v56 = vld [vmem:[%s16622_s3 + $0x40] sm:$0xff]  ;;  %v6532_v1 = vld [vmem:[%s16622_s3 + $0x10] sm:$0xff] }
 0x30e   :  { %6500 = vmatpush.bf16.msra.mxu2 %v9986_v46  ;;  %v10015_v25 = vld [vmem:[%s16619_s1 + $0x1898] sm:$0xf0]  ;;  %v9826_v46 = vor.u32 %v10857_v18, %v9823_v60  ;;  %v9890_v61 = vor.u32 %v10873_v9, %v9887_v0  ;;  %v6535_v18 = vld [vmem:[%s16622_s3 + $0x28] sm:$0xff]  ;;  %v16733_v60 = vld [vmem:[#allocation44_spill] sm:$0xff] }
 0x30f   :  { %6514 = vmatpush.bf16.msra.mxu3 %v10050_v50  ;;  %v5656_v49 = vadd.f32 %v14470_v28, %v5642_v17  ;;  %v10855_v50 = vld [vmem:[%s16619_s1 + $0x1704] sm:$0xf]  ;;  %v10018_v57 = vor.u32 %v10905_v24, %v10015_v25  ;;  %v9879_v28 = vld [vmem:[%s16619_s1 + $0x1788] sm:$0xf0] }
 0x310   :  { %6473 = vmatpush.bf16.msra.mxu0 %v9850_v4  ;;  %v9882_v8 = vor.u32 %v10871_v27, %v9879_v28  ;;  %v6531_v25 = vld [vmem:[%s16622_s3 + $0x8] sm:$0xff] }
 0x311   :  { %6487 = vmatpush.bf16.msra.mxu1 %v9914_v34  ;;  %v5670_v4 = vadd.f32 %v14509_v10, %v5656_v49  ;;  %v10007_v34 = vld [vmem:[%s16619_s1 + $0x1888] sm:$0xf0]  ;;  %v6545_v10 = vld [vmem:[%s16622_s3 + $0x78] sm:$0xff] }
 0x312   :  { %6501 = vmatpush.bf16.msra.mxu2 %v9978_v30  ;;  %v9818_v30 = vor.u32 %v10855_v50, %v9815_v58  ;;  %v10010_v59 = vor.u32 %v10903_v21, %v10007_v34 }
 0x313   :  { %6515 = vmatpush.bf16.msra.mxu3 %v10042_v51  ;;  %v5684_v51 = vadd.f32 %v14520_v52, %v5670_v4  ;;  %v16730_v52 = vld [vmem:[#allocation38_spill] sm:$0xff]  ;;  %v6117_v17 = vpop.f32.mrf.mxu2 }
 0x314   :  { %6474 = vmatpush.bf16.msra.mxu0 %v9842_v22  ;;  %v16510_v22 = vpop.f32.mrf.mxu1 }
 0x315   :  { %6488 = vmatpush.bf16.msra.mxu1 %v9906_v38  ;;  %v5698_v13 = vadd.f32 %v14669_v42, %v5684_v51  ;;  %v6543_v42 = vld [vmem:[%s16622_s3 + $0x68] sm:$0xff]  ;;  %v16732_v38 = vld [vmem:[#allocation41_spill] sm:$0xff]  ;;  %v6102_v34 = vadd.f32 %v16510_v22, %v6088_v20  ;;  %v6550_v20 = vld [vmem:[%s16622_s3 + $0xa0] sm:$0xff] }
 0x316   :  { %6502 = vmatpush.bf16.msra.mxu2 %v9970_v37  ;;  %v6542_v37 = vld [vmem:[%s16622_s3 + $0x60] sm:$0xff] }
 0x317   :  { %6516 = vmatpush.bf16.msra.mxu3 %v10034_v45  ;;  %v5712_v33 = vadd.f32 %v14677_v39, %v5698_v13  ;;  %v16522_v39 = vpop.f32.mrf.mxu3  ;;  %v6540_v45 = vld [vmem:[%s16622_s3 + $0x50] sm:$0xff] }
 0x318   :  { %6475 = vmatpush.bf16.msra.mxu0 %v9834_v2 }
 0x319   :  { %6489 = vmatpush.bf16.msra.mxu1 %v9898_v6  ;;  %v5726_v41 = vadd.f32 %v14716_v19, %v5712_v33  ;;  %v16528_v19 = vpop.f32.mrf.mxu0 }
 0x31a   :  { %6503 = vmatpush.bf16.msra.mxu2 %v9962_v44 }
 0x31b   :  { %6517 = vmatpush.bf16.msra.mxu3 %v10026_v16  ;;  %v5740_v36 = vadd.f32 %v14727_v15, %v5726_v41  ;;  %v6537_v15 = vld [vmem:[%s16622_s3 + $0x38] sm:$0xff]  ;;  %v6171_v5 = vpop.f32.mrf.mxu2 }
 0x31c   :  { %6476 = vmatpush.bf16.msra.mxu0 %v9826_v46  ;;  %v16537_v29 = vpop.f32.mrf.mxu1 }
 0x31d   :  { %6490 = vmatpush.bf16.msra.mxu1 %v9890_v61  ;;  %v5754_v14 = vadd.f32 %v14876_v62, %v5740_v36  ;;  %v6536_v62 = vld [vmem:[%s16622_s3 + $0x30] sm:$0xff]  ;;  %v16734_v61 = vld [vmem:[#allocation45_spill] sm:$0xff] }
 0x31e   :  { %6504 = vmatpush.bf16.msra.mxu2 %v9954_v54  ;;  %v6526_v54 = vmax.f32 %v16734_v61, 0.0 }
 0x31f   :  { %6518 = vmatpush.bf16.msra.mxu3 %v10018_v57  ;;  %v5768_v43 = vadd.f32 %v14884_v31, %v5754_v14  ;;  %v6131_v6 = vpop.f32.mrf.mxu3  ;;  %v6534_v31 = vld [vmem:[%s16622_s3 + $0x20] sm:$0xff] }
 0x320   :  { %6477 = vmatpush.bf16.msra.mxu0 %v9818_v30 }
 0x321   :  { %6491 = vmatpush.bf16.msra.mxu1 %v9882_v8  ;;  %v5782_v2 = vadd.f32 %v14923_v12, %v5768_v43  ;;  %v6143_v44 = vpop.f32.mrf.mxu0  ;;  %v6533_v12 = vld [vmem:[%s16622_s3 + $0x18] sm:$0xff]  ;;  %v6116_v8 = vadd.f32 %v16520_v53, %v6102_v34 }
 0x322   :  { %6505 = vmatpush.bf16.msra.mxu2 %v9946_v40  ;;  %v6090_v40 = vadd.f32 %v16528_v19, %v15891_v55 }
 0x323   :  { %6519 = vmatpush.bf16.msra.mxu3 %v10010_v59  ;;  %6478 = vmatmul.bf16.vlgmr.msra.gmra.mxu0 %v16729_v32  ;;  %v5796_v9 = vadd.f32 %v16733_v60, %v5782_v2  ;;  %v6173_v27 = vpop.f32.mrf.mxu2  ;;  %v6130_v51 = vadd.f32 %v16522_v39, %v6116_v8  ;;  %v6553_v60 = vld [vmem:[%s16622_s3 + $0xb8] sm:$0xff] }
 0x324   :  { %6566 = vmatpush.msrb.mxu0 %v6545_v10  ;;  %6492 = vmatmul.bf16.vlgmr.msra.gmra.mxu1 %v16730_v52  ;;  %v6157_v16 = vpop.f32.mrf.mxu1 }
 0x325   :  { %6506 = vmatmul.bf16.vlgmr.msra.gmra.mxu2 %v16731_v3  ;;  %v5810_v0 = vadd.f32 %v15093_v47, %v5796_v9  ;;  %v6530_v47 = vld [vmem:[%s16622_s3] sm:$0xff]  ;;  %v6144_v32 = vadd.f32 %v6143_v44, %v6130_v51  ;;  %v6548_v51 = vld [vmem:[%s16622_s3 + $0x90] sm:$0xff] }
 0x326   :  { %10919 = vmatpush.msrb.mxu2 %v6545_v10  ;;  %6520 = vmatmul.bf16.vlgmr.msra.gmra.mxu3 %v16732_v38 }
 0x327   :  { %6567 = vmatpush.msrb.mxu0 %v6544_v7  ;;  %v6185_v24 = vpop.f32.mrf.mxu3  ;;  %v5824_v46 = vadd.f32 %v15101_v23, %v5810_v0  ;;  %v6158_v63 = vadd.f32 %v6157_v16, %v6144_v32 }
 0x328   :  { %10920 = vmatpush.msrb.mxu2 %v6544_v7  ;;  %v6104_v7 = vadd.f32 %v16537_v29, %v6090_v40 }
 0x329   :  { %6568 = vmatpush.msrb.mxu0 %v6543_v42  ;;  %v6145_v49 = vpop.f32.mrf.mxu0  ;;  %v6528_v50 = vmax.f32 %v5824_v46, 0.0  ;;  %v6172_v33 = vadd.f32 %v6171_v5, %v6158_v63 }
 0x32a   :  { %10921 = vmatpush.msrb.mxu2 %v6543_v42  ;;  %v6118_v48 = vadd.f32 %v6117_v17, %v6104_v7  ;;  %v6546_v7 = vld [vmem:[%s16622_s3 + $0x80] sm:$0xff] }
 0x32b   :  { %6569 = vmatpush.msrb.mxu0 %v6542_v37  ;;  %v6227_v35 = vpop.f32.mrf.mxu2  ;;  %v6186_v41 = vadd.f32 %v6185_v24, %v6172_v33 }
 0x32c   :  { %10922 = vmatpush.msrb.mxu2 %v6542_v37  ;;  %v6159_v58 = vpop.f32.mrf.mxu1  ;;  %v6132_v42 = vadd.f32 %v6131_v6, %v6118_v48 }
 0x32d   :  { %6570 = vmatpush.msrb.mxu0 %v6541_v11 }
 0x32e   :  { %10923 = vmatpush.msrb.mxu2 %v6541_v11  ;;  %v6146_v38 = vadd.f32 %v6145_v49, %v6132_v42 }
 0x32f   :  { %6571 = vmatpush.msrb.mxu0 %v6540_v45  ;;  %v6187_v57 = vpop.f32.mrf.mxu3 }
 0x330   :  { %10924 = vmatpush.msrb.mxu2 %v6540_v45  ;;  %v6160_v55 = vadd.f32 %v6159_v58, %v6146_v38  ;;  %v6552_v58 = vld [vmem:[%s16622_s3 + $0xb0] sm:$0xff] }
 0x331   :  { %6572 = vmatpush.msrb.mxu0 %v6539_v26  ;;  %v6199_v23 = vpop.f32.mrf.mxu0 }
 0x332   :  { %10925 = vmatpush.msrb.mxu2 %v6539_v26  ;;  %v6200_v53 = vadd.f32 %v6199_v23, %v6186_v41  ;;  %v6174_v45 = vadd.f32 %v6173_v27, %v6160_v55 }
 0x333   :  { %6573 = vmatpush.msrb.mxu0 %v6538_v56  ;;  %v6229_v59 = vpop.f32.mrf.mxu2 }
 0x334   :  { %10926 = vmatpush.msrb.mxu2 %v6538_v56  ;;  %v6213_v28 = vpop.f32.mrf.mxu1  ;;  %v6188_v14 = vadd.f32 %v6187_v57, %v6174_v45  ;;  %v6551_v57 = vld [vmem:[%s16622_s3 + $0xa8] sm:$0xff] }
 0x335   :  { %6574 = vmatpush.msrb.mxu0 %v6537_v15  ;;  %v6214_v36 = vadd.f32 %v6213_v28, %v6200_v53 }
 0x336   :  { %10927 = vmatpush.msrb.mxu2 %v6537_v15 }
 0x337   :  { %6575 = vmatpush.msrb.mxu0 %v6536_v62  ;;  %v6241_v4 = vpop.f32.mrf.mxu3  ;;  %v6228_v56 = vadd.f32 %v6227_v35, %v6214_v36 }
 0x338   :  { %10928 = vmatpush.msrb.mxu2 %v6536_v62 }
 0x339   :  { %6576 = vmatpush.msrb.mxu0 %v6535_v18  ;;  %v6201_v21 = vpop.f32.mrf.mxu0  ;;  %v6242_v43 = vadd.f32 %v6241_v4, %v6228_v56 }
 0x33a   :  { %10929 = vmatpush.msrb.mxu2 %v6535_v18  ;;  %v6202_v15 = vadd.f32 %v6201_v21, %v6188_v14 }
 0x33b   :  { %6577 = vmatpush.msrb.mxu0 %v6534_v31  ;;  %v6283_v3 = vpop.f32.mrf.mxu2 }
 0x33c   :  { %10930 = vmatpush.msrb.mxu2 %v6534_v31  ;;  %v6215_v30 = vpop.f32.mrf.mxu1  ;;  %v6554_v31 = vld [vmem:[%s16622_s3 + $0xc0] sm:$0xff] }
 0x33d   :  { %6578 = vmatpush.msrb.mxu0 %v6533_v12  ;;  %v6216_v2 = vadd.f32 %v6215_v30, %v6202_v15  ;;  %6596 = vmatpush.msrb.mxu1 %v6554_v31  ;;  %v6549_v30 = vld [vmem:[%s16622_s3 + $0x98] sm:$0xff] }
 0x33e   :  { %10931 = vmatpush.msrb.mxu2 %v6533_v12 }
 0x33f   :  { %6579 = vmatpush.msrb.mxu0 %v6532_v1  ;;  %v6243_v10 = vpop.f32.mrf.mxu3  ;;  %v6230_v44 = vadd.f32 %v6229_v59, %v6216_v2  ;;  %6597 = vmatpush.msrb.mxu1 %v6553_v60 }
 0x340   :  { %10932 = vmatpush.msrb.mxu2 %v6532_v1 }
 0x341   :  { %6580 = vmatpush.msrb.mxu0 %v6531_v25  ;;  %v6255_v13 = vpop.f32.mrf.mxu0  ;;  %v6244_v12 = vadd.f32 %v6243_v10, %v6230_v44  ;;  %6598 = vmatpush.msrb.mxu1 %v6552_v58 }
 0x342   :  { %10933 = vmatpush.msrb.mxu2 %v6531_v25  ;;  %v6256_v17 = vadd.f32 %v6255_v13, %v6242_v43  ;;  %v6547_v13 = vld [vmem:[%s16622_s3 + $0x88] sm:$0xff] }
 0x343   :  { %6581 = vmatpush.msrb.mxu0 %v6530_v47  ;;  %v6285_v39 = vpop.f32.mrf.mxu2  ;;  %6599 = vmatpush.msrb.mxu1 %v6551_v57 }
 0x344   :  { %10934 = vmatpush.msrb.mxu2 %v6530_v47  ;;  %6582 = vmatmul.f32.vlgmr.msrb.gmra.mxu0 %v6526_v54  ;;  %v6269_v52 = vpop.f32.mrf.mxu1 }
 0x345   :  { %6585 = vmatmul.f32.vlgmr.msrb.gmra.mxu2 %v6528_v50  ;;  %v6270_v9 = vadd.f32 %v6269_v52, %v6256_v17  ;;  %6600 = vmatpush.msrb.mxu1 %v6550_v20 }
 0x347   :  { %v6297_v22 = vpop.f32.mrf.mxu3  ;;  %v6284_v0 = vadd.f32 %v6283_v3, %v6270_v9  ;;  %6601 = vmatpush.msrb.mxu1 %v6549_v30 }
 0x349   :  { %v6257_v37 = vpop.f32.mrf.mxu0  ;;  %v6298_v24 = vadd.f32 %v6297_v22, %v6284_v0  ;;  %6602 = vmatpush.msrb.mxu1 %v6548_v51 }
 0x34a   :  { %v6258_v1 = vadd.f32 %v6257_v37, %v6244_v12 }
 0x34b   :  { %v6339_v62 = vpop.f32.mrf.mxu2  ;;  %6603 = vmatpush.msrb.mxu1 %v6547_v13 }
 0x34c   :  { %v6271_v11 = vpop.f32.mrf.mxu1 }
 0x34d   :  { %v6272_v49 = vadd.f32 %v6271_v11, %v6258_v1  ;;  %6604 = vmatpush.msrb.mxu1 %v6546_v7 }
 0x34f   :  { %v6299_v19 = vpop.f32.mrf.mxu3  ;;  %v6286_v54 = vadd.f32 %v6285_v39, %v6272_v49 }
 0x351   :  { %v6311_v26 = vpop.f32.mrf.mxu0  ;;  %v6300_v23 = vadd.f32 %v6299_v19, %v6286_v54  ;;  %v10935_v54 = vld [vmem:[%s16623_s4] ss:$0 sm:$0xff] }
 0x352   :  { %v6312_v47 = vadd.f32 %v6311_v26, %v6298_v24 }
 0x353   :  { %v6341_v5 = vpop.f32.mrf.mxu2 }
 0x354   :  { %v6325_v29 = vpop.f32.mrf.mxu1 }
 0x355   :  { %v6326_v50 = vadd.f32 %v6325_v29, %v6312_v47 }
 0x357   :  { %v6353_v6 = vpop.f32.mrf.mxu3  ;;  %v6340_v28 = vadd.f32 %v6339_v62, %v6326_v50 }
 0x359   :  { %v6313_v18 = vpop.f32.mrf.mxu0  ;;  %v6354_v34 = vadd.f32 %v6353_v6, %v6340_v28 }
 0x35a   :  { %v6314_v4 = vadd.f32 %v6313_v18, %v6300_v23 }
 0x35c   :  { %v6327_v16 = vpop.f32.mrf.mxu1 }
 0x35d   :  { %v6328_v40 = vadd.f32 %v6327_v16, %v6314_v4 }
 0x35f   :  { %v6355_v25 = vpop.f32.mrf.mxu3  ;;  %v6342_v10 = vadd.f32 %v6341_v5, %v6328_v40 }
 0x361   :  { %v6367_v46 = vpop.f32.mrf.mxu0  ;;  %v6356_v3 = vadd.f32 %v6355_v25, %v6342_v10 }
 0x362   :  { %v6368_v59 = vadd.f32 %v6367_v46, %v6354_v34 }
 0x364   :  { %v6381_v61 = vpop.f32.mrf.mxu1 }
 0x365   :  { %v6382_v52 = vadd.f32 %v6381_v61, %v6368_v59 }
 0x368   :  { %v6395_v27 = vpop.f32.mrf.mxu2 }
 0x369   :  { %v6409_v35 = vpop.f32.mrf.mxu3  ;;  %v6369_v21 = vpop.f32.mrf.mxu0  ;;  %v6396_v42 = vadd.f32 %v6395_v27, %v6382_v52 }
 0x36a   :  { %v6370_v22 = vadd.f32 %v6369_v21, %v6356_v3 }
 0x36b   :  { %v6410_v38 = vadd.f32 %v6409_v35, %v6396_v42 }
 0x36c   :  { %v6383_v8 = vpop.f32.mrf.mxu1 }
 0x36d   :  { %v6384_v41 = vadd.f32 %v6383_v8, %v6370_v22 }
 0x370   :  { %v6397_v32 = vpop.f32.mrf.mxu2 }
 0x371   :  { %v6411_v48 = vpop.f32.mrf.mxu3  ;;  %v6398_v53 = vadd.f32 %v6397_v32, %v6384_v41 }
 0x373   :  { %v6412_v19 = vadd.f32 %v6411_v48, %v6398_v53 }
 0x380   :  { %v6423_v63 = vpop.f32.mrf.mxu0 }
 0x381   :  { %v6437_v33 = vpop.f32.mrf.mxu1  ;;  %v6424_v11 = vadd.f32 %v6423_v63, %v6410_v38 }
 0x383   :  { %v6438_v39 = vadd.f32 %v6437_v33, %v6424_v11 }
 0x388   :  { %v6451_v37 = vpop.f32.mrf.mxu2  ;;  %v6425_v45 = vpop.f32.mrf.mxu0 }
 0x389   :  { %v6465_v55 = vpop.f32.mrf.mxu3  ;;  %v6439_v36 = vpop.f32.mrf.mxu1  ;;  %v6452_v26 = vadd.f32 %v6451_v37, %v6438_v39  ;;  %v6426_v14 = vadd.f32 %v6425_v45, %v6412_v19 }
 0x38b   :  { %v6466_v29 = vadd.f32 %v6465_v55, %v6452_v26  ;;  %v6440_v62 = vadd.f32 %v6439_v36, %v6426_v14 }
 0x390   :  { %v6453_v56 = vpop.f32.mrf.mxu2 }
 0x391   :  { %v6467_v15 = vpop.f32.mrf.mxu3  ;;  %v6454_v6 = vadd.f32 %v6453_v56, %v6440_v62 }
 0x393   :  { %v6468_v31 = vadd.f32 %v6467_v15, %v6454_v6 }
 0x3a0   :  { %v6479_v43 = vpop.f32.mrf.mxu0 }
 0x3a1   :  { %v6480_v2 = vadd.f32 %v6479_v43, %v6466_v29  ;;  %v6493_v17 = vpop.f32.mrf.mxu1 }
 0x3a3   :  { %v6494_v44 = vadd.f32 %v6493_v17, %v6480_v2 }
 0x3a8   :  { %v6507_v18 = vpop.f32.mrf.mxu2  ;;  %v6481_v16 = vpop.f32.mrf.mxu0 }
 0x3a9   :  { %v6508_v60 = vadd.f32 %v6507_v18, %v6494_v44  ;;  %v6521_v9 = vpop.f32.mrf.mxu3  ;;  %v6482_v0 = vadd.f32 %v6481_v16, %v6468_v31  ;;  %v6495_v5 = vpop.f32.mrf.mxu1 }
 0x3ab   :  { %v6522_v12 = vadd.f32 %v6521_v9, %v6508_v60  ;;  %v6496_v24 = vadd.f32 %v6495_v5, %v6482_v0 }
 0x3ad   :  { %v6527_v1 = vmax.f32 %v6522_v12, 0.0 }
 0x3af   :  { %10067 = vmatmul.msk.f32.vlgmr.msrb.gmra.mxu1 %vm6559_vm0, %v6527_v1 }
 0x3b0   :  { %v6509_v25 = vpop.f32.mrf.mxu2 }
 0x3b1   :  { %v6510_v46 = vadd.f32 %v6509_v25, %v6496_v24  ;;  %v6523_v49 = vpop.f32.mrf.mxu3 }
 0x3b3   :  { %v6524_v47 = vadd.f32 %v6523_v49, %v6510_v46 }
 0x3b5   :  { %v6529_v61 = vmax.f32 %v6524_v47, 0.0 }
 0x3b7   :  { %10068 = vmatmul.msk.f32.gmra.mxu1 %vm6559_vm0, %v6529_v61 }
 0x3c1   :  { %v6583_v50 = vpop.f32.mrf.mxu0 }
 0x3c2   :  { %v6584_v58 = vadd.f32 %v10935_v54, %v6583_v50 }
 0x3c8   :  { %v6586_v28 = vpop.f32.mrf.mxu2 }
 0x3c9   :  { %v6587_v35 = vadd.f32 %v10935_v54, %v6586_v28 }
 0x42c   :  { %v6606_v27 = vpop.f32.mrf.mxu1 }
 0x42d   :  { %v6607_v57 = vadd.f32 %v6606_v27, %v6584_v58 }
 0x42f   :  { %v6613_v23 = vsel %vm6612_vm1, %v6607_v57, -inf }
 0x430   :  { %6614 = vmax.xlane.f32.xlu0 %v6613_v23 }
 0x434   :  { %v6609_v20 = vpop.f32.mrf.mxu1 }
 0x435   :  { %v6610_v4 = vadd.f32 %v6609_v20, %v6587_v35 }
 0x437   :  { %v6616_v21 = vsel %vm6612_vm1, %v6610_v4, -inf }
 0x438   :  { %6617 = vmax.xlane.f32.xlu0 %v6616_v21 }
 0x4a3   :  { %v6615_v34 = vpop.xlane.xlu0 %6614 }
 0x4a4   :  { %v6619_v30 = vsub.f32 %v6607_v57, %v6615_v34 }
 0x4a6   :  { %v6621_v8 = vmul.f32 1.442695, %v6619_v30 }
 0x4a8   :  { %10936 = vpow2.f32 %v6621_v8 }
 0x4ab   :  { %v6618_v40 = vpop.xlane.xlu0 %6617 }
 0x4ac   :  { %v6620_v59 = vsub.f32 %v6610_v4, %v6618_v40 }
 0x4ae   :  { %v10937_v51 = vpop.eup %10936  ;;  %v6623_v10 = vmul.f32 1.442695, %v6620_v59 }
 0x4af   :  { %v6625_v13 = vsel %vm6612_vm1, %v10937_v51, 0.0 }
 0x4b0   :  { %10938 = vpow2.f32 %v6623_v10  ;;  %6626 = vadd.xlane.f32.xlu1 %v6625_v13 }
 0x4b6   :  { %v10939_v7 = vpop.eup %10938 }
 0x4b7   :  { %v6628_v32 = vsel %vm6612_vm1, %v10939_v7, 0.0 }
 0x4b8   :  { %6629 = vadd.xlane.f32.xlu1 %v6628_v32 }
 0x523   :  { %v6627_v52 = vpop.xlane.xlu1 %6626 }
 0x524   :  { %10940 = vrcp.f32 %v6627_v52  ;;  %v6642_v33 = vand.u32 2147483648, %v6627_v52  ;;  %v6640_v38 = vand.u32 2147483647, %v6627_v52  ;;  %vm6636_vm3 = vweird.f32 %v6627_v52 }
 0x526   :  { %v6643_v11 = vor.u32 1.1754944e-38, %v6642_v33  ;;  %vm6641_vm5 = vcmp.eq.f32.partialorder %v6640_v38, 8.507059e+37 }
 0x52a   :  { %v10941_v48 = vpop.eup %10940 }
 0x52b   :  { %v6632_v63 = vmul.f32 %v10941_v48, %v6627_v52  ;;  %v6630_v3 = vpop.xlane.xlu1 %6629  ;;  %vm6637_vm2 = vweird.f32 %v10941_v48 }
 0x52c   :  { %10942 = vrcp.f32 %v6630_v3  ;;  %vm6638_vm4 = vmor %vm6636_vm3, %vm6637_vm2  ;;  %v6657_v19 = vand.u32 2147483648, %v6630_v3  ;;  %v6655_v14 = vand.u32 2147483647, %v6630_v3  ;;  %vm6651_vm7 = vweird.f32 %v6630_v3 }
 0x52d   :  { %v6633_v42 = vsub.f32 1.0, %v6632_v63 }
 0x52e   :  { %v6658_v29 = vor.u32 1.1754944e-38, %v6657_v19  ;;  %vm6656_vm9 = vcmp.eq.f32.partialorder %v6655_v14, 8.507059e+37 }
 0x52f   :  { %v6634_v22 = vmul.f32 %v10941_v48, %v6633_v42 }
 0x531   :  { %v6635_v37 = vadd.f32 %v10941_v48, %v6634_v22 }
 0x532   :  { %v10943_v41 = vpop.eup %10942 }
 0x533   :  { %v6639_v55 = vsel %vm6638_vm4, %v10941_v48, %v6635_v37  ;;  %v6647_v53 = vmul.f32 %v10943_v41, %v6630_v3  ;;  %vm6652_vm6 = vweird.f32 %v10943_v41 }
 0x534   :  { %v6644_v45 = vsel %vm6641_vm5, %v6643_v11, %v6639_v55  ;;  %vm6653_vm8 = vmor %vm6651_vm7, %vm6652_vm6 }
 0x535   :  { %v6645_v39 = vmul.f32 %v10937_v51, %v6644_v45  ;;  %v6648_v36 = vsub.f32 1.0, %v6647_v53 }
 0x537   :  { %6661 = vst.msk [vmem:[%s16624_s5] sm:$0xff] %vm6612_vm1, %v6645_v39  ;;  %v6649_v26 = vmul.f32 %v10943_v41, %v6648_v36 }
 0x539   :  { %v6650_v56 = vadd.f32 %v10943_v41, %v6649_v26 }
 0x53b   :  { %v6654_v15 = vsel %vm6653_vm8, %v10943_v41, %v6650_v56 }
 0x53c   :  { %v6659_v43 = vsel %vm6656_vm9, %v6658_v29, %v6654_v15 }
 0x53d   :  { %v6660_v62 = vmul.f32 %v10939_v7, %v6659_v43 }
 0x53f   :  { %6662 = vst.msk [vmem:[%s16624_s5 + $0x8] sm:$0xff] %vm6612_vm1, %v6660_v62 }

</bundles_post_ra>
